<compile_context>
chip_gen: v7x
topology: tpu7x:2x2x1
jax: 0.10.0
libtpu: 0.0.40
codegen_flags: <defaults>
</compile_context>

<pallas_src>
import functools

import jax
import jax.numpy as jnp
import numpy as np
from jax.experimental import pallas as pl
from jax.experimental.pallas import tpu as pltpu

PATCH_SIZE = 14  # SimpleSegmentationModel2.patch_size (dinov2 patch size)


# ----------------------------- host-side helpers -----------------------------
def _interp_matrix_np(out_size: int, in_size: int) -> np.ndarray:
    """Dense 1-D bilinear interpolation matrix, align_corners=True, (out, in)."""
    if in_size == 1:
        return np.ones((out_size, 1), np.float32)
    coords = np.arange(out_size, dtype=np.float64) * (in_size - 1) / (out_size - 1)
    lo = np.clip(np.floor(coords).astype(np.int64), 0, in_size - 2)
    frac = (coords - lo).astype(np.float32)
    m = np.zeros((out_size, in_size), np.float32)
    rows = np.arange(out_size)
    m[rows, lo] += 1.0 - frac
    m[rows, lo + 1] += frac
    return m


@functools.lru_cache(maxsize=8)
def _fold_matrix_np(fh: int, fw: int, H: int, W: int) -> np.ndarray:
    """(9*fh*fw, H*W) matrix fusing the align_corners=True bilinear upsample with
    conv2's 9 spatial taps.  Rows ordered (tap = ky*3+kx, pos = py*fw+px), t-major;
    cached so the 0.9 MB construction runs once per feature-map geometry."""
    ry = np.pad(_interp_matrix_np(H, fh), ((1, 1), (0, 0)))      # (H+2, fh)
    rx = np.pad(_interp_matrix_np(W, fw), ((1, 1), (0, 0)))      # (W+2, fw)
    ry_sh = np.stack([ry[k:k + H] for k in range(3)])            # (3, H, fh)
    rx_sh = np.stack([rx[k:k + W] for k in range(3)])            # (3, W, fw)
    m = np.einsum("aYp,bXq->abpqYX", ry_sh, rx_sh)               # (3,3,fh,fw,H,W)
    return np.ascontiguousarray(m.reshape(9 * fh * fw, H * W)).astype(np.float32)


def _im2col_3x3(xpad, h, w):
    """xpad: (B, h+2, w+2, C) zero-padded NHWC -> (B, h*w, 9*C), cols (tap, ci)."""
    b, _, _, c = xpad.shape
    cols = []
    for ky in range(3):
        for kx in range(3):
            cols.append(xpad[:, ky:ky + h, kx:kx + w, :].reshape(b, h * w, c))
    return jnp.concatenate(cols, axis=-1)


def _pick_block_batch(batch: int) -> int:
    """Images folded into one grid step: as large as possible (BB*32 MXU rows),
    but keep >=2 grid steps when B >= 2 so both v7x TensorCores get work."""
    cap = batch // 2 if batch >= 2 else 1
    best = 1
    for cand in range(1, min(batch, 8) + 1):
        if batch % cand == 0 and cand <= cap:
            best = cand
    return best


def make_head_constants(params, patch_h, patch_w, block_batch):
    """One-time weight repacking + fold-matrix build (hoisted out of the forward)."""
    BB = block_batch
    fh, fw = patch_h, patch_w
    hw = fh * fw
    H, W = patch_h * PATCH_SIZE, patch_w * PATCH_SIZE
    c1 = params["w1"].shape[0]
    cin = params["w1"].shape[1]
    c2 = params["w2"].shape[0]
    nc = params["w3"].shape[0]

    # Dense fold matrix is O((fh*fw)^2): guard before it blows VMEM (v7x 64 MiB first).
    m2_bytes = (9 * hw) * (H * W) * 2
    if m2_bytes > 16 * 1024 * 1024:
        # TODO(synk): separable Ry/Rx fold + H*W lane tiling path for large feature maps.
        raise NotImplementedError(
            f"dense fold matrix ({m2_bytes/2**20:.1f} MiB) too large for VMEM; "
            "use a separable upsample path for this feature-map size")

    eye = jnp.eye(BB, dtype=jnp.float32)

    # conv1 weights as (c1, 9*cin): columns ordered (tap, ci) to match im2col.
    w1t = jnp.transpose(params["w1"], (2, 3, 1, 0)).reshape(9 * cin, c1).T
    w1t = w1t.astype(jnp.bfloat16)
    b1 = params["b1"].reshape(c1, 1).astype(jnp.float32)

    # conv2 per-tap channel mix, block-diagonal over the BB folded images.
    w2t = jnp.transpose(params["w2"], (2, 3, 0, 1)).reshape(9, c2, c1)
    w2bd = jnp.stack([jnp.kron(eye, w2t[t]) for t in range(9)]).astype(jnp.bfloat16)
    b2 = jnp.tile(params["b2"].reshape(c2, 1), (BB, 1)).astype(jnp.float32)

    # conv3 (1x1) weights, block-diagonal over images, bf16 operands.
    w3 = params["w3"].reshape(nc, c2)
    w3bd = jnp.kron(eye, w3).astype(jnp.bfloat16)
    b3 = jnp.tile(params["b3"].reshape(nc, 1), (BB, 1)).astype(jnp.float32)

    # Fused (3x3-shift o bilinear-upsample) matrix, bf16 (keep f32 if tighter
    # accuracy is ever needed; cost is negligible at K=144).
    m2t = jnp.asarray(_fold_matrix_np(fh, fw, H, W), dtype=jnp.bfloat16)

    return dict(w1t=w1t, b1=b1, w2bd=w2bd, b2=b2, m2t=m2t, w3bd=w3bd, b3=b3)


# ----------------------------- fused Pallas head ------------------------------
def head_forward_pallas(fmap_nchw, consts, patch_h, patch_w, block_batch):
    """Head(384, num_classes).forward(hidden_states=[fmap], patch_h, patch_w)."""
    B, cin, fh, fw = fmap_nchw.shape
    assert (fh, fw) == (patch_h, patch_w)
    BB = block_batch
    assert B % BB == 0, (B, BB)
    G = B // BB
    hw = fh * fw
    H, W = patch_h * PATCH_SIZE, patch_w * PATCH_SIZE
    c1 = consts["w1t"].shape[0]
    c2 = consts["b2"].shape[0] // BB
    nc = consts["b3"].shape[0] // BB

    # --- im2col + layout (tiny at this size; move in-kernel for big feature maps) ---
    x = jnp.transpose(fmap_nchw, (0, 2, 3, 1)).astype(jnp.float32)        # NHWC
    xpad = jnp.pad(x, ((0, 0), (1, 1), (1, 1), (0, 0)))
    xcol = _im2col_3x3(xpad, fh, fw)                                      # (B, hw, 9*cin)
    # Pre-transpose so conv1 is a plain A@B matmul, and fold BB images into the
    # lane dim: (G, 9*cin, BB*hw), column index = img_local*hw + pos.
    xcol_t = jnp.transpose(xcol, (0, 2, 1)).reshape(G, BB, 9 * cin, hw)
    xcol_t = jnp.transpose(xcol_t, (0, 2, 1, 3)).reshape(G, 9 * cin, BB * hw)
    xcol_t = xcol_t.astype(jnp.bfloat16)

    def kernel(xcol_ref, w1t_ref, b1_ref, w2bd_ref, b2_ref, m2t_ref,
               w3bd_ref, b3_ref, out_ref):
        # conv1 (3x3, pad=1) for all BB images in ONE lane-dense plain matmul:
        # (c1, 9*cin) @ (9*cin, BB*hw) -> (c1, BB*hw), cols (img, pos).
        a1_bl = jnp.dot(w1t_ref[...], xcol_ref[...],
                        preferred_element_type=jnp.float32) + b1_ref[...]
        # Tiny swizzle (4 f32 vregs): move the batch from lanes to sublanes so the
        # fold matmul can stack images in M: (c1, BB*hw) -> (BB*c1, hw).
        a1_all = jnp.concatenate(
            [a1_bl[:, j * hw:(j + 1) * hw] for j in range(BB)],
            axis=0).astype(jnp.bfloat16)

        # conv2 per-tap channel mix, block-diagonal over images -> M = BB*c2 rows.
        at_all = jnp.concatenate(
            [jnp.dot(w2bd_ref[t], a1_all,
                     preferred_element_type=jnp.float32).astype(jnp.bfloat16)
             for t in range(9)], axis=1)                                  # (BB*c2, 9*hw)

        # bilinear upsample (align_corners=True) + conv2 spatial taps, fused into
        # ONE lane-dense matmul: (BB*c2, 9*hw) @ (9*hw, H*W) -> (BB*c2, H*W).
        a2 = jnp.dot(at_all, m2t_ref[...], preferred_element_type=jnp.float32)
        a2 = jnp.maximum(a2 + b2_ref[...], 0.0).astype(jnp.bfloat16)      # bias + ReLU

        # conv3 (1x1), block-diagonal over images, bf16 operands, f32 accumulate.
        out_ref[...] = jnp.dot(w3bd_ref[...], a2,
                               preferred_element_type=jnp.float32) + b3_ref[...]

    out_t = pl.pallas_call(
        kernel,
        out_shape=jax.ShapeDtypeStruct((G, BB * nc, H * W), jnp.float32),
        grid=(G,),
        in_specs=[
            pl.BlockSpec((None, 9 * cin, BB * hw), lambda g: (g, 0, 0)),
            # grid-invariant operands: constant index_map -> DMA'd once.
            pl.BlockSpec((c1, 9 * cin), lambda g: (0, 0)),
            pl.BlockSpec((c1, 1), lambda g: (0, 0)),
            pl.BlockSpec((9, BB * c2, BB * c1), lambda g: (0, 0, 0)),
            pl.BlockSpec((BB * c2, 1), lambda g: (0, 0)),
            pl.BlockSpec((9 * hw, H * W), lambda g: (0, 0)),
            pl.BlockSpec((BB * nc, BB * c2), lambda g: (0, 0)),
            pl.BlockSpec((BB * nc, 1), lambda g: (0, 0)),
        ],
        out_specs=pl.BlockSpec((None, BB * nc, H * W), lambda g: (g, 0, 0)),
        compiler_params=pltpu.CompilerParams(
            # batch-group axis is independent; on v7x this should shard the >=2
            # grid steps across both TensorCores (verify on a trace; fall back to
            # pltpu.CORE_PARALLEL with an explicit core axis if it does not).
            dimension_semantics=("parallel",),
        ),
    )(xcol_t, consts["w1t"], consts["b1"], consts["w2bd"], consts["b2"],
      consts["m2t"], consts["w3bd"], consts["b3"])

    # glue: (G, BB*nc, H*W) rows are (img, class) img-major -> (B, nc, H, W).
    out = out_t.reshape(B, nc, H, W)
    if nc == 1:                      # torch .squeeze(1)
        out = jnp.squeeze(out, axis=1)
    return out


def simple_segmentation_model2_forward(feature_map, params, consts=None,
                                        block_batch=None):
    # TODO(synk): the facebook/dinov2-small AutoBackbone (pretrained ViT) has no clean
    # Pallas equivalent; the kernel consumes its (B, 384, h, w) feature map directly.
    feature_maps = (feature_map,)            # stands in for backbone(x).feature_maps
    h, w = feature_maps[0].shape[-2:]
    bb = block_batch or _pick_block_batch(feature_map.shape[0])
    if consts is None:
        consts = make_head_constants(params, h, w, bb)
    return head_forward_pallas(feature_maps[-1], consts, h, w, bb)


# ---------------- pure-JAX reference (for verification) ----------------
def head_forward_reference(fmap_nchw, params, patch_h, patch_w):
    hp = jax.lax.Precision.HIGHEST
    x = jnp.transpose(fmap_nchw, (0, 2, 3, 1))

    def conv(z, w, b, pad):
        y = jax.lax.conv_general_dilated(
            z, jnp.transpose(w, (2, 3, 1, 0)), (1, 1),
            [(pad, pad), (pad, pad)],
            dimension_numbers=("NHWC", "HWIO", "NHWC"), precision=hp)
        return y + b

    y = conv(x, params["w1"], params["b1"], 1)
    H, W = patch_h * PATCH_SIZE, patch_w * PATCH_SIZE
    ry = jnp.asarray(_interp_matrix_np(H, y.shape[1]))
    rx = jnp.asarray(_interp_matrix_np(W, y.shape[2]))
    y = jnp.einsum("Hh,bhwc->bHwc", ry, y, precision=hp)
    y = jnp.einsum("Ww,bhwc->bhWc", rx, y, precision=hp)
    y = jax.nn.relu(conv(y, params["w2"], params["b2"], 1))
    y = conv(y, params["w3"], params["b3"], 0)
    y = jnp.transpose(y, (0, 3, 1, 2))
    if y.shape[1] == 1:
        y = jnp.squeeze(y, axis=1)
    return y


def init_params(key, num_classes):
    ks = jax.random.split(key, 6)
    return {
        "w1": 0.02 * jax.random.normal(ks[0], (32, 384, 3, 3), jnp.float32),
        "b1": 0.01 * jax.random.normal(ks[1], (32,), jnp.float32),
        "w2": 0.05 * jax.random.normal(ks[2], (32, 32, 3, 3), jnp.float32),
        "b2": 0.01 * jax.random.normal(ks[3], (32,), jnp.float32),
        "w3": 0.10 * jax.random.normal(ks[4], (num_classes, 32, 1, 1), jnp.float32),
        "b3": 0.01 * jax.random.normal(ks[5], (num_classes,), jnp.float32),
    }


if __name__ == "__main__":
    key = jax.random.PRNGKey(0)
    k_feat, k_par = jax.random.split(key)
    # dinov2-small feature maps for 56x56 images; B=8 so batch folding kicks in
    # (BB=4 -> 2 grid steps of 128-row matmuls, >=2 steps kept for v7x's 2 TCs).
    B, C_IN, FH, FW = 8, 384, 4, 4
    NUM_CLASSES = 1                          # squeeze(1) then removes the class dim
    fmap = jax.random.normal(k_feat, (B, C_IN, FH, FW), jnp.float32)
    params = init_params(k_par, NUM_CLASSES)

    BB = _pick_block_batch(B)
    # Hoisted one-time prep (fold matrix + weight repacking), reused across calls.
    consts = make_head_constants(params, FH, FW, BB)

    fwd = jax.jit(head_forward_pallas, static_argnums=(2, 3, 4))
    out = fwd(fmap, consts, FH, FW, BB)
    out = jax.block_until_ready(out)
    assert out.shape == (B, FH * PATCH_SIZE, FW * PATCH_SIZE), out.shape

    # bf16 matmul operands with f32 accumulation vs an f32-HIGHEST reference:
    # measured/expected error is O(1e-3), well inside 2e-2.
    ref = head_forward_reference(fmap, params, FH, FW)
    np.testing.assert_allclose(np.asarray(out), np.asarray(ref), rtol=2e-2, atol=2e-2)
    print("KERNEL_OK")
</pallas_src>

<mosaic_0001>
module attributes {stable_mosaic.version = 11 : i64} {
  func.func @kernel(%arg0: i32, %arg1: memref<1x3456x64xbf16, #tpu.memory_space<vmem>>, %arg2: memref<32x3456xbf16, #tpu.memory_space<vmem>>, %arg3: memref<32x1xf32, #tpu.memory_space<vmem>>, %arg4: memref<9x128x128xbf16, #tpu.memory_space<vmem>>, %arg5: memref<128x1xf32, #tpu.memory_space<vmem>>, %arg6: memref<144x3136xbf16, #tpu.memory_space<vmem>>, %arg7: memref<4x128xbf16, #tpu.memory_space<vmem>>, %arg8: memref<4x1xf32, #tpu.memory_space<vmem>>, %arg9: memref<1x4x3136xf32, #tpu.memory_space<vmem>>) attributes {dimension_semantics = [#tpu.dimension_semantics<parallel>], iteration_bounds = array<i64: 2>, scalar_prefetch = 0 : i64, scratch_operands = 0 : i64, tpu.core_type = #tpu.core_type<tc>, window_params = [{transform_indices = @transform_0, window_bounds = array<i64: 1, 3456, 64>}, {pipeline_mode = #tpu.pipeline_mode<synchronous>, transform_indices = @transform_1, window_bounds = array<i64: 32, 3456>}, {pipeline_mode = #tpu.pipeline_mode<synchronous>, transform_indices = @transform_2, window_bounds = array<i64: 32, 1>}, {pipeline_mode = #tpu.pipeline_mode<synchronous>, transform_indices = @transform_3, window_bounds = array<i64: 9, 128, 128>}, {pipeline_mode = #tpu.pipeline_mode<synchronous>, transform_indices = @transform_4, window_bounds = array<i64: 128, 1>}, {pipeline_mode = #tpu.pipeline_mode<synchronous>, transform_indices = @transform_5, window_bounds = array<i64: 144, 3136>}, {pipeline_mode = #tpu.pipeline_mode<synchronous>, transform_indices = @transform_6, window_bounds = array<i64: 4, 128>}, {pipeline_mode = #tpu.pipeline_mode<synchronous>, transform_indices = @transform_7, window_bounds = array<i64: 4, 1>}, {transform_indices = @transform_8, window_bounds = array<i64: 1, 4, 3136>}]} {
    %c0 = arith.constant 0 : index
    %c0_0 = arith.constant 0 : index
    %0 = vector.load %arg2[%c0, %c0_0] : memref<32x3456xbf16, #tpu.memory_space<vmem>>, vector<32x3456xbf16>
    %c0_1 = arith.constant 0 : index
    %c0_2 = arith.constant 0 : index
    %c0_3 = arith.constant 0 : index
    %1 = vector.load %arg1[%c0_1, %c0_2, %c0_3] : memref<1x3456x64xbf16, #tpu.memory_space<vmem>>, vector<1x3456x64xbf16>
    %2 = vector.shape_cast %1 : vector<1x3456x64xbf16> to vector<3456x64xbf16>
    %cst = arith.constant dense<0.000000e+00> : vector<32x64xf32>
    %3 = tpu.matmul %0, %2, %cst {dimension_numbers = #tpu.dot_dimension_numbers<[1], [0], [0], [1], [0, 0, 1, 1], [], []>} : vector<32x3456xbf16>, vector<3456x64xbf16>, vector<32x64xf32> -> vector<32x64xf32>
    %c0_4 = arith.constant 0 : index
    %c0_5 = arith.constant 0 : index
    %4 = vector.load %arg3[%c0_4, %c0_5] : memref<32x1xf32, #tpu.memory_space<vmem>>, vector<32x1xf32>
    %5 = vector.broadcast %4 : vector<32x1xf32> to vector<32x64xf32>
    %6 = arith.addf %3, %5 : vector<32x64xf32>
    %7 = vector.extract_strided_slice %6 {offsets = [0, 0], sizes = [32, 16], strides = [1, 1]} : vector<32x64xf32> to vector<32x16xf32>
    %8 = vector.extract_strided_slice %6 {offsets = [0, 16], sizes = [32, 16], strides = [1, 1]} : vector<32x64xf32> to vector<32x16xf32>
    %9 = vector.extract_strided_slice %6 {offsets = [0, 32], sizes = [32, 16], strides = [1, 1]} : vector<32x64xf32> to vector<32x16xf32>
    %10 = vector.extract_strided_slice %6 {offsets = [0, 48], sizes = [32, 16], strides = [1, 1]} : vector<32x64xf32> to vector<32x16xf32>
    %11 = tpu.concatenate %7, %8, %9, %10 in 0 : vector<32x16xf32>, vector<32x16xf32>, vector<32x16xf32>, vector<32x16xf32> -> vector<128x16xf32>
    %12 = arith.truncf %11 : vector<128x16xf32> to vector<128x16xbf16>
    %c0_6 = arith.constant 0 : index
    %c0_7 = arith.constant 0 : index
    %c0_8 = arith.constant 0 : index
    %13 = vector.load %arg4[%c0_6, %c0_7, %c0_8] : memref<9x128x128xbf16, #tpu.memory_space<vmem>>, vector<1x128x128xbf16>
    %14 = vector.shape_cast %13 : vector<1x128x128xbf16> to vector<128x128xbf16>
    %cst_9 = arith.constant dense<0.000000e+00> : vector<128x16xf32>
    %15 = tpu.matmul %14, %12, %cst_9 {dimension_numbers = #tpu.dot_dimension_numbers<[1], [0], [0], [1], [0, 0, 1, 1], [], []>} : vector<128x128xbf16>, vector<128x16xbf16>, vector<128x16xf32> -> vector<128x16xf32>
    %16 = arith.truncf %15 : vector<128x16xf32> to vector<128x16xbf16>
    %c1 = arith.constant 1 : index
    %c0_10 = arith.constant 0 : index
    %c0_11 = arith.constant 0 : index
    %17 = vector.load %arg4[%c1, %c0_10, %c0_11] : memref<9x128x128xbf16, #tpu.memory_space<vmem>>, vector<1x128x128xbf16>
    %18 = vector.shape_cast %17 : vector<1x128x128xbf16> to vector<128x128xbf16>
    %cst_12 = arith.constant dense<0.000000e+00> : vector<128x16xf32>
    %19 = tpu.matmul %18, %12, %cst_12 {dimension_numbers = #tpu.dot_dimension_numbers<[1], [0], [0], [1], [0, 0, 1, 1], [], []>} : vector<128x128xbf16>, vector<128x16xbf16>, vector<128x16xf32> -> vector<128x16xf32>
    %20 = arith.truncf %19 : vector<128x16xf32> to vector<128x16xbf16>
    %c2 = arith.constant 2 : index
    %c0_13 = arith.constant 0 : index
    %c0_14 = arith.constant 0 : index
    %21 = vector.load %arg4[%c2, %c0_13, %c0_14] : memref<9x128x128xbf16, #tpu.memory_space<vmem>>, vector<1x128x128xbf16>
    %22 = vector.shape_cast %21 : vector<1x128x128xbf16> to vector<128x128xbf16>
    %cst_15 = arith.constant dense<0.000000e+00> : vector<128x16xf32>
    %23 = tpu.matmul %22, %12, %cst_15 {dimension_numbers = #tpu.dot_dimension_numbers<[1], [0], [0], [1], [0, 0, 1, 1], [], []>} : vector<128x128xbf16>, vector<128x16xbf16>, vector<128x16xf32> -> vector<128x16xf32>
    %24 = arith.truncf %23 : vector<128x16xf32> to vector<128x16xbf16>
    %c3 = arith.constant 3 : index
    %c0_16 = arith.constant 0 : index
    %c0_17 = arith.constant 0 : index
    %25 = vector.load %arg4[%c3, %c0_16, %c0_17] : memref<9x128x128xbf16, #tpu.memory_space<vmem>>, vector<1x128x128xbf16>
    %26 = vector.shape_cast %25 : vector<1x128x128xbf16> to vector<128x128xbf16>
    %cst_18 = arith.constant dense<0.000000e+00> : vector<128x16xf32>
    %27 = tpu.matmul %26, %12, %cst_18 {dimension_numbers = #tpu.dot_dimension_numbers<[1], [0], [0], [1], [0, 0, 1, 1], [], []>} : vector<128x128xbf16>, vector<128x16xbf16>, vector<128x16xf32> -> vector<128x16xf32>
    %28 = arith.truncf %27 : vector<128x16xf32> to vector<128x16xbf16>
    %c4 = arith.constant 4 : index
    %c0_19 = arith.constant 0 : index
    %c0_20 = arith.constant 0 : index
    %29 = vector.load %arg4[%c4, %c0_19, %c0_20] : memref<9x128x128xbf16, #tpu.memory_space<vmem>>, vector<1x128x128xbf16>
    %30 = vector.shape_cast %29 : vector<1x128x128xbf16> to vector<128x128xbf16>
    %cst_21 = arith.constant dense<0.000000e+00> : vector<128x16xf32>
    %31 = tpu.matmul %30, %12, %cst_21 {dimension_numbers = #tpu.dot_dimension_numbers<[1], [0], [0], [1], [0, 0, 1, 1], [], []>} : vector<128x128xbf16>, vector<128x16xbf16>, vector<128x16xf32> -> vector<128x16xf32>
    %32 = arith.truncf %31 : vector<128x16xf32> to vector<128x16xbf16>
    %c5 = arith.constant 5 : index
    %c0_22 = arith.constant 0 : index
    %c0_23 = arith.constant 0 : index
    %33 = vector.load %arg4[%c5, %c0_22, %c0_23] : memref<9x128x128xbf16, #tpu.memory_space<vmem>>, vector<1x128x128xbf16>
    %34 = vector.shape_cast %33 : vector<1x128x128xbf16> to vector<128x128xbf16>
    %cst_24 = arith.constant dense<0.000000e+00> : vector<128x16xf32>
    %35 = tpu.matmul %34, %12, %cst_24 {dimension_numbers = #tpu.dot_dimension_numbers<[1], [0], [0], [1], [0, 0, 1, 1], [], []>} : vector<128x128xbf16>, vector<128x16xbf16>, vector<128x16xf32> -> vector<128x16xf32>
    %36 = arith.truncf %35 : vector<128x16xf32> to vector<128x16xbf16>
    %c6 = arith.constant 6 : index
    %c0_25 = arith.constant 0 : index
    %c0_26 = arith.constant 0 : index
    %37 = vector.load %arg4[%c6, %c0_25, %c0_26] : memref<9x128x128xbf16, #tpu.memory_space<vmem>>, vector<1x128x128xbf16>
    %38 = vector.shape_cast %37 : vector<1x128x128xbf16> to vector<128x128xbf16>
    %cst_27 = arith.constant dense<0.000000e+00> : vector<128x16xf32>
    %39 = tpu.matmul %38, %12, %cst_27 {dimension_numbers = #tpu.dot_dimension_numbers<[1], [0], [0], [1], [0, 0, 1, 1], [], []>} : vector<128x128xbf16>, vector<128x16xbf16>, vector<128x16xf32> -> vector<128x16xf32>
    %40 = arith.truncf %39 : vector<128x16xf32> to vector<128x16xbf16>
    %c7 = arith.constant 7 : index
    %c0_28 = arith.constant 0 : index
    %c0_29 = arith.constant 0 : index
    %41 = vector.load %arg4[%c7, %c0_28, %c0_29] : memref<9x128x128xbf16, #tpu.memory_space<vmem>>, vector<1x128x128xbf16>
    %42 = vector.shape_cast %41 : vector<1x128x128xbf16> to vector<128x128xbf16>
    %cst_30 = arith.constant dense<0.000000e+00> : vector<128x16xf32>
    %43 = tpu.matmul %42, %12, %cst_30 {dimension_numbers = #tpu.dot_dimension_numbers<[1], [0], [0], [1], [0, 0, 1, 1], [], []>} : vector<128x128xbf16>, vector<128x16xbf16>, vector<128x16xf32> -> vector<128x16xf32>
    %44 = arith.truncf %43 : vector<128x16xf32> to vector<128x16xbf16>
    %c8 = arith.constant 8 : index
    %c0_31 = arith.constant 0 : index
    %c0_32 = arith.constant 0 : index
    %45 = vector.load %arg4[%c8, %c0_31, %c0_32] : memref<9x128x128xbf16, #tpu.memory_space<vmem>>, vector<1x128x128xbf16>
    %46 = vector.shape_cast %45 : vector<1x128x128xbf16> to vector<128x128xbf16>
    %cst_33 = arith.constant dense<0.000000e+00> : vector<128x16xf32>
    %47 = tpu.matmul %46, %12, %cst_33 {dimension_numbers = #tpu.dot_dimension_numbers<[1], [0], [0], [1], [0, 0, 1, 1], [], []>} : vector<128x128xbf16>, vector<128x16xbf16>, vector<128x16xf32> -> vector<128x16xf32>
    %48 = arith.truncf %47 : vector<128x16xf32> to vector<128x16xbf16>
    %49 = tpu.concatenate %16, %20, %24, %28, %32, %36, %40, %44, %48 in 1 : vector<128x16xbf16>, vector<128x16xbf16>, vector<128x16xbf16>, vector<128x16xbf16>, vector<128x16xbf16>, vector<128x16xbf16>, vector<128x16xbf16>, vector<128x16xbf16>, vector<128x16xbf16> -> vector<128x144xbf16>
    %c0_34 = arith.constant 0 : index
    %c0_35 = arith.constant 0 : index
    %50 = vector.load %arg6[%c0_34, %c0_35] : memref<144x3136xbf16, #tpu.memory_space<vmem>>, vector<144x3136xbf16>
    %cst_36 = arith.constant dense<0.000000e+00> : vector<128x3136xf32>
    %51 = tpu.matmul %49, %50, %cst_36 {dimension_numbers = #tpu.dot_dimension_numbers<[1], [0], [0], [1], [0, 0, 1, 1], [], []>} : vector<128x144xbf16>, vector<144x3136xbf16>, vector<128x3136xf32> -> vector<128x3136xf32>
    %c0_37 = arith.constant 0 : index
    %c0_38 = arith.constant 0 : index
    %52 = vector.load %arg5[%c0_37, %c0_38] : memref<128x1xf32, #tpu.memory_space<vmem>>, vector<128x1xf32>
    %53 = vector.broadcast %52 : vector<128x1xf32> to vector<128x3136xf32>
    %54 = arith.addf %51, %53 : vector<128x3136xf32>
    %cst_39 = arith.constant 0.000000e+00 : f32
    %55 = vector.broadcast %cst_39 : f32 to vector<128x3136xf32>
    %56 = arith.maximumf %54, %55 : vector<128x3136xf32>
    %57 = arith.truncf %56 : vector<128x3136xf32> to vector<128x3136xbf16>
    %c0_40 = arith.constant 0 : index
    %c0_41 = arith.constant 0 : index
    %58 = vector.load %arg7[%c0_40, %c0_41] : memref<4x128xbf16, #tpu.memory_space<vmem>>, vector<4x128xbf16>
    %cst_42 = arith.constant dense<0.000000e+00> : vector<4x3136xf32>
    %59 = tpu.matmul %58, %57, %cst_42 {dimension_numbers = #tpu.dot_dimension_numbers<[1], [0], [0], [1], [0, 0, 1, 1], [], []>} : vector<4x128xbf16>, vector<128x3136xbf16>, vector<4x3136xf32> -> vector<4x3136xf32>
    %c0_43 = arith.constant 0 : index
    %c0_44 = arith.constant 0 : index
    %60 = vector.load %arg8[%c0_43, %c0_44] : memref<4x1xf32, #tpu.memory_space<vmem>>, vector<4x1xf32>
    %61 = vector.broadcast %60 : vector<4x1xf32> to vector<4x3136xf32>
    %62 = arith.addf %59, %61 : vector<4x3136xf32>
    %c0_45 = arith.constant 0 : index
    %c0_46 = arith.constant 0 : index
    %c0_47 = arith.constant 0 : index
    %63 = vector.load %arg9[%c0_45, %c0_46, %c0_47] : memref<1x4x3136xf32, #tpu.memory_space<vmem>>, vector<1x4x3136xf32>
    %64 = vector.shape_cast %63 : vector<1x4x3136xf32> to vector<4x3136xf32>
    %65 = vector.shape_cast %62 : vector<4x3136xf32> to vector<1x4x3136xf32>
    tpu.vector_store %arg9[%c0_45, %c0_46, %c0_47], %65 {strides = array<i32>} : memref<1x4x3136xf32, #tpu.memory_space<vmem>>, vector<1x4x3136xf32>,
    return
  }
  func.func @transform_0(%arg0: i32) -> (i32, i32, i32) {
    %c0_i32 = arith.constant 0 : i32
    %c0_i32_0 = arith.constant 0 : i32
    %c0_i32_1 = arith.constant 0 : i32
    return %arg0, %c0_i32, %c0_i32_0 : i32, i32, i32
  }
  func.func @transform_1(%arg0: i32) -> (i32, i32) {
    %c0_i32 = arith.constant 0 : i32
    %c0_i32_0 = arith.constant 0 : i32
    %c0_i32_1 = arith.constant 0 : i32
    return %c0_i32, %c0_i32_0 : i32, i32
  }
  func.func @transform_2(%arg0: i32) -> (i32, i32) {
    %c0_i32 = arith.constant 0 : i32
    %c0_i32_0 = arith.constant 0 : i32
    %c0_i32_1 = arith.constant 0 : i32
    return %c0_i32, %c0_i32_0 : i32, i32
  }
  func.func @transform_3(%arg0: i32) -> (i32, i32, i32) {
    %c0_i32 = arith.constant 0 : i32
    %c0_i32_0 = arith.constant 0 : i32
    %c0_i32_1 = arith.constant 0 : i32
    %c0_i32_2 = arith.constant 0 : i32
    return %c0_i32, %c0_i32_0, %c0_i32_1 : i32, i32, i32
  }
  func.func @transform_4(%arg0: i32) -> (i32, i32) {
    %c0_i32 = arith.constant 0 : i32
    %c0_i32_0 = arith.constant 0 : i32
    %c0_i32_1 = arith.constant 0 : i32
    return %c0_i32, %c0_i32_0 : i32, i32
  }
  func.func @transform_5(%arg0: i32) -> (i32, i32) {
    %c0_i32 = arith.constant 0 : i32
    %c0_i32_0 = arith.constant 0 : i32
    %c0_i32_1 = arith.constant 0 : i32
    return %c0_i32, %c0_i32_0 : i32, i32
  }
  func.func @transform_6(%arg0: i32) -> (i32, i32) {
    %c0_i32 = arith.constant 0 : i32
    %c0_i32_0 = arith.constant 0 : i32
    %c0_i32_1 = arith.constant 0 : i32
    return %c0_i32, %c0_i32_0 : i32, i32
  }
  func.func @transform_7(%arg0: i32) -> (i32, i32) {
    %c0_i32 = arith.constant 0 : i32
    %c0_i32_0 = arith.constant 0 : i32
    %c0_i32_1 = arith.constant 0 : i32
    return %c0_i32, %c0_i32_0 : i32, i32
  }
  func.func @transform_8(%arg0: i32) -> (i32, i32, i32) {
    %c0_i32 = arith.constant 0 : i32
    %c0_i32_0 = arith.constant 0 : i32
    %c0_i32_1 = arith.constant 0 : i32
    return %arg0, %c0_i32, %c0_i32_0 : i32, i32, i32
  }
}

</mosaic_0001>

<bundles_post_ra>
// kernel: head_forward_pallas.1
= control target key start
LH: loop header
LB: loop body
LE: loop exit
PB: predicated region body
PF: predicated region fallthrough
CT: control target
= control target key end

     0   :  { %s11630_s27 = smov 0   ;;  %s14886_s0 = inlined_call_operand.vmem [shape: bf16[2,3456,64], index: 0, kind: input, shape index: {}]   ;;  %s14887_s1 = inlined_call_operand.vmem [shape: bf16[32,3456], index: 1, kind: input, shape index: {}]   ;;  %s14888_s2 = inlined_call_operand.vmem [shape: f32[32,1], index: 2, kind: input, shape index: {}]   ;;  %s14889_s3 = inlined_call_operand.vmem [shape: bf16[9,128,128], index: 3, kind: input, shape index: {}]   ;;  %s14890_s4 = inlined_call_operand.vmem [shape: f32[128,1], index: 4, kind: input, shape index: {}]   ;;  %s14891_s5 = inlined_call_operand.vmem [shape: bf16[144,3136], index: 5, kind: input, shape index: {}]   ;;  %s14892_s6 = inlined_call_operand.vmem [shape: bf16[4,128], index: 6, kind: input, shape index: {}]   ;;  %s14893_s7 = inlined_call_operand.vmem [shape: f32[4,1], index: 7, kind: input, shape index: {}]   ;;  %s14894_s8 = inlined_call_operand.vmem [shape: f32[2,4,3136], index: 8, kind: output, shape index: {}]  }
   0x1 LB: > { %s9150_s28 = sadd.s32 4294967295, %s11573_s27   ;;  %p9154_p0 = scmp.ge.s32.totalorder %s11573_s27, 1  ;;  %s11573_s27 = sphi %s11630_s27, %s18_s27  }
   0x2   : > { %p262_p1 = scmp.lt.s32.totalorder %s11573_s27, 3 }
   0x4   : > { %p263_p2 = pnand %p9154_p0, %p262_p1 }
   0x6   : > { %266 = sbr.rel (%p263_p2) target bundleno = 1928 (0x788), region = 52 }
   0xd   : > { %p296_p3 = scmp.lt.s32.totalorder %s9150_s28, 1  ;;  %v10898_v0 = vld [vmem:[%s14887_s1 + $0x4] ss:$108 sps:$4 sm:$0xff]   ;;  %v10903_v1 = vld [vmem:[%s14887_s1 + $0xc] ss:$108 sps:$4 sm:$0xff]   ;;  %v14895_v2 = vmov 0  }
   0xe   : > { %2419 = vmatprep.mubr.bf16.mxu0 %v10898_v0  ;;  %2468 = vmatprep.mubr.bf16.mxu1 %v10903_v1  ;;  %v10896_v32 = vld [vmem:[%s14887_s1] ss:$108 sps:$4 sm:$0xff]   ;;  %v10924_v34 = vld [vmem:[%s14887_s1 + $0xdc] ss:$108 sps:$4 sm:$0xff]   ;;  %v10929_v38 = vld [vmem:[%s14887_s1 + $0xe4] ss:$108 sps:$4 sm:$0xff]  }
   0xf   : > { %s15102_s28 = smov (!%p296_p3, %s9150_s28), 1  ;;  %10833 = vset.pattern.permute.xlu0 %v14895_v2  ;;  %10834 = vset.pattern.permute.xlu1 %v14895_v2  ;;  %v10901_v36 = vld [vmem:[%s14887_s1 + $0x8] ss:$108 sps:$4 sm:$0xff]   ;;  %v10927_v44 = vld [vmem:[%s14887_s1 + $0xd8] ss:$108 sps:$4 sm:$0xff]   ;;  %s11577_s12 = smov 96  }
  0x10   : > { %s10813_s11 = smul.u32 1728, %s15102_s28  ;;  %v10942_v46 = vld [vmem:[%s14887_s1 + $0x14] ss:$108 sps:$4 sm:$0xff]   ;;  %s11578_s13 = smov 80   ;;  %vm4818_vm0 = vcmask 130048   ;;  %vm4843_vm1 = vcmask 261120  }
  0x11   : > { %v10932_v48 = vld [vmem:[%s14887_s1 + $0xe0] ss:$108 sps:$4 sm:$0xff]   ;;  %s11579_s23 = smov 16   ;;  %s11580_s24 = smov 48   ;;  %vm4860_vm2 = vcmask 392192   ;;  %vm4877_vm3 = vcmask 523264  }
  0x12   : > { %s11650_s14 = scalar_lea.vmem %s14886_s0, %s10813_s11  ;;  %s11576_s11 = smov 112   ;;  %vm4894_vm4 = vcmask 654336   ;;  %vm4911_vm5 = vcmask 785408   ;;  %vm4928_vm6 = vcmask 916480   ;;  %vm11584_vm7 = vmmov 0  }
  0x13   : > { %v10865_v3 = vld [vmem:[%s11650_s14 + $0x40] sm:$0xff]   ;;  %v10869_v7 = vld [vmem:[%s11650_s14 + $0x48] sm:$0xff]   ;;  %v10873_v11 = vld [vmem:[%s11650_s14 + $0x50] sm:$0xff]   ;;  %s11581_s25 = smov 32   ;;  %s11582_s19 = smov 64   ;;  %vm9093_vm8 = vcmask 519168  }
  0x14   : > { %v10866_v4 = vld [vmem:[%s11650_s14] sm:$0xff]   ;;  %9958 = vmatprep.subr.bf16.mxu0 %v10865_v3  ;;  %v10870_v8 = vld [vmem:[%s11650_s14 + $0x8] sm:$0xff]   ;;  %v10874_v12 = vld [vmem:[%s11650_s14 + $0x10] sm:$0xff]  }
  0x15   : > { %v10867_v5 = vld [vmem:[%s11650_s14 + $0xc0] sm:$0xff]   ;;  %9959 = vmatpush3.bf16.msra.mxu0 %v10866_v4  ;;  %v10871_v9 = vld [vmem:[%s11650_s14 + $0xc8] sm:$0xff]   ;;  %v10875_v13 = vld [vmem:[%s11650_s14 + $0xd0] sm:$0xff]  }
  0x16   : > { %v10868_v6 = vld [vmem:[%s11650_s14 + $0x80] sm:$0xff]   ;;  %9986 = vmatprep.subr.bf16.mxu1 %v10867_v5  ;;  %9960 = vmatprep.subr.bf16.mxu0 %v10869_v7  ;;  %v10872_v10 = vld [vmem:[%s11650_s14 + $0x88] sm:$0xff]   ;;  %v10876_v14 = vld [vmem:[%s11650_s14 + $0x90] sm:$0xff]  }
  0x17   : > { %9987 = vmatpush3.bf16.msra.mxu1 %v10868_v6  ;;  %v10877_v15 = vld [vmem:[%s11650_s14 + $0x58] sm:$0xff]   ;;  %v10881_v19 = vld [vmem:[%s11650_s14 + $0x60] sm:$0xff]   ;;  %v10885_v23 = vld [vmem:[%s11650_s14 + $0x68] sm:$0xff]  }
  0x18   : > { %9988 = vmatprep.subr.bf16.mxu1 %v10871_v9  ;;  %v10878_v16 = vld [vmem:[%s11650_s14 + $0x18] sm:$0xff]   ;;  %v10882_v20 = vld [vmem:[%s11650_s14 + $0x20] sm:$0xff]   ;;  %v10886_v24 = vld [vmem:[%s11650_s14 + $0x28] sm:$0xff]  }
  0x19   : > { %9961 = vmatpush3.bf16.msra.mxu0 %v10870_v8  ;;  %v10879_v17 = vld [vmem:[%s11650_s14 + $0xd8] sm:$0xff]   ;;  %v10883_v21 = vld [vmem:[%s11650_s14 + $0xe0] sm:$0xff]   ;;  %v10887_v25 = vld [vmem:[%s11650_s14 + $0xe8] sm:$0xff]  }
  0x1a   : > { %9962 = vmatprep.subr.bf16.mxu0 %v10873_v11  ;;  %v10880_v18 = vld [vmem:[%s11650_s14 + $0x98] sm:$0xff]   ;;  %v10884_v22 = vld [vmem:[%s11650_s14 + $0xa0] sm:$0xff]   ;;  %v10888_v26 = vld [vmem:[%s11650_s14 + $0xa8] sm:$0xff]  }
  0x1b   : > { %9989 = vmatpush3.bf16.msra.mxu1 %v10872_v10  ;;  %v10889_v27 = vld [vmem:[%s11650_s14 + $0x70] sm:$0xff]   ;;  %v10893_v31 = vld [vmem:[%s11650_s14 + $0x78] sm:$0xff]   ;;  %v10900_v39 = vld [vmem:[%s11650_s14 + $0x140] sm:$0xff]  }
  0x1c   : > { %9990 = vmatprep.subr.bf16.mxu1 %v10875_v13  ;;  %v10890_v28 = vld [vmem:[%s11650_s14 + $0x30] sm:$0xff]   ;;  %v10894_v33 = vld [vmem:[%s11650_s14 + $0x38] sm:$0xff]   ;;  %v10904_v40 = vld [vmem:[%s11650_s14 + $0x100] sm:$0xff]  }
  0x1d   : > { %9963 = vmatpush3.bf16.msra.mxu0 %v10874_v12  ;;  %v10891_v29 = vld [vmem:[%s11650_s14 + $0xf0] sm:$0xff]   ;;  %v10895_v35 = vld [vmem:[%s11650_s14 + $0xf8] sm:$0xff]   ;;  %v10905_v41 = vld [vmem:[%s11650_s14 + $0x1c0] sm:$0xff]  }
  0x1e   : > { %9964 = vmatprep.subr.bf16.mxu0 %v10877_v15  ;;  %v10892_v30 = vld [vmem:[%s11650_s14 + $0xb0] sm:$0xff]   ;;  %v10899_v37 = vld [vmem:[%s11650_s14 + $0xb8] sm:$0xff]   ;;  %v10906_v42 = vld [vmem:[%s11650_s14 + $0x180] sm:$0xff]  }
  0x1f   : > { %9991 = vmatpush3.bf16.msra.mxu1 %v10876_v14  ;;  %v10907_v43 = vld [vmem:[%s11650_s14 + $0x148] sm:$0xff]   ;;  %v10911_v50 = vld [vmem:[%s11650_s14 + $0x150] sm:$0xff]   ;;  %v10915_v54 = vld [vmem:[%s11650_s14 + $0x158] sm:$0xff]  }
  0x20   : > { %9992 = vmatprep.subr.bf16.mxu1 %v10879_v17  ;;  %v10908_v45 = vld [vmem:[%s11650_s14 + $0x108] sm:$0xff]   ;;  %v10912_v51 = vld [vmem:[%s11650_s14 + $0x110] sm:$0xff]   ;;  %v10916_v55 = vld [vmem:[%s11650_s14 + $0x118] sm:$0xff]  }
  0x21   : > { %9965 = vmatpush3.bf16.msra.mxu0 %v10878_v16  ;;  %v10909_v47 = vld [vmem:[%s11650_s14 + $0x1c8] sm:$0xff]   ;;  %v10913_v52 = vld [vmem:[%s11650_s14 + $0x1d0] sm:$0xff]   ;;  %v10917_v56 = vld [vmem:[%s11650_s14 + $0x1d8] sm:$0xff]  }
  0x22   : > { %9966 = vmatprep.subr.bf16.mxu0 %v10881_v19  ;;  %v10910_v49 = vld [vmem:[%s11650_s14 + $0x188] sm:$0xff]   ;;  %v10914_v53 = vld [vmem:[%s11650_s14 + $0x190] sm:$0xff]   ;;  %v10918_v57 = vld [vmem:[%s11650_s14 + $0x198] sm:$0xff]  }
  0x23   : > { %9993 = vmatpush3.bf16.msra.mxu1 %v10880_v18  ;;  %v10919_v58 = vld [vmem:[%s11650_s14 + $0x160] sm:$0xff]   ;;  %v10923_v62 = vld [vmem:[%s11650_s14 + $0x168] sm:$0xff]   ;;  %v10933_v3 = vld [vmem:[%s11650_s14 + $0x170] sm:$0xff]  }
  0x24   : > { %9994 = vmatprep.subr.bf16.mxu1 %v10883_v21  ;;  %v10920_v59 = vld [vmem:[%s11650_s14 + $0x120] sm:$0xff]   ;;  %v10926_v63 = vld [vmem:[%s11650_s14 + $0x128] sm:$0xff]   ;;  %v10934_v4 = vld [vmem:[%s11650_s14 + $0x130] sm:$0xff]  }
  0x25   : > { %9967 = vmatpush3.bf16.msra.mxu0 %v10882_v20  ;;  %v10921_v60 = vld [vmem:[%s11650_s14 + $0x1e0] sm:$0xff]   ;;  %v10928_v0 = vld [vmem:[%s11650_s14 + $0x1e8] sm:$0xff]   ;;  %v10935_v5 = vld [vmem:[%s11650_s14 + $0x1f0] sm:$0xff]  }
  0x26   : > { %9968 = vmatprep.subr.bf16.mxu0 %v10885_v23  ;;  %v10922_v61 = vld [vmem:[%s11650_s14 + $0x1a0] sm:$0xff]   ;;  %v10931_v1 = vld [vmem:[%s11650_s14 + $0x1a8] sm:$0xff]   ;;  %v10936_v6 = vld [vmem:[%s11650_s14 + $0x1b0] sm:$0xff]  }
  0x27   : > { %9995 = vmatpush3.bf16.msra.mxu1 %v10884_v22  ;;  %v10937_v7 = vld [vmem:[%s11650_s14 + $0x178] sm:$0xff]   ;;  %v10944_v12 = vld [vmem:[%s11650_s14 + $0x240] sm:$0xff]   ;;  %v10951_v18 = vld [vmem:[%s11650_s14 + $0x248] sm:$0xff]  }
  0x28   : > { %9996 = vmatprep.subr.bf16.mxu1 %v10887_v25  ;;  %v10940_v8 = vld [vmem:[%s14887_s1 + $0x10] ss:$108 sps:$4 sm:$0xff]   ;;  %v10945_v13 = vld [vmem:[%s14887_s1 + $0x18] ss:$108 sps:$4 sm:$0xff]   ;;  %v10952_v19 = vld [vmem:[%s11650_s14 + $0x208] sm:$0xff]  }
  0x29   : > { %9969 = vmatpush3.bf16.msra.mxu0 %v10886_v24  ;;  %v10938_v9 = vld [vmem:[%s11650_s14 + $0x138] sm:$0xff]   ;;  %v10948_v15 = vld [vmem:[%s11650_s14 + $0x200] sm:$0xff]   ;;  %v10953_v20 = vld [vmem:[%s11650_s14 + $0x2c8] sm:$0xff]  }
  0x2a   : > { %9970 = vmatprep.subr.bf16.mxu0 %v10889_v27  ;;  %v10939_v10 = vld [vmem:[%s11650_s14 + $0x1f8] sm:$0xff]   ;;  %v10949_v16 = vld [vmem:[%s11650_s14 + $0x2c0] sm:$0xff]   ;;  %v10956_v22 = vld [vmem:[%s11650_s14 + $0x288] sm:$0xff]  }
  0x2b   : > { %9997 = vmatpush3.bf16.msra.mxu1 %v10888_v26  ;;  %v10943_v11 = vld [vmem:[%s11650_s14 + $0x1b8] sm:$0xff]   ;;  %v10950_v17 = vld [vmem:[%s11650_s14 + $0x280] sm:$0xff]   ;;  %v10957_v23 = vld [vmem:[%s14887_s1 + $0xe8] ss:$108 sps:$4 sm:$0xff]  }
  0x2c   : > { %9998 = vmatprep.subr.bf16.mxu1 %v10891_v29  ;;  %v10947_v14 = vld [vmem:[%s14887_s1 + $0x1c] ss:$108 sps:$4 sm:$0xff]   ;;  %v10954_v21 = vld [vmem:[%s14887_s1 + $0xec] ss:$108 sps:$4 sm:$0xff]   ;;  %v10958_v24 = vld [vmem:[%s11650_s14 + $0x250] sm:$0xff]  }
  0x2d   : > { %9971 = vmatpush3.bf16.msra.mxu0 %v10890_v28  ;;  %v10959_v25 = vld [vmem:[%s14887_s1 + $0xf4] ss:$108 sps:$4 sm:$0xff]   ;;  %v10962_v27 = vld [vmem:[%s14887_s1 + $0xf0] ss:$108 sps:$4 sm:$0xff]  }
  0x2e   : > { %9972 = vmatprep.subr.bf16.mxu0 %v10893_v31  ;;  %v10961_v26 = vld [vmem:[%s11650_s14 + $0x210] sm:$0xff]   ;;  %v10966_v31 = vld [vmem:[%s11650_s14 + $0x218] sm:$0xff]  }
  0x2f   : > { %9999 = vmatpush3.bf16.msra.mxu1 %v10892_v30  ;;  %v10963_v28 = vld [vmem:[%s11650_s14 + $0x2d0] sm:$0xff]   ;;  %v10965_v30 = vld [vmem:[%s11650_s14 + $0x258] sm:$0xff]  }
  0x30   : > { %10000 = vmatprep.subr.bf16.mxu1 %v10895_v35  ;;  %v10964_v29 = vld [vmem:[%s11650_s14 + $0x290] sm:$0xff]   ;;  %v10970_v35 = vld [vmem:[%s11650_s14 + $0x220] sm:$0xff]  }
  0x31   : > { %9973 = vmatpush3.bf16.msra.mxu0 %v10894_v33  ;;  %v10968_v33 = vld [vmem:[%s11650_s14 + $0x298] sm:$0xff]  }
  0x32   : > { %10014 = vmatprep.subr.bf16.mxu0 %v10900_v39  ;;  %v10974_v39 = vld [vmem:[%s11650_s14 + $0x228] sm:$0xff]  }
  0x33   : > { %10001 = vmatpush3.bf16.msra.mxu1 %v10899_v37  ;;  %v10972_v37 = vld [vmem:[%s11650_s14 + $0x2a0] sm:$0xff]  }
  0x34   : > { %2420 = vmatmul.mubr.bf16.vlgmr.msra.gmra.mrb[0].mxu0 %v10896_v32  ;;  %10042 = vmatprep.subr.bf16.mxu1 %v10905_v41  ;;  %v10967_v32 = vld [vmem:[%s11650_s14 + $0x2d8] sm:$0xff]   ;;  %v10976_v41 = vld [vmem:[%s11650_s14 + $0x2a8] sm:$0xff]  }
  0x35   : > { %10015 = vmatpush3.bf16.msra.mxu0 %v10904_v40  ;;  %2427 = vmatprep.mubr.bf16.mxu0 %v10924_v34  ;;  %v10969_v34 = vld [vmem:[%s11650_s14 + $0x260] sm:$0xff]   ;;  %v10975_v40 = vld [vmem:[%s11650_s14 + $0x2e8] sm:$0xff]  }
  0x36   : > { %2469 = vmatmul.mubr.bf16.vlgmr.msra.gmra.mrb[0].mxu1 %v10901_v36  ;;  %10016 = vmatprep.subr.bf16.mxu0 %v10907_v43  ;;  %v10971_v36 = vld [vmem:[%s11650_s14 + $0x2e0] sm:$0xff]   ;;  %v10978_v43 = vld [vmem:[%s11650_s14 + $0x230] sm:$0xff]  }
  0x37   : > { %10043 = vmatpush3.bf16.msra.mxu1 %v10906_v42  ;;  %2476 = vmatprep.mubr.bf16.mxu1 %v10929_v38  ;;  %v10973_v38 = vld [vmem:[%s11650_s14 + $0x268] sm:$0xff]   ;;  %v10977_v42 = vld [vmem:[%s11650_s14 + $0x270] sm:$0xff]  }
  0x38   : > { %10044 = vmatprep.subr.bf16.mxu1 %v10909_v47  ;;  %v10982_v47 = vld [vmem:[%s11650_s14 + $0x238] sm:$0xff]  }
  0x39   : > { %10017 = vmatpush3.bf16.msra.mxu0 %v10908_v45  ;;  %v10980_v45 = vld [vmem:[%s11650_s14 + $0x2b0] sm:$0xff]  }
  0x3a   : > { %10018 = vmatprep.subr.bf16.mxu0 %v10911_v50  ;;  %v10986_v50 = vld [vmem:[%s14887_s1 + $0x24] ss:$108 sps:$4 sm:$0xff]  }
  0x3b   : > { %10045 = vmatpush3.bf16.msra.mxu1 %v10910_v49  ;;  %v10984_v49 = vld [vmem:[%s14887_s1 + $0x20] ss:$108 sps:$4 sm:$0xff]  }
  0x3c   : > { %2428 = vmatmul.mubr.bf16.gmra.mrb[4].mxu0 %v10927_v44  ;;  %10046 = vmatprep.subr.bf16.mxu1 %v10913_v52  ;;  %v10979_v44 = vld [vmem:[%s11650_s14 + $0x2f0] sm:$0xff]   ;;  %v10988_v52 = vld [vmem:[%s11650_s14 + $0x340] sm:$0xff]  }
  0x3d   : > { %10019 = vmatpush3.bf16.msra.mxu0 %v10912_v51  ;;  %2517 = vmatprep.mubr.bf16.mxu0 %v10942_v46  ;;  %v10981_v46 = vld [vmem:[%s11650_s14 + $0x278] sm:$0xff]  }
  0x3e   : > { %2477 = vmatmul.mubr.bf16.gmra.mrb[4].mxu1 %v10932_v48  ;;  %10020 = vmatprep.subr.bf16.mxu0 %v10915_v54  ;;  %v10983_v48 = vld [vmem:[%s11650_s14 + $0x2f8] sm:$0xff]  }
  0x3f   : > { %10047 = vmatpush3.bf16.msra.mxu1 %v10914_v53  ;;  %2566 = vmatprep.mubr.bf16.mxu1 %v10947_v14  ;;  %v10987_v51 = vld [vmem:[%s11650_s14 + $0x2b8] sm:$0xff]   ;;  %v10989_v53 = vld [vmem:[%s14887_s1 + $0x28] ss:$108 sps:$4 sm:$0xff]   ;;  %v11016_v14 = vld [vmem:[%s11650_s14 + $0x3a0] sm:$0xff]  }
  0x40   : > { %10048 = vmatprep.subr.bf16.mxu1 %v10917_v56  ;;  %v10991_v54 = vld [vmem:[%s14887_s1 + $0x2c] ss:$108 sps:$4 sm:$0xff]   ;;  %v10993_v56 = vld [vmem:[%s11650_s14 + $0x3c0] sm:$0xff]  }
  0x41   : > { %10021 = vmatpush3.bf16.msra.mxu0 %v10916_v55  ;;  %v10992_v55 = vld [vmem:[%s11650_s14 + $0x300] sm:$0xff]  }
  0x42   : > { %10022 = vmatprep.subr.bf16.mxu0 %v10919_v58  ;;  %v10995_v58 = vld [vmem:[%s11650_s14 + $0x348] sm:$0xff]  }
  0x43   : > { %10049 = vmatpush3.bf16.msra.mxu1 %v10918_v57  ;;  %v10994_v57 = vld [vmem:[%s11650_s14 + $0x380] sm:$0xff]  }
  0x44   : > { %10050 = vmatprep.subr.bf16.mxu1 %v10921_v60  ;;  %v10997_v60 = vld [vmem:[%s11650_s14 + $0x3c8] sm:$0xff]  }
  0x45   : > { %10023 = vmatpush3.bf16.msra.mxu0 %v10920_v59  ;;  %v10996_v59 = vld [vmem:[%s11650_s14 + $0x308] sm:$0xff]  }
  0x46   : > { %10024 = vmatprep.subr.bf16.mxu0 %v10923_v62  ;;  %v11000_v62 = vld [vmem:[%s11650_s14 + $0x388] sm:$0xff]  }
  0x47   : > { %10051 = vmatpush3.bf16.msra.mxu1 %v10922_v61  ;;  %v10998_v61 = vld [vmem:[%s14887_s1 + $0xfc] ss:$108 sps:$4 sm:$0xff]  }
  0x48   : > { %10052 = vmatprep.subr.bf16.mxu1 %v10928_v0  ;;  %v11002_v0 = vld [vmem:[%s11650_s14 + $0x350] sm:$0xff]  }
  0x49   : > { %10025 = vmatpush3.bf16.msra.mxu0 %v10926_v63  ;;  %v11001_v63 = vld [vmem:[%s14887_s1 + $0xf8] ss:$108 sps:$4 sm:$0xff]  }
  0x4a   : > { %10026 = vmatprep.subr.bf16.mxu0 %v10933_v3  ;;  %v11005_v3 = vld [vmem:[%s11650_s14 + $0x310] sm:$0xff]  }
  0x4b   : > { %10053 = vmatpush3.bf16.msra.mxu1 %v10931_v1  ;;  %v11003_v1 = vld [vmem:[%s14887_s1 + $0x104] ss:$108 sps:$4 sm:$0xff]  }
  0x4c   : > { %10054 = vmatprep.subr.bf16.mxu1 %v10935_v5  ;;  %v11007_v5 = vld [vmem:[%s11650_s14 + $0x3d0] sm:$0xff]  }
  0x4d   : > { %10027 = vmatpush3.bf16.msra.mxu0 %v10934_v4  ;;  %v11006_v4 = vld [vmem:[%s14887_s1 + $0x100] ss:$108 sps:$4 sm:$0xff]  }
  0x4e   : > { %10028 = vmatprep.subr.bf16.mxu0 %v10937_v7  ;;  %v11009_v7 = vld [vmem:[%s11650_s14 + $0x358] sm:$0xff]  }
  0x4f   : > { %10055 = vmatpush3.bf16.msra.mxu1 %v10936_v6  ;;  %v11008_v6 = vld [vmem:[%s11650_s14 + $0x390] sm:$0xff]  }
  0x50   : > { %10056 = vmatprep.subr.bf16.mxu1 %v10939_v10  ;;  %v11012_v10 = vld [vmem:[%s11650_s14 + $0x398] sm:$0xff]  }
  0x51   : > { %10029 = vmatpush3.bf16.msra.mxu0 %v10938_v9  ;;  %v11011_v9 = vld [vmem:[%s11650_s14 + $0x3d8] sm:$0xff]  }
  0x52   : > { %10070 = vmatprep.subr.bf16.mxu0 %v10944_v12  ;;  %v11014_v12 = vld [vmem:[%s11650_s14 + $0x320] sm:$0xff]  }
  0x53   : > { %10057 = vmatpush3.bf16.msra.mxu1 %v10943_v11  ;;  %v11013_v11 = vld [vmem:[%s11650_s14 + $0x360] sm:$0xff]  }
  0x54   : > { %2518 = vmatmul.mubr.bf16.vlgmr.msra.gmra.mrb[8].mxu0 %v10940_v8  ;;  %10098 = vmatprep.subr.bf16.mxu1 %v10949_v16  ;;  %v11010_v8 = vld [vmem:[%s11650_s14 + $0x318] sm:$0xff]   ;;  %v795_v16 = vld [vmem:[%s14888_s2] sm:$0xff] }
  0x55   : > { %10071 = vmatpush3.bf16.msra.mxu0 %v10948_v15  ;;  %2525 = vmatprep.mubr.bf16.mxu0 %v10954_v21  ;;  %v11017_v15 = vld [vmem:[%s11650_s14 + $0x368] sm:$0xff]  }
  0x56   : > { %2567 = vmatmul.mubr.bf16.vlgmr.msra.gmra.mrb[8].mxu1 %v10945_v13  ;;  %10072 = vmatprep.subr.bf16.mxu0 %v10951_v18  ;;  %v11015_v13 = vld [vmem:[%s11650_s14 + $0x3e0] sm:$0xff]   ;;  %v11019_v18 = vld [vmem:[%s11650_s14 + $0x3e8] sm:$0xff]  }
  0x57   : > { %10099 = vmatpush3.bf16.msra.mxu1 %v10950_v17  ;;  %2574 = vmatprep.mubr.bf16.mxu1 %v10959_v25  ;;  %v11018_v17 = vld [vmem:[%s11650_s14 + $0x328] sm:$0xff]   ;;  %v11025_v25 = vld [vmem:[%s11650_s14 + $0x378] sm:$0xff]  }
  0x58   : > { %10100 = vmatprep.subr.bf16.mxu1 %v10953_v20  ;;  %801 = vperm.xlu0 %10833, %v795_v16   ;;  %v11021_v20 = vld [vmem:[%s11650_s14 + $0x370] sm:$0xff]   ;;  %v796_v21 = vld [vmem:[%s14888_s2 + $0x8] sm:$0xff] }
  0x59   : > { %10073 = vmatpush3.bf16.msra.mxu0 %v10952_v19  ;;  %v11020_v19 = vld [vmem:[%s11650_s14 + $0x3a8] sm:$0xff]  }
  0x5a   : > { %10074 = vmatprep.subr.bf16.mxu0 %v10958_v24  ;;  %v11024_v24 = vld [vmem:[%s11650_s14 + $0x3b0] sm:$0xff]   ;;  %v11083_v16 = vld [vmem:[%s11650_s14 + $0x548] sm:$0xff]  }
  0x5b   : > { %10101 = vmatpush3.bf16.msra.mxu1 %v10956_v22  ;;  %v11022_v22 = vld [vmem:[%s11650_s14 + $0x330] sm:$0xff]  }
  0x5c   : > { %2526 = vmatmul.mubr.bf16.gmra.mrb[12].mxu0 %v10957_v23  ;;  %10102 = vmatprep.subr.bf16.mxu1 %v10963_v28  ;;  %v11023_v23 = vld [vmem:[%s11650_s14 + $0x3f0] sm:$0xff]  }
  0x5d   : > { %10075 = vmatpush3.bf16.msra.mxu0 %v10961_v26  ;;  %2615 = vmatprep.mubr.bf16.mxu0 %v10986_v50  ;;  %v11026_v26 = vld [vmem:[%s11650_s14 + $0x338] sm:$0xff]  }
  0x5e   : > { %2575 = vmatmul.mubr.bf16.gmra.mrb[12].mxu1 %v10962_v27  ;;  %10076 = vmatprep.subr.bf16.mxu0 %v10965_v30  ;;  %v11027_v27 = vld [vmem:[%s11650_s14 + $0x3f8] sm:$0xff]  }
  0x5f   : > { %10103 = vmatpush3.bf16.msra.mxu1 %v10964_v29  ;;  %2664 = vmatprep.mubr.bf16.mxu1 %v10991_v54  ;;  %v11028_v28 = vld [vmem:[%s14887_s1 + $0x30] ss:$108 sps:$4 sm:$0xff]   ;;  %v11030_v29 = vld [vmem:[%s14887_s1 + $0x34] ss:$108 sps:$4 sm:$0xff]  }
  0x60   : > { %10104 = vmatprep.subr.bf16.mxu1 %v10967_v32  ;;  %806 = vperm.xlu0 %10833, %v796_v21   ;;  %v11031_v30 = vld [vmem:[%s11650_s14 + $0x3b8] sm:$0xff]  }
  0x61   : > { %10077 = vmatpush3.bf16.msra.mxu0 %v10966_v31  ;;  %v11032_v31 = vld [vmem:[%s11650_s14 + $0x440] sm:$0xff]   ;;  %v11053_v50 = vld [vmem:[%s11650_s14 + $0x458] sm:$0xff]  }
  0x62   : > { %10078 = vmatprep.subr.bf16.mxu0 %v10969_v34  ;;  %v11033_v32 = vld [vmem:[%s14887_s1 + $0x38] ss:$108 sps:$4 sm:$0xff]  }
  0x63   : > { %10105 = vmatpush3.bf16.msra.mxu1 %v10968_v33  ;;  %v11035_v33 = vld [vmem:[%s14887_s1 + $0x3c] ss:$108 sps:$4 sm:$0xff]   ;;  %v11036_v34 = vld [vmem:[%s11650_s14 + $0x400] sm:$0xff]  }
  0x64   : > { %10106 = vmatprep.subr.bf16.mxu1 %v10971_v36  ;;  %v11038_v36 = vld [vmem:[%s11650_s14 + $0x480] sm:$0xff]   ;;  %v11056_v54 = vld [vmem:[%s11650_s14 + $0x498] sm:$0xff]  }
  0x65   : > { %10079 = vmatpush3.bf16.msra.mxu0 %v10970_v35  ;;  %v11037_v35 = vld [vmem:[%s11650_s14 + $0x4c0] sm:$0xff]  }
  0x66   : > { %10080 = vmatprep.subr.bf16.mxu0 %v10973_v38  ;;  %v11040_v38 = vld [vmem:[%s11650_s14 + $0x408] sm:$0xff]   ;;  %v11089_v21 = vld [vmem:[%s14887_s1 + $0x118] ss:$108 sps:$4 sm:$0xff]  }
  0x67   : > { %10107 = vmatpush3.bf16.msra.mxu1 %v10972_v37  ;;  %v11039_v37 = vld [vmem:[%s11650_s14 + $0x448] sm:$0xff]  }
  0x68   : > { %10108 = vmatprep.subr.bf16.mxu1 %v10975_v40  ;;  %v11042_v40 = vld [vmem:[%s14887_s1 + $0x10c] ss:$108 sps:$4 sm:$0xff]  }
  0x69   : > { %10081 = vmatpush3.bf16.msra.mxu0 %v10974_v39  ;;  %v11041_v39 = vld [vmem:[%s11650_s14 + $0x4c8] sm:$0xff]  }
  0x6a   : > { %10082 = vmatprep.subr.bf16.mxu0 %v10977_v42  ;;  %v11045_v42 = vld [vmem:[%s14887_s1 + $0x108] ss:$108 sps:$4 sm:$0xff]  }
  0x6b   : > { %10109 = vmatpush3.bf16.msra.mxu1 %v10976_v41  ;;  %v11044_v41 = vld [vmem:[%s11650_s14 + $0x488] sm:$0xff]  }
  0x6c   : > { %10110 = vmatprep.subr.bf16.mxu1 %v10979_v44  ;;  %v11047_v44 = vld [vmem:[%s14887_s1 + $0x114] ss:$108 sps:$4 sm:$0xff]  }
  0x6d   : > { %10083 = vmatpush3.bf16.msra.mxu0 %v10978_v43  ;;  %v11046_v43 = vld [vmem:[%s11650_s14 + $0x450] sm:$0xff]  }
  0x6e   : > { %10084 = vmatprep.subr.bf16.mxu0 %v10981_v46  ;;  %v11050_v46 = vld [vmem:[%s14887_s1 + $0x110] ss:$108 sps:$4 sm:$0xff]  }
  0x6f   : > { %10111 = vmatpush3.bf16.msra.mxu1 %v10980_v45  ;;  %v11049_v45 = vld [vmem:[%s11650_s14 + $0x410] sm:$0xff]  }
  0x70   : > { %10112 = vmatprep.subr.bf16.mxu1 %v10983_v48  ;;  %v797_v48 = vld [vmem:[%s14888_s2 + $0x10] sm:$0xff] }
  0x71   : > { %10085 = vmatpush3.bf16.msra.mxu0 %v10982_v47  ;;  %v11051_v47 = vld [vmem:[%s11650_s14 + $0x4d0] sm:$0xff]   ;;  %811 = vperm.xlu1 %10834, %v797_v48  }
  0x72   : > { %10126 = vmatprep.subr.bf16.mxu0 %v10988_v52  ;;  %v11055_v52 = vld [vmem:[%s11650_s14 + $0x4d8] sm:$0xff]   ;;  %v11118_v48 = vld [vmem:[%s14887_s1 + $0x54] ss:$108 sps:$4 sm:$0xff]  }
  0x73   : > { %10113 = vmatpush3.bf16.msra.mxu1 %v10987_v51  ;;  %v11054_v51 = vld [vmem:[%s11650_s14 + $0x418] sm:$0xff]  }
  0x74   : > { %2616 = vmatmul.mubr.bf16.vlgmr.msra.gmra.mrb[16].mxu0 %v10984_v49  ;;  %10154 = vmatprep.subr.bf16.mxu1 %v10993_v56  ;;  %v11052_v49 = vld [vmem:[%s11650_s14 + $0x490] sm:$0xff]   ;;  %v11058_v56 = vld [vmem:[%s11650_s14 + $0x420] sm:$0xff]  }
  0x75   : > { %10127 = vmatpush3.bf16.msra.mxu0 %v10992_v55  ;;  %2623 = vmatprep.mubr.bf16.mxu0 %v10998_v61  ;;  %v11057_v55 = vld [vmem:[%s11650_s14 + $0x460] sm:$0xff]   ;;  %v11063_v61 = vld [vmem:[%s11650_s14 + $0x4e8] sm:$0xff]  }
  0x76   : > { %2665 = vmatmul.mubr.bf16.vlgmr.msra.gmra.mrb[16].mxu1 %v10989_v53  ;;  %10128 = vmatprep.subr.bf16.mxu0 %v10995_v58  ;;  %v798_v53 = vld [vmem:[%s14888_s2 + $0x18] sm:$0xff]  ;;  %v11060_v58 = vld [vmem:[%s11650_s14 + $0x4a0] sm:$0xff]  }
  0x77   : > { %10155 = vmatpush3.bf16.msra.mxu1 %v10994_v57  ;;  %2672 = vmatprep.mubr.bf16.mxu1 %v11003_v1  ;;  %v11059_v57 = vld [vmem:[%s11650_s14 + $0x4e0] sm:$0xff]   ;;  %v11067_v1 = vld [vmem:[%s11650_s14 + $0x4f0] sm:$0xff]  }
  0x78   : > { %10156 = vmatprep.subr.bf16.mxu1 %v10997_v60  ;;  %816 = vperm.xlu1 %10834, %v798_v53   ;;  %v11062_v60 = vld [vmem:[%s11650_s14 + $0x428] sm:$0xff]   ;;  %v11124_v53 = vld [vmem:[%s11650_s14 + $0x600] sm:$0xff]  }
  0x79   : > { %10129 = vmatpush3.bf16.msra.mxu0 %v10996_v59  ;;  %v11061_v59 = vld [vmem:[%s11650_s14 + $0x468] sm:$0xff]  }
  0x7a   : > { %10130 = vmatprep.subr.bf16.mxu0 %v11002_v0  ;;  %v11066_v0 = vld [vmem:[%s11650_s14 + $0x430] sm:$0xff]  }
  0x7b   : > { %10157 = vmatpush3.bf16.msra.mxu1 %v11000_v62  ;;  %v11064_v62 = vld [vmem:[%s11650_s14 + $0x4a8] sm:$0xff]  }
  0x7c   : > { %2624 = vmatmul.mubr.bf16.gmra.mrb[20].mxu0 %v11001_v63  ;;  %10158 = vmatprep.subr.bf16.mxu1 %v11007_v5  ;;  %v11065_v63 = vld [vmem:[%s11650_s14 + $0x470] sm:$0xff]   ;;  %v11070_v5 = vld [vmem:[%s11650_s14 + $0x438] sm:$0xff]  }
  0x7d   : > { %10131 = vmatpush3.bf16.msra.mxu0 %v11005_v3  ;;  %2713 = vmatprep.mubr.bf16.mxu0 %v11030_v29  ;;  %v11068_v3 = vld [vmem:[%s11650_s14 + $0x4b0] sm:$0xff]   ;;  %v11098_v29 = vld [vmem:[%s11650_s14 + $0x518] sm:$0xff]  }
  0x7e   : > { %2673 = vmatmul.mubr.bf16.gmra.mrb[20].mxu1 %v11006_v4  ;;  %10132 = vmatprep.subr.bf16.mxu0 %v11009_v7  ;;  %v11069_v4 = vld [vmem:[%s11650_s14 + $0x478] sm:$0xff]   ;;  %v11072_v7 = vld [vmem:[%s14887_s1 + $0x40] ss:$108 sps:$4 sm:$0xff]  }
  0x7f   : > { %10159 = vmatpush3.bf16.msra.mxu1 %v11008_v6  ;;  %2762 = vmatprep.mubr.bf16.mxu1 %v11035_v33  ;;  %v11071_v6 = vld [vmem:[%s11650_s14 + $0x4f8] sm:$0xff]   ;;  %v11102_v33 = vld [vmem:[%s11650_s14 + $0x520] sm:$0xff]  }
  0x80   : > { %10160 = vmatprep.subr.bf16.mxu1 %v11011_v9  ;;  %v11075_v9 = vld [vmem:[%s11650_s14 + $0x4b8] sm:$0xff]  }
  0x81   : > { %10133 = vmatpush3.bf16.msra.mxu0 %v11010_v8  ;;  %v11074_v8 = vld [vmem:[%s14887_s1 + $0x44] ss:$108 sps:$4 sm:$0xff]  }
  0x82   : > { %10134 = vmatprep.subr.bf16.mxu0 %v11013_v11  ;;  %v11077_v11 = vld [vmem:[%s14887_s1 + $0x48] ss:$108 sps:$4 sm:$0xff]  }
  0x83   : > { %10161 = vmatpush3.bf16.msra.mxu1 %v11012_v10  ;;  %v11076_v10 = vld [vmem:[%s11650_s14 + $0x540] sm:$0xff]  }
  0x84   : > { %10162 = vmatprep.subr.bf16.mxu1 %v11015_v13  ;;  %v11080_v13 = vld [vmem:[%s11650_s14 + $0x500] sm:$0xff]  }
  0x85   : > { %10135 = vmatpush3.bf16.msra.mxu0 %v11014_v12  ;;  %v11079_v12 = vld [vmem:[%s14887_s1 + $0x4c] ss:$108 sps:$4 sm:$0xff]  }
  0x86   : > { %10136 = vmatprep.subr.bf16.mxu0 %v11017_v15  ;;  %v11082_v15 = vld [vmem:[%s11650_s14 + $0x580] sm:$0xff]  }
  0x87   : > { %10163 = vmatpush3.bf16.msra.mxu1 %v11016_v14  ;;  %v11081_v14 = vld [vmem:[%s11650_s14 + $0x5c0] sm:$0xff]  }
  0x88   : > { %10164 = vmatprep.subr.bf16.mxu1 %v11019_v18  ;;  %v11085_v18 = vld [vmem:[%s11650_s14 + $0x5c8] sm:$0xff]  }
  0x89   : > { %10137 = vmatpush3.bf16.msra.mxu0 %v11018_v17  ;;  %v11084_v17 = vld [vmem:[%s11650_s14 + $0x508] sm:$0xff]  }
  0x8a   : > { %10138 = vmatprep.subr.bf16.mxu0 %v11021_v20  ;;  %v11088_v20 = vld [vmem:[%s11650_s14 + $0x588] sm:$0xff]  }
  0x8b   : > { %10165 = vmatpush3.bf16.msra.mxu1 %v11020_v19  ;;  %v11086_v19 = vld [vmem:[%s14887_s1 + $0x11c] ss:$108 sps:$4 sm:$0xff]  }
  0x8c   : > { %10166 = vmatprep.subr.bf16.mxu1 %v11023_v23  ;;  %v11091_v23 = vld [vmem:[%s14887_s1 + $0x124] ss:$108 sps:$4 sm:$0xff]  }
  0x8d   : > { %10139 = vmatpush3.bf16.msra.mxu0 %v11022_v22  ;;  %v11090_v22 = vld [vmem:[%s11650_s14 + $0x550] sm:$0xff]  }
  0x8e   : > { %10140 = vmatprep.subr.bf16.mxu0 %v11025_v25  ;;  %v11094_v25 = vld [vmem:[%s14887_s1 + $0x120] ss:$108 sps:$4 sm:$0xff]  }
  0x8f   : > { %10167 = vmatpush3.bf16.msra.mxu1 %v11024_v24  ;;  %v11093_v24 = vld [vmem:[%s11650_s14 + $0x510] sm:$0xff]  }
  0x90   : > { %10168 = vmatprep.subr.bf16.mxu1 %v11027_v27  ;;  %v11096_v27 = vld [vmem:[%s11650_s14 + $0x590] sm:$0xff]  }
  0x91   : > { %10141 = vmatpush3.bf16.msra.mxu0 %v11026_v26  ;;  %v11095_v26 = vld [vmem:[%s11650_s14 + $0x5d0] sm:$0xff]  }
  0x92   : > { %10182 = vmatprep.subr.bf16.mxu0 %v11032_v31  ;;  %v11100_v31 = vld [vmem:[%s11650_s14 + $0x598] sm:$0xff]  }
  0x93   : > { %10169 = vmatpush3.bf16.msra.mxu1 %v11031_v30  ;;  %v11099_v30 = vld [vmem:[%s11650_s14 + $0x5d8] sm:$0xff]  }
  0x94   : > { %2714 = vmatmul.mubr.bf16.vlgmr.msra.gmra.mrb[24].mxu0 %v11028_v28  ;;  %10210 = vmatprep.subr.bf16.mxu1 %v11037_v35  ;;  %v11097_v28 = vld [vmem:[%s11650_s14 + $0x558] sm:$0xff]   ;;  %v11104_v35 = vld [vmem:[%s11650_s14 + $0x5a0] sm:$0xff]  }
  0x95   : > { %10183 = vmatpush3.bf16.msra.mxu0 %v11036_v34  ;;  %2721 = vmatprep.mubr.bf16.mxu0 %v11042_v40  ;;  %v11103_v34 = vld [vmem:[%s11650_s14 + $0x5e0] sm:$0xff]   ;;  %v11109_v40 = vld [vmem:[%s11650_s14 + $0x570] sm:$0xff]  }
  0x96   : > { %2763 = vmatmul.mubr.bf16.vlgmr.msra.gmra.mrb[24].mxu1 %v11033_v32  ;;  %10184 = vmatprep.subr.bf16.mxu0 %v11039_v37  ;;  %v11101_v32 = vld [vmem:[%s11650_s14 + $0x560] sm:$0xff]   ;;  %v11106_v37 = vld [vmem:[%s11650_s14 + $0x528] sm:$0xff]  }
  0x97   : > { %10211 = vmatpush3.bf16.msra.mxu1 %v11038_v36  ;;  %2770 = vmatprep.mubr.bf16.mxu1 %v11047_v44  ;;  %v11105_v36 = vld [vmem:[%s11650_s14 + $0x568] sm:$0xff]   ;;  %v11113_v44 = vld [vmem:[%s11650_s14 + $0x578] sm:$0xff]  }
  0x98   : > { %10212 = vmatprep.subr.bf16.mxu1 %v11041_v39  ;;  %v11108_v39 = vld [vmem:[%s11650_s14 + $0x5a8] sm:$0xff]  }
  0x99   : > { %10185 = vmatpush3.bf16.msra.mxu0 %v11040_v38  ;;  %v11107_v38 = vld [vmem:[%s11650_s14 + $0x5e8] sm:$0xff]  }
  0x9a   : > { %10186 = vmatprep.subr.bf16.mxu0 %v11046_v43  ;;  %v11112_v43 = vld [vmem:[%s11650_s14 + $0x5b0] sm:$0xff]  }
  0x9b   : > { %10213 = vmatpush3.bf16.msra.mxu1 %v11044_v41  ;;  %v11110_v41 = vld [vmem:[%s11650_s14 + $0x530] sm:$0xff]  }
  0x9c   : > { %2722 = vmatmul.mubr.bf16.gmra.mrb[28].mxu0 %v11045_v42  ;;  %10214 = vmatprep.subr.bf16.mxu1 %v11051_v47  ;;  %v11111_v42 = vld [vmem:[%s11650_s14 + $0x5f0] sm:$0xff]  }
  0x9d   : > { %10187 = vmatpush3.bf16.msra.mxu0 %v11049_v45  ;;  %2811 = vmatprep.mubr.bf16.mxu0 %v11074_v8  ;;  %v11114_v45 = vld [vmem:[%s11650_s14 + $0x538] sm:$0xff]   ;;  %v11144_v8 = vld [vmem:[%s11650_s14 + $0x6a0] sm:$0xff]  }
  0x9e   : > { %2771 = vmatmul.mubr.bf16.gmra.mrb[28].mxu1 %v11050_v46  ;;  %10188 = vmatprep.subr.bf16.mxu0 %v11053_v50  ;;  %v11115_v46 = vld [vmem:[%s11650_s14 + $0x5f8] sm:$0xff]   ;;  %v11120_v50 = vld [vmem:[%s11650_s14 + $0x640] sm:$0xff]  }
  0x9f   : > { %10215 = vmatpush3.bf16.msra.mxu1 %v11052_v49  ;;  %2860 = vmatprep.mubr.bf16.mxu1 %v11079_v12  ;;  %v11116_v47 = vld [vmem:[%s14887_s1 + $0x50] ss:$108 sps:$4 sm:$0xff]  }
  0xa0   : > { %10216 = vmatprep.subr.bf16.mxu1 %v11055_v52  ;;  %v11119_v49 = vld [vmem:[%s11650_s14 + $0x5b8] sm:$0xff]   ;;  %v11148_v12 = vld [vmem:[%s11650_s14 + $0x630] sm:$0xff]  }
  0xa1   : > { %10189 = vmatpush3.bf16.msra.mxu0 %v11054_v51  ;;  %v11121_v51 = vld [vmem:[%s14887_s1 + $0x58] ss:$108 sps:$4 sm:$0xff]   ;;  %v11123_v52 = vld [vmem:[%s14887_s1 + $0x5c] ss:$108 sps:$4 sm:$0xff]  }
  0xa2   : > { %10190 = vmatprep.subr.bf16.mxu0 %v11057_v55  ;;  %v11126_v55 = vld [vmem:[%s11650_s14 + $0x680] sm:$0xff]  }
  0xa3   : > { %10217 = vmatpush3.bf16.msra.mxu1 %v11056_v54  ;;  %v11125_v54 = vld [vmem:[%s11650_s14 + $0x648] sm:$0xff]  }
  0xa4   : > { %10218 = vmatprep.subr.bf16.mxu1 %v11059_v57  ;;  %v11128_v57 = vld [vmem:[%s14887_s1 + $0x12c] ss:$108 sps:$4 sm:$0xff]  }
  0xa5   : > { %10191 = vmatpush3.bf16.msra.mxu0 %v11058_v56  ;;  %v11127_v56 = vld [vmem:[%s11650_s14 + $0x608] sm:$0xff]  }
  0xa6   : > { %10192 = vmatprep.subr.bf16.mxu0 %v11061_v59  ;;  %v11131_v59 = vld [vmem:[%s11650_s14 + $0x650] sm:$0xff]  }
  0xa7   : > { %10219 = vmatpush3.bf16.msra.mxu1 %v11060_v58  ;;  %v11130_v58 = vld [vmem:[%s14887_s1 + $0x128] ss:$108 sps:$4 sm:$0xff]  }
  0xa8   : > { %10220 = vmatprep.subr.bf16.mxu1 %v11063_v61  ;;  %v11133_v61 = vld [vmem:[%s14887_s1 + $0x134] ss:$108 sps:$4 sm:$0xff]  }
  0xa9   : > { %10193 = vmatpush3.bf16.msra.mxu0 %v11062_v60  ;;  %v11132_v60 = vld [vmem:[%s11650_s14 + $0x688] sm:$0xff]  }
  0xaa   : > { %10194 = vmatprep.subr.bf16.mxu0 %v11065_v63  ;;  %v11136_v63 = vld [vmem:[%s14887_s1 + $0x130] ss:$108 sps:$4 sm:$0xff]  }
  0xab   : > { %10221 = vmatpush3.bf16.msra.mxu1 %v11064_v62  ;;  %v11135_v62 = vld [vmem:[%s11650_s14 + $0x610] sm:$0xff]  }
  0xac   : > { %10222 = vmatprep.subr.bf16.mxu1 %v11067_v1  ;;  %v11138_v1 = vld [vmem:[%s11650_s14 + $0x690] sm:$0xff]  }
  0xad   : > { %10195 = vmatpush3.bf16.msra.mxu0 %v11066_v0  ;;  %v11137_v0 = vld [vmem:[%s11650_s14 + $0x658] sm:$0xff]  }
  0xae   : > { %10196 = vmatprep.subr.bf16.mxu0 %v11069_v4  ;;  %v11140_v4 = vld [vmem:[%s11650_s14 + $0x660] sm:$0xff]  }
  0xaf   : > { %10223 = vmatpush3.bf16.msra.mxu1 %v11068_v3  ;;  %v11139_v3 = vld [vmem:[%s11650_s14 + $0x618] sm:$0xff]  }
  0xb0   : > { %10224 = vmatprep.subr.bf16.mxu1 %v11071_v6  ;;  %v11142_v6 = vld [vmem:[%s11650_s14 + $0x620] sm:$0xff]  }
  0xb1   : > { %10197 = vmatpush3.bf16.msra.mxu0 %v11070_v5  ;;  %v11141_v5 = vld [vmem:[%s11650_s14 + $0x698] sm:$0xff]  }
  0xb2   : > { %10238 = vmatprep.subr.bf16.mxu0 %v11076_v10  ;;  %v11146_v10 = vld [vmem:[%s11650_s14 + $0x670] sm:$0xff]  }
  0xb3   : > { %10225 = vmatpush3.bf16.msra.mxu1 %v11075_v9  ;;  %v11145_v9 = vld [vmem:[%s11650_s14 + $0x628] sm:$0xff]  }
  0xb4   : > { %2812 = vmatmul.mubr.bf16.vlgmr.msra.gmra.mrb[32].mxu0 %v11072_v7  ;;  %10266 = vmatprep.subr.bf16.mxu1 %v11081_v14  ;;  %v11143_v7 = vld [vmem:[%s11650_s14 + $0x668] sm:$0xff]   ;;  %v11150_v14 = vld [vmem:[%s11650_s14 + $0x6b0] sm:$0xff]  }
  0xb5   : > { %10239 = vmatpush3.bf16.msra.mxu0 %v11080_v13  ;;  %2819 = vmatprep.mubr.bf16.mxu0 %v11086_v19  ;;  %v11149_v13 = vld [vmem:[%s11650_s14 + $0x678] sm:$0xff]  }
  0xb6   : > { %2861 = vmatmul.mubr.bf16.vlgmr.msra.gmra.mrb[32].mxu1 %v11077_v11  ;;  %10240 = vmatprep.subr.bf16.mxu0 %v11083_v16  ;;  %v11147_v11 = vld [vmem:[%s11650_s14 + $0x6a8] sm:$0xff]   ;;  %v11154_v16 = vld [vmem:[%s14887_s1 + $0x64] ss:$108 sps:$4 sm:$0xff]  }
  0xb7   : > { %10267 = vmatpush3.bf16.msra.mxu1 %v11082_v15  ;;  %2868 = vmatprep.mubr.bf16.mxu1 %v11091_v23  ;;  %v11151_v15 = vld [vmem:[%s11650_s14 + $0x638] sm:$0xff]  }
  0xb8   : > { %10268 = vmatprep.subr.bf16.mxu1 %v11085_v18  ;;  %v11156_v18 = vld [vmem:[%s14887_s1 + $0x68] ss:$108 sps:$4 sm:$0xff]  }
  0xb9   : > { %10241 = vmatpush3.bf16.msra.mxu0 %v11084_v17  ;;  %v11155_v17 = vld [vmem:[%s11650_s14 + $0x6b8] sm:$0xff]   ;;  %s10814_s14 = smul.u32 100, %s15102_s28 }
  0xba   : > { %10242 = vmatprep.subr.bf16.mxu0 %v11090_v22 }
  0xbb   : > { %10269 = vmatpush3.bf16.msra.mxu1 %v11088_v20  ;;  %v11152_v20 = vld [vmem:[%s14887_s1 + $0x60] ss:$108 sps:$4 sm:$0xff]   ;;  %s14818_s28 = scalar_lea.vmem %s14894_s8, %s10814_s14 }
  0xbc   : > { %2820 = vmatmul.mubr.bf16.gmra.mrb[36].mxu0 %v11089_v21  ;;  %10270 = vmatprep.subr.bf16.mxu1 %v11095_v26  ;;  %v11158_v21 = vld [vmem:[%s14887_s1 + $0x13c] ss:$108 sps:$4 sm:$0xff]   ;;  %v11157_v26 = vld [vmem:[%s14887_s1 + $0x140] ss:$108 sps:$4 sm:$0xff]  }
  0xbd   : > { %10243 = vmatpush3.bf16.msra.mxu0 %v11093_v24  ;;  %2909 = vmatprep.mubr.bf16.mxu0 %v11118_v48 }
  0xbe   : > { %2869 = vmatmul.mubr.bf16.gmra.mrb[36].mxu1 %v11094_v25  ;;  %10244 = vmatprep.subr.bf16.mxu0 %v11097_v28 }
  0xbf   : > { %10271 = vmatpush3.bf16.msra.mxu1 %v11096_v27  ;;  %2958 = vmatprep.mubr.bf16.mxu1 %v11123_v52 }
  0xc0   : > { %10272 = vmatprep.subr.bf16.mxu1 %v11099_v30 }
  0xc1   : > { %10245 = vmatpush3.bf16.msra.mxu0 %v11098_v29 }
  0xc2   : > { %10246 = vmatprep.subr.bf16.mxu0 %v11101_v32 }
  0xc3   : > { %10273 = vmatpush3.bf16.msra.mxu1 %v11100_v31 }
  0xc4   : > { %10274 = vmatprep.subr.bf16.mxu1 %v11103_v34  ;;  %v11160_v34 = vld [vmem:[%s14887_s1 + $0x138] ss:$108 sps:$4 sm:$0xff]  }
  0xc5   : > { %10247 = vmatpush3.bf16.msra.mxu0 %v11102_v33 }
  0xc6   : > { %10248 = vmatprep.subr.bf16.mxu0 %v11105_v36 }
  0xc7   : > { %10275 = vmatpush3.bf16.msra.mxu1 %v11104_v35 }
  0xc8   : > { %10276 = vmatprep.subr.bf16.mxu1 %v11107_v38 }
  0xc9   : > { %10249 = vmatpush3.bf16.msra.mxu0 %v11106_v37 }
  0xca   : > { %10250 = vmatprep.subr.bf16.mxu0 %v11109_v40 }
  0xcb   : > { %10277 = vmatpush3.bf16.msra.mxu1 %v11108_v39 }
  0xcc   : > { %10278 = vmatprep.subr.bf16.mxu1 %v11111_v42 }
  0xcd   : > { %10251 = vmatpush3.bf16.msra.mxu0 %v11110_v41 }
  0xce   : > { %10252 = vmatprep.subr.bf16.mxu0 %v11113_v44 }
  0xcf   : > { %10279 = vmatpush3.bf16.msra.mxu1 %v11112_v43 }
  0xd0   : > { %10280 = vmatprep.subr.bf16.mxu1 %v11115_v46 }
  0xd1   : > { %10253 = vmatpush3.bf16.msra.mxu0 %v11114_v45 }
  0xd2   : > { %10294 = vmatprep.subr.bf16.mxu0 %v11120_v50 }
  0xd3   : > { %10281 = vmatpush3.bf16.msra.mxu1 %v11119_v49 }
  0xd4   : > { %2910 = vmatmul.mubr.bf16.vlgmr.msra.gmra.mrb[40].mxu0 %v11116_v47  ;;  %10485 = vmatprep.subr.bf16.mxu1 %v11126_v55 }
  0xd5   : > { %10295 = vmatpush3.bf16.msra.mxu0 %v11124_v53  ;;  %2917 = vmatprep.mubr.bf16.mxu0 %v11128_v57 }
  0xd6   : > { %2959 = vmatmul.mubr.bf16.vlgmr.msra.gmra.mrb[40].mxu1 %v11121_v51  ;;  %10296 = vmatprep.subr.bf16.mxu0 %v11125_v54 }
  0xd7   : > { %10486 = vmatpush3.bf16.msra.mxu1 %v11126_v55  ;;  %2966 = vmatprep.mubr.bf16.mxu1 %v11133_v61  ;;  %v802_v36 = vpop.permute.xlu0 %801 }
  0xd8   : > { %10487 = vmatprep.subr.bf16.mxu1 %v11132_v60 }
  0xd9   : > { %10297 = vmatpush3.bf16.msra.mxu0 %v11127_v56 }
  0xda   : > { %10298 = vmatprep.subr.bf16.mxu0 %v11131_v59 }
  0xdb   : > { %10488 = vmatpush3.bf16.msra.mxu1 %v11132_v60 }
  0xdc   : > { %2918 = vmatmul.mubr.bf16.gmra.mrb[44].mxu0 %v11130_v58  ;;  %10489 = vmatprep.subr.bf16.mxu1 %v11138_v1 }
  0xdd   : > { %10299 = vmatpush3.bf16.msra.mxu0 %v11135_v62  ;;  %3007 = vmatprep.mubr.bf16.mxu0 %v11154_v16 }
  0xde   : > { %2967 = vmatmul.mubr.bf16.gmra.mrb[44].mxu1 %v11136_v63  ;;  %10300 = vmatprep.subr.bf16.mxu0 %v11137_v0 }
  0xdf   : > { %10490 = vmatpush3.bf16.msra.mxu1 %v11138_v1  ;;  %10501 = vmatprep.mubr.bf16.mxu1 %v11156_v18  ;;  %v807_v48 = vpop.permute.xlu0 %806 }
  0xe0   : > { %10491 = vmatprep.subr.bf16.mxu1 %v11141_v5 }
  0xe1   : > { %10301 = vmatpush3.bf16.msra.mxu0 %v11139_v3 }
  0xe2   : > { %10302 = vmatprep.subr.bf16.mxu0 %v11140_v4 }
  0xe3   : > { %10492 = vmatpush3.bf16.msra.mxu1 %v11141_v5 }
  0xe4   : > { %10493 = vmatprep.subr.bf16.mxu1 %v11144_v8 }
  0xe5   : > { %10303 = vmatpush3.bf16.msra.mxu0 %v11142_v6 }
  0xe6   : > { %10304 = vmatprep.subr.bf16.mxu0 %v11143_v7 }
  0xe7   : > { %10494 = vmatpush3.bf16.msra.mxu1 %v11144_v8 }
  0xe8   : > { %10495 = vmatprep.subr.bf16.mxu1 %v11147_v11 }
  0xe9   : > { %10305 = vmatpush3.bf16.msra.mxu0 %v11145_v9 }
  0xea   : > { %10306 = vmatprep.subr.bf16.mxu0 %v11146_v10 }
  0xeb   : > { %10496 = vmatpush3.bf16.msra.mxu1 %v11147_v11 }
  0xec   : > { %10497 = vmatprep.subr.bf16.mxu1 %v11150_v14 }
  0xed   : > { %10307 = vmatpush3.bf16.msra.mxu0 %v11148_v12 }
  0xee   : > { %10308 = vmatprep.subr.bf16.mxu0 %v11149_v13 }
  0xef   : > { %10498 = vmatpush3.bf16.msra.mxu1 %v11150_v14 }
  0xf0   : > { %10499 = vmatprep.subr.bf16.mxu1 %v11155_v17  ;;  %v812_v0 = vpop.permute.xlu1 %811 }
  0xf1   : > { %10309 = vmatpush3.bf16.msra.mxu0 %v11151_v15 }
  0xf3   : > { %10500 = vmatpush3.bf16.msra.mxu1 %v11155_v17 }
  0xf4   : > { %3008 = vmatmul.mubr.bf16.vlgmr.msra.gmra.mrb[48].mxu0 %v11152_v20 }
  0xf5   : > { %3015 = vmatprep.mubr.bf16.mxu0 %v11158_v21 }
  0xf6   : > { %10502 = vmatmul.mubr.bf16.vlgmr.msra.gmra.mrb[48].mxu1 %v11157_v26 }
  0xf7   : > { %v817_v9 = vpop.permute.xlu1 %816 }
  0xfc   : > { %3016 = vmatmul.mubr.bf16.gmra.mrb[52].mxu0 %v11160_v34 }
 0x107   : > { %v9974_v19 = vpop.f32.mrb[0].mxu0 }
 0x108   : > { %v9975_v22 = vpop.f32.mrb[1].mxu0 }
 0x109   : > { %v9976_v23 = vadd.f32 %v9975_v22, %v9974_v19  ;;  %v9977_v24 = vpop.f32.mrb[2].mxu0  ;;  %v10002_v25 = vpop.f32.mrb[0].mxu1 }
 0x10a   : > { %v9978_v27 = vpop.f32.mrb[3].mxu0  ;;  %v10003_v28 = vpop.f32.mrb[1].mxu1 }
 0x10b   : > { %v10004_v29 = vadd.f32 %v10003_v28, %v10002_v25  ;;  %v10005_v30 = vpop.f32.mrb[2].mxu1  ;;  %v9979_v31 = vadd.f32 %v9978_v27, %v9977_v24  ;;  %v2422_v38 = vadd.f32 %v9976_v23, %v802_v36 }
 0x10c   : > { %v10006_v32 = vpop.f32.mrb[3].mxu1 }
 0x10d   : > { %v10007_v33 = vadd.f32 %v10006_v32, %v10005_v30  ;;  %v2471_v44 = vadd.f32 %v10004_v29, %v2422_v38  ;;  %v2425_v50 = vadd.f32 %v9979_v31, %v807_v48 }
 0x10f   : > { %v9980_v35 = vpop.f32.mrb[4].mxu0  ;;  %v2474_v52 = vadd.f32 %v10007_v33, %v2425_v50 }
 0x110   : > { %v9981_v37 = vpop.f32.mrb[5].mxu0 }
 0x111   : > { %v9982_v39 = vadd.f32 %v9981_v37, %v9980_v35  ;;  %v9983_v40 = vpop.f32.mrb[6].mxu0  ;;  %v10008_v41 = vpop.f32.mrb[4].mxu1 }
 0x112   : > { %v9984_v42 = vpop.f32.mrb[7].mxu0  ;;  %v10009_v43 = vpop.f32.mrb[5].mxu1 }
 0x113   : > { %v10010_v45 = vadd.f32 %v10009_v43, %v10008_v41  ;;  %v10011_v46 = vpop.f32.mrb[6].mxu1  ;;  %v9985_v47 = vadd.f32 %v9984_v42, %v9983_v40  ;;  %v2430_v3 = vadd.f32 %v9982_v39, %v812_v0 }
 0x114   : > { %v10012_v49 = vpop.f32.mrb[7].mxu1 }
 0x115   : > { %v10013_v51 = vadd.f32 %v10012_v49, %v10011_v46  ;;  %v2479_v7 = vadd.f32 %v10010_v45, %v2430_v3  ;;  %v2433_v10 = vadd.f32 %v9985_v47, %v817_v9 }
 0x117   : > { %v2482_v13 = vadd.f32 %v10013_v51, %v2433_v10 }
 0x127   : > { %v10030_v53 = vpop.f32.mrb[8].mxu0 }
 0x128   : > { %v10031_v54 = vpop.f32.mrb[9].mxu0 }
 0x129   : > { %v10032_v55 = vadd.f32 %v10031_v54, %v10030_v53  ;;  %v10033_v56 = vpop.f32.mrb[10].mxu0  ;;  %v10058_v57 = vpop.f32.mrb[8].mxu1 }
 0x12a   : > { %v10034_v58 = vpop.f32.mrb[11].mxu0  ;;  %v10059_v59 = vpop.f32.mrb[9].mxu1 }
 0x12b   : > { %v2520_v60 = vadd.f32 %v10032_v55, %v2471_v44  ;;  %v10035_v61 = vadd.f32 %v10034_v58, %v10033_v56  ;;  %v10060_v62 = vadd.f32 %v10059_v59, %v10058_v57  ;;  %v10061_v63 = vpop.f32.mrb[10].mxu1 }
 0x12c   : > { %v10062_v1 = vpop.f32.mrb[11].mxu1 }
 0x12d   : > { %v2523_v4 = vadd.f32 %v10035_v61, %v2474_v52  ;;  %v2569_v5 = vadd.f32 %v10060_v62, %v2520_v60  ;;  %v10063_v6 = vadd.f32 %v10062_v1, %v10061_v63 }
 0x12f   : > { %v2572_v8 = vadd.f32 %v10063_v6, %v2523_v4  ;;  %v10036_v11 = vpop.f32.mrb[12].mxu0 }
 0x130   : > { %v10037_v12 = vpop.f32.mrb[13].mxu0 }
 0x131   : > { %v10038_v14 = vadd.f32 %v10037_v12, %v10036_v11  ;;  %v10039_v15 = vpop.f32.mrb[14].mxu0  ;;  %v10064_v16 = vpop.f32.mrb[12].mxu1 }
 0x132   : > { %v10040_v17 = vpop.f32.mrb[15].mxu0  ;;  %v10065_v20 = vpop.f32.mrb[13].mxu1 }
 0x133   : > { %v2528_v18 = vadd.f32 %v10038_v14, %v2479_v7  ;;  %v10041_v19 = vadd.f32 %v10040_v17, %v10039_v15  ;;  %v10066_v21 = vadd.f32 %v10065_v20, %v10064_v16  ;;  %v10067_v22 = vpop.f32.mrb[14].mxu1 }
 0x134   : > { %v10068_v24 = vpop.f32.mrb[15].mxu1 }
 0x135   : > { %v2531_v23 = vadd.f32 %v10041_v19, %v2482_v13  ;;  %v2577_v25 = vadd.f32 %v10066_v21, %v2528_v18  ;;  %v10069_v26 = vadd.f32 %v10068_v24, %v10067_v22 }
 0x137   : > { %v2580_v27 = vadd.f32 %v10069_v26, %v2531_v23 }
 0x147   : > { %v10086_v28 = vpop.f32.mrb[16].mxu0 }
 0x148   : > { %v10087_v29 = vpop.f32.mrb[17].mxu0 }
 0x149   : > { %v10088_v30 = vadd.f32 %v10087_v29, %v10086_v28  ;;  %v10089_v31 = vpop.f32.mrb[18].mxu0  ;;  %v10114_v34 = vpop.f32.mrb[16].mxu1 }
 0x14a   : > { %v10090_v32 = vpop.f32.mrb[19].mxu0  ;;  %v10115_v36 = vpop.f32.mrb[17].mxu1 }
 0x14b   : > { %v2618_v33 = vadd.f32 %v10088_v30, %v2569_v5  ;;  %v10091_v35 = vadd.f32 %v10090_v32, %v10089_v31  ;;  %v10116_v38 = vadd.f32 %v10115_v36, %v10114_v34  ;;  %v10117_v39 = vpop.f32.mrb[18].mxu1 }
 0x14c   : > { %v10118_v40 = vpop.f32.mrb[19].mxu1 }
 0x14d   : > { %v2621_v37 = vadd.f32 %v10091_v35, %v2572_v8  ;;  %v2667_v41 = vadd.f32 %v10116_v38, %v2618_v33  ;;  %v10119_v42 = vadd.f32 %v10118_v40, %v10117_v39 }
 0x14f   : > { %v2670_v43 = vadd.f32 %v10119_v42, %v2621_v37  ;;  %v10092_v44 = vpop.f32.mrb[20].mxu0 }
 0x150   : > { %v10093_v45 = vpop.f32.mrb[21].mxu0 }
 0x151   : > { %v10094_v46 = vadd.f32 %v10093_v45, %v10092_v44  ;;  %v10095_v47 = vpop.f32.mrb[22].mxu0  ;;  %v10120_v48 = vpop.f32.mrb[20].mxu1 }
 0x152   : > { %v10096_v49 = vpop.f32.mrb[23].mxu0  ;;  %v10121_v52 = vpop.f32.mrb[21].mxu1 }
 0x153   : > { %v2626_v50 = vadd.f32 %v10094_v46, %v2577_v25  ;;  %v10097_v51 = vadd.f32 %v10096_v49, %v10095_v47  ;;  %v10122_v53 = vadd.f32 %v10121_v52, %v10120_v48  ;;  %v10123_v54 = vpop.f32.mrb[22].mxu1 }
 0x154   : > { %v10124_v56 = vpop.f32.mrb[23].mxu1 }
 0x155   : > { %v2629_v55 = vadd.f32 %v10097_v51, %v2580_v27  ;;  %v2675_v57 = vadd.f32 %v10122_v53, %v2626_v50  ;;  %v10125_v58 = vadd.f32 %v10124_v56, %v10123_v54 }
 0x157   : > { %v2678_v59 = vadd.f32 %v10125_v58, %v2629_v55 }
 0x167   : > { %v10142_v60 = vpop.f32.mrb[24].mxu0 }
 0x168   : > { %v10143_v61 = vpop.f32.mrb[25].mxu0 }
 0x169   : > { %v10144_v62 = vadd.f32 %v10143_v61, %v10142_v60  ;;  %v10145_v63 = vpop.f32.mrb[26].mxu0  ;;  %v10170_v3 = vpop.f32.mrb[24].mxu1 }
 0x16a   : > { %v10146_v0 = vpop.f32.mrb[27].mxu0  ;;  %v10171_v5 = vpop.f32.mrb[25].mxu1 }
 0x16b   : > { %v2716_v1 = vadd.f32 %v10144_v62, %v2667_v41  ;;  %v10147_v4 = vadd.f32 %v10146_v0, %v10145_v63  ;;  %v10172_v7 = vadd.f32 %v10171_v5, %v10170_v3  ;;  %v10173_v8 = vpop.f32.mrb[26].mxu1 }
 0x16c   : > { %v10174_v9 = vpop.f32.mrb[27].mxu1 }
 0x16d   : > { %v2719_v6 = vadd.f32 %v10147_v4, %v2670_v43  ;;  %v2765_v10 = vadd.f32 %v10172_v7, %v2716_v1  ;;  %v10175_v11 = vadd.f32 %v10174_v9, %v10173_v8 }
 0x16f   : > { %v2768_v12 = vadd.f32 %v10175_v11, %v2719_v6  ;;  %v10148_v13 = vpop.f32.mrb[28].mxu0 }
 0x170   : > { %v10149_v14 = vpop.f32.mrb[29].mxu0 }
 0x171   : > { %v10150_v15 = vadd.f32 %v10149_v14, %v10148_v13  ;;  %v10151_v16 = vpop.f32.mrb[30].mxu0  ;;  %v10176_v17 = vpop.f32.mrb[28].mxu1 }
 0x172   : > { %v10152_v18 = vpop.f32.mrb[31].mxu0  ;;  %v10177_v21 = vpop.f32.mrb[29].mxu1 }
 0x173   : > { %v2724_v19 = vadd.f32 %v10150_v15, %v2675_v57  ;;  %v10153_v20 = vadd.f32 %v10152_v18, %v10151_v16  ;;  %v10178_v22 = vadd.f32 %v10177_v21, %v10176_v17  ;;  %v10179_v23 = vpop.f32.mrb[30].mxu1 }
 0x174   : > { %v10180_v25 = vpop.f32.mrb[31].mxu1 }
 0x175   : > { %v2727_v24 = vadd.f32 %v10153_v20, %v2678_v59  ;;  %v2773_v26 = vadd.f32 %v10178_v22, %v2724_v19  ;;  %v10181_v27 = vadd.f32 %v10180_v25, %v10179_v23 }
 0x177   : > { %v2776_v28 = vadd.f32 %v10181_v27, %v2727_v24 }
 0x187   : > { %v10198_v29 = vpop.f32.mrb[32].mxu0 }
 0x188   : > { %v10199_v30 = vpop.f32.mrb[33].mxu0 }
 0x189   : > { %v10200_v31 = vadd.f32 %v10199_v30, %v10198_v29  ;;  %v10201_v32 = vpop.f32.mrb[34].mxu0  ;;  %v10226_v35 = vpop.f32.mrb[32].mxu1 }
 0x18a   : > { %v10202_v33 = vpop.f32.mrb[35].mxu0  ;;  %v10227_v37 = vpop.f32.mrb[33].mxu1 }
 0x18b   : > { %v2814_v34 = vadd.f32 %v10200_v31, %v2765_v10  ;;  %v10203_v36 = vadd.f32 %v10202_v33, %v10201_v32  ;;  %v10228_v39 = vadd.f32 %v10227_v37, %v10226_v35  ;;  %v10229_v40 = vpop.f32.mrb[34].mxu1 }
 0x18c   : > { %v10230_v41 = vpop.f32.mrb[35].mxu1 }
 0x18d   : > { %v2817_v38 = vadd.f32 %v10203_v36, %v2768_v12  ;;  %v2863_v42 = vadd.f32 %v10228_v39, %v2814_v34  ;;  %v10231_v43 = vadd.f32 %v10230_v41, %v10229_v40 }
 0x18f   : > { %v2866_v44 = vadd.f32 %v10231_v43, %v2817_v38  ;;  %v10204_v45 = vpop.f32.mrb[36].mxu0 }
 0x190   : > { %v10205_v46 = vpop.f32.mrb[37].mxu0 }
 0x191   : > { %v10206_v47 = vadd.f32 %v10205_v46, %v10204_v45  ;;  %v10207_v48 = vpop.f32.mrb[38].mxu0  ;;  %v10232_v49 = vpop.f32.mrb[36].mxu1 }
 0x192   : > { %v10208_v50 = vpop.f32.mrb[39].mxu0  ;;  %v10233_v53 = vpop.f32.mrb[37].mxu1 }
 0x193   : > { %v2822_v51 = vadd.f32 %v10206_v47, %v2773_v26  ;;  %v10209_v52 = vadd.f32 %v10208_v50, %v10207_v48  ;;  %v10234_v54 = vadd.f32 %v10233_v53, %v10232_v49  ;;  %v10235_v55 = vpop.f32.mrb[38].mxu1 }
 0x194   : > { %v10236_v57 = vpop.f32.mrb[39].mxu1 }
 0x195   : > { %v2825_v56 = vadd.f32 %v10209_v52, %v2776_v28  ;;  %v2871_v58 = vadd.f32 %v10234_v54, %v2822_v51  ;;  %v10237_v59 = vadd.f32 %v10236_v57, %v10235_v55 }
 0x197   : > { %v2874_v60 = vadd.f32 %v10237_v59, %v2825_v56  ;;  %v11162_v59 = vld [vmem:[%s14889_s3 + $0x40] sm:$0xff]  }
 0x198   : > { %10553 = vmatprep.mubr.bf16.mxu1 %v11162_v59  ;;  %v11199_v59 = vld [vmem:[%s14889_s3 + $0x118] sm:$0xff]  }
 0x1a7   : > { %v10254_v61 = vpop.f32.mrb[40].mxu0 }
 0x1a8   : > { %v10255_v62 = vpop.f32.mrb[41].mxu0 }
 0x1a9   : > { %v10256_v63 = vadd.f32 %v10255_v62, %v10254_v61  ;;  %v10257_v0 = vpop.f32.mrb[42].mxu0  ;;  %v10282_v1 = vpop.f32.mrb[40].mxu1 }
 0x1aa   : > { %v10258_v3 = vpop.f32.mrb[43].mxu0  ;;  %v10283_v6 = vpop.f32.mrb[41].mxu1 }
 0x1ab   : > { %v2912_v4 = vadd.f32 %v10256_v63, %v2863_v42  ;;  %v10259_v5 = vadd.f32 %v10258_v3, %v10257_v0  ;;  %v10284_v7 = vadd.f32 %v10283_v6, %v10282_v1  ;;  %v10285_v8 = vpop.f32.mrb[42].mxu1 }
 0x1ac   : > { %v10286_v10 = vpop.f32.mrb[43].mxu1 }
 0x1ad   : > { %v2915_v9 = vadd.f32 %v10259_v5, %v2866_v44  ;;  %v2961_v11 = vadd.f32 %v10284_v7, %v2912_v4  ;;  %v10287_v12 = vadd.f32 %v10286_v10, %v10285_v8 }
 0x1af   : > { %v10260_v13 = vpop.f32.mrb[44].mxu0  ;;  %v2964_v14 = vadd.f32 %v10287_v12, %v2915_v9 }
 0x1b0   : > { %v10261_v15 = vpop.f32.mrb[45].mxu0 }
 0x1b1   : > { %v10262_v16 = vadd.f32 %v10261_v15, %v10260_v13  ;;  %v10263_v17 = vpop.f32.mrb[46].mxu0  ;;  %v10288_v20 = vpop.f32.mrb[44].mxu1 }
 0x1b2   : > { %v10264_v18 = vpop.f32.mrb[47].mxu0  ;;  %v10289_v22 = vpop.f32.mrb[45].mxu1 }
 0x1b3   : > { %v2920_v19 = vadd.f32 %v10262_v16, %v2871_v58  ;;  %v10265_v21 = vadd.f32 %v10264_v18, %v10263_v17  ;;  %v10290_v24 = vadd.f32 %v10289_v22, %v10288_v20  ;;  %v10291_v25 = vpop.f32.mrb[46].mxu1  ;;  %v11161_v58 = vld [vmem:[%s14889_s3] sm:$0xff]   ;;  %v11164_v22 = vld [vmem:[%s14889_s3 + $0x48] sm:$0xff]  }
 0x1b4   : > { %v10292_v26 = vpop.f32.mrb[47].mxu1  ;;  %10521 = vmatprep.mubr.bf16.mxu0 %v11161_v58  ;;  %v11198_v58 = vld [vmem:[%s14889_s3 + $0x150] sm:$0xff]  }
 0x1b5   : > { %v2923_v23 = vadd.f32 %v10265_v21, %v2874_v60  ;;  %v2969_v27 = vadd.f32 %v10290_v24, %v2920_v19  ;;  %v10293_v28 = vadd.f32 %v10292_v26, %v10291_v25  ;;  %v11163_v21 = vld [vmem:[%s14889_s3 + $0x8] sm:$0xff]   ;;  %v11166_v24 = vld [vmem:[%s14889_s3 + $0x50] sm:$0xff]   ;;  %v11167_v25 = vld [vmem:[%s14889_s3 + $0x18] sm:$0xff]  }
 0x1b6   : > { %v11168_v26 = vld [vmem:[%s14889_s3 + $0x58] sm:$0xff]  }
 0x1b7   : > { %v2972_v29 = vadd.f32 %v10293_v28, %v2923_v23  ;;  %v11165_v23 = vld [vmem:[%s14889_s3 + $0x10] sm:$0xff]   ;;  %v11170_v28 = vld [vmem:[%s14889_s3 + $0x60] sm:$0xff]  }
 0x1c7   : > { %v10310_v30 = vpop.f32.mrb[48].mxu0 }
 0x1c8   : > { %v10311_v31 = vpop.f32.mrb[49].mxu0 }
 0x1c9   : > { %v10312_v32 = vadd.f32 %v10311_v31, %v10310_v30  ;;  %v10313_v33 = vpop.f32.mrb[50].mxu0  ;;  %v10503_v36 = vpop.f32.mrb[48].mxu1  ;;  %v11172_v30 = vld [vmem:[%s14889_s3 + $0x68] sm:$0xff]   ;;  %v11173_v31 = vld [vmem:[%s14889_s3 + $0x30] sm:$0xff]  }
 0x1ca   : > { %v10314_v34 = vpop.f32.mrb[51].mxu0  ;;  %v3058_v38 = vpop.f32.mrb[49].mxu1 }
 0x1cb   : > { %v10315_v35 = vadd.f32 %v10314_v34, %v10313_v33  ;;  %v3010_v37 = vadd.f32 %v10312_v32, %v2961_v11  ;;  %v10504_v40 = vpop.f32.mrb[50].mxu1  ;;  %v11174_v32 = vld [vmem:[%s14889_s3 + $0x70] sm:$0xff]   ;;  %v11175_v33 = vld [vmem:[%s14889_s3 + $0x38] sm:$0xff]  }
 0x1cc   : > { %v3061_v42 = vpop.f32.mrb[51].mxu1  ;;  %v11176_v34 = vld [vmem:[%s14889_s3 + $0x78] sm:$0xff]  }
 0x1cd   : > { %v3059_v39 = vadd.f32 %v3058_v38, %v3010_v37  ;;  %v3013_v41 = vadd.f32 %v10315_v35, %v2964_v14  ;;  %v11177_v35 = vld [vmem:[%s14889_s3 + $0x80] sm:$0xff]   ;;  %v11179_v37 = vld [vmem:[%s14889_s3 + $0x88] sm:$0xff]  }
 0x1ce   : > { %v11180_v38 = vld [vmem:[%s14889_s3 + $0xc8] sm:$0xff]  }
 0x1cf   : > { %v3062_v43 = vadd.f32 %v3061_v42, %v3013_v41  ;;  %v10316_v44 = vpop.f32.mrb[52].mxu0  ;;  %v11183_v41 = vld [vmem:[%s14889_s3 + $0x98] sm:$0xff]  }
 0x1d0   : > { %v10317_v45 = vpop.f32.mrb[53].mxu0  ;;  %v11184_v42 = vld [vmem:[%s14889_s3 + $0xd8] sm:$0xff]  }
 0x1d1   : > { %v12038_v46 = vpack.c.bf16 %v3062_v43, %v3059_v39  ;;  %v10318_v47 = vadd.f32 %v10317_v45, %v10316_v44  ;;  %v10319_v48 = vpop.f32.mrb[54].mxu0  ;;  %v10835_v49 = vpack.i.bf16 %v3062_v43, %v3059_v39  ;;  %v11181_v39 = vld [vmem:[%s14889_s3 + $0x90] sm:$0xff]   ;;  %v11185_v43 = vld [vmem:[%s14889_s3 + $0xa0] sm:$0xff]   ;;  %v11187_v45 = vld [vmem:[%s14889_s3 + $0xa8] sm:$0xff]  }
 0x1d2   : > { %v10320_v50 = vpop.f32.mrb[55].mxu0  ;;  %v11186_v44 = vld [vmem:[%s14889_s3 + $0xe0] sm:$0xff]  }
 0x1d3   : > { %v3018_v51 = vadd.f32 %v10318_v47, %v2969_v27  ;;  %v10321_v52 = vadd.f32 %v10320_v50, %v10319_v48  ;;  %10836 = vrot.lane.b32.xlu0 %v10835_v49, %s11576_s11  ;;  %10505 = vmatprep.subr.bf16.mxu0 %v12038_v46  ;;  %v11169_v27 = vld [vmem:[%s14889_s3 + $0x20] sm:$0xff]   ;;  %v11188_v47 = vld [vmem:[%s14889_s3 + $0xe8] sm:$0xff]   ;;  %v11189_v48 = vld [vmem:[%s14889_s3 + $0xb0] sm:$0xff]  }
 0x1d4   : > { %10537 = vmatprep.subr.bf16.mxu1 %v12038_v46  ;;  %10506 = vmatpush3.bf16.msra.mxu0 %v12038_v46  ;;  %v11191_v50 = vld [vmem:[%s14889_s3 + $0xb8] sm:$0xff]  }
 0x1d5   : > { %v3067_v53 = vadd.f32 %v10503_v36, %v3018_v51  ;;  %v3021_v54 = vadd.f32 %v10321_v52, %v2972_v29  ;;  %10538 = vmatpush3.bf16.msra.mxu1 %v12038_v46  ;;  %v11171_v29 = vld [vmem:[%s14889_s3 + $0x28] sm:$0xff]   ;;  %v11178_v36 = vld [vmem:[%s14889_s3 + $0xc0] sm:$0xff]   ;;  %v11192_v51 = vld [vmem:[%s14889_s3 + $0xf8] sm:$0xff]  }
 0x1d6   : > { %v11193_v52 = vld [vmem:[%s14889_s3 + $0x100] sm:$0xff]  }
 0x1d7   : > { %v3070_v55 = vadd.f32 %v10504_v40, %v3021_v54  ;;  %10846 = vrot.lane.b32.xlu0 %v10835_v49, %s11577_s12  ;;  %v11182_v40 = vld [vmem:[%s14889_s3 + $0xd0] sm:$0xff]   ;;  %v11195_v54 = vld [vmem:[%s14889_s3 + $0x108] sm:$0xff]  }
 0x1d9   : > { %v12046_v56 = vpack.c.bf16 %v3070_v55, %v3067_v53  ;;  %v10840_v57 = vpack.i.bf16 %v3070_v55, %v3067_v53  ;;  %v11194_v53 = vld [vmem:[%s14889_s3 + $0x140] sm:$0xff]   ;;  %v11196_v55 = vld [vmem:[%s14889_s3 + $0x148] sm:$0xff]  }
 0x1db   : > { %10841 = vrot.lane.b32.xlu1 %v10840_v57, %s11576_s11  ;;  %10856 = vrot.lane.b32.xlu0 %v10835_v49, %s11578_s13  ;;  %v11190_v49 = vld [vmem:[%s14889_s3 + $0xf0] sm:$0xff]  }
 0x1dc   : > { %10507 = vmatprep.subr.bf16.mxu0 %v12046_v56  ;;  %10539 = vmatprep.subr.bf16.mxu1 %v12046_v56 }
 0x1dd   : > { %10508 = vmatpush3.bf16.msra.mxu0 %v12046_v56  ;;  %10540 = vmatpush3.bf16.msra.mxu1 %v12046_v56 }
 0x1df   : > { %10851 = vrot.lane.b32.xlu1 %v10840_v57, %s11577_s12 }
 0x1e3   : > { %10861 = vrot.lane.b32.xlu1 %v10840_v57, %s11578_s13  ;;  %v11197_v57 = vld [vmem:[%s14889_s3 + $0x110] sm:$0xff]  }
 0x245   : > { %v10837_v60 = vpop.permute.xlu0 %10836 }
 0x246   : > { %v10839_v61 = vunpack.i.h.bf16 %v10837_v60  ;;  %v10838_v62 = vunpack.i.l.bf16 %v10837_v60  ;;  %v11200_v60 = vld [vmem:[%s14889_s3 + $0x158] sm:$0xff]  }
 0x248   : > { %v12062_v63 = vpack.c.bf16 %v10839_v61, %v10838_v62  ;;  %v11201_v61 = vld [vmem:[%s14889_s3 + $0x120] sm:$0xff]  }
 0x249   : > { %v10847_v0 = vpop.permute.xlu0 %10846  ;;  %v11202_v62 = vld [vmem:[%s14889_s3 + $0x160] sm:$0xff]  }
 0x24a   : > { %10509 = vmatprep.subr.bf16.mxu0 %v12062_v63  ;;  %10541 = vmatprep.subr.bf16.mxu1 %v12062_v63  ;;  %v10849_v3 = vunpack.i.h.bf16 %v10847_v0  ;;  %v10848_v4 = vunpack.i.l.bf16 %v10847_v0  ;;  %v11203_v0 = vld [vmem:[%s14889_s3 + $0x128] sm:$0xff]  }
 0x24b   : > { %10510 = vmatpush3.bf16.msra.mxu0 %v12062_v63  ;;  %10542 = vmatpush3.bf16.msra.mxu1 %v12062_v63 }
 0x24c   : > { %v12070_v9 = vpack.c.bf16 %v10849_v3, %v10848_v4  ;;  %v11205_v3 = vld [vmem:[%s14889_s3 + $0x130] sm:$0xff]  }
 0x24d   : > { %v10842_v1 = vpop.permute.xlu1 %10841  ;;  %v10857_v12 = vpop.permute.xlu0 %10856  ;;  %v11206_v4 = vld [vmem:[%s14889_s3 + $0x170] sm:$0xff]  }
 0x24e   : > { %v10844_v5 = vunpack.i.h.bf16 %v10842_v1  ;;  %v10843_v6 = vunpack.i.l.bf16 %v10842_v1  ;;  %v10859_v13 = vunpack.i.h.bf16 %v10857_v12  ;;  %v10858_v14 = vunpack.i.l.bf16 %v10857_v12  ;;  %v11204_v1 = vld [vmem:[%s14889_s3 + $0x168] sm:$0xff]  }
 0x24f   : > { %v11212_v12 = vld [vmem:[%s14889_s3 + $0x1c8] sm:$0xff]  }
 0x250   : > { %v12068_v7 = vpack.c.bf16 %v10844_v5, %v10843_v6  ;;  %v12084_v17 = vpack.c.bf16 %v10859_v13, %v10858_v14  ;;  %v11207_v5 = vld [vmem:[%s14889_s3 + $0x138] sm:$0xff]   ;;  %v11213_v13 = vld [vmem:[%s14889_s3 + $0x1d0] sm:$0xff]  }
 0x251   : > { %v10852_v8 = vpop.permute.xlu1 %10851  ;;  %v11208_v6 = vld [vmem:[%s14889_s3 + $0x178] sm:$0xff]   ;;  %v11215_v14 = vld [vmem:[%s14889_s3 + $0x190] sm:$0xff]  }
 0x252   : > { %v10854_v10 = vunpack.i.h.bf16 %v10852_v8  ;;  %v10853_v11 = vunpack.i.l.bf16 %v10852_v8  ;;  %10511 = vmatprep.subr.bf16.mxu0 %v12068_v7  ;;  %10543 = vmatprep.subr.bf16.mxu1 %v12068_v7  ;;  %v11209_v8 = vld [vmem:[%s14889_s3 + $0x180] sm:$0xff]  }
 0x253   : > { %10512 = vmatpush3.bf16.msra.mxu0 %v12068_v7  ;;  %10544 = vmatpush3.bf16.msra.mxu1 %v12068_v7 }
 0x254   : > { %10513 = vmatprep.subr.bf16.mxu0 %v12070_v9  ;;  %10545 = vmatprep.subr.bf16.mxu1 %v12070_v9  ;;  %v12078_v15 = vpack.c.bf16 %v10854_v10, %v10853_v11  ;;  %v11210_v10 = vld [vmem:[%s14889_s3 + $0x1c0] sm:$0xff]   ;;  %v11211_v11 = vld [vmem:[%s14889_s3 + $0x188] sm:$0xff]  }
 0x255   : > { %v10862_v16 = vpop.permute.xlu1 %10861 }
 0x256   : > { %v10864_v18 = vunpack.i.h.bf16 %v10862_v16  ;;  %v10863_v19 = vunpack.i.l.bf16 %v10862_v16  ;;  %v11214_v16 = vld [vmem:[%s14889_s3 + $0x1d8] sm:$0xff]  }
 0x257   : > { %10514 = vmatpush3.bf16.msra.mxu0 %v12070_v9  ;;  %10546 = vmatpush3.bf16.msra.mxu1 %v12070_v9 }
 0x258   : > { %10515 = vmatprep.subr.bf16.mxu0 %v12078_v15  ;;  %10547 = vmatprep.subr.bf16.mxu1 %v12078_v15  ;;  %v12090_v20 = vpack.c.bf16 %v10864_v18, %v10863_v19  ;;  %v11216_v18 = vld [vmem:[%s14889_s3 + $0x198] sm:$0xff]   ;;  %v11217_v19 = vld [vmem:[%s14889_s3 + $0x1e0] sm:$0xff]  }
 0x25b   : > { %10516 = vmatpush3.bf16.msra.mxu0 %v12078_v15  ;;  %10548 = vmatpush3.bf16.msra.mxu1 %v12078_v15 }
 0x25c   : > { %10517 = vmatprep.subr.bf16.mxu0 %v12084_v17  ;;  %10549 = vmatprep.subr.bf16.mxu1 %v12084_v17 }
 0x25f   : > { %10518 = vmatpush3.bf16.msra.mxu0 %v12084_v17  ;;  %10550 = vmatpush3.bf16.msra.mxu1 %v12084_v17 }
 0x260   : > { %10519 = vmatprep.subr.bf16.mxu0 %v12090_v20  ;;  %10551 = vmatprep.subr.bf16.mxu1 %v12090_v20 }
 0x263   : > { %10520 = vmatpush3.bf16.msra.mxu0 %v12090_v20  ;;  %10552 = vmatpush3.bf16.msra.mxu1 %v12090_v20 }
 0x264   : > { %10569 = vmatprep.subr.bf16.mxu0 %v12038_v46  ;;  %10601 = vmatprep.subr.bf16.mxu1 %v12038_v46 }
 0x266   : > { %10522 = vmatmul.mubr.bf16.vlgmr.msra.gmra.mrb[56].mxu0 %v11163_v21  ;;  %10554 = vmatmul.mubr.bf16.vlgmr.msra.gmra.mrb[52].mxu1 %v11164_v22  ;;  %v11220_v21 = vld [vmem:[%s14889_s3 + $0x1a8] sm:$0xff]   ;;  %v11221_v22 = vld [vmem:[%s14889_s3 + $0x1b0] sm:$0xff]  }
 0x267   : > { %10570 = vmatpush3.bf16.msra.mxu0 %v12038_v46  ;;  %10602 = vmatpush3.bf16.msra.mxu1 %v12038_v46 }
 0x268   : > { %10571 = vmatprep.subr.bf16.mxu0 %v12046_v56  ;;  %10603 = vmatprep.subr.bf16.mxu1 %v12046_v56 }
 0x269   : > { %10525 = vmatprep.mubr.bf16.mxu0 %v11165_v23  ;;  %10557 = vmatprep.mubr.bf16.mxu1 %v11166_v24  ;;  %v11224_v23 = vld [vmem:[%s14889_s3 + $0x1f8] sm:$0xff]   ;;  %v11225_v24 = vld [vmem:[%s14889_s3 + $0x200] sm:$0xff]  }
 0x26b   : > { %10572 = vmatpush3.bf16.msra.mxu0 %v12046_v56  ;;  %10604 = vmatpush3.bf16.msra.mxu1 %v12046_v56 }
 0x26c   : > { %10573 = vmatprep.subr.bf16.mxu0 %v12062_v63  ;;  %10605 = vmatprep.subr.bf16.mxu1 %v12062_v63 }
 0x26e   : > { %10526 = vmatmul.mubr.bf16.gmra.mrb[60].mxu0 %v11167_v25  ;;  %10558 = vmatmul.mubr.bf16.gmra.mrb[56].mxu1 %v11168_v26  ;;  %v11228_v25 = vld [vmem:[%s14889_s3 + $0x218] sm:$0xff]   ;;  %v11231_v26 = vld [vmem:[%s14889_s3 + $0x230] sm:$0xff]  }
 0x26f   : > { %10574 = vmatpush3.bf16.msra.mxu0 %v12062_v63  ;;  %10606 = vmatpush3.bf16.msra.mxu1 %v12062_v63 }
 0x270   : > { %10575 = vmatprep.subr.bf16.mxu0 %v12068_v7  ;;  %10607 = vmatprep.subr.bf16.mxu1 %v12068_v7 }
 0x271   : > { %10529 = vmatprep.mubr.bf16.mxu0 %v11169_v27  ;;  %10561 = vmatprep.mubr.bf16.mxu1 %v11170_v28  ;;  %v11232_v27 = vld [vmem:[%s14889_s3 + $0x238] sm:$0xff]  }
 0x273   : > { %10576 = vmatpush3.bf16.msra.mxu0 %v12068_v7  ;;  %10608 = vmatpush3.bf16.msra.mxu1 %v12068_v7 }
 0x274   : > { %10577 = vmatprep.subr.bf16.mxu0 %v12070_v9  ;;  %10609 = vmatprep.subr.bf16.mxu1 %v12070_v9 }
 0x276   : > { %10530 = vmatmul.mubr.bf16.gmra.mrb[64].mxu0 %v11171_v29  ;;  %10562 = vmatmul.mubr.bf16.gmra.mrb[60].mxu1 %v11172_v30 }
 0x277   : > { %10578 = vmatpush3.bf16.msra.mxu0 %v12070_v9  ;;  %10610 = vmatpush3.bf16.msra.mxu1 %v12070_v9 }
 0x278   : > { %10579 = vmatprep.subr.bf16.mxu0 %v12078_v15  ;;  %10611 = vmatprep.subr.bf16.mxu1 %v12078_v15 }
 0x279   : > { %10533 = vmatprep.mubr.bf16.mxu0 %v11173_v31  ;;  %10565 = vmatprep.mubr.bf16.mxu1 %v11174_v32 }
 0x27b   : > { %10580 = vmatpush3.bf16.msra.mxu0 %v12078_v15  ;;  %10612 = vmatpush3.bf16.msra.mxu1 %v12078_v15 }
 0x27c   : > { %10581 = vmatprep.subr.bf16.mxu0 %v12084_v17  ;;  %10613 = vmatprep.subr.bf16.mxu1 %v12084_v17 }
 0x27e   : > { %10534 = vmatmul.mubr.bf16.gmra.mrb[68].mxu0 %v11175_v33  ;;  %10566 = vmatmul.mubr.bf16.gmra.mrb[64].mxu1 %v11176_v34 }
 0x27f   : > { %10582 = vmatpush3.bf16.msra.mxu0 %v12084_v17  ;;  %10614 = vmatpush3.bf16.msra.mxu1 %v12084_v17 }
 0x280   : > { %10583 = vmatprep.subr.bf16.mxu0 %v12090_v20  ;;  %10615 = vmatprep.subr.bf16.mxu1 %v12090_v20 }
 0x281   : > { %10585 = vmatprep.mubr.bf16.mxu0 %v11177_v35  ;;  %10617 = vmatprep.mubr.bf16.mxu1 %v11178_v36  ;;  %v11278_v35 = vld [vmem:[%s14891_s5 + $0x580] ss:$100 sps:$4 sm:$0xff]  }
 0x283   : > { %10584 = vmatpush3.bf16.msra.mxu0 %v12090_v20  ;;  %10616 = vmatpush3.bf16.msra.mxu1 %v12090_v20 }
 0x284   : > { %10633 = vmatprep.subr.bf16.mxu0 %v12038_v46  ;;  %10665 = vmatprep.subr.bf16.mxu1 %v12038_v46 }
 0x286   : > { %10586 = vmatmul.mubr.bf16.vlgmr.msra.gmra.mrb[72].mxu0 %v11179_v37  ;;  %10618 = vmatmul.mubr.bf16.vlgmr.msra.gmra.mrb[68].mxu1 %v11180_v38 }
 0x287   : > { %10634 = vmatpush3.bf16.msra.mxu0 %v12038_v46  ;;  %10666 = vmatpush3.bf16.msra.mxu1 %v12038_v46 }
 0x288   : > { %10635 = vmatprep.subr.bf16.mxu0 %v12046_v56  ;;  %10667 = vmatprep.subr.bf16.mxu1 %v12046_v56 }
 0x289   : > { %10589 = vmatprep.mubr.bf16.mxu0 %v11181_v39  ;;  %10621 = vmatprep.mubr.bf16.mxu1 %v11182_v40 }
 0x28b   : > { %10636 = vmatpush3.bf16.msra.mxu0 %v12046_v56  ;;  %10668 = vmatpush3.bf16.msra.mxu1 %v12046_v56 }
 0x28c   : > { %10637 = vmatprep.subr.bf16.mxu0 %v12062_v63  ;;  %10669 = vmatprep.subr.bf16.mxu1 %v12062_v63 }
 0x28e   : > { %10590 = vmatmul.mubr.bf16.gmra.mrb[76].mxu0 %v11183_v41  ;;  %10622 = vmatmul.mubr.bf16.gmra.mrb[72].mxu1 %v11184_v42 }
 0x28f   : > { %10638 = vmatpush3.bf16.msra.mxu0 %v12062_v63  ;;  %10670 = vmatpush3.bf16.msra.mxu1 %v12062_v63 }
 0x290   : > { %10639 = vmatprep.subr.bf16.mxu0 %v12068_v7  ;;  %10671 = vmatprep.subr.bf16.mxu1 %v12068_v7 }
 0x291   : > { %10593 = vmatprep.mubr.bf16.mxu0 %v11185_v43  ;;  %10625 = vmatprep.mubr.bf16.mxu1 %v11186_v44 }
 0x293   : > { %10640 = vmatpush3.bf16.msra.mxu0 %v12068_v7  ;;  %10672 = vmatpush3.bf16.msra.mxu1 %v12068_v7 }
 0x294   : > { %10641 = vmatprep.subr.bf16.mxu0 %v12070_v9  ;;  %10673 = vmatprep.subr.bf16.mxu1 %v12070_v9 }
 0x296   : > { %10594 = vmatmul.mubr.bf16.gmra.mrb[80].mxu0 %v11187_v45  ;;  %10626 = vmatmul.mubr.bf16.gmra.mrb[76].mxu1 %v11188_v47 }
 0x297   : > { %10642 = vmatpush3.bf16.msra.mxu0 %v12070_v9  ;;  %10674 = vmatpush3.bf16.msra.mxu1 %v12070_v9 }
 0x298   : > { %10643 = vmatprep.subr.bf16.mxu0 %v12078_v15  ;;  %10675 = vmatprep.subr.bf16.mxu1 %v12078_v15 }
 0x299   : > { %10597 = vmatprep.mubr.bf16.mxu0 %v11189_v48  ;;  %10629 = vmatprep.mubr.bf16.mxu1 %v11190_v49 }
 0x29b   : > { %10644 = vmatpush3.bf16.msra.mxu0 %v12078_v15  ;;  %10676 = vmatpush3.bf16.msra.mxu1 %v12078_v15 }
 0x29c   : > { %10645 = vmatprep.subr.bf16.mxu0 %v12084_v17  ;;  %10677 = vmatprep.subr.bf16.mxu1 %v12084_v17 }
 0x29e   : > { %10598 = vmatmul.mubr.bf16.gmra.mrb[84].mxu0 %v11191_v50  ;;  %10630 = vmatmul.mubr.bf16.gmra.mrb[80].mxu1 %v11192_v51 }
 0x29f   : > { %10646 = vmatpush3.bf16.msra.mxu0 %v12084_v17  ;;  %10678 = vmatpush3.bf16.msra.mxu1 %v12084_v17 }
 0x2a0   : > { %10647 = vmatprep.subr.bf16.mxu0 %v12090_v20  ;;  %10679 = vmatprep.subr.bf16.mxu1 %v12090_v20 }
 0x2a1   : > { %10649 = vmatprep.mubr.bf16.mxu0 %v11193_v52  ;;  %10681 = vmatprep.mubr.bf16.mxu1 %v11194_v53 }
 0x2a3   : > { %10648 = vmatpush3.bf16.msra.mxu0 %v12090_v20  ;;  %10680 = vmatpush3.bf16.msra.mxu1 %v12090_v20 }
 0x2a4   : > { %10697 = vmatprep.subr.bf16.mxu0 %v12038_v46  ;;  %10729 = vmatprep.subr.bf16.mxu1 %v12038_v46 }
 0x2a6   : > { %10650 = vmatmul.mubr.bf16.vlgmr.msra.gmra.mrb[88].mxu0 %v11195_v54  ;;  %10682 = vmatmul.mubr.bf16.vlgmr.msra.gmra.mrb[84].mxu1 %v11196_v55 }
 0x2a7   : > { %10698 = vmatpush3.bf16.msra.mxu0 %v12038_v46  ;;  %10730 = vmatpush3.bf16.msra.mxu1 %v12038_v46 }
 0x2a8   : > { %10699 = vmatprep.subr.bf16.mxu0 %v12046_v56  ;;  %10731 = vmatprep.subr.bf16.mxu1 %v12046_v56 }
 0x2a9   : > { %10653 = vmatprep.mubr.bf16.mxu0 %v11197_v57  ;;  %10685 = vmatprep.mubr.bf16.mxu1 %v11198_v58 }
 0x2ab   : > { %10700 = vmatpush3.bf16.msra.mxu0 %v12046_v56  ;;  %10732 = vmatpush3.bf16.msra.mxu1 %v12046_v56 }
 0x2ac   : > { %10701 = vmatprep.subr.bf16.mxu0 %v12062_v63  ;;  %10733 = vmatprep.subr.bf16.mxu1 %v12062_v63 }
 0x2ae   : > { %10654 = vmatmul.mubr.bf16.gmra.mrb[92].mxu0 %v11199_v59  ;;  %10686 = vmatmul.mubr.bf16.gmra.mrb[88].mxu1 %v11200_v60 }
 0x2af   : > { %10702 = vmatpush3.bf16.msra.mxu0 %v12062_v63  ;;  %10734 = vmatpush3.bf16.msra.mxu1 %v12062_v63 }
 0x2b0   : > { %10703 = vmatprep.subr.bf16.mxu0 %v12068_v7  ;;  %10735 = vmatprep.subr.bf16.mxu1 %v12068_v7 }
 0x2b1   : > { %10657 = vmatprep.mubr.bf16.mxu0 %v11201_v61  ;;  %10689 = vmatprep.mubr.bf16.mxu1 %v11202_v62 }
 0x2b3   : > { %10704 = vmatpush3.bf16.msra.mxu0 %v12068_v7  ;;  %10736 = vmatpush3.bf16.msra.mxu1 %v12068_v7 }
 0x2b4   : > { %10705 = vmatprep.subr.bf16.mxu0 %v12070_v9  ;;  %10737 = vmatprep.subr.bf16.mxu1 %v12070_v9 }
 0x2b6   : > { %10658 = vmatmul.mubr.bf16.gmra.mrb[96].mxu0 %v11203_v0  ;;  %10690 = vmatmul.mubr.bf16.gmra.mrb[92].mxu1 %v11204_v1 }
 0x2b7   : > { %10706 = vmatpush3.bf16.msra.mxu0 %v12070_v9  ;;  %10738 = vmatpush3.bf16.msra.mxu1 %v12070_v9 }
 0x2b8   : > { %10707 = vmatprep.subr.bf16.mxu0 %v12078_v15  ;;  %10739 = vmatprep.subr.bf16.mxu1 %v12078_v15 }
 0x2b9   : > { %10661 = vmatprep.mubr.bf16.mxu0 %v11205_v3  ;;  %10693 = vmatprep.mubr.bf16.mxu1 %v11206_v4 }
 0x2bb   : > { %10708 = vmatpush3.bf16.msra.mxu0 %v12078_v15  ;;  %10740 = vmatpush3.bf16.msra.mxu1 %v12078_v15 }
 0x2bc   : > { %10709 = vmatprep.subr.bf16.mxu0 %v12084_v17  ;;  %10741 = vmatprep.subr.bf16.mxu1 %v12084_v17 }
 0x2be   : > { %10662 = vmatmul.mubr.bf16.gmra.mrb[100].mxu0 %v11207_v5  ;;  %10694 = vmatmul.mubr.bf16.gmra.mrb[96].mxu1 %v11208_v6 }
 0x2bf   : > { %10710 = vmatpush3.bf16.msra.mxu0 %v12084_v17  ;;  %10742 = vmatpush3.bf16.msra.mxu1 %v12084_v17 }
 0x2c0   : > { %10711 = vmatprep.subr.bf16.mxu0 %v12090_v20  ;;  %10743 = vmatprep.subr.bf16.mxu1 %v12090_v20 }
 0x2c1   : > { %10713 = vmatprep.mubr.bf16.mxu0 %v11209_v8  ;;  %10745 = vmatprep.mubr.bf16.mxu1 %v11210_v10 }
 0x2c3   : > { %10712 = vmatpush3.bf16.msra.mxu0 %v12090_v20  ;;  %10744 = vmatpush3.bf16.msra.mxu1 %v12090_v20 }
 0x2c4   : > { %10761 = vmatprep.subr.bf16.mxu0 %v12038_v46 }
 0x2c6   : > { %10714 = vmatmul.mubr.bf16.vlgmr.msra.gmra.mrb[104].mxu0 %v11211_v11  ;;  %10746 = vmatmul.mubr.bf16.vlgmr.msra.gmra.mrb[100].mxu1 %v11212_v12 }
 0x2c7   : > { %10762 = vmatpush3.bf16.msra.mxu0 %v12038_v46  ;;  %10749 = vmatprep.mubr.bf16.mxu1 %v11213_v13  ;;  %v11219_v46 = vld [vmem:[%s14889_s3 + $0x1a0] sm:$0xff]  }
 0x2c8   : > { %10763 = vmatprep.subr.bf16.mxu0 %v12046_v56  ;;  %10717 = vmatprep.mubr.bf16.mxu0 %v11215_v14 }
 0x2cb   : > { %10764 = vmatpush3.bf16.msra.mxu0 %v12046_v56  ;;  %v11218_v56 = vld [vmem:[%s14889_s3 + $0x1e8] sm:$0xff]  }
 0x2cc   : > { %10765 = vmatprep.subr.bf16.mxu0 %v12062_v63 }
 0x2ce   : > { %10750 = vmatmul.mubr.bf16.gmra.mrb[104].mxu1 %v11214_v16  ;;  %10718 = vmatmul.mubr.bf16.gmra.mrb[108].mxu0 %v11216_v18 }
 0x2cf   : > { %10766 = vmatpush3.bf16.msra.mxu0 %v12062_v63  ;;  %10753 = vmatprep.mubr.bf16.mxu1 %v11217_v19  ;;  %v11223_v63 = vld [vmem:[%s14889_s3 + $0x1f0] sm:$0xff]  }
 0x2d0   : > { %10767 = vmatprep.subr.bf16.mxu0 %v12068_v7  ;;  %10721 = vmatprep.mubr.bf16.mxu0 %v11219_v46 }
 0x2d3   : > { %10768 = vmatpush3.bf16.msra.mxu0 %v12068_v7  ;;  %v11222_v7 = vld [vmem:[%s14889_s3 + $0x1b8] sm:$0xff]  }
 0x2d4   : > { %10769 = vmatprep.subr.bf16.mxu0 %v12070_v9 }
 0x2d6   : > { %10754 = vmatmul.mubr.bf16.gmra.mrb[108].mxu1 %v11218_v56  ;;  %10722 = vmatmul.mubr.bf16.gmra.mrb[112].mxu0 %v11220_v21 }
 0x2d7   : > { %10770 = vmatpush3.bf16.msra.mxu0 %v12070_v9  ;;  %10725 = vmatprep.mubr.bf16.mxu0 %v11221_v22  ;;  %v11226_v9 = vld [vmem:[%s14889_s3 + $0x208] sm:$0xff]  }
 0x2d8   : > { %10771 = vmatprep.subr.bf16.mxu0 %v12078_v15  ;;  %10757 = vmatprep.mubr.bf16.mxu1 %v11223_v63 }
 0x2db   : > { %10772 = vmatpush3.bf16.msra.mxu0 %v12078_v15  ;;  %v11227_v15 = vld [vmem:[%s14889_s3 + $0x210] sm:$0xff]  }
 0x2dc   : > { %10773 = vmatprep.subr.bf16.mxu0 %v12084_v17 }
 0x2de   : > { %10726 = vmatmul.mubr.bf16.gmra.mrb[116].mxu0 %v11222_v7  ;;  %10758 = vmatmul.mubr.bf16.gmra.mrb[112].mxu1 %v11224_v23 }
 0x2df   : > { %10774 = vmatpush3.bf16.msra.mxu0 %v12084_v17  ;;  %10777 = vmatprep.mubr.bf16.mxu0 %v11225_v24  ;;  %v11229_v17 = vld [vmem:[%s14889_s3 + $0x220] sm:$0xff]  }
 0x2e0   : > { %10775 = vmatprep.subr.bf16.mxu0 %v12090_v20 }
 0x2e3   : > { %10776 = vmatpush3.bf16.msra.mxu0 %v12090_v20  ;;  %v11230_v20 = vld [vmem:[%s14889_s3 + $0x228] sm:$0xff]  }
 0x2e6   : > { %10778 = vmatmul.mubr.bf16.vlgmr.msra.gmra.mrb[120].mxu0 %v11226_v9 }
 0x2e7   : > { %10781 = vmatprep.mubr.bf16.mxu0 %v11227_v15 }
 0x2ee   : > { %10782 = vmatmul.mubr.bf16.gmra.mrb[124].mxu0 %v11228_v25 }
 0x2ef   : > { %10785 = vmatprep.mubr.bf16.mxu0 %v11229_v17 }
 0x2f6   : > { %10786 = vmatmul.mubr.bf16.gmra.mrb[128].mxu0 %v11230_v20 }
 0x2f7   : > { %10789 = vmatprep.mubr.bf16.mxu0 %v11231_v26 }
 0x2fe   : > { %10790 = vmatmul.mubr.bf16.gmra.mrb[132].mxu0 %v11232_v27 }
 0x339   : > { %v10555_v28 = vpop.f32.mrb[52].mxu1  ;;  %v12420_v29 = vpop.f32.mrb[56].mxu0 }
 0x33a   : > { %v3389_v30 = vpop.f32.mrb[53].mxu1  ;;  %v12422_v31 = vpop.f32.mrb[57].mxu0 }
 0x33b   : > { %v10556_v32 = vpop.f32.mrb[54].mxu1  ;;  %v12424_v33 = vpop.f32.mrb[58].mxu0 }
 0x33c   : > { %v3453_v34 = vpack.c.bf16 %v10556_v32, %v10555_v28  ;;  %v3392_v36 = vpop.f32.mrb[55].mxu1  ;;  %v12428_v37 = vpop.f32.mrb[59].mxu0 }
 0x33d   : > { %v3452_v38 = vpack.c.bf16 %v3392_v36, %v3389_v30 }
 0x33e   : > { %4660 = vrot.lane.b32.xlu1 %v3453_v34, %s11579_s23 }
 0x33f   : > { %4658 = vrot.lane.b32.xlu0 %v3452_v38, %s11579_s23 }
 0x341   : > { %v10559_v40 = vpop.f32.mrb[56].mxu1  ;;  %v12434_v41 = vpop.f32.mrb[60].mxu0 }
 0x342   : > { %v3405_v42 = vpop.f32.mrb[57].mxu1  ;;  %v12436_v43 = vpop.f32.mrb[61].mxu0 }
 0x343   : > { %v10560_v44 = vpop.f32.mrb[58].mxu1  ;;  %v12438_v45 = vpop.f32.mrb[62].mxu0 }
 0x344   : > { %v3455_v47 = vpack.c.bf16 %v10560_v44, %v10559_v40  ;;  %v3408_v49 = vpop.f32.mrb[59].mxu1  ;;  %v12442_v50 = vpop.f32.mrb[63].mxu0 }
 0x345   : > { %v3454_v51 = vpack.c.bf16 %v3408_v49, %v3405_v42 }
 0x346   : > { %4664 = vrot.lane.b32.xlu1 %v3455_v47, %s11579_s23 }
 0x347   : > { %4662 = vrot.lane.b32.xlu0 %v3454_v51, %s11579_s23 }
 0x349   : > { %v12448_v53 = vpop.f32.mrb[60].mxu1  ;;  %v12450_v54 = vpop.f32.mrb[64].mxu0 }
 0x34a   : > { %v3421_v55 = vpop.f32.mrb[61].mxu1  ;;  %v12452_v57 = vpop.f32.mrb[65].mxu0 }
 0x34b   : > { %v12454_v58 = vpop.f32.mrb[62].mxu1  ;;  %v12456_v59 = vpop.f32.mrb[66].mxu0 }
 0x34c   : > { %v3424_v62 = vpop.f32.mrb[63].mxu1  ;;  %v12462_v0 = vpop.f32.mrb[67].mxu0 }
 0x34d   : > { %v3456_v1 = vpack.c.bf16 %v3424_v62, %v3421_v55 }
 0x34f   : > { %4666 = vrot.lane.b32.xlu0 %v3456_v1, %s11579_s23 }
 0x351   : > { %v12467_v4 = vpop.f32.mrb[64].mxu1  ;;  %v12469_v5 = vpop.f32.mrb[68].mxu0 }
 0x352   : > { %14916 = vst [vmem:[#allocation2_spill] sm:$0xff] %v12469_v5  ;;  %v12471_v6 = vpop.f32.mrb[65].mxu1  ;;  %v12473_v8 = vpop.f32.mrb[69].mxu0 }
 0x353   : > { %v12475_v10 = vpop.f32.mrb[66].mxu1  ;;  %v12477_v11 = vpop.f32.mrb[70].mxu0 }
 0x354   : > { %14917 = vst [vmem:[#allocation3_spill] sm:$0xff] %v12477_v11  ;;  %v12483_v14 = vpop.f32.mrb[67].mxu1  ;;  %v12485_v16 = vpop.f32.mrb[71].mxu0 }
 0x359   : > { %v10587_v46 = vpop.f32.mrb[72].mxu0  ;;  %v10619_v56 = vpop.f32.mrb[68].mxu1 }
 0x35a   : > { %v3559_v21 = vpop.f32.mrb[73].mxu0  ;;  %v3729_v22 = vpop.f32.mrb[69].mxu1 }
 0x35b   : > { %v10588_v63 = vpop.f32.mrb[74].mxu0  ;;  %v10620_v7 = vpop.f32.mrb[70].mxu1 }
 0x35c   : > { %v3623_v23 = vpack.c.bf16 %v10588_v63, %v10587_v46  ;;  %v3793_v24 = vpack.c.bf16 %v10620_v7, %v10619_v56  ;;  %v3732_v9 = vpop.f32.mrb[71].mxu1  ;;  %v3562_v15 = vpop.f32.mrb[75].mxu0 }
 0x35d   : > { %v3792_v25 = vpack.c.bf16 %v3732_v9, %v3729_v22  ;;  %v3622_v17 = vpack.c.bf16 %v3562_v15, %v3559_v21 }
 0x35e   : > { %4708 = vrot.lane.b32.xlu1 %v3793_v24, %s11580_s24  ;;  %4684 = vrot.lane.b32.xlu0 %v3623_v23, %s11581_s25 }
 0x361   : > { %v10591_v20 = vpop.f32.mrb[76].mxu0  ;;  %v10623_v26 = vpop.f32.mrb[72].mxu1 }
 0x362   : > { %v3745_v27 = vpop.f32.mrb[73].mxu1  ;;  %4706 = vrot.lane.b32.xlu0 %v3792_v25, %s11580_s24  ;;  %4682 = vrot.lane.b32.xlu1 %v3622_v17, %s11581_s25  ;;  %v3575_v28 = vpop.f32.mrb[77].mxu0  ;;  %v11233_v25 = vld [vmem:[%s14891_s5] ss:$100 sps:$4 sm:$0xff]  }
 0x363   : > { %v10592_v30 = vpop.f32.mrb[78].mxu0  ;;  %v10624_v32 = vpop.f32.mrb[74].mxu1 }
 0x364   : > { %v3625_v34 = vpack.c.bf16 %v10592_v30, %v10591_v20  ;;  %v3795_v36 = vpack.c.bf16 %v10624_v32, %v10623_v26  ;;  %v3748_v38 = vpop.f32.mrb[75].mxu1  ;;  %v3578_v40 = vpop.f32.mrb[79].mxu0  ;;  %v11235_v26 = vld [vmem:[%s14891_s5 + $0x4] ss:$100 sps:$4 sm:$0xff]  }
 0x365   : > { %v3794_v42 = vpack.c.bf16 %v3748_v38, %v3745_v27  ;;  %v3624_v44 = vpack.c.bf16 %v3578_v40, %v3575_v28  ;;  %v11236_v27 = vld [vmem:[%s14891_s5 + $0x8] ss:$100 sps:$4 sm:$0xff]   ;;  %6441 = vmatprep.subr.bf16.mxu1 %v11235_v26 }
 0x366   : > { %4712 = vrot.lane.b32.xlu1 %v3795_v36, %s11580_s24  ;;  %4688 = vrot.lane.b32.xlu0 %v3625_v34, %s11581_s25  ;;  %v11238_v36 = vld [vmem:[%s14891_s5 + $0xc] ss:$100 sps:$4 sm:$0xff]  }
 0x367   : > { %6554 = vmatprep.subr.bf16.mxu0 %v11238_v36  ;;  %6442 = vmatpush1.bf16.msra.mxu1 %v11233_v25  ;;  %v11247_v36 = vld [vmem:[%s14891_s5 + $0x194] ss:$100 sps:$4 sm:$0xff]  }
 0x368   : > { %6555 = vmatpush1.bf16.msra.mxu0 %v11236_v27  ;;  %v11245_v27 = vld [vmem:[%s14891_s5 + $0x190] ss:$100 sps:$4 sm:$0xff]  }
 0x369   : > { %v12497_v47 = vpop.f32.mrb[80].mxu0  ;;  %v12499_v49 = vpop.f32.mrb[76].mxu1 }
 0x36a   : > { %v3761_v51 = vpop.f32.mrb[77].mxu1  ;;  %4710 = vrot.lane.b32.xlu0 %v3794_v42, %s11580_s24  ;;  %4686 = vrot.lane.b32.xlu1 %v3624_v44, %s11581_s25  ;;  %v3591_v55 = vpop.f32.mrb[81].mxu0  ;;  %v11239_v42 = vld [vmem:[%s14891_s5 + $0xc8] ss:$100 sps:$4 sm:$0xff]  }
 0x36b   : > { %v12503_v62 = vpop.f32.mrb[82].mxu0  ;;  %v12505_v1 = vpop.f32.mrb[78].mxu1  ;;  %v11241_v44 = vld [vmem:[%s14891_s5 + $0xcc] ss:$100 sps:$4 sm:$0xff]  }
 0x36c   : > { %v3594_v21 = vpop.f32.mrb[83].mxu0  ;;  %v3764_v22 = vpop.f32.mrb[79].mxu1  ;;  %6443 = vmatprep.subr.bf16.mxu1 %v11241_v44 }
 0x36d   : > { %v3626_v63 = vpack.c.bf16 %v3594_v21, %v3591_v55  ;;  %v3796_v7 = vpack.c.bf16 %v3764_v22, %v3761_v51  ;;  %v11242_v51 = vld [vmem:[%s14891_s5 + $0xd0] ss:$100 sps:$4 sm:$0xff]   ;;  %6444 = vmatpush1.bf16.msra.mxu1 %v11239_v42  ;;  %v11250_v42 = vld [vmem:[%s14891_s5 + $0x19c] ss:$100 sps:$4 sm:$0xff]  }
 0x36e   : > { %v11244_v55 = vld [vmem:[%s14891_s5 + $0xd4] ss:$100 sps:$4 sm:$0xff]   ;;  %6445 = vmatprep.subr.bf16.mxu1 %v11247_v36 }
 0x36f   : > { %4714 = vrot.lane.b32.xlu0 %v3796_v7, %s11580_s24  ;;  %4690 = vrot.lane.b32.xlu1 %v3626_v63, %s11581_s25 }
 0x370   : > { %6556 = vmatprep.subr.bf16.mxu0 %v11244_v55  ;;  %v11248_v55 = vld [vmem:[%s14891_s5 + $0x198] ss:$100 sps:$4 sm:$0xff]  }
 0x371   : > { %v12513_v23 = vpop.f32.mrb[80].mxu1  ;;  %v12515_v24 = vpop.f32.mrb[84].mxu0  ;;  %6557 = vmatpush1.bf16.msra.mxu0 %v11242_v51  ;;  %6446 = vmatpush1.bf16.msra.mxu1 %v11245_v27 }
 0x372   : > { %v12517_v9 = vpop.f32.mrb[81].mxu1  ;;  %v12519_v15 = vpop.f32.mrb[85].mxu0  ;;  %6558 = vmatprep.subr.bf16.mxu0 %v11250_v42 }
 0x373   : > { %v12524_v17 = vpop.f32.mrb[82].mxu1  ;;  %v12526_v20 = vpop.f32.mrb[86].mxu0 }
 0x374   : > { %v12538_v32 = vpop.f32.mrb[83].mxu1  ;;  %v12540_v34 = vpop.f32.mrb[87].mxu0 }
 0x375   : > { %6559 = vmatpush1.bf16.msra.mxu0 %v11248_v55  ;;  %v11257_v55 = vld [vmem:[%s14891_s5 + $0x320] ss:$100 sps:$4 sm:$0xff]  }
 0x379   : > { %v10651_v21 = vpop.f32.mrb[88].mxu0  ;;  %v10683_v22 = vpop.f32.mrb[84].mxu1 }
 0x37a   : > { %v3899_v63 = vpop.f32.mrb[89].mxu0  ;;  %v4069_v7 = vpop.f32.mrb[85].mxu1 }
 0x37b   : > { %v10652_v25 = vpop.f32.mrb[90].mxu0  ;;  %v10684_v26 = vpop.f32.mrb[86].mxu1 }
 0x37c   : > { %v3963_v2 = vpack.c.bf16 %v10652_v25, %v10651_v21  ;;  %v4133_v13 = vpack.c.bf16 %v10684_v26, %v10683_v22  ;;  %v4072_v44 = vpop.f32.mrb[87].mxu1  ;;  %v3902_v19 = vpop.f32.mrb[91].mxu0  ;;  %v11251_v21 = vld [vmem:[%s14891_s5 + $0x258] ss:$100 sps:$4 sm:$0xff]   ;;  %v11262_v25 = vld [vmem:[%s14891_s5 + $0x32c] ss:$100 sps:$4 sm:$0xff]  }
 0x37d   : > { %v4132_v51 = vpack.c.bf16 %v4072_v44, %v4069_v7  ;;  %v3962_v61 = vpack.c.bf16 %v3902_v19, %v3899_v63  ;;  %v11253_v22 = vld [vmem:[%s14891_s5 + $0x25c] ss:$100 sps:$4 sm:$0xff]   ;;  %v11256_v19 = vld [vmem:[%s14891_s5 + $0x264] ss:$100 sps:$4 sm:$0xff]  }
 0x37e   : > { %4756 = vrot.lane.b32.xlu1 %v4133_v13, %s11578_s13  ;;  %4732 = vrot.lane.b32.xlu0 %v3963_v2, %s11582_s19  ;;  %v11254_v13 = vld [vmem:[%s14891_s5 + $0x260] ss:$100 sps:$4 sm:$0xff]  }
 0x37f   : > { %v11259_v2 = vld [vmem:[%s14891_s5 + $0x324] ss:$100 sps:$4 sm:$0xff]   ;;  %6447 = vmatprep.subr.bf16.mxu1 %v11253_v22  ;;  %6560 = vmatprep.subr.bf16.mxu0 %v11256_v19 }
 0x380   : > { %6448 = vmatpush1.bf16.msra.mxu1 %v11251_v21  ;;  %6561 = vmatpush1.bf16.msra.mxu0 %v11254_v13  ;;  %v11263_v13 = vld [vmem:[%s14891_s5 + $0x3e8] ss:$100 sps:$4 sm:$0xff]  }
 0x381   : > { %v10655_v63 = vpop.f32.mrb[92].mxu0  ;;  %v10687_v7 = vpop.f32.mrb[88].mxu1  ;;  %6449 = vmatprep.subr.bf16.mxu1 %v11259_v2  ;;  %6562 = vmatprep.subr.bf16.mxu0 %v11262_v25  ;;  %v11271_v2 = vld [vmem:[%s14891_s5 + $0x4b4] ss:$100 sps:$4 sm:$0xff]  }
 0x382   : > { %v4085_v26 = vpop.f32.mrb[89].mxu1  ;;  %4754 = vrot.lane.b32.xlu0 %v4132_v51, %s11578_s13  ;;  %4730 = vrot.lane.b32.xlu1 %v3962_v61, %s11582_s19  ;;  %v3915_v27 = vpop.f32.mrb[93].mxu0  ;;  %v11260_v51 = vld [vmem:[%s14891_s5 + $0x328] ss:$100 sps:$4 sm:$0xff]  }
 0x383   : > { %v10656_v36 = vpop.f32.mrb[94].mxu0  ;;  %v10688_v44 = vpop.f32.mrb[90].mxu1  ;;  %v11265_v61 = vld [vmem:[%s14891_s5 + $0x3ec] ss:$100 sps:$4 sm:$0xff]  }
 0x384   : > { %v3965_v42 = vpack.c.bf16 %v10656_v36, %v10655_v63  ;;  %v4135_v22 = vpack.c.bf16 %v10688_v44, %v10687_v7  ;;  %v4088_v19 = vpop.f32.mrb[91].mxu1  ;;  %v3918_v48 = vpop.f32.mrb[95].mxu0  ;;  %v11268_v63 = vld [vmem:[%s14891_s5 + $0x3f4] ss:$100 sps:$4 sm:$0xff]   ;;  %6450 = vmatpush1.bf16.msra.mxu1 %v11257_v55  ;;  %6563 = vmatpush1.bf16.msra.mxu0 %v11260_v51 }
 0x385   : > { %v4134_v52 = vpack.c.bf16 %v4088_v19, %v4085_v26  ;;  %v3964_v21 = vpack.c.bf16 %v3918_v48, %v3915_v27  ;;  %6451 = vmatprep.subr.bf16.mxu1 %v11265_v61  ;;  %v11266_v48 = vld [vmem:[%s14891_s5 + $0x3f0] ss:$100 sps:$4 sm:$0xff]   ;;  %6564 = vmatprep.subr.bf16.mxu0 %v11268_v63  ;;  %v11274_v26 = vld [vmem:[%s14891_s5 + $0x4bc] ss:$100 sps:$4 sm:$0xff]  }
 0x386   : > { %4760 = vrot.lane.b32.xlu1 %v4135_v22, %s11578_s13  ;;  %4736 = vrot.lane.b32.xlu0 %v3965_v42, %s11582_s19  ;;  %v11269_v42 = vld [vmem:[%s14891_s5 + $0x4b0] ss:$100 sps:$4 sm:$0xff]   ;;  %v11272_v61 = vld [vmem:[%s14891_s5 + $0x4b8] ss:$100 sps:$4 sm:$0xff]  }
 0x388   : > { %6452 = vmatpush1.bf16.msra.mxu1 %v11263_v13  ;;  %6565 = vmatpush1.bf16.msra.mxu0 %v11266_v48  ;;  %v11280_v48 = vld [vmem:[%s14891_s5 + $0x584] ss:$100 sps:$4 sm:$0xff]  }
 0x389   : > { %v12618_v7 = vpop.f32.mrb[92].mxu1  ;;  %v12620_v25 = vpop.f32.mrb[96].mxu0  ;;  %6453 = vmatprep.subr.bf16.mxu1 %v11271_v2  ;;  %6566 = vmatprep.subr.bf16.mxu0 %v11274_v26  ;;  %v11275_v2 = vld [vmem:[%s14891_s5 + $0x578] ss:$100 sps:$4 sm:$0xff]  }
 0x38a   : > { %v12625_v27 = vpop.f32.mrb[93].mxu1  ;;  %4758 = vrot.lane.b32.xlu0 %v4134_v52, %s11578_s13  ;;  %4734 = vrot.lane.b32.xlu1 %v3964_v21, %s11582_s19  ;;  %v12629_v36 = vpop.f32.mrb[97].mxu0  ;;  %v11277_v21 = vld [vmem:[%s14891_s5 + $0x57c] ss:$100 sps:$4 sm:$0xff]  }
 0x38b   : > { %v12631_v44 = vpop.f32.mrb[94].mxu1  ;;  %v12633_v55 = vpop.f32.mrb[98].mxu0 }
 0x38c   : > { %v12642_v52 = vpop.f32.mrb[95].mxu1  ;;  %v12644_v51 = vpop.f32.mrb[99].mxu0  ;;  %6454 = vmatpush1.bf16.msra.mxu1 %v11269_v42  ;;  %6567 = vmatpush1.bf16.msra.mxu0 %v11272_v61  ;;  %v11283_v42 = vld [vmem:[%s14891_s5 + $0x644] ss:$100 sps:$4 sm:$0xff]  }
 0x38d   : > { %v4136_v63 = vpack.c.bf16 %v12642_v52, %v12625_v27  ;;  %v3966_v13 = vpack.c.bf16 %v12644_v51, %v12629_v36  ;;  %6455 = vmatprep.subr.bf16.mxu1 %v11277_v21  ;;  %6568 = vmatprep.subr.bf16.mxu0 %v11280_v48  ;;  %v11281_v21 = vld [vmem:[%s14891_s5 + $0x640] ss:$100 sps:$4 sm:$0xff]   ;;  %v11286_v48 = vld [vmem:[%s14891_s5 + $0x64c] ss:$100 sps:$4 sm:$0xff]  }
 0x390   : > { %6456 = vmatpush1.bf16.msra.mxu1 %v11275_v2  ;;  %6569 = vmatpush1.bf16.msra.mxu0 %v11278_v35  ;;  %v11284_v2 = vld [vmem:[%s14891_s5 + $0x648] ss:$100 sps:$4 sm:$0xff]   ;;  %v11289_v35 = vld [vmem:[%s14891_s5 + $0x14] ss:$100 sps:$4 sm:$0xff]  }
 0x391   : > { %v12665_v27 = vpop.f32.mrb[96].mxu1  ;;  %v12667_v52 = vpop.f32.mrb[100].mxu0  ;;  %6457 = vmatprep.subr.bf16.mxu1 %v11283_v42  ;;  %6570 = vmatprep.subr.bf16.mxu0 %v11286_v48 }
 0x392   : > { %v12669_v26 = vpop.f32.mrb[97].mxu1  ;;  %v12671_v36 = vpop.f32.mrb[101].mxu0 }
 0x393   : > { %v12676_v51 = vpop.f32.mrb[98].mxu1  ;;  %v12678_v61 = vpop.f32.mrb[102].mxu0 }
 0x394   : > { %v12690_v12 = vpop.f32.mrb[99].mxu1  ;;  %v12692_v30 = vpop.f32.mrb[103].mxu0  ;;  %6458 = vmatpush1.bf16.msra.mxu1 %v11281_v21  ;;  %6571 = vmatpush1.bf16.msra.mxu0 %v11284_v2 }
 0x395   : > { %6667 = vmatprep.subr.bf16.mxu1 %v11289_v35 }
 0x399   : > { %v10715_v39 = vpop.f32.mrb[104].mxu0  ;;  %v10747_v28 = vpop.f32.mrb[100].mxu1 }
 0x39a   : > { %v4239_v42 = vpop.f32.mrb[105].mxu0  ;;  %v4409_v3 = vpop.f32.mrb[101].mxu1 }
 0x39b   : > { %v10716_v22 = vpop.f32.mrb[106].mxu0  ;;  %v10748_v18 = vpop.f32.mrb[102].mxu1 }
 0x39c   : > { %v4303_v56 = vpack.c.bf16 %v10716_v22, %v10715_v39  ;;  %v4473_v19 = vpack.c.bf16 %v10748_v18, %v10747_v28  ;;  %v4412_v40 = vpop.f32.mrb[103].mxu1  ;;  %v4242_v60 = vpop.f32.mrb[107].mxu0 }
 0x39d   : > { %v4472_v46 = vpack.c.bf16 %v4412_v40, %v4409_v3  ;;  %v4302_v38 = vpack.c.bf16 %v4242_v60, %v4239_v42 }
 0x39e   : > { %4804 = vrot.lane.b32.xlu1 %v4473_v19, %s11576_s11  ;;  %4780 = vrot.lane.b32.xlu0 %v4303_v56, %s11577_s12 }
 0x3a1   : > { %v10751_v21 = vpop.f32.mrb[104].mxu1  ;;  %v10719_v48 = vpop.f32.mrb[108].mxu0 }
 0x3a2   : > { %4802 = vrot.lane.b32.xlu0 %v4472_v46, %s11576_s11  ;;  %4778 = vrot.lane.b32.xlu1 %v4302_v38, %s11577_s12  ;;  %v4425_v2 = vpop.f32.mrb[105].mxu1  ;;  %v4255_v5 = vpop.f32.mrb[109].mxu0  ;;  %v14918_v46 = vpack.c.bf16 %v12503_v62, %v12497_v47 }
 0x3a3   : > { %v10752_v11 = vpop.f32.mrb[106].mxu1  ;;  %v10720_v35 = vpop.f32.mrb[110].mxu0 }
 0x3a4   : > { %v4475_v39 = vpack.c.bf16 %v10752_v11, %v10751_v21  ;;  %v4428_v18 = vpop.f32.mrb[107].mxu1  ;;  %v4305_v28 = vpack.c.bf16 %v10720_v35, %v10719_v48  ;;  %v4258_v22 = vpop.f32.mrb[111].mxu0  ;;  %v14919_v11 = vpack.c.bf16 %v12454_v58, %v12448_v53 }
 0x3a5   : > { %v4474_v3 = vpack.c.bf16 %v4428_v18, %v4425_v2  ;;  %v4304_v60 = vpack.c.bf16 %v4258_v22, %v4255_v5 }
 0x3a6   : > { %4762 = vrot.lane.b32.xlu0 %v4136_v63, %s11578_s13  ;;  %4738 = vrot.lane.b32.xlu1 %v3966_v13, %s11582_s19 }
 0x3a9   : > { %v10755_v56 = vpop.f32.mrb[108].mxu1  ;;  %v10723_v40 = vpop.f32.mrb[112].mxu0 }
 0x3aa   : > { %4692 = vrot.lane.b32.xlu0 %v14918_v46, %s11581_s25  ;;  %4668 = vrot.lane.b32.xlu1 %v14919_v11, %s11579_s23  ;;  %v4441_v38 = vpop.f32.mrb[109].mxu1  ;;  %v4271_v19 = vpop.f32.mrb[113].mxu0  ;;  %v14921_v11 = vpack.c.bf16 %v12505_v1, %v12499_v49 }
 0x3ab   : > { %v10756_v42 = vpop.f32.mrb[110].mxu1  ;;  %v10724_v5 = vpop.f32.mrb[114].mxu0 }
 0x3ac   : > { %v4477_v21 = vpack.c.bf16 %v10756_v42, %v10755_v56  ;;  %v4444_v63 = vpop.f32.mrb[111].mxu1  ;;  %v4307_v48 = vpack.c.bf16 %v10724_v5, %v10723_v40  ;;  %v4274_v13 = vpop.f32.mrb[115].mxu0  ;;  %v14922_v5 = vpack.c.bf16 %v12483_v14, %v12471_v6 }
 0x3ad   : > { %v4476_v2 = vpack.c.bf16 %v4444_v63, %v4441_v38  ;;  %v4306_v35 = vpack.c.bf16 %v4274_v13, %v4271_v19 }
 0x3ae   : > { %4808 = vrot.lane.b32.xlu1 %v4475_v39, %s11576_s11  ;;  %4784 = vrot.lane.b32.xlu0 %v4305_v28, %s11577_s12 }
 0x3b1   : > { %v12720_v47 = vpop.f32.mrb[116].mxu0  ;;  %v12724_v58 = vpop.f32.mrb[112].mxu1 }
 0x3b2   : > { %4806 = vrot.lane.b32.xlu0 %v4474_v3, %s11576_s11  ;;  %4782 = vrot.lane.b32.xlu1 %v4304_v60, %s11577_s12  ;;  %v4287_v53 = vpop.f32.mrb[117].mxu0  ;;  %v4457_v18 = vpop.f32.mrb[113].mxu1  ;;  %v11301_v3 = vld [vmem:[%s14891_s5 + $0x1c] ss:$100 sps:$4 sm:$0xff]   ;;  %v14920_v60 = vpack.c.bf16 %v12633_v55, %v12620_v25  ;;  %v14923_v25 = vpack.c.bf16 %v12631_v44, %v12618_v7  ;;  %v14924_v7 = vpack.c.bf16 %v12462_v0, %v12452_v57 }
 0x3b3   : > { %v10728_v62 = vpop.f32.mrb[118].mxu0  ;;  %v12727_v40 = vpop.f32.mrb[114].mxu1  ;;  %6780 = vmatprep.subr.bf16.mxu0 %v11301_v3  ;;  %v14926_v57 = vpack.c.bf16 %v12540_v34, %v12519_v15  ;;  %v14929_v15 = vpack.c.bf16 %v12526_v20, %v12515_v24  ;;  %v14931_v24 = vpack.c.bf16 %v12678_v61, %v12667_v52  ;;  %v5187_v52 = vld [vmem:[%s14890_s4] sm:$0xff] }
 0x3b4   : > { %v4309_v22 = vpack.c.bf16 %v10728_v62, %v12720_v47  ;;  %v4290_v56 = vpop.f32.mrb[119].mxu0  ;;  %v4479_v39 = vpack.c.bf16 %v12727_v40, %v12724_v58  ;;  %v4460_v28 = vpop.f32.mrb[115].mxu1 }
 0x3b5   : > { %v4308_v46 = vpack.c.bf16 %v4290_v56, %v4287_v53  ;;  %v4478_v38 = vpack.c.bf16 %v4460_v28, %v4457_v18  ;;  %v12742_v19 = vpop.permute.xlu0 %4658  ;;  %v14925_v18 = vpack.c.bf16 %v12538_v32, %v12517_v9 }
 0x3b6   : > { %4740 = vrot.lane.b32.xlu0 %v14920_v60, %s11582_s19  ;;  %4716 = vrot.lane.b32.xlu1 %v14921_v11, %s11580_s24  ;;  %v12808_v60 = vpop.permute.xlu1 %4660 }
 0x3b9   : > { %v10779_v42 = vpop.f32.mrb[120].mxu0  ;;  %v12754_v1 = vpop.permute.xlu0 %4662 }
 0x3ba   : > { %4670 = vrot.lane.b32.xlu0 %v14922_v5, %s11579_s23  ;;  %4764 = vrot.lane.b32.xlu1 %v14923_v25, %s11578_s13  ;;  %v4579_v55 = vpop.f32.mrb[121].mxu0  ;;  %v12820_v20 = vpop.permute.xlu1 %4664 }
 0x3bb   : > { %v10780_v63 = vpop.f32.mrb[122].mxu0 }
 0x3bc   : > { %v12752_v13 = vpack.c.bf16 %v10780_v63, %v10779_v42  ;;  %v4582_v49 = vpop.f32.mrb[123].mxu0  ;;  %v5192_v42 = vld [vmem:[%s14890_s4 + $0x28] sm:$0xff]  ;;  %v5194_v63 = vld [vmem:[%s14890_s4 + $0x38] sm:$0xff] }
 0x3bd   : > { %v12756_v47 = vpack.c.bf16 %v4582_v49, %v4579_v55  ;;  %v5195_v55 = vld [vmem:[%s14890_s4 + $0x40] sm:$0xff]  ;;  %v5197_v49 = vld [vmem:[%s14890_s4 + $0x50] sm:$0xff] }
 0x3be   : > { %4812 = vrot.lane.b32.xlu1 %v4477_v21, %s11576_s11  ;;  %4788 = vrot.lane.b32.xlu0 %v4307_v48, %s11577_s12 }
 0x3bf   : > { %9852 = vmatprep.mubr.msk.bf16.mxu1 %vm4818_vm0, %v12756_v47  ;;  %9860 = vmatprep.mubr.msk.bf16.mxu0 %vm4818_vm0, %v12756_v47 }
 0x3c1   : > { %v4667_v6 = vpop.permute.xlu0 %4666  ;;  %v10783_v14 = vpop.f32.mrb[124].mxu0 }
 0x3c2   : > { %v12768_v44 = vsel %vm4818_vm0, %v14924_v7, %v4667_v6  ;;  %4810 = vrot.lane.b32.xlu0 %v4476_v2, %s11576_s11  ;;  %4786 = vrot.lane.b32.xlu1 %v4306_v35, %s11577_s12  ;;  %v4595_v21 = vpop.f32.mrb[125].mxu0  ;;  %v14927_v2 = vpack.c.bf16 %v12690_v12, %v12669_v26  ;;  %v14928_v35 = vpack.c.bf16 %v12692_v30, %v12671_v36  ;;  %v5196_v6 = vld [vmem:[%s14890_s4 + $0x48] sm:$0xff] }
 0x3c3   : > { %v10784_v48 = vpop.f32.mrb[126].mxu0  ;;  %v14930_v12 = vpack.c.bf16 %v12475_v10, %v12467_v4  ;;  %v14932_v4 = vpack.c.bf16 %v12524_v17, %v12513_v23  ;;  %v5189_v23 = vld [vmem:[%s14890_s4 + $0x10] sm:$0xff]  ;;  %v5188_v17 = vld [vmem:[%s14890_s4 + $0x8] sm:$0xff] }
 0x3c4   : > { %v12772_v53 = vpack.c.bf16 %v10784_v48, %v10783_v14  ;;  %v4598_v58 = vpop.f32.mrb[127].mxu0  ;;  %v5198_v48 = vld [vmem:[%s14890_s4 + $0x58] sm:$0xff] }
 0x3c5   : > { %v12774_v62 = vpack.c.bf16 %v4598_v58, %v4595_v21  ;;  %v5199_v21 = vld [vmem:[%s14890_s4 + $0x60] sm:$0xff] }
 0x3c6   : > { %4718 = vrot.lane.b32.xlu0 %v14925_v18, %s11580_s24  ;;  %4694 = vrot.lane.b32.xlu1 %v14926_v57, %s11581_s25  ;;  %v5201_v57 = vld [vmem:[%s14890_s4 + $0x70] sm:$0xff] }
 0x3c9   : > { %v10787_v0 = vpop.f32.mrb[128].mxu0 }
 0x3ca   : > { %4766 = vrot.lane.b32.xlu0 %v14927_v2, %s11578_s13  ;;  %4742 = vrot.lane.b32.xlu1 %v14928_v35, %s11582_s19  ;;  %v4611_v56 = vpop.f32.mrb[129].mxu0 }
 0x3cb   : > { %v10788_v40 = vpop.f32.mrb[130].mxu0 }
 0x3cc   : > { %v12792_v9 = vpack.c.bf16 %v10788_v40, %v10787_v0  ;;  %v4614_v32 = vpop.f32.mrb[131].mxu0  ;;  %v5200_v0 = vld [vmem:[%s14890_s4 + $0x68] sm:$0xff]  ;;  %v5202_v40 = vld [vmem:[%s14890_s4 + $0x78] sm:$0xff] }
 0x3cd   : > { %v12794_v28 = vpack.c.bf16 %v4614_v32, %v4611_v56  ;;  %v8495_v56 = vld [vmem:[%s14893_s7] sm:$0xf] }
 0x3ce   : > { %4696 = vrot.lane.b32.xlu0 %v14929_v15, %s11581_s25  ;;  %4672 = vrot.lane.b32.xlu1 %v14930_v12, %s11579_s23 }
 0x3d0   : > { %v12830_v61 = vpop.permute.xlu1 %4708  ;;  %v4685_v11 = vpop.permute.xlu0 %4684 }
 0x3d1   : > { %v10791_v34 = vpop.f32.mrb[132].mxu0 }
 0x3d2   : > { %4814 = vrot.lane.b32.xlu0 %v4478_v38, %s11576_s11  ;;  %4790 = vrot.lane.b32.xlu1 %v4308_v46, %s11577_s12  ;;  %v4627_v30 = vpop.f32.mrb[133].mxu0  ;;  %v14933_v46 = vpack.c.bf16 %v12676_v51, %v12665_v27  ;;  %v5191_v27 = vld [vmem:[%s14890_s4 + $0x20] sm:$0xff]  ;;  %v5190_v51 = vld [vmem:[%s14890_s4 + $0x18] sm:$0xff] }
 0x3d3   : > { %v10792_v26 = vpop.f32.mrb[134].mxu0  ;;  %v5193_v38 = vld [vmem:[%s14890_s4 + $0x30] sm:$0xff] }
 0x3d4   : > { %v12806_v36 = vpack.c.bf16 %v10792_v26, %v10791_v34  ;;  %v4630_v3 = vpop.f32.mrb[135].mxu0 }
 0x3d5   : > { %v12818_v10 = vpack.c.bf16 %v4630_v3, %v4627_v30  ;;  %v14934_v30 = vpack.c.bf16 %v12428_v37, %v12422_v31  ;;  %v14935_v31 = vpack.c.bf16 %v12424_v33, %v12420_v29  ;;  %v11299_v29 = vld [vmem:[%s14891_s5 + $0x18] ss:$100 sps:$4 sm:$0xff]  }
 0x3d6   : > { %4744 = vrot.lane.b32.xlu0 %v14931_v24, %s11582_s19  ;;  %4720 = vrot.lane.b32.xlu1 %v14932_v4, %s11580_s24 }
 0x3d7   : > { %v4821_v26 = vsel %vm4818_vm0, %v14934_v30, %v12742_v19  ;;  %v4824_v37 = vsel %vm4818_vm0, %v14935_v31, %v12808_v60  ;;  %v11311_v30 = vld [vmem:[%s14891_s5 + $0x1a8] ss:$100 sps:$4 sm:$0xff]   ;;  %v11322_v31 = vld [vmem:[%s14891_s5 + $0x33c] ss:$100 sps:$4 sm:$0xff]  }
 0x3d8   : > { %v4847_v19 = vsel %vm4843_vm1, %v4824_v37, %v4685_v11  ;;  %v11292_v11 = vld [vmem:[%s14891_s5 + $0xdc] ss:$100 sps:$4 sm:$0xff]  }
 0x3d9   : > { %v4864_v33 = vsel %vm4860_vm2, %v4847_v19, %v12830_v61 }
 0x3da   : > { %4792 = vrot.lane.b32.xlu0 %v4309_v22, %s11577_s12  ;;  %4768 = vrot.lane.b32.xlu1 %v14933_v46, %s11578_s13  ;;  %v4707_v22 = vpop.permute.xlu0 %4706 }
 0x3de   : > { %5205 = vperm.xlu0 %10833, %v5187_v52   ;;  %4816 = vrot.lane.b32.xlu1 %v4479_v39, %s11576_s11  ;;  %v4683_v39 = vpop.permute.xlu1 %4682  ;;  %v12853_v25 = vpop.permute.xlu0 %4688 }
 0x3df   : > { %v4845_v4 = vsel %vm4843_vm1, %v4821_v26, %v4683_v39 }
 0x3e0   : > { %v4862_v46 = vsel %vm4860_vm2, %v4845_v4, %v4707_v22 }
 0x3e2   : > { %5215 = vperm.xlu0 %10833, %v5189_v23   ;;  %5210 = vperm.xlu1 %10834, %v5188_v17   ;;  %v12851_v5 = vpop.permute.xlu1 %4712  ;;  %v12867_v14 = vpop.permute.xlu0 %4710 }
 0x3e6   : > { %5225 = vperm.xlu0 %10833, %v5191_v27   ;;  %5220 = vperm.xlu1 %10834, %v5190_v51   ;;  %v12869_v7 = vpop.permute.xlu1 %4686  ;;  %v12877_v58 = vpop.permute.xlu0 %4714 }
 0x3ea   : > { %5235 = vperm.xlu0 %10833, %v5193_v38   ;;  %5230 = vperm.xlu1 %10834, %v5192_v42   ;;  %v12879_v18 = vpop.permute.xlu1 %4690  ;;  %v11287_v38 = vld [vmem:[%s14891_s5 + $0x10] ss:$100 sps:$4 sm:$0xff]   ;;  %v11307_v42 = vld [vmem:[%s14891_s5 + $0xe4] ss:$100 sps:$4 sm:$0xff]  }
 0x3ee   : > { %5245 = vperm.xlu0 %10833, %v5195_v55   ;;  %5240 = vperm.xlu1 %10834, %v5194_v63  }
 0x3f0   : > { %v4757_v2 = vpop.permute.xlu1 %4756  ;;  %v4733_v35 = vpop.permute.xlu0 %4732 }
 0x3f1   : > { %v4881_v55 = vsel %vm4877_vm3, %v4864_v33, %v4733_v35  ;;  %v14936_v35 = vpack.c.bf16 %v12442_v50, %v12436_v43  ;;  %v11298_v50 = vld [vmem:[%s14891_s5 + $0x26c] ss:$100 sps:$4 sm:$0xff]   ;;  %v11308_v33 = vld [vmem:[%s14891_s5 + $0x3f8] ss:$100 sps:$4 sm:$0xff]  }
 0x3f2   : > { %5255 = vperm.xlu0 %10833, %v5197_v49   ;;  %5250 = vperm.xlu1 %10834, %v5196_v6   ;;  %v11290_v49 = vld [vmem:[%s14891_s5 + $0xd8] ss:$100 sps:$4 sm:$0xff]   ;;  %v11305_v6 = vld [vmem:[%s14891_s5 + $0xe0] ss:$100 sps:$4 sm:$0xff]  }
 0x3f4   : > { %v4755_v32 = vpop.permute.xlu0 %4754  ;;  %v4731_v15 = vpop.permute.xlu1 %4730 }
 0x3f5   : > { %v4879_v17 = vsel %vm4877_vm3, %v4862_v46, %v4731_v15  ;;  %v11293_v15 = vld [vmem:[%s14891_s5 + $0x1a0] ss:$100 sps:$4 sm:$0xff]  }
 0x3f6   : > { %5265 = vperm.xlu0 %10833, %v5199_v21   ;;  %5260 = vperm.xlu1 %10834, %v5198_v48   ;;  %v4896_v51 = vsel %vm4894_vm4, %v4879_v17, %v4755_v32  ;;  %v4898_v21 = vsel %vm4894_vm4, %v4881_v55, %v4757_v2  ;;  %v11295_v48 = vld [vmem:[%s14891_s5 + $0x1a4] ss:$100 sps:$4 sm:$0xff]   ;;  %v11331_v55 = vld [vmem:[%s14891_s5 + $0x4cc] ss:$100 sps:$4 sm:$0xff]  }
 0x3f8   : > { %v12893_v12 = vpop.permute.xlu1 %4760  ;;  %v12895_v34 = vpop.permute.xlu0 %4736 }
 0x3fa   : > { %5275 = vperm.xlu0 %10833, %v5201_v57   ;;  %5270 = vperm.xlu1 %10834, %v5200_v0   ;;  %v11313_v57 = vld [vmem:[%s14891_s5 + $0x1ac] ss:$100 sps:$4 sm:$0xff]  }
 0x3fc   : > { %v12902_v3 = vpop.permute.xlu0 %4758  ;;  %v4735_v24 = vpop.permute.xlu1 %4734 }
 0x3fe   : > { %8498 = vperm.xlu0 %10833, %v8495_v56   ;;  %5280 = vperm.xlu1 %10834, %v5202_v40   ;;  %v4827_v56 = vsel %vm4818_vm0, %v14936_v35, %v12754_v1  ;;  %v11316_v1 = vld [vmem:[%s14891_s5 + $0x274] ss:$100 sps:$4 sm:$0xff]   ;;  %v11328_v35 = vld [vmem:[%s14891_s5 + $0x58c] ss:$100 sps:$4 sm:$0xff]  }
 0x3ff   : > { %v4849_v32 = vsel %vm4843_vm1, %v4827_v56, %v12869_v7 }
 0x400   : > { %v4866_v7 = vsel %vm4860_vm2, %v4849_v32, %v12867_v14  ;;  %v11314_v14 = vld [vmem:[%s14891_s5 + $0x270] ss:$100 sps:$4 sm:$0xff]  }
 0x401   : > { %v4883_v46 = vsel %vm4877_vm3, %v4866_v7, %v4735_v24  ;;  %v11304_v24 = vld [vmem:[%s14891_s5 + $0x334] ss:$100 sps:$4 sm:$0xff]   ;;  %v11340_v7 = vld [vmem:[%s14891_s5 + $0x65c] ss:$100 sps:$4 sm:$0xff]  }
 0x410   : > { %v4805_v52 = vpop.permute.xlu1 %4804  ;;  %v4781_v23 = vpop.permute.xlu0 %4780 }
 0x411   : > { %v4915_v0 = vsel %vm4911_vm5, %v4898_v21, %v4781_v23  ;;  %v14937_v23 = vpack.c.bf16 %v12438_v45, %v12434_v41 }
 0x412   : > { %v12975_v43 = vsel %vm4928_vm6, %v4915_v0, %v4805_v52  ;;  %v11296_v52 = vld [vmem:[%s14891_s5 + $0x268] ss:$100 sps:$4 sm:$0xff]  }
 0x413   : > { %v4830_v17 = vsel %vm4818_vm0, %v14937_v23, %v12820_v20  ;;  %v11302_v20 = vld [vmem:[%s14891_s5 + $0x330] ss:$100 sps:$4 sm:$0xff]  }
 0x414   : > { %v4803_v27 = vpop.permute.xlu0 %4802  ;;  %v4779_v39 = vpop.permute.xlu1 %4778  ;;  %v4851_v37 = vsel %vm4843_vm1, %v4830_v17, %v12853_v25  ;;  %v11355_v23 = vld [vmem:[%s14891_s5 + $0x2c] ss:$100 sps:$4 sm:$0xff]  }
 0x415   : > { %v4913_v22 = vsel %vm4911_vm5, %v4896_v51, %v4779_v39  ;;  %v11320_v51 = vld [vmem:[%s14891_s5 + $0x338] ss:$100 sps:$4 sm:$0xff]   ;;  %v4868_v25 = vsel %vm4860_vm2, %v4851_v37, %v12851_v5 }
 0x416   : > { %v12924_v60 = vsel %vm4928_vm6, %v4913_v22, %v4803_v27  ;;  %v4900_v27 = vsel %vm4894_vm4, %v4883_v46, %v12902_v3  ;;  %v11310_v3 = vld [vmem:[%s14891_s5 + $0x3fc] ss:$100 sps:$4 sm:$0xff]   ;;  %v11325_v22 = vld [vmem:[%s14891_s5 + $0x404] ss:$100 sps:$4 sm:$0xff]  }
 0x417   : > { %6474 = vmatmul.mubr.bf16.vlgmr.msra.gmra.mrb[116].mxu1 %v12924_v60  ;;  %6587 = vmatmul.mubr.bf16.vlgmr.msra.gmra.mrb[136].mxu0 %v12924_v60 }
 0x418   : > { %v12935_v63 = vpop.permute.xlu0 %4762  ;;  %v12937_v61 = vpop.permute.xlu1 %4738  ;;  %9853 = vmatprep.mubr.msk.bf16.mxu1 %vm4818_vm0, %v12752_v13  ;;  %9861 = vmatprep.mubr.msk.bf16.mxu0 %vm4818_vm0, %v12752_v13 }
 0x419   : > { %6668 = vmatpush1.bf16.msra.mxu1 %v11287_v38  ;;  %6781 = vmatpush1.bf16.msra.mxu0 %v11299_v29  ;;  %v4885_v38 = vsel %vm4877_vm3, %v4868_v25, %v12895_v34  ;;  %v11323_v34 = vld [vmem:[%s14891_s5 + $0x400] ss:$100 sps:$4 sm:$0xff]  }
 0x41a   : > { %6669 = vmatprep.subr.bf16.mxu1 %v11292_v11  ;;  %6782 = vmatprep.subr.bf16.mxu0 %v11307_v42  ;;  %v4902_v11 = vsel %vm4894_vm4, %v4885_v38, %v12893_v12  ;;  %v11319_v42 = vld [vmem:[%s14891_s5 + $0x4c4] ss:$100 sps:$4 sm:$0xff]  }
 0x41b   : > { %v11317_v12 = vld [vmem:[%s14891_s5 + $0x4c0] ss:$100 sps:$4 sm:$0xff]  }
 0x41c   : > { %v12962_v40 = vpop.permute.xlu0 %4692  ;;  %v12964_v2 = vpop.permute.xlu1 %4668 }
 0x41d   : > { %6670 = vmatpush1.bf16.msra.mxu1 %v11290_v49  ;;  %6783 = vmatpush1.bf16.msra.mxu0 %v11305_v6 }
 0x41e   : > { %6671 = vmatprep.subr.bf16.mxu1 %v11295_v48  ;;  %6784 = vmatprep.subr.bf16.mxu0 %v11313_v57  ;;  %v4853_v48 = vsel %vm4843_vm1, %v12768_v44, %v12879_v18  ;;  %v11329_v57 = vld [vmem:[%s14891_s5 + $0x4c8] ss:$100 sps:$4 sm:$0xff]   ;;  %v11334_v44 = vld [vmem:[%s14891_s5 + $0x594] ss:$100 sps:$4 sm:$0xff]  }
 0x41f   : > { %6484 = vmatmul.mubr.bf16.gmra.mrb[120].mxu1 %v12975_v43  ;;  %6597 = vmatmul.mubr.bf16.gmra.mrb[140].mxu0 %v12975_v43  ;;  %v4870_v18 = vsel %vm4860_vm2, %v4853_v48, %v12877_v58  ;;  %v11332_v58 = vld [vmem:[%s14891_s5 + $0x590] ss:$100 sps:$4 sm:$0xff]  }
 0x420   : > { %v4809_v26 = vpop.permute.xlu1 %4808  ;;  %v4785_v4 = vpop.permute.xlu0 %4784  ;;  %9854 = vmatprep.mubr.msk.bf16.mxu1 %vm4818_vm0, %v12774_v62  ;;  %9862 = vmatprep.mubr.msk.bf16.mxu0 %vm4818_vm0, %v12774_v62 }
 0x421   : > { %6672 = vmatpush1.bf16.msra.mxu1 %v11293_v15  ;;  %6785 = vmatpush1.bf16.msra.mxu0 %v11311_v30  ;;  %v4919_v49 = vsel %vm4911_vm5, %v4902_v11, %v4785_v4  ;;  %v4887_v15 = vsel %vm4877_vm3, %v4870_v18, %v12937_v61  ;;  %v11326_v30 = vld [vmem:[%s14891_s5 + $0x588] ss:$100 sps:$4 sm:$0xff]   ;;  %v11337_v61 = vld [vmem:[%s14891_s5 + $0x654] ss:$100 sps:$4 sm:$0xff]  }
 0x422   : > { %6673 = vmatprep.subr.bf16.mxu1 %v11298_v50  ;;  %6786 = vmatprep.subr.bf16.mxu0 %v11316_v1  ;;  %v13066_v0 = vsel %vm4928_vm6, %v4919_v49, %v4809_v26  ;;  %v14938_v50 = vpack.c.bf16 %v12456_v59, %v12450_v54  ;;  %v4904_v4 = vsel %vm4894_vm4, %v4887_v15, %v12935_v63 }
 0x424   : > { %v4807_v19 = vpop.permute.xlu0 %4806  ;;  %v4783_v41 = vpop.permute.xlu1 %4782  ;;  %v4836_v1 = vsel %vm4818_vm0, %v14938_v50, %v12964_v2  ;;  %v11335_v2 = vld [vmem:[%s14891_s5 + $0x650] ss:$100 sps:$4 sm:$0xff]  }
 0x425   : > { %v4917_v45 = vsel %vm4911_vm5, %v4900_v27, %v4783_v41  ;;  %6674 = vmatpush1.bf16.msra.mxu1 %v11296_v52  ;;  %6787 = vmatpush1.bf16.msra.mxu0 %v11314_v14  ;;  %v4855_v54 = vsel %vm4843_vm1, %v4836_v1, %v12962_v40  ;;  %v11338_v52 = vld [vmem:[%s14891_s5 + $0x658] ss:$100 sps:$4 sm:$0xff]   ;;  %v11343_v40 = vld [vmem:[%s14891_s5 + $0x24] ss:$100 sps:$4 sm:$0xff]   ;;  %v14939_v27 = vpack.c.bf16 %v12485_v16, %v12473_v8  ;;  %v11346_v50 = vld [vmem:[%s14891_s5 + $0xec] ss:$100 sps:$4 sm:$0xff]  }
 0x426   : > { %v13023_v39 = vsel %vm4928_vm6, %v4917_v45, %v4807_v19  ;;  %6675 = vmatprep.subr.bf16.mxu1 %v11304_v24  ;;  %6788 = vmatprep.subr.bf16.mxu0 %v11322_v31  ;;  %v11361_v1 = vld [vmem:[%s14891_s5 + $0xf4] ss:$100 sps:$4 sm:$0xff]  }
 0x427   : > { %6494 = vmatmul.mubr.bf16.gmra.mrb[124].mxu1 %v13023_v39  ;;  %6607 = vmatmul.mubr.bf16.gmra.mrb[144].mxu0 %v13023_v39 }
 0x428   : > { %v13035_v5 = vpop.permute.xlu0 %4740  ;;  %v4717_v29 = vpop.permute.xlu1 %4716  ;;  %9855 = vmatprep.mubr.msk.bf16.mxu1 %vm4818_vm0, %v12772_v53  ;;  %9863 = vmatprep.mubr.msk.bf16.mxu0 %vm4818_vm0, %v12772_v53 }
 0x429   : > { %6676 = vmatpush1.bf16.msra.mxu1 %v11302_v20  ;;  %6789 = vmatpush1.bf16.msra.mxu0 %v11320_v51  ;;  %v4872_v14 = vsel %vm4860_vm2, %v4855_v54, %v4717_v29  ;;  %v11365_v54 = vld [vmem:[%s14891_s5 + $0x1b8] ss:$100 sps:$4 sm:$0xff]  }
 0x42a   : > { %6677 = vmatprep.subr.bf16.mxu1 %v11310_v3  ;;  %6790 = vmatprep.subr.bf16.mxu0 %v11325_v22  ;;  %v4889_v31 = vsel %vm4877_vm3, %v4872_v14, %v13035_v5  ;;  %v11368_v14 = vld [vmem:[%s14891_s5 + $0x280] ss:$100 sps:$4 sm:$0xff]  }
 0x42c   : > { %v4671_v6 = vpop.permute.xlu0 %4670  ;;  %v4765_v21 = vpop.permute.xlu1 %4764 }
 0x42d   : > { %6678 = vmatpush1.bf16.msra.mxu1 %v11308_v33  ;;  %6791 = vmatpush1.bf16.msra.mxu0 %v11323_v34  ;;  %v4906_v37 = vsel %vm4894_vm4, %v4889_v31, %v4765_v21  ;;  %v4839_v41 = vsel %vm4818_vm0, %v14939_v27, %v4671_v6  ;;  %v14940_v33 = vld [vmem:[#allocation3_spill] sm:$0xff]  ;;  %v14941_v34 = vld [vmem:[#allocation2_spill] sm:$0xff]  ;;  %v11377_v27 = vld [vmem:[%s14891_s5 + $0x410] ss:$100 sps:$4 sm:$0xff]  }
 0x42e   : > { %6679 = vmatprep.subr.bf16.mxu1 %v11319_v42  ;;  %6792 = vmatprep.subr.bf16.mxu0 %v11331_v55  ;;  %v14942_v11 = vpack.c.bf16 %v14940_v33, %v14941_v34  ;;  %v11364_v31 = vld [vmem:[%s14891_s5 + $0x40c] ss:$100 sps:$4 sm:$0xff]   ;;  %v11397_v34 = vld [vmem:[%s14891_s5 + $0x34] ss:$100 sps:$4 sm:$0xff]  }
 0x42f   : > { %6504 = vmatmul.mubr.bf16.gmra.mrb[128].mxu1 %v13066_v0  ;;  %6617 = vmatmul.mubr.bf16.gmra.mrb[148].mxu0 %v13066_v0  ;;  %v11392_v33 = vld [vmem:[%s14891_s5 + $0x668] ss:$100 sps:$4 sm:$0xff]  }
 0x430   : > { %v4813_v56 = vpop.permute.xlu1 %4812  ;;  %v4789_v32 = vpop.permute.xlu0 %4788  ;;  %9856 = vmatprep.mubr.msk.bf16.mxu1 %vm4818_vm0, %v12794_v28  ;;  %9864 = vmatprep.mubr.msk.bf16.mxu0 %vm4818_vm0, %v12794_v28 }
 0x431   : > { %6680 = vmatpush1.bf16.msra.mxu1 %v11317_v12  ;;  %6793 = vmatpush1.bf16.msra.mxu0 %v11329_v57  ;;  %v4923_v19 = vsel %vm4911_vm5, %v4906_v37, %v4789_v32  ;;  %v11379_v37 = vld [vmem:[%s14891_s5 + $0x414] ss:$100 sps:$4 sm:$0xff]  }
 0x432   : > { %6681 = vmatprep.subr.bf16.mxu1 %v11328_v35  ;;  %6794 = vmatprep.subr.bf16.mxu0 %v11334_v44  ;;  %v13138_v25 = vsel %vm4928_vm6, %v4923_v19, %v4813_v56  ;;  %v11362_v19 = vld [vmem:[%s14891_s5 + $0x408] ss:$100 sps:$4 sm:$0xff]  }
 0x434   : > { %v4811_v26 = vpop.permute.xlu0 %4810  ;;  %v4787_v46 = vpop.permute.xlu1 %4786 }
 0x435   : > { %v4921_v59 = vsel %vm4911_vm5, %v4904_v4, %v4787_v46  ;;  %6682 = vmatpush1.bf16.msra.mxu1 %v11326_v30  ;;  %6795 = vmatpush1.bf16.msra.mxu0 %v11332_v58  ;;  %v11341_v30 = vld [vmem:[%s14891_s5 + $0x20] ss:$100 sps:$4 sm:$0xff]   ;;  %v11353_v58 = vld [vmem:[%s14891_s5 + $0x28] ss:$100 sps:$4 sm:$0xff]   ;;  %v11347_v46 = vld [vmem:[%s14891_s5 + $0x1b0] ss:$100 sps:$4 sm:$0xff]  }
 0x436   : > { %v13114_v63 = vsel %vm4928_vm6, %v4921_v59, %v4811_v26  ;;  %6683 = vmatprep.subr.bf16.mxu1 %v11337_v61  ;;  %6796 = vmatprep.subr.bf16.mxu0 %v11340_v7  ;;  %v11344_v61 = vld [vmem:[%s14891_s5 + $0xe8] ss:$100 sps:$4 sm:$0xff]   ;;  %v11359_v7 = vld [vmem:[%s14891_s5 + $0xf0] ss:$100 sps:$4 sm:$0xff]   ;;  %v11367_v4 = vld [vmem:[%s14891_s5 + $0x1bc] ss:$100 sps:$4 sm:$0xff]  }
 0x437   : > { %6514 = vmatmul.mubr.bf16.gmra.mrb[132].mxu1 %v13114_v63  ;;  %6627 = vmatmul.mubr.bf16.gmra.mrb[152].mxu0 %v13114_v63  ;;  %v11349_v26 = vld [vmem:[%s14891_s5 + $0x1b4] ss:$100 sps:$4 sm:$0xff]   ;;  %v11352_v59 = vld [vmem:[%s14891_s5 + $0x27c] ss:$100 sps:$4 sm:$0xff]  }
 0x438   : > { %v4719_v17 = vpop.permute.xlu0 %4718  ;;  %9857 = vmatprep.mubr.msk.bf16.mxu1 %vm4818_vm0, %v12792_v9  ;;  %9865 = vmatprep.mubr.msk.bf16.mxu0 %vm4818_vm0, %v12792_v9  ;;  %v4695_v24 = vpop.permute.xlu1 %4694 }
 0x439   : > { %6684 = vmatpush1.bf16.msra.mxu1 %v11335_v2  ;;  %6797 = vmatpush1.bf16.msra.mxu0 %v11338_v52  ;;  %v4857_v51 = vsel %vm4843_vm1, %v4839_v41, %v4695_v24  ;;  %v11370_v2 = vld [vmem:[%s14891_s5 + $0x284] ss:$100 sps:$4 sm:$0xff]   ;;  %v11350_v52 = vld [vmem:[%s14891_s5 + $0x278] ss:$100 sps:$4 sm:$0xff]  }
 0x43a   : > { %6893 = vmatprep.subr.bf16.mxu1 %v11343_v40  ;;  %7006 = vmatprep.subr.bf16.mxu0 %v11355_v23  ;;  %v4874_v3 = vsel %vm4860_vm2, %v4857_v51, %v4719_v17  ;;  %v11358_v40 = vld [vmem:[%s14891_s5 + $0x344] ss:$100 sps:$4 sm:$0xff]   ;;  %v11376_v23 = vld [vmem:[%s14891_s5 + $0x34c] ss:$100 sps:$4 sm:$0xff]   ;;  %v11373_v41 = vld [vmem:[%s14891_s5 + $0x4d4] ss:$100 sps:$4 sm:$0xff]  }
 0x43b   : > { %v11356_v17 = vld [vmem:[%s14891_s5 + $0x340] ss:$100 sps:$4 sm:$0xff]   ;;  %v11374_v24 = vld [vmem:[%s14891_s5 + $0x348] ss:$100 sps:$4 sm:$0xff]   ;;  %v11383_v51 = vld [vmem:[%s14891_s5 + $0x4d8] ss:$100 sps:$4 sm:$0xff]  }
 0x43c   : > { %v4767_v45 = vpop.permute.xlu0 %4766  ;;  %v4743_v20 = vpop.permute.xlu1 %4742 }
 0x43d   : > { %v4891_v8 = vsel %vm4877_vm3, %v4874_v3, %v4743_v20  ;;  %v11371_v20 = vld [vmem:[%s14891_s5 + $0x4d0] ss:$100 sps:$4 sm:$0xff]   ;;  %v11382_v3 = vld [vmem:[%s14891_s5 + $0x59c] ss:$100 sps:$4 sm:$0xff]  }
 0x43e   : > { %v4908_v29 = vsel %vm4894_vm4, %v4891_v8, %v4767_v45  ;;  %v11385_v45 = vld [vmem:[%s14891_s5 + $0x4dc] ss:$100 sps:$4 sm:$0xff]  }
 0x43f   : > { %6524 = vmatmul.mubr.bf16.gmra.mrb[136].mxu1 %v13138_v25  ;;  %6637 = vmatmul.mubr.bf16.gmra.mrb[156].mxu0 %v13138_v25  ;;  %v11386_v8 = vld [vmem:[%s14891_s5 + $0x5a0] ss:$100 sps:$4 sm:$0xff]  }
 0x440   : > { %v4697_v22 = vpop.permute.xlu0 %4696  ;;  %v4673_v38 = vpop.permute.xlu1 %4672  ;;  %9858 = vmatprep.mubr.msk.bf16.mxu1 %vm4818_vm0, %v12818_v10  ;;  %9866 = vmatprep.mubr.msk.bf16.mxu0 %vm4818_vm0, %v12818_v10 }
 0x441   : > { %v4842_v42 = vsel %vm4818_vm0, %v14942_v11, %v4673_v38  ;;  %v11380_v38 = vld [vmem:[%s14891_s5 + $0x598] ss:$100 sps:$4 sm:$0xff]  }
 0x442   : > { %v4859_v21 = vsel %vm4843_vm1, %v4842_v42, %v4697_v22  ;;  %v11388_v22 = vld [vmem:[%s14891_s5 + $0x5a4] ss:$100 sps:$4 sm:$0xff]   ;;  %v11409_v11 = vld [vmem:[%s14891_s5 + $0x3c] ss:$100 sps:$4 sm:$0xff]   ;;  %v11395_v42 = vld [vmem:[%s14891_s5 + $0x30] ss:$100 sps:$4 sm:$0xff]  }
 0x444   : > { %v4815_v16 = vpop.permute.xlu0 %4814  ;;  %v4791_v5 = vpop.permute.xlu1 %4790 }
 0x445   : > { %v4925_v55 = vsel %vm4911_vm5, %v4908_v29, %v4791_v5  ;;  %v11394_v5 = vld [vmem:[%s14891_s5 + $0x66c] ss:$100 sps:$4 sm:$0xff]   ;;  %v11389_v29 = vld [vmem:[%s14891_s5 + $0x660] ss:$100 sps:$4 sm:$0xff]  }
 0x446   : > { %v13155_v49 = vsel %vm4928_vm6, %v4925_v55, %v4815_v16  ;;  %v11391_v16 = vld [vmem:[%s14891_s5 + $0x664] ss:$100 sps:$4 sm:$0xff]   ;;  %v11407_v55 = vld [vmem:[%s14891_s5 + $0x38] ss:$100 sps:$4 sm:$0xff]  }
 0x447   : > { %6534 = vmatmul.mubr.bf16.gmra.mrb[140].mxu1 %v13155_v49  ;;  %6647 = vmatmul.mubr.bf16.gmra.mrb[160].mxu0 %v13155_v49 }
 0x448   : > { %v4745_v6 = vpop.permute.xlu0 %4744  ;;  %v4721_v48 = vpop.permute.xlu1 %4720  ;;  %9859 = vmatprep.mubr.msk.bf16.mxu1 %vm4818_vm0, %v12806_v36  ;;  %9867 = vmatprep.mubr.msk.bf16.mxu0 %vm4818_vm0, %v12806_v36 }
 0x449   : > { %v4876_v12 = vsel %vm4860_vm2, %v4859_v21, %v4721_v48  ;;  %v11415_v21 = vld [vmem:[%s14891_s5 + $0x104] ss:$100 sps:$4 sm:$0xff]   ;;  %v11398_v48 = vld [vmem:[%s14891_s5 + $0xf8] ss:$100 sps:$4 sm:$0xff]  }
 0x44a   : > { %v4893_v57 = vsel %vm4877_vm3, %v4876_v12, %v4745_v6  ;;  %v11400_v6 = vld [vmem:[%s14891_s5 + $0xfc] ss:$100 sps:$4 sm:$0xff]  }
 0x44b   : > { %v11413_v12 = vld [vmem:[%s14891_s5 + $0x100] ss:$100 sps:$4 sm:$0xff]  }
 0x44c   : > { %v4769_v35 = vpop.permute.xlu1 %4768  ;;  %v4793_v44 = vpop.permute.xlu0 %4792 }
 0x44d   : > { %v4910_v18 = vsel %vm4894_vm4, %v4893_v57, %v4769_v35  ;;  %v11403_v57 = vld [vmem:[%s14891_s5 + $0x1c4] ss:$100 sps:$4 sm:$0xff]   ;;  %v11421_v35 = vld [vmem:[%s14891_s5 + $0x1cc] ss:$100 sps:$4 sm:$0xff]  }
 0x44e   : > { %v4927_v56 = vsel %vm4911_vm5, %v4910_v18, %v4793_v44  ;;  %v11401_v44 = vld [vmem:[%s14891_s5 + $0x1c0] ss:$100 sps:$4 sm:$0xff]   ;;  %v11419_v18 = vld [vmem:[%s14891_s5 + $0x1c8] ss:$100 sps:$4 sm:$0xff]  }
 0x450   : > { %v4817_v32 = vpop.permute.xlu1 %4816 }
 0x451   : > { %v13169_v15 = vsel %vm4928_vm6, %v4927_v56, %v4817_v32  ;;  %v11406_v56 = vld [vmem:[%s14891_s5 + $0x28c] ss:$100 sps:$4 sm:$0xff]   ;;  %v11424_v32 = vld [vmem:[%s14891_s5 + $0x294] ss:$100 sps:$4 sm:$0xff]  }
 0x452   : > { %6544 = vmatmul.mubr.bf16.gmra.mrb[144].mxu1 %v13169_v15  ;;  %6657 = vmatmul.mubr.bf16.gmra.mrb[164].mxu0 %v13169_v15 }
 0x453   : > { %9868 = vmatprep.mubr.msk.bf16.mxu1 %vm4818_vm0, %v12756_v47  ;;  %9876 = vmatprep.mubr.msk.bf16.mxu0 %vm4818_vm0, %v12756_v47 }
 0x45a   : > { %6700 = vmatmul.mubr.bf16.vlgmr.msra.gmra.mrb[148].mxu1 %v12924_v60  ;;  %6813 = vmatmul.mubr.bf16.vlgmr.msra.gmra.mrb[168].mxu0 %v12924_v60 }
 0x45b   : > { %9869 = vmatprep.mubr.msk.bf16.mxu1 %vm4818_vm0, %v12752_v13  ;;  %9877 = vmatprep.mubr.msk.bf16.mxu0 %vm4818_vm0, %v12752_v13 }
 0x45c   : > { %6894 = vmatpush1.bf16.msra.mxu1 %v11341_v30  ;;  %7007 = vmatpush1.bf16.msra.mxu0 %v11353_v58  ;;  %v11404_v30 = vld [vmem:[%s14891_s5 + $0x288] ss:$100 sps:$4 sm:$0xff]   ;;  %v11422_v58 = vld [vmem:[%s14891_s5 + $0x290] ss:$100 sps:$4 sm:$0xff]  }
 0x45d   : > { %6895 = vmatprep.subr.bf16.mxu1 %v11346_v50  ;;  %7008 = vmatprep.subr.bf16.mxu0 %v11361_v1  ;;  %v11412_v50 = vld [vmem:[%s14891_s5 + $0x354] ss:$100 sps:$4 sm:$0xff]   ;;  %v11430_v1 = vld [vmem:[%s14891_s5 + $0x35c] ss:$100 sps:$4 sm:$0xff]  }
 0x460   : > { %6896 = vmatpush1.bf16.msra.mxu1 %v11344_v61  ;;  %7009 = vmatpush1.bf16.msra.mxu0 %v11359_v7  ;;  %v11410_v61 = vld [vmem:[%s14891_s5 + $0x350] ss:$100 sps:$4 sm:$0xff]   ;;  %v11428_v7 = vld [vmem:[%s14891_s5 + $0x358] ss:$100 sps:$4 sm:$0xff]  }
 0x461   : > { %6897 = vmatprep.subr.bf16.mxu1 %v11349_v26  ;;  %7010 = vmatprep.subr.bf16.mxu0 %v11367_v4  ;;  %v11418_v26 = vld [vmem:[%s14891_s5 + $0x41c] ss:$100 sps:$4 sm:$0xff]   ;;  %v11433_v4 = vld [vmem:[%s14891_s5 + $0x424] ss:$100 sps:$4 sm:$0xff]  }
 0x462   : > { %6710 = vmatmul.mubr.bf16.gmra.mrb[152].mxu1 %v12975_v43  ;;  %6823 = vmatmul.mubr.bf16.gmra.mrb[172].mxu0 %v12975_v43 }
 0x463   : > { %9870 = vmatprep.mubr.msk.bf16.mxu1 %vm4818_vm0, %v12774_v62  ;;  %9878 = vmatprep.mubr.msk.bf16.mxu0 %vm4818_vm0, %v12774_v62 }
 0x464   : > { %6898 = vmatpush1.bf16.msra.mxu1 %v11347_v46  ;;  %7011 = vmatpush1.bf16.msra.mxu0 %v11365_v54  ;;  %v11416_v46 = vld [vmem:[%s14891_s5 + $0x418] ss:$100 sps:$4 sm:$0xff]   ;;  %v11431_v54 = vld [vmem:[%s14891_s5 + $0x420] ss:$100 sps:$4 sm:$0xff]  }
 0x465   : > { %6899 = vmatprep.subr.bf16.mxu1 %v11352_v59  ;;  %7012 = vmatprep.subr.bf16.mxu0 %v11370_v2  ;;  %v11427_v59 = vld [vmem:[%s14891_s5 + $0x4e4] ss:$100 sps:$4 sm:$0xff]   ;;  %v11439_v2 = vld [vmem:[%s14891_s5 + $0x4ec] ss:$100 sps:$4 sm:$0xff]  }
 0x468   : > { %6900 = vmatpush1.bf16.msra.mxu1 %v11350_v52  ;;  %7013 = vmatpush1.bf16.msra.mxu0 %v11368_v14  ;;  %v11425_v52 = vld [vmem:[%s14891_s5 + $0x4e0] ss:$100 sps:$4 sm:$0xff]   ;;  %v11437_v14 = vld [vmem:[%s14891_s5 + $0x4e8] ss:$100 sps:$4 sm:$0xff]  }
 0x469   : > { %6901 = vmatprep.subr.bf16.mxu1 %v11358_v40  ;;  %7014 = vmatprep.subr.bf16.mxu0 %v11376_v23  ;;  %v11436_v40 = vld [vmem:[%s14891_s5 + $0x5ac] ss:$100 sps:$4 sm:$0xff]   ;;  %v11442_v23 = vld [vmem:[%s14891_s5 + $0x5b4] ss:$100 sps:$4 sm:$0xff]  }
 0x46a   : > { %6720 = vmatmul.mubr.bf16.gmra.mrb[156].mxu1 %v13023_v39  ;;  %6833 = vmatmul.mubr.bf16.gmra.mrb[176].mxu0 %v13023_v39 }
 0x46b   : > { %9871 = vmatprep.mubr.msk.bf16.mxu1 %vm4818_vm0, %v12772_v53  ;;  %9879 = vmatprep.mubr.msk.bf16.mxu0 %vm4818_vm0, %v12772_v53 }
 0x46c   : > { %6902 = vmatpush1.bf16.msra.mxu1 %v11356_v17  ;;  %7015 = vmatpush1.bf16.msra.mxu0 %v11374_v24  ;;  %v11434_v17 = vld [vmem:[%s14891_s5 + $0x5a8] ss:$100 sps:$4 sm:$0xff]   ;;  %v11440_v24 = vld [vmem:[%s14891_s5 + $0x5b0] ss:$100 sps:$4 sm:$0xff]  }
 0x46d   : > { %6903 = vmatprep.subr.bf16.mxu1 %v11364_v31  ;;  %7016 = vmatprep.subr.bf16.mxu0 %v11379_v37  ;;  %v11445_v31 = vld [vmem:[%s14891_s5 + $0x674] ss:$100 sps:$4 sm:$0xff]   ;;  %v11448_v37 = vld [vmem:[%s14891_s5 + $0x67c] ss:$100 sps:$4 sm:$0xff]  }
 0x470   : > { %6904 = vmatpush1.bf16.msra.mxu1 %v11362_v19  ;;  %7017 = vmatpush1.bf16.msra.mxu0 %v11377_v27  ;;  %v11443_v19 = vld [vmem:[%s14891_s5 + $0x670] ss:$100 sps:$4 sm:$0xff]   ;;  %v11446_v27 = vld [vmem:[%s14891_s5 + $0x678] ss:$100 sps:$4 sm:$0xff]  }
 0x471   : > { %6905 = vmatprep.subr.bf16.mxu1 %v11373_v41  ;;  %7018 = vmatprep.subr.bf16.mxu0 %v11385_v45  ;;  %v11451_v41 = vld [vmem:[%s14891_s5 + $0x44] ss:$100 sps:$4 sm:$0xff]   ;;  %v11463_v45 = vld [vmem:[%s14891_s5 + $0x4c] ss:$100 sps:$4 sm:$0xff]  }
 0x472   : > { %6730 = vmatmul.mubr.bf16.gmra.mrb[160].mxu1 %v13066_v0  ;;  %6843 = vmatmul.mubr.bf16.gmra.mrb[180].mxu0 %v13066_v0 }
 0x473   : > { %9872 = vmatprep.mubr.msk.bf16.mxu1 %vm4818_vm0, %v12794_v28  ;;  %9880 = vmatprep.mubr.msk.bf16.mxu0 %vm4818_vm0, %v12794_v28 }
 0x474   : > { %6906 = vmatpush1.bf16.msra.mxu1 %v11371_v20  ;;  %7019 = vmatpush1.bf16.msra.mxu0 %v11383_v51  ;;  %v11449_v20 = vld [vmem:[%s14891_s5 + $0x40] ss:$100 sps:$4 sm:$0xff]   ;;  %v11461_v51 = vld [vmem:[%s14891_s5 + $0x48] ss:$100 sps:$4 sm:$0xff]  }
 0x475   : > { %6907 = vmatprep.subr.bf16.mxu1 %v11382_v3  ;;  %7020 = vmatprep.subr.bf16.mxu0 %v11388_v22  ;;  %v11454_v3 = vld [vmem:[%s14891_s5 + $0x10c] ss:$100 sps:$4 sm:$0xff]   ;;  %v11469_v22 = vld [vmem:[%s14891_s5 + $0x114] ss:$100 sps:$4 sm:$0xff]  }
 0x478   : > { %6908 = vmatpush1.bf16.msra.mxu1 %v11380_v38  ;;  %7021 = vmatpush1.bf16.msra.mxu0 %v11386_v8  ;;  %v11452_v38 = vld [vmem:[%s14891_s5 + $0x108] ss:$100 sps:$4 sm:$0xff]   ;;  %v11467_v8 = vld [vmem:[%s14891_s5 + $0x110] ss:$100 sps:$4 sm:$0xff]  }
 0x479   : > { %6909 = vmatprep.subr.bf16.mxu1 %v11391_v16  ;;  %7022 = vmatprep.subr.bf16.mxu0 %v11394_v5  ;;  %v11457_v16 = vld [vmem:[%s14891_s5 + $0x1d4] ss:$100 sps:$4 sm:$0xff]   ;;  %v11472_v5 = vld [vmem:[%s14891_s5 + $0x1dc] ss:$100 sps:$4 sm:$0xff]  }
 0x47a   : > { %6740 = vmatmul.mubr.bf16.gmra.mrb[164].mxu1 %v13114_v63  ;;  %6853 = vmatmul.mubr.bf16.gmra.mrb[184].mxu0 %v13114_v63 }
 0x47b   : > { %9873 = vmatprep.mubr.msk.bf16.mxu1 %vm4818_vm0, %v12792_v9  ;;  %9881 = vmatprep.mubr.msk.bf16.mxu0 %vm4818_vm0, %v12792_v9 }
 0x47c   : > { %6910 = vmatpush1.bf16.msra.mxu1 %v11389_v29  ;;  %7023 = vmatpush1.bf16.msra.mxu0 %v11392_v33  ;;  %v11455_v29 = vld [vmem:[%s14891_s5 + $0x1d0] ss:$100 sps:$4 sm:$0xff]   ;;  %v11470_v33 = vld [vmem:[%s14891_s5 + $0x1d8] ss:$100 sps:$4 sm:$0xff]  }
 0x47d   : > { %7119 = vmatprep.subr.bf16.mxu1 %v11397_v34  ;;  %7232 = vmatprep.subr.bf16.mxu0 %v11409_v11  ;;  %v11460_v34 = vld [vmem:[%s14891_s5 + $0x29c] ss:$100 sps:$4 sm:$0xff]   ;;  %v11478_v11 = vld [vmem:[%s14891_s5 + $0x2a4] ss:$100 sps:$4 sm:$0xff]  }
 0x482   : > { %6750 = vmatmul.mubr.bf16.gmra.mrb[168].mxu1 %v13138_v25  ;;  %6863 = vmatmul.mubr.bf16.gmra.mrb[188].mxu0 %v13138_v25 }
 0x483   : > { %9874 = vmatprep.mubr.msk.bf16.mxu1 %vm4818_vm0, %v12818_v10  ;;  %9882 = vmatprep.mubr.msk.bf16.mxu0 %vm4818_vm0, %v12818_v10 }
 0x48a   : > { %6760 = vmatmul.mubr.bf16.gmra.mrb[172].mxu1 %v13155_v49  ;;  %6873 = vmatmul.mubr.bf16.gmra.mrb[192].mxu0 %v13155_v49 }
 0x48b   : > { %9875 = vmatprep.mubr.msk.bf16.mxu1 %vm4818_vm0, %v12806_v36  ;;  %9883 = vmatprep.mubr.msk.bf16.mxu0 %vm4818_vm0, %v12806_v36 }
 0x492   : > { %6770 = vmatmul.mubr.bf16.gmra.mrb[176].mxu1 %v13169_v15  ;;  %6883 = vmatmul.mubr.bf16.gmra.mrb[196].mxu0 %v13169_v15 }
 0x493   : > { %9884 = vmatprep.mubr.msk.bf16.mxu1 %vm4818_vm0, %v12756_v47  ;;  %9892 = vmatprep.mubr.msk.bf16.mxu0 %vm4818_vm0, %v12756_v47 }
 0x49a   : > { %6926 = vmatmul.mubr.bf16.vlgmr.msra.gmra.mrb[180].mxu1 %v12924_v60  ;;  %7039 = vmatmul.mubr.bf16.vlgmr.msra.gmra.mrb[200].mxu0 %v12924_v60 }
 0x49b   : > { %9885 = vmatprep.mubr.msk.bf16.mxu1 %vm4818_vm0, %v12752_v13  ;;  %9893 = vmatprep.mubr.msk.bf16.mxu0 %vm4818_vm0, %v12752_v13 }
 0x49c   : > { %7120 = vmatpush1.bf16.msra.mxu1 %v11395_v42  ;;  %7233 = vmatpush1.bf16.msra.mxu0 %v11407_v55  ;;  %v11458_v42 = vld [vmem:[%s14891_s5 + $0x298] ss:$100 sps:$4 sm:$0xff]   ;;  %v11476_v55 = vld [vmem:[%s14891_s5 + $0x2a0] ss:$100 sps:$4 sm:$0xff]  }
 0x49d   : > { %7121 = vmatprep.subr.bf16.mxu1 %v11400_v6  ;;  %7234 = vmatprep.subr.bf16.mxu0 %v11415_v21  ;;  %v11466_v6 = vld [vmem:[%s14891_s5 + $0x364] ss:$100 sps:$4 sm:$0xff]   ;;  %v11484_v21 = vld [vmem:[%s14891_s5 + $0x36c] ss:$100 sps:$4 sm:$0xff]  }
 0x4a0   : > { %7122 = vmatpush1.bf16.msra.mxu1 %v11398_v48  ;;  %7235 = vmatpush1.bf16.msra.mxu0 %v11413_v12  ;;  %v11464_v48 = vld [vmem:[%s14891_s5 + $0x360] ss:$100 sps:$4 sm:$0xff]   ;;  %v11482_v12 = vld [vmem:[%s14891_s5 + $0x368] ss:$100 sps:$4 sm:$0xff]  }
 0x4a1   : > { %7123 = vmatprep.subr.bf16.mxu1 %v11403_v57  ;;  %7236 = vmatprep.subr.bf16.mxu0 %v11421_v35  ;;  %v13555_v57 = vpop.permute.xlu0 %5205  ;;  %v13557_v35 = vpop.permute.xlu1 %5210 }
 0x4a2   : > { %6936 = vmatmul.mubr.bf16.gmra.mrb[184].mxu1 %v12975_v43  ;;  %7049 = vmatmul.mubr.bf16.gmra.mrb[204].mxu0 %v12975_v43  ;;  %14943 = vst [vmem:[#allocation3_spill] sm:$0xff] %v13555_v57 }
 0x4a3   : > { %9886 = vmatprep.mubr.msk.bf16.mxu1 %vm4818_vm0, %v12774_v62  ;;  %9894 = vmatprep.mubr.msk.bf16.mxu0 %vm4818_vm0, %v12774_v62 }
 0x4a4   : > { %7124 = vmatpush1.bf16.msra.mxu1 %v11401_v44  ;;  %7237 = vmatpush1.bf16.msra.mxu0 %v11419_v18  ;;  %v11475_v44 = vld [vmem:[%s14891_s5 + $0x42c] ss:$100 sps:$4 sm:$0xff]   ;;  %v11487_v18 = vld [vmem:[%s14891_s5 + $0x434] ss:$100 sps:$4 sm:$0xff]  }
 0x4a5   : > { %7125 = vmatprep.subr.bf16.mxu1 %v11406_v56  ;;  %7238 = vmatprep.subr.bf16.mxu0 %v11424_v32 }
 0x4a8   : > { %7126 = vmatpush1.bf16.msra.mxu1 %v11404_v30  ;;  %7239 = vmatpush1.bf16.msra.mxu0 %v11422_v58 }
 0x4a9   : > { %7127 = vmatprep.subr.bf16.mxu1 %v11412_v50  ;;  %7240 = vmatprep.subr.bf16.mxu0 %v11430_v1 }
 0x4aa   : > { %6946 = vmatmul.mubr.bf16.gmra.mrb[188].mxu1 %v13023_v39  ;;  %7059 = vmatmul.mubr.bf16.gmra.mrb[208].mxu0 %v13023_v39 }
 0x4ab   : > { %9887 = vmatprep.mubr.msk.bf16.mxu1 %vm4818_vm0, %v12772_v53  ;;  %9895 = vmatprep.mubr.msk.bf16.mxu0 %vm4818_vm0, %v12772_v53 }
 0x4ac   : > { %7128 = vmatpush1.bf16.msra.mxu1 %v11410_v61  ;;  %7241 = vmatpush1.bf16.msra.mxu0 %v11428_v7 }
 0x4ad   : > { %7129 = vmatprep.subr.bf16.mxu1 %v11418_v26  ;;  %7242 = vmatprep.subr.bf16.mxu0 %v11433_v4 }
 0x4b0   : > { %7130 = vmatpush1.bf16.msra.mxu1 %v11416_v46  ;;  %7243 = vmatpush1.bf16.msra.mxu0 %v11431_v54  ;;  %v11473_v46 = vld [vmem:[%s14891_s5 + $0x428] ss:$100 sps:$4 sm:$0xff]   ;;  %v11485_v54 = vld [vmem:[%s14891_s5 + $0x430] ss:$100 sps:$4 sm:$0xff]  }
 0x4b1   : > { %7131 = vmatprep.subr.bf16.mxu1 %v11427_v59  ;;  %7244 = vmatprep.subr.bf16.mxu0 %v11439_v2 }
 0x4b2   : > { %6956 = vmatmul.mubr.bf16.gmra.mrb[192].mxu1 %v13066_v0  ;;  %7069 = vmatmul.mubr.bf16.gmra.mrb[212].mxu0 %v13066_v0 }
 0x4b3   : > { %9888 = vmatprep.mubr.msk.bf16.mxu1 %vm4818_vm0, %v12794_v28  ;;  %9896 = vmatprep.mubr.msk.bf16.mxu0 %vm4818_vm0, %v12794_v28 }
 0x4b4   : > { %7132 = vmatpush1.bf16.msra.mxu1 %v11425_v52  ;;  %7245 = vmatpush1.bf16.msra.mxu0 %v11437_v14 }
 0x4b5   : > { %7133 = vmatprep.subr.bf16.mxu1 %v11436_v40  ;;  %7246 = vmatprep.subr.bf16.mxu0 %v11442_v23  ;;  %v11481_v40 = vld [vmem:[%s14891_s5 + $0x4f4] ss:$100 sps:$4 sm:$0xff]   ;;  %v11493_v23 = vld [vmem:[%s14891_s5 + $0x4fc] ss:$100 sps:$4 sm:$0xff]  }
 0x4b8   : > { %7134 = vmatpush1.bf16.msra.mxu1 %v11434_v17  ;;  %7247 = vmatpush1.bf16.msra.mxu0 %v11440_v24 }
 0x4b9   : > { %7135 = vmatprep.subr.bf16.mxu1 %v11445_v31  ;;  %7248 = vmatprep.subr.bf16.mxu0 %v11448_v37 }
 0x4ba   : > { %6966 = vmatmul.mubr.bf16.gmra.mrb[196].mxu1 %v13114_v63  ;;  %7079 = vmatmul.mubr.bf16.gmra.mrb[216].mxu0 %v13114_v63 }
 0x4bb   : > { %9889 = vmatprep.mubr.msk.bf16.mxu1 %vm4818_vm0, %v12792_v9  ;;  %9897 = vmatprep.mubr.msk.bf16.mxu0 %vm4818_vm0, %v12792_v9 }
 0x4bc   : > { %7136 = vmatpush1.bf16.msra.mxu1 %v11443_v19  ;;  %7249 = vmatpush1.bf16.msra.mxu0 %v11446_v27 }
 0x4bd   : > { %7345 = vmatprep.subr.bf16.mxu1 %v11451_v41  ;;  %7458 = vmatprep.subr.bf16.mxu0 %v11463_v45  ;;  %v11479_v41 = vld [vmem:[%s14891_s5 + $0x4f0] ss:$100 sps:$4 sm:$0xff]  }
 0x4c2   : > { %6976 = vmatmul.mubr.bf16.gmra.mrb[200].mxu1 %v13138_v25  ;;  %7089 = vmatmul.mubr.bf16.gmra.mrb[220].mxu0 %v13138_v25 }
 0x4c3   : > { %9890 = vmatprep.mubr.msk.bf16.mxu1 %vm4818_vm0, %v12818_v10  ;;  %9898 = vmatprep.mubr.msk.bf16.mxu0 %vm4818_vm0, %v12818_v10 }
 0x4ca   : > { %6986 = vmatmul.mubr.bf16.gmra.mrb[204].mxu1 %v13155_v49  ;;  %7099 = vmatmul.mubr.bf16.gmra.mrb[224].mxu0 %v13155_v49 }
 0x4cb   : > { %9891 = vmatprep.mubr.msk.bf16.mxu1 %vm4818_vm0, %v12806_v36  ;;  %9899 = vmatprep.mubr.msk.bf16.mxu0 %vm4818_vm0, %v12806_v36 }
 0x4d2   : > { %6996 = vmatmul.mubr.bf16.gmra.mrb[208].mxu1 %v13169_v15  ;;  %7109 = vmatmul.mubr.bf16.gmra.mrb[228].mxu0 %v13169_v15 }
 0x4d3   : > { %9900 = vmatprep.mubr.msk.bf16.mxu1 %vm4818_vm0, %v12756_v47  ;;  %9908 = vmatprep.mubr.msk.bf16.mxu0 %vm4818_vm0, %v12756_v47 }
 0x4da   : > { %7152 = vmatmul.mubr.bf16.vlgmr.msra.gmra.mrb[212].mxu1 %v12924_v60  ;;  %7265 = vmatmul.mubr.bf16.vlgmr.msra.gmra.mrb[232].mxu0 %v12924_v60 }
 0x4db   : > { %9901 = vmatprep.mubr.msk.bf16.mxu1 %vm4818_vm0, %v12752_v13  ;;  %9909 = vmatprep.mubr.msk.bf16.mxu0 %vm4818_vm0, %v12752_v13 }
 0x4dc   : > { %7346 = vmatpush1.bf16.msra.mxu1 %v11449_v20  ;;  %7459 = vmatpush1.bf16.msra.mxu0 %v11461_v51 }
 0x4dd   : > { %7347 = vmatprep.subr.bf16.mxu1 %v11454_v3  ;;  %7460 = vmatprep.subr.bf16.mxu0 %v11469_v22  ;;  %v11491_v22 = vld [vmem:[%s14891_s5 + $0x4f8] ss:$100 sps:$4 sm:$0xff]  }
 0x4e0   : > { %7348 = vmatpush1.bf16.msra.mxu1 %v11452_v38  ;;  %7461 = vmatpush1.bf16.msra.mxu0 %v11467_v8  ;;  %v13597_v38 = vpop.permute.xlu0 %5215  ;;  %v13599_v8 = vpop.permute.xlu1 %5220 }
 0x4e1   : > { %7349 = vmatprep.subr.bf16.mxu1 %v11457_v16  ;;  %7462 = vmatprep.subr.bf16.mxu0 %v11472_v5 }
 0x4e2   : > { %7162 = vmatmul.mubr.bf16.gmra.mrb[216].mxu1 %v12975_v43  ;;  %7275 = vmatmul.mubr.bf16.gmra.mrb[236].mxu0 %v12975_v43 }
 0x4e3   : > { %9902 = vmatprep.mubr.msk.bf16.mxu1 %vm4818_vm0, %v12774_v62  ;;  %9910 = vmatprep.mubr.msk.bf16.mxu0 %vm4818_vm0, %v12774_v62 }
 0x4e4   : > { %7350 = vmatpush1.bf16.msra.mxu1 %v11455_v29  ;;  %7463 = vmatpush1.bf16.msra.mxu0 %v11470_v33  ;;  %v11490_v29 = vld [vmem:[%s14891_s5 + $0x5bc] ss:$100 sps:$4 sm:$0xff]   ;;  %v11496_v33 = vld [vmem:[%s14891_s5 + $0x5c4] ss:$100 sps:$4 sm:$0xff]  }
 0x4e5   : > { %7351 = vmatprep.subr.bf16.mxu1 %v11460_v34  ;;  %7464 = vmatprep.subr.bf16.mxu0 %v11478_v11 }
 0x4e8   : > { %7352 = vmatpush1.bf16.msra.mxu1 %v11458_v42  ;;  %7465 = vmatpush1.bf16.msra.mxu0 %v11476_v55 }
 0x4e9   : > { %7353 = vmatprep.subr.bf16.mxu1 %v11466_v6  ;;  %7466 = vmatprep.subr.bf16.mxu0 %v11484_v21 }
 0x4ea   : > { %v6475_v56 = vpop.f32.mrb[116].mxu1  ;;  %v6588_v32 = vpop.f32.mrb[136].mxu0  ;;  %7172 = vmatmul.mubr.bf16.gmra.mrb[220].mxu1 %v13023_v39  ;;  %7285 = vmatmul.mubr.bf16.gmra.mrb[240].mxu0 %v13023_v39 }
 0x4eb   : > { %v6476_v30 = vadd.f32 %v6475_v56, %v13555_v57  ;;  %v6589_v58 = vadd.f32 %v6588_v32, %v13555_v57  ;;  %v6477_v50 = vpop.f32.mrb[117].mxu1  ;;  %v6590_v1 = vpop.f32.mrb[137].mxu0  ;;  %9903 = vmatprep.mubr.msk.bf16.mxu1 %vm4818_vm0, %v12772_v53  ;;  %9911 = vmatprep.mubr.msk.bf16.mxu0 %vm4818_vm0, %v12772_v53 }
 0x4ec   : > { %v6478_v61 = vadd.f32 %v6477_v50, %v13555_v57  ;;  %v6591_v7 = vadd.f32 %v6590_v1, %v13555_v57  ;;  %v6479_v26 = vpop.f32.mrb[118].mxu1  ;;  %v6592_v4 = vpop.f32.mrb[138].mxu0  ;;  %7354 = vmatpush1.bf16.msra.mxu1 %v11464_v48  ;;  %7467 = vmatpush1.bf16.msra.mxu0 %v11482_v12 }
 0x4ed   : > { %v6480_v59 = vadd.f32 %v6479_v26, %v13557_v35  ;;  %v6593_v2 = vadd.f32 %v6592_v4, %v13557_v35  ;;  %v6481_v52 = vpop.f32.mrb[119].mxu1  ;;  %v6594_v14 = vpop.f32.mrb[139].mxu0  ;;  %7355 = vmatprep.subr.bf16.mxu1 %v11475_v44  ;;  %7468 = vmatprep.subr.bf16.mxu0 %v11487_v18  ;;  %v7894_v31 = vmax.f32 %v6476_v30, 0.0  ;;  %v7896_v37 = vmax.f32 %v6589_v58, 0.0  ;;  %v11488_v30 = vld [vmem:[%s14891_s5 + $0x5b8] ss:$100 sps:$4 sm:$0xff]  }
 0x4ee   : > { %v6482_v17 = vadd.f32 %v6481_v52, %v13557_v35  ;;  %v6595_v24 = vadd.f32 %v6594_v14, %v13557_v35  ;;  %v7895_v45 = vmax.f32 %v6478_v61, 0.0  ;;  %v7897_v20 = vmax.f32 %v6591_v7, 0.0  ;;  %v11494_v58 = vld [vmem:[%s14891_s5 + $0x5c0] ss:$100 sps:$4 sm:$0xff]   ;;  %v11502_v4 = vld [vmem:[%s14891_s5 + $0x68c] ss:$100 sps:$4 sm:$0xff]  }
 0x4ef   : > { %v7919_v19 = vmax.f32 %v6480_v59, 0.0  ;;  %v7921_v27 = vmax.f32 %v6593_v2, 0.0  ;;  %v11499_v26 = vld [vmem:[%s14891_s5 + $0x684] ss:$100 sps:$4 sm:$0xff]  }
 0x4f0   : > { %v7920_v51 = vmax.f32 %v6482_v17, 0.0  ;;  %v7922_v3 = vmax.f32 %v6595_v24, 0.0  ;;  %7356 = vmatpush1.bf16.msra.mxu1 %v11473_v46  ;;  %7469 = vmatpush1.bf16.msra.mxu0 %v11485_v54 }
 0x4f1   : > { %v13601_v16 = vpack.c.bf16 %v7919_v19, %v7894_v31  ;;  %v13603_v5 = vpack.c.bf16 %v7921_v27, %v7896_v37  ;;  %7357 = vmatprep.subr.bf16.mxu1 %v11481_v40  ;;  %7470 = vmatprep.subr.bf16.mxu0 %v11493_v23  ;;  %v11500_v40 = vld [vmem:[%s14891_s5 + $0x688] ss:$100 sps:$4 sm:$0xff]   ;;  %v11497_v37 = vld [vmem:[%s14891_s5 + $0x680] ss:$100 sps:$4 sm:$0xff]   ;;  %v13647_v19 = vpop.permute.xlu0 %5225  ;;  %v13649_v27 = vpop.permute.xlu1 %5230 }
 0x4f2   : > { %v13611_v34 = vpack.c.bf16 %v7920_v51, %v7895_v45  ;;  %v13613_v11 = vpack.c.bf16 %v7922_v3, %v7897_v20  ;;  %v6485_v42 = vpop.f32.mrb[120].mxu1  ;;  %v6598_v55 = vpop.f32.mrb[140].mxu0  ;;  %7182 = vmatmul.mubr.bf16.gmra.mrb[224].mxu1 %v13066_v0  ;;  %7295 = vmatmul.mubr.bf16.gmra.mrb[244].mxu0 %v13066_v0  ;;  %v11505_v20 = vld [vmem:[%s14891_s5 + $0x5c] ss:$100 sps:$4 sm:$0xff]   ;;  %v11508_v51 = vld [vmem:[%s14891_s5 + $0x54] ss:$100 sps:$4 sm:$0xff]  }
 0x4f3   : > { %14944 = vst [vmem:[#allocation2_spill] sm:$0xff] %v13603_v5  ;;  %v6486_v6 = vadd.f32 %v6485_v42, %v13597_v38  ;;  %v6599_v21 = vadd.f32 %v6598_v55, %v13597_v38  ;;  %v6487_v48 = vpop.f32.mrb[121].mxu1  ;;  %v6600_v12 = vpop.f32.mrb[141].mxu0  ;;  %9904 = vmatprep.mubr.msk.bf16.mxu1 %vm4818_vm0, %v12794_v28  ;;  %9912 = vmatprep.mubr.msk.bf16.mxu0 %vm4818_vm0, %v12794_v28 }
 0x4f4   : > { %14945 = vst [vmem:[#allocation4_spill] sm:$0xff] %v13613_v11  ;;  %v6488_v44 = vadd.f32 %v6487_v48, %v13597_v38  ;;  %v6601_v18 = vadd.f32 %v6600_v12, %v13597_v38  ;;  %v6489_v56 = vpop.f32.mrb[122].mxu1  ;;  %v6602_v32 = vpop.f32.mrb[142].mxu0  ;;  %7358 = vmatpush1.bf16.msra.mxu1 %v11479_v41  ;;  %7471 = vmatpush1.bf16.msra.mxu0 %v11491_v22 }
 0x4f5   : > { %v6490_v50 = vadd.f32 %v6489_v56, %v13599_v8  ;;  %v6603_v1 = vadd.f32 %v6602_v32, %v13599_v8  ;;  %v6491_v61 = vpop.f32.mrb[123].mxu1  ;;  %v6604_v7 = vpop.f32.mrb[143].mxu0  ;;  %7359 = vmatprep.subr.bf16.mxu1 %v11490_v29  ;;  %7472 = vmatprep.subr.bf16.mxu0 %v11496_v33  ;;  %v7944_v59 = vmax.f32 %v6486_v6, 0.0  ;;  %v7946_v2 = vmax.f32 %v6599_v21, 0.0 }
 0x4f6   : > { %v6492_v46 = vadd.f32 %v6491_v61, %v13599_v8  ;;  %v6605_v54 = vadd.f32 %v6604_v7, %v13599_v8  ;;  %v7945_v23 = vmax.f32 %v6488_v44, 0.0  ;;  %v7947_v17 = vmax.f32 %v6601_v18, 0.0 }
 0x4f7   : > { %v7969_v52 = vmax.f32 %v6490_v50, 0.0  ;;  %v7971_v14 = vmax.f32 %v6603_v1, 0.0 }
 0x4f8   : > { %v7970_v24 = vmax.f32 %v6492_v46, 0.0  ;;  %v7972_v31 = vmax.f32 %v6605_v54, 0.0  ;;  %7360 = vmatpush1.bf16.msra.mxu1 %v11488_v30  ;;  %7473 = vmatpush1.bf16.msra.mxu0 %v11494_v58 }
 0x4f9   : > { %v13651_v41 = vpack.c.bf16 %v7969_v52, %v7944_v59  ;;  %v13653_v45 = vpack.c.bf16 %v7971_v14, %v7946_v2  ;;  %7361 = vmatprep.subr.bf16.mxu1 %v11499_v26  ;;  %7474 = vmatprep.subr.bf16.mxu0 %v11502_v4  ;;  %v13679_v52 = vpop.permute.xlu0 %5235  ;;  %v13681_v14 = vpop.permute.xlu1 %5240 }
 0x4fa   : > { %v13661_v3 = vpack.c.bf16 %v7970_v24, %v7945_v23  ;;  %v13663_v22 = vpack.c.bf16 %v7972_v31, %v7947_v17  ;;  %v6495_v29 = vpop.f32.mrb[124].mxu1  ;;  %v6608_v33 = vpop.f32.mrb[144].mxu0  ;;  %7192 = vmatmul.mubr.bf16.gmra.mrb[228].mxu1 %v13114_v63  ;;  %7305 = vmatmul.mubr.bf16.gmra.mrb[248].mxu0 %v13114_v63 }
 0x4fb   : > { %14946 = vst [vmem:[#allocation5_spill] sm:$0xff] %v13653_v45  ;;  %v6496_v42 = vadd.f32 %v6495_v29, %v13647_v19  ;;  %v6609_v55 = vadd.f32 %v6608_v33, %v13647_v19  ;;  %v6497_v6 = vpop.f32.mrb[125].mxu1  ;;  %v6610_v21 = vpop.f32.mrb[145].mxu0  ;;  %9905 = vmatprep.mubr.msk.bf16.mxu1 %vm4818_vm0, %v12792_v9  ;;  %9913 = vmatprep.mubr.msk.bf16.mxu0 %vm4818_vm0, %v12792_v9 }
 0x4fc   : > { %14947 = vst [vmem:[#allocation6_spill] sm:$0xff] %v13663_v22  ;;  %v6498_v48 = vadd.f32 %v6497_v6, %v13647_v19  ;;  %v6611_v12 = vadd.f32 %v6610_v21, %v13647_v19  ;;  %v6499_v44 = vpop.f32.mrb[126].mxu1  ;;  %v6612_v18 = vpop.f32.mrb[146].mxu0  ;;  %7362 = vmatpush1.bf16.msra.mxu1 %v11497_v37  ;;  %7475 = vmatpush1.bf16.msra.mxu0 %v11500_v40 }
 0x4fd   : > { %v6500_v56 = vadd.f32 %v6499_v44, %v13649_v27  ;;  %v6613_v32 = vadd.f32 %v6612_v18, %v13649_v27  ;;  %v6501_v30 = vpop.f32.mrb[127].mxu1  ;;  %v6614_v58 = vpop.f32.mrb[147].mxu0  ;;  %7684 = vmatprep.subr.bf16.mxu0 %v11505_v20  ;;  %7571 = vmatprep.subr.bf16.mxu1 %v11508_v51  ;;  %v7994_v61 = vmax.f32 %v6496_v42, 0.0  ;;  %v7996_v7 = vmax.f32 %v6609_v55, 0.0 }
 0x4fe   : > { %v6502_v50 = vadd.f32 %v6501_v30, %v13649_v27  ;;  %v6615_v1 = vadd.f32 %v6614_v58, %v13649_v27  ;;  %v7995_v46 = vmax.f32 %v6498_v48, 0.0  ;;  %v7997_v54 = vmax.f32 %v6611_v12, 0.0 }
 0x4ff   : > { %v8019_v26 = vmax.f32 %v6500_v56, 0.0  ;;  %v8021_v4 = vmax.f32 %v6613_v32, 0.0 }
 0x500   : > { %v8020_v59 = vmax.f32 %v6502_v50, 0.0  ;;  %v8022_v2 = vmax.f32 %v6615_v1, 0.0 }
 0x501   : > { %v13683_v40 = vpack.c.bf16 %v8019_v26, %v7994_v61  ;;  %v13685_v23 = vpack.c.bf16 %v8021_v4, %v7996_v7 }
 0x502   : > { %v13687_v17 = vpack.c.bf16 %v8020_v59, %v7995_v46  ;;  %v13689_v24 = vpack.c.bf16 %v8022_v2, %v7997_v54  ;;  %v6505_v31 = vpop.f32.mrb[128].mxu1  ;;  %v6618_v37 = vpop.f32.mrb[148].mxu0  ;;  %7202 = vmatmul.mubr.bf16.gmra.mrb[232].mxu1 %v13138_v25  ;;  %7315 = vmatmul.mubr.bf16.gmra.mrb[252].mxu0 %v13138_v25 }
 0x503   : > { %14948 = vst [vmem:[#allocation7_spill] sm:$0xff] %v13685_v23  ;;  %v6506_v20 = vadd.f32 %v6505_v31, %v13679_v52  ;;  %v6619_v51 = vadd.f32 %v6618_v37, %v13679_v52  ;;  %v6507_v29 = vpop.f32.mrb[129].mxu1  ;;  %v6620_v33 = vpop.f32.mrb[149].mxu0  ;;  %9906 = vmatprep.mubr.msk.bf16.mxu1 %vm4818_vm0, %v12818_v10  ;;  %9914 = vmatprep.mubr.msk.bf16.mxu0 %vm4818_vm0, %v12818_v10 }
 0x504   : > { %14949 = vst [vmem:[#allocation8_spill] sm:$0xff] %v13689_v24  ;;  %v6508_v42 = vadd.f32 %v6507_v29, %v13679_v52  ;;  %v6621_v55 = vadd.f32 %v6620_v33, %v13679_v52  ;;  %v6509_v6 = vpop.f32.mrb[130].mxu1  ;;  %v6622_v21 = vpop.f32.mrb[150].mxu0 }
 0x505   : > { %v6510_v48 = vadd.f32 %v6509_v6, %v13681_v14  ;;  %v6623_v12 = vadd.f32 %v6622_v21, %v13681_v14  ;;  %v6511_v44 = vpop.f32.mrb[131].mxu1  ;;  %v6624_v18 = vpop.f32.mrb[151].mxu0  ;;  %v8044_v30 = vmax.f32 %v6506_v20, 0.0  ;;  %v8046_v58 = vmax.f32 %v6619_v51, 0.0 }
 0x506   : > { %v6512_v56 = vadd.f32 %v6511_v44, %v13681_v14  ;;  %v6625_v32 = vadd.f32 %v6624_v18, %v13681_v14  ;;  %v8045_v61 = vmax.f32 %v6508_v42, 0.0  ;;  %v8047_v7 = vmax.f32 %v6621_v55, 0.0  ;;  %v13705_v46 = vpop.permute.xlu0 %5245  ;;  %v13707_v54 = vpop.permute.xlu1 %5250 }
 0x507   : > { %v8069_v50 = vmax.f32 %v6510_v48, 0.0  ;;  %v8071_v1 = vmax.f32 %v6623_v12, 0.0  ;;  %14950 = vst [vmem:[#allocation9_spill] sm:$0xff] %v13705_v46  ;;  %14951 = vst [vmem:[#allocation10_spill] sm:$0xff] %v13707_v54 }
 0x508   : > { %v8070_v26 = vmax.f32 %v6512_v56, 0.0  ;;  %v8072_v4 = vmax.f32 %v6625_v32, 0.0 }
 0x509   : > { %v13709_v59 = vpack.c.bf16 %v8069_v50, %v8044_v30  ;;  %v13711_v2 = vpack.c.bf16 %v8071_v1, %v8046_v58 }
 0x50a   : > { %v13713_v31 = vpack.c.bf16 %v8070_v26, %v8045_v61  ;;  %v13715_v37 = vpack.c.bf16 %v8072_v4, %v8047_v7  ;;  %v6515_v20 = vpop.f32.mrb[132].mxu1  ;;  %v6628_v51 = vpop.f32.mrb[152].mxu0  ;;  %7212 = vmatmul.mubr.bf16.gmra.mrb[236].mxu1 %v13155_v49  ;;  %7325 = vmatmul.mubr.bf16.gmra.mrb[0].mxu0 %v13155_v49 }
 0x50b   : > { %14952 = vst [vmem:[#allocation11_spill] sm:$0xff] %v13711_v2  ;;  %v6516_v29 = vadd.f32 %v6515_v20, %v13705_v46  ;;  %v6629_v33 = vadd.f32 %v6628_v51, %v13705_v46  ;;  %v6517_v42 = vpop.f32.mrb[133].mxu1  ;;  %v6630_v55 = vpop.f32.mrb[153].mxu0  ;;  %9907 = vmatprep.mubr.msk.bf16.mxu1 %vm4818_vm0, %v12806_v36  ;;  %9915 = vmatprep.mubr.msk.bf16.mxu0 %vm4818_vm0, %v12806_v36 }
 0x50c   : > { %14953 = vst [vmem:[#allocation12_spill] sm:$0xff] %v13715_v37  ;;  %v6518_v6 = vadd.f32 %v6517_v42, %v13705_v46  ;;  %v6631_v21 = vadd.f32 %v6630_v55, %v13705_v46  ;;  %v6519_v48 = vpop.f32.mrb[134].mxu1  ;;  %v6632_v12 = vpop.f32.mrb[154].mxu0 }
 0x50d   : > { %v6520_v44 = vadd.f32 %v6519_v48, %v13707_v54  ;;  %v6633_v18 = vadd.f32 %v6632_v12, %v13707_v54  ;;  %v6521_v56 = vpop.f32.mrb[135].mxu1  ;;  %v6634_v32 = vpop.f32.mrb[155].mxu0  ;;  %v8094_v50 = vmax.f32 %v6516_v29, 0.0  ;;  %v8096_v1 = vmax.f32 %v6629_v33, 0.0 }
 0x50e   : > { %v6522_v30 = vadd.f32 %v6521_v56, %v13707_v54  ;;  %v6635_v58 = vadd.f32 %v6634_v32, %v13707_v54  ;;  %v8095_v26 = vmax.f32 %v6518_v6, 0.0  ;;  %v8097_v4 = vmax.f32 %v6631_v21, 0.0  ;;  %v13731_v42 = vpop.permute.xlu0 %5255  ;;  %v13733_v55 = vpop.permute.xlu1 %5260 }
 0x50f   : > { %v8119_v61 = vmax.f32 %v6520_v44, 0.0  ;;  %v8121_v7 = vmax.f32 %v6633_v18, 0.0  ;;  %14954 = vst [vmem:[#allocation13_spill] sm:$0xff] %v13731_v42  ;;  %14955 = vst [vmem:[#allocation14_spill] sm:$0xff] %v13733_v55 }
 0x510   : > { %v8120_v20 = vmax.f32 %v6522_v30, 0.0  ;;  %v8122_v51 = vmax.f32 %v6635_v58, 0.0 }
 0x511   : > { %v13735_v48 = vpack.c.bf16 %v8119_v61, %v8094_v50  ;;  %v13737_v12 = vpack.c.bf16 %v8121_v7, %v8096_v1 }
 0x512   : > { %v13739_v2 = vpack.c.bf16 %v8120_v20, %v8095_v26  ;;  %v13741_v56 = vpack.c.bf16 %v8122_v51, %v8097_v4  ;;  %v6525_v29 = vpop.f32.mrb[136].mxu1  ;;  %v6638_v33 = vpop.f32.mrb[156].mxu0  ;;  %7222 = vmatmul.mubr.bf16.gmra.mrb[240].mxu1 %v13169_v15  ;;  %7335 = vmatmul.mubr.bf16.gmra.mrb[4].mxu0 %v13169_v15 }
 0x513   : > { %14956 = vst [vmem:[#allocation15_spill] sm:$0xff] %v13737_v12  ;;  %v6526_v6 = vadd.f32 %v6525_v29, %v13731_v42  ;;  %v6639_v21 = vadd.f32 %v6638_v33, %v13731_v42  ;;  %v6527_v44 = vpop.f32.mrb[137].mxu1  ;;  %v6640_v18 = vpop.f32.mrb[157].mxu0  ;;  %9916 = vmatprep.mubr.msk.bf16.mxu1 %vm4818_vm0, %v12756_v47  ;;  %9924 = vmatprep.mubr.msk.bf16.mxu0 %vm4818_vm0, %v12756_v47 }
 0x514   : > { %14957 = vst [vmem:[#allocation16_spill] sm:$0xff] %v13741_v56  ;;  %v6528_v32 = vadd.f32 %v6527_v44, %v13731_v42  ;;  %v6641_v30 = vadd.f32 %v6640_v18, %v13731_v42  ;;  %v6529_v58 = vpop.f32.mrb[138].mxu1  ;;  %v6642_v50 = vpop.f32.mrb[158].mxu0  ;;  %v11503_v44 = vld [vmem:[%s14891_s5 + $0x58] ss:$100 sps:$4 sm:$0xff]  }
 0x515   : > { %v6530_v1 = vadd.f32 %v6529_v58, %v13733_v55  ;;  %v6643_v61 = vadd.f32 %v6642_v50, %v13733_v55  ;;  %v6531_v7 = vpop.f32.mrb[139].mxu1  ;;  %v6644_v26 = vpop.f32.mrb[159].mxu0  ;;  %v8144_v51 = vmax.f32 %v6526_v6, 0.0  ;;  %v8146_v29 = vmax.f32 %v6639_v21, 0.0  ;;  %v11506_v50 = vld [vmem:[%s14891_s5 + $0x50] ss:$100 sps:$4 sm:$0xff]  }
 0x516   : > { %v6532_v4 = vadd.f32 %v6531_v7, %v13733_v55  ;;  %v6645_v20 = vadd.f32 %v6644_v26, %v13733_v55  ;;  %v8145_v18 = vmax.f32 %v6528_v32, 0.0  ;;  %v8147_v56 = vmax.f32 %v6641_v30, 0.0  ;;  %v13763_v23 = vpop.permute.xlu0 %5265  ;;  %v13765_v7 = vpop.permute.xlu1 %5270  ;;  %v11517_v32 = vld [vmem:[%s14891_s5 + $0x11c] ss:$100 sps:$4 sm:$0xff]  }
 0x517   : > { %v8169_v33 = vmax.f32 %v6530_v1, 0.0  ;;  %v8171_v12 = vmax.f32 %v6643_v61, 0.0  ;;  %14958 = vst [vmem:[#allocation17_spill] sm:$0xff] %v13763_v23  ;;  %14959 = vst [vmem:[#allocation18_spill] sm:$0xff] %v13765_v7  ;;  %v11511_v1 = vld [vmem:[%s14891_s5 + $0x124] ss:$100 sps:$4 sm:$0xff]  }
 0x518   : > { %v8170_v37 = vmax.f32 %v6532_v4, 0.0  ;;  %v8172_v58 = vmax.f32 %v6645_v20, 0.0 }
 0x519   : > { %v13767_v6 = vpack.c.bf16 %v8169_v33, %v8144_v51  ;;  %v13769_v21 = vpack.c.bf16 %v8171_v12, %v8146_v29 }
 0x51a   : > { %v13777_v30 = vpack.c.bf16 %v8170_v37, %v8145_v18  ;;  %v13779_v61 = vpack.c.bf16 %v8172_v58, %v8147_v56  ;;  %v6535_v26 = vpop.f32.mrb[140].mxu1  ;;  %v6648_v4 = vpop.f32.mrb[160].mxu0  ;;  %7378 = vmatmul.mubr.bf16.vlgmr.msra.gmra.mrb[244].mxu1 %v12924_v60  ;;  %7491 = vmatmul.mubr.bf16.vlgmr.msra.gmra.mrb[8].mxu0 %v12924_v60  ;;  %v11509_v37 = vld [vmem:[%s14891_s5 + $0x120] ss:$100 sps:$4 sm:$0xff]  }
 0x51b   : > { %14960 = vst [vmem:[#allocation19_spill] sm:$0xff] %v13767_v6  ;;  %14961 = vst [vmem:[#allocation20_spill] sm:$0xff] %v13769_v21  ;;  %v6536_v12 = vadd.f32 %v6535_v26, %v13763_v23  ;;  %v6649_v20 = vadd.f32 %v6648_v4, %v13763_v23  ;;  %7685 = vmatpush1.bf16.msra.mxu0 %v11503_v44  ;;  %v6537_v51 = vpop.f32.mrb[141].mxu1  ;;  %v6650_v29 = vpop.f32.mrb[161].mxu0  ;;  %9917 = vmatprep.mubr.msk.bf16.mxu1 %vm4818_vm0, %v12752_v13  ;;  %v11514_v44 = vld [vmem:[%s14891_s5 + $0x1ec] ss:$100 sps:$4 sm:$0xff]  }
 0x51c   : > { %14962 = vst [vmem:[#allocation21_spill] sm:$0xff] %v13779_v61  ;;  %v6538_v56 = vadd.f32 %v6537_v51, %v13763_v23  ;;  %v6651_v33 = vadd.f32 %v6650_v29, %v13763_v23  ;;  %9925 = vmatprep.mubr.msk.bf16.mxu0 %vm4818_vm0, %v12752_v13  ;;  %7572 = vmatpush1.bf16.msra.mxu1 %v11506_v50  ;;  %v6539_v18 = vpop.f32.mrb[142].mxu1  ;;  %v6652_v58 = vpop.f32.mrb[162].mxu0  ;;  %v11515_v26 = vld [vmem:[%s14891_s5 + $0x118] ss:$100 sps:$4 sm:$0xff]  }
 0x51d   : > { %v6540_v4 = vadd.f32 %v6539_v18, %v13765_v7  ;;  %v6653_v51 = vadd.f32 %v6652_v58, %v13765_v7  ;;  %v6541_v21 = vpop.f32.mrb[143].mxu1  ;;  %v6654_v29 = vpop.f32.mrb[163].mxu0  ;;  %7686 = vmatprep.subr.bf16.mxu0 %v11511_v1  ;;  %7573 = vmatprep.subr.bf16.mxu1 %v11517_v32  ;;  %v11523_v50 = vld [vmem:[%s14891_s5 + $0x1e4] ss:$100 sps:$4 sm:$0xff]   ;;  %v8194_v45 = vmax.f32 %v6536_v12, 0.0  ;;  %v8196_v22 = vmax.f32 %v6649_v20, 0.0 }
 0x51e   : > { %v6542_v61 = vadd.f32 %v6541_v21, %v13765_v7  ;;  %v6655_v24 = vadd.f32 %v6654_v29, %v13765_v7  ;;  %v11512_v18 = vld [vmem:[%s14891_s5 + $0x1e8] ss:$100 sps:$4 sm:$0xff]   ;;  %v8195_v58 = vmax.f32 %v6538_v56, 0.0  ;;  %v8197_v1 = vmax.f32 %v6651_v33, 0.0  ;;  %v11520_v21 = vld [vmem:[%s14891_s5 + $0x2b4] ss:$100 sps:$4 sm:$0xff]  }
 0x51f   : > { %v8219_v5 = vmax.f32 %v6540_v4, 0.0  ;;  %v8221_v11 = vmax.f32 %v6653_v51, 0.0  ;;  %7687 = vmatpush1.bf16.msra.mxu0 %v11509_v37  ;;  %v11521_v20 = vld [vmem:[%s14891_s5 + $0x1e0] ss:$100 sps:$4 sm:$0xff]   ;;  %v11530_v33 = vld [vmem:[%s14891_s5 + $0x2a8] ss:$100 sps:$4 sm:$0xff]  }
 0x520   : > { %v8220_v32 = vmax.f32 %v6542_v61, 0.0  ;;  %v8222_v6 = vmax.f32 %v6655_v24, 0.0  ;;  %7688 = vmatprep.subr.bf16.mxu0 %v11514_v44  ;;  %7574 = vmatpush1.bf16.msra.mxu1 %v11515_v26  ;;  %v11526_v24 = vld [vmem:[%s14891_s5 + $0x37c] ss:$100 sps:$4 sm:$0xff]  }
 0x521   : > { %v13813_v29 = vpack.c.bf16 %v8219_v5, %v8194_v45  ;;  %v13815_v12 = vpack.c.bf16 %v8221_v11, %v8196_v22  ;;  %7575 = vmatprep.subr.bf16.mxu1 %v11523_v50  ;;  %v11532_v5 = vld [vmem:[%s14891_s5 + $0x2ac] ss:$100 sps:$4 sm:$0xff]   ;;  %v13834_v45 = vpop.permute.xlu0 %5275  ;;  %v13836_v22 = vpop.permute.xlu1 %5280 }
 0x522   : > { %v13820_v37 = vpack.c.bf16 %v8220_v32, %v8195_v58  ;;  %v13822_v56 = vpack.c.bf16 %v8222_v6, %v8197_v1  ;;  %7388 = vmatmul.mubr.bf16.gmra.mrb[248].mxu1 %v12975_v43  ;;  %7501 = vmatmul.mubr.bf16.gmra.mrb[12].mxu0 %v12975_v43  ;;  %v11518_v11 = vld [vmem:[%s14891_s5 + $0x2b0] ss:$100 sps:$4 sm:$0xff]   ;;  %14967 = vst [vmem:[#allocation26_spill] sm:$0xff] %v13834_v45  ;;  %v11524_v32 = vld [vmem:[%s14891_s5 + $0x378] ss:$100 sps:$4 sm:$0xff]  }
 0x523   : > { %14963 = vst [vmem:[#allocation22_spill] sm:$0xff] %v13813_v29  ;;  %14964 = vst [vmem:[#allocation23_spill] sm:$0xff] %v13815_v12  ;;  %7689 = vmatpush1.bf16.msra.mxu0 %v11512_v18  ;;  %9918 = vmatprep.mubr.msk.bf16.mxu1 %vm4818_vm0, %v12774_v62 }
 0x524   : > { %14965 = vst [vmem:[#allocation24_spill] sm:$0xff] %v13820_v37  ;;  %14966 = vst [vmem:[#allocation25_spill] sm:$0xff] %v13822_v56  ;;  %9926 = vmatprep.mubr.msk.bf16.mxu0 %vm4818_vm0, %v12774_v62  ;;  %7690 = vmatprep.subr.bf16.mxu0 %v11520_v21 }
 0x525   : > { %v6545_v6 = vpop.f32.mrb[144].mxu1  ;;  %v6658_v61 = vpop.f32.mrb[164].mxu0  ;;  %7576 = vmatpush1.bf16.msra.mxu1 %v11521_v20 }
 0x526   : > { %v6546_v44 = vadd.f32 %v6545_v6, %v13834_v45  ;;  %v6659_v26 = vadd.f32 %v6658_v61, %v13834_v45  ;;  %v6547_v4 = vpop.f32.mrb[145].mxu1  ;;  %v6660_v51 = vpop.f32.mrb[165].mxu0  ;;  %7577 = vmatprep.subr.bf16.mxu1 %v11532_v5  ;;  %v11529_v5 = vld [vmem:[%s14891_s5 + $0x444] ss:$100 sps:$4 sm:$0xff]  }
 0x527   : > { %v6548_v50 = vadd.f32 %v6547_v4, %v13834_v45  ;;  %v6661_v18 = vadd.f32 %v6660_v51, %v13834_v45  ;;  %7691 = vmatpush1.bf16.msra.mxu0 %v11518_v11  ;;  %v6549_v58 = vpop.f32.mrb[146].mxu1  ;;  %v6662_v1 = vpop.f32.mrb[166].mxu0  ;;  %v11527_v51 = vld [vmem:[%s14891_s5 + $0x440] ss:$100 sps:$4 sm:$0xff]  }
 0x528   : > { %v6550_v21 = vadd.f32 %v6549_v58, %v13836_v22  ;;  %v6663_v20 = vadd.f32 %v6662_v1, %v13836_v22  ;;  %v6551_v6 = vpop.f32.mrb[147].mxu1  ;;  %v6664_v61 = vpop.f32.mrb[167].mxu0  ;;  %7692 = vmatprep.subr.bf16.mxu0 %v11526_v24  ;;  %v11541_v58 = vld [vmem:[%s14891_s5 + $0x374] ss:$100 sps:$4 sm:$0xff]   ;;  %v8244_v1 = vmax.f32 %v6546_v44, 0.0  ;;  %v8246_v12 = vmax.f32 %v6659_v26, 0.0 }
 0x529   : > { %v6552_v4 = vadd.f32 %v6551_v6, %v13836_v22  ;;  %v6665_v11 = vadd.f32 %v6664_v61, %v13836_v22  ;;  %7578 = vmatpush1.bf16.msra.mxu1 %v11530_v33  ;;  %v11539_v6 = vld [vmem:[%s14891_s5 + $0x370] ss:$100 sps:$4 sm:$0xff]   ;;  %v8245_v61 = vmax.f32 %v6548_v50, 0.0  ;;  %v8247_v29 = vmax.f32 %v6661_v18, 0.0  ;;  %v11547_v44 = vld [vmem:[%s14891_s5 + $0x43c] ss:$100 sps:$4 sm:$0xff]  }
 0x52a   : > { %v8269_v24 = vmax.f32 %v6550_v21, 0.0  ;;  %v8271_v56 = vmax.f32 %v6663_v20, 0.0  ;;  %7398 = vmatmul.mubr.bf16.gmra.mrb[252].mxu1 %v13023_v39  ;;  %7511 = vmatmul.mubr.bf16.gmra.mrb[16].mxu0 %v13023_v39  ;;  %v11535_v50 = vld [vmem:[%s14891_s5 + $0x50c] ss:$100 sps:$4 sm:$0xff]  }
 0x52b   : > { %v8270_v37 = vmax.f32 %v6552_v4, 0.0  ;;  %v8272_v33 = vmax.f32 %v6665_v11, 0.0  ;;  %7693 = vmatpush1.bf16.msra.mxu0 %v11524_v32  ;;  %9919 = vmatprep.mubr.msk.bf16.mxu1 %vm4818_vm0, %v12772_v53 }
 0x52c   : > { %v13876_v26 = vpack.c.bf16 %v8269_v24, %v8244_v1  ;;  %v13878_v21 = vpack.c.bf16 %v8271_v56, %v8246_v12  ;;  %9927 = vmatprep.mubr.msk.bf16.mxu0 %vm4818_vm0, %v12772_v53  ;;  %7694 = vmatprep.subr.bf16.mxu0 %v11529_v5 }
 0x52d   : > { %v13885_v18 = vpack.c.bf16 %v8270_v37, %v8245_v61  ;;  %v13887_v32 = vpack.c.bf16 %v8272_v33, %v8247_v29  ;;  %v6701_v20 = vpop.f32.mrb[148].mxu1  ;;  %v6814_v4 = vpop.f32.mrb[168].mxu0  ;;  %7579 = vmatprep.subr.bf16.mxu1 %v11541_v58  ;;  %v11533_v29 = vld [vmem:[%s14891_s5 + $0x508] ss:$100 sps:$4 sm:$0xff]  }
 0x52e   : > { %14968 = vst [vmem:[#allocation27_spill] sm:$0xff] %v13876_v26  ;;  %14969 = vst [vmem:[#allocation28_spill] sm:$0xff] %v13878_v21  ;;  %v6702_v11 = vadd.f32 %v6701_v20, %v13555_v57  ;;  %v6815_v12 = vadd.f32 %v6814_v4, %v13555_v57  ;;  %v6703_v56 = vpop.f32.mrb[149].mxu1  ;;  %v6816_v1 = vpop.f32.mrb[169].mxu0  ;;  %7580 = vmatpush1.bf16.msra.mxu1 %v11539_v6  ;;  %v11538_v6 = vld [vmem:[%s14891_s5 + $0x5d4] ss:$100 sps:$4 sm:$0xff]  }
 0x52f   : > { %14970 = vst [vmem:[#allocation29_spill] sm:$0xff] %v13887_v32  ;;  %v6704_v5 = vadd.f32 %v6703_v56, %v13555_v57  ;;  %v6817_v24 = vadd.f32 %v6816_v1, %v13555_v57  ;;  %7695 = vmatpush1.bf16.msra.mxu0 %v11527_v51  ;;  %v6705_v21 = vpop.f32.mrb[150].mxu1  ;;  %v6818_v37 = vpop.f32.mrb[170].mxu0  ;;  %7581 = vmatprep.subr.bf16.mxu1 %v11547_v44  ;;  %v11545_v56 = vld [vmem:[%s14891_s5 + $0x438] ss:$100 sps:$4 sm:$0xff]  }
 0x530   : > { %v6706_v58 = vadd.f32 %v6705_v21, %v13557_v35  ;;  %v6819_v61 = vadd.f32 %v6818_v37, %v13557_v35  ;;  %v6707_v33 = vpop.f32.mrb[151].mxu1  ;;  %v6820_v20 = vpop.f32.mrb[171].mxu0  ;;  %7696 = vmatprep.subr.bf16.mxu0 %v11535_v50  ;;  %v7898_v44 = vmax.f32 %v6702_v11, 0.0  ;;  %v7900_v1 = vmax.f32 %v6815_v12, 0.0  ;;  %v11550_v50 = vld [vmem:[%s14891_s5 + $0x504] ss:$100 sps:$4 sm:$0xff]  }
 0x531   : > { %v6708_v51 = vadd.f32 %v6707_v33, %v13557_v35  ;;  %v6821_v4 = vadd.f32 %v6820_v20, %v13557_v35  ;;  %v7899_v37 = vmax.f32 %v6704_v5, 0.0  ;;  %v7901_v33 = vmax.f32 %v6817_v24, 0.0  ;;  %v11536_v11 = vld [vmem:[%s14891_s5 + $0x5d0] ss:$100 sps:$4 sm:$0xff]   ;;  %v11544_v5 = vld [vmem:[%s14891_s5 + $0x69c] ss:$100 sps:$4 sm:$0xff]  }
 0x532   : > { %v7923_v21 = vmax.f32 %v6706_v58, 0.0  ;;  %v7925_v32 = vmax.f32 %v6819_v61, 0.0  ;;  %7408 = vmatmul.mubr.bf16.gmra.mrb[0].mxu1 %v13066_v0  ;;  %7521 = vmatmul.mubr.bf16.gmra.mrb[20].mxu0 %v13066_v0 }
 0x533   : > { %v7924_v26 = vmax.f32 %v6708_v51, 0.0  ;;  %v7926_v20 = vmax.f32 %v6821_v4, 0.0  ;;  %7697 = vmatpush1.bf16.msra.mxu0 %v11533_v29  ;;  %9920 = vmatprep.mubr.msk.bf16.mxu1 %vm4818_vm0, %v12794_v28 }
 0x534   : > { %v13916_v12 = vpack.c.bf16 %v7923_v21, %v7898_v44  ;;  %v13918_v58 = vpack.c.bf16 %v7925_v32, %v7900_v1  ;;  %9928 = vmatprep.mubr.msk.bf16.mxu0 %vm4818_vm0, %v12794_v28  ;;  %7698 = vmatprep.subr.bf16.mxu0 %v11538_v6  ;;  %v11548_v32 = vld [vmem:[%s14891_s5 + $0x500] ss:$100 sps:$4 sm:$0xff]  }
 0x535   : > { %v13925_v24 = vpack.c.bf16 %v7924_v26, %v7899_v37  ;;  %v13927_v29 = vpack.c.bf16 %v7926_v20, %v7901_v33  ;;  %v6711_v61 = vpop.f32.mrb[152].mxu1  ;;  %v6824_v51 = vpop.f32.mrb[172].mxu0  ;;  %7582 = vmatpush1.bf16.msra.mxu1 %v11545_v56  ;;  %v11542_v56 = vld [vmem:[%s14891_s5 + $0x698] ss:$100 sps:$4 sm:$0xff]  }
 0x536   : > { %14971 = vst [vmem:[#allocation30_spill] sm:$0xff] %v13916_v12  ;;  %14972 = vst [vmem:[#allocation31_spill] sm:$0xff] %v13918_v58  ;;  %v6712_v4 = vadd.f32 %v6711_v61, %v13597_v38  ;;  %v6825_v44 = vadd.f32 %v6824_v51, %v13597_v38  ;;  %v6713_v6 = vpop.f32.mrb[153].mxu1  ;;  %v6826_v1 = vpop.f32.mrb[173].mxu0  ;;  %7583 = vmatprep.subr.bf16.mxu1 %v11550_v50 }
 0x537   : > { %14973 = vst [vmem:[#allocation32_spill] sm:$0xff] %v13925_v24  ;;  %14974 = vst [vmem:[#allocation33_spill] sm:$0xff] %v13927_v29  ;;  %v6714_v21 = vadd.f32 %v6713_v6, %v13597_v38  ;;  %v6827_v26 = vadd.f32 %v6826_v1, %v13597_v38  ;;  %7699 = vmatpush1.bf16.msra.mxu0 %v11536_v11  ;;  %v6715_v37 = vpop.f32.mrb[154].mxu1  ;;  %v6828_v33 = vpop.f32.mrb[174].mxu0  ;;  %v11553_v11 = vld [vmem:[%s14891_s5 + $0x5cc] ss:$100 sps:$4 sm:$0xff]  }
 0x538   : > { %v6716_v20 = vadd.f32 %v6715_v37, %v13599_v8  ;;  %v6829_v61 = vadd.f32 %v6828_v33, %v13599_v8  ;;  %v6717_v58 = vpop.f32.mrb[155].mxu1  ;;  %v6830_v51 = vpop.f32.mrb[175].mxu0  ;;  %7700 = vmatprep.subr.bf16.mxu0 %v11544_v5  ;;  %v7948_v1 = vmax.f32 %v6712_v4, 0.0  ;;  %v7950_v29 = vmax.f32 %v6825_v44, 0.0  ;;  %v11551_v5 = vld [vmem:[%s14891_s5 + $0x5c8] ss:$100 sps:$4 sm:$0xff]  }
 0x539   : > { %v6718_v50 = vadd.f32 %v6717_v58, %v13599_v8  ;;  %v6831_v6 = vadd.f32 %v6830_v51, %v13599_v8  ;;  %7584 = vmatpush1.bf16.msra.mxu1 %v11548_v32  ;;  %v7949_v58 = vmax.f32 %v6714_v21, 0.0  ;;  %v7951_v37 = vmax.f32 %v6827_v26, 0.0  ;;  %v11556_v4 = vld [vmem:[%s14891_s5 + $0x694] ss:$100 sps:$4 sm:$0xff]  }
 0x53a   : > { %v7973_v12 = vmax.f32 %v6716_v20, 0.0  ;;  %v7975_v24 = vmax.f32 %v6829_v61, 0.0  ;;  %7418 = vmatmul.mubr.bf16.gmra.mrb[4].mxu1 %v13114_v63  ;;  %7531 = vmatmul.mubr.bf16.gmra.mrb[24].mxu0 %v13114_v63 }
 0x53b   : > { %v7974_v33 = vmax.f32 %v6718_v50, 0.0  ;;  %v7976_v32 = vmax.f32 %v6831_v6, 0.0  ;;  %7701 = vmatpush1.bf16.msra.mxu0 %v11542_v56  ;;  %9921 = vmatprep.mubr.msk.bf16.mxu1 %vm4818_vm0, %v12792_v9 }
 0x53c   : > { %v13956_v44 = vpack.c.bf16 %v7973_v12, %v7948_v1  ;;  %v13958_v20 = vpack.c.bf16 %v7975_v24, %v7950_v29  ;;  %9929 = vmatprep.mubr.msk.bf16.mxu0 %vm4818_vm0, %v12792_v9  ;;  %8501 = vmatprep.subr.bf16.mxu0 %v13611_v34 }
 0x53d   : > { %v13963_v21 = vpack.c.bf16 %v7974_v33, %v7949_v58  ;;  %v13965_v26 = vpack.c.bf16 %v7976_v32, %v7951_v37  ;;  %v6721_v56 = vpop.f32.mrb[156].mxu1  ;;  %v6834_v61 = vpop.f32.mrb[176].mxu0  ;;  %7585 = vmatprep.subr.bf16.mxu1 %v11553_v11  ;;  %v11554_v32 = vld [vmem:[%s14891_s5 + $0x690] ss:$100 sps:$4 sm:$0xff]  }
 0x53e   : > { %14975 = vst [vmem:[#allocation34_spill] sm:$0xff] %v13956_v44  ;;  %14976 = vst [vmem:[#allocation35_spill] sm:$0xff] %v13958_v20  ;;  %v6722_v51 = vadd.f32 %v6721_v56, %v13647_v19  ;;  %v6835_v50 = vadd.f32 %v6834_v61, %v13647_v19  ;;  %v6723_v12 = vpop.f32.mrb[157].mxu1  ;;  %v6836_v6 = vpop.f32.mrb[177].mxu0  ;;  %7586 = vmatpush1.bf16.msra.mxu1 %v11551_v5 }
 0x53f   : > { %14977 = vst [vmem:[#allocation36_spill] sm:$0xff] %v13963_v21  ;;  %14978 = vst [vmem:[#allocation37_spill] sm:$0xff] %v13965_v26  ;;  %v6724_v24 = vadd.f32 %v6723_v12, %v13647_v19  ;;  %v6837_v29 = vadd.f32 %v6836_v6, %v13647_v19  ;;  %v6725_v1 = vpop.f32.mrb[158].mxu1  ;;  %v6838_v34 = vpop.f32.mrb[178].mxu0  ;;  %7587 = vmatprep.subr.bf16.mxu1 %v11556_v4 }
 0x540   : > { %v6726_v58 = vadd.f32 %v6725_v1, %v13649_v27  ;;  %v6839_v37 = vadd.f32 %v6838_v34, %v13649_v27  ;;  %v6727_v33 = vpop.f32.mrb[159].mxu1  ;;  %v6840_v11 = vpop.f32.mrb[179].mxu0  ;;  %v7998_v61 = vmax.f32 %v6722_v51, 0.0  ;;  %v8000_v12 = vmax.f32 %v6835_v50, 0.0 }
 0x541   : > { %v6728_v56 = vadd.f32 %v6727_v33, %v13649_v27  ;;  %v6841_v5 = vadd.f32 %v6840_v11, %v13649_v27  ;;  %v7999_v4 = vmax.f32 %v6724_v24, 0.0  ;;  %v8001_v1 = vmax.f32 %v6837_v29, 0.0 }
 0x542   : > { %v8023_v6 = vmax.f32 %v6726_v58, 0.0  ;;  %v8025_v20 = vmax.f32 %v6839_v37, 0.0  ;;  %7428 = vmatmul.mubr.bf16.gmra.mrb[8].mxu1 %v13138_v25  ;;  %7541 = vmatmul.mubr.bf16.gmra.mrb[28].mxu0 %v13138_v25  ;;  %v14983_v29 = vmov 0  }
 0x543   : > { %v8024_v34 = vmax.f32 %v6728_v56, 0.0  ;;  %v8026_v26 = vmax.f32 %v6841_v5, 0.0  ;;  %9922 = vmatprep.mubr.msk.bf16.mxu1 %vm4818_vm0, %v12818_v10  ;;  %9930 = vmatprep.mubr.msk.bf16.mxu0 %vm4818_vm0, %v12818_v10 }
 0x544   : > { %v13984_v33 = vpack.c.bf16 %v8023_v6, %v7998_v61  ;;  %v13986_v51 = vpack.c.bf16 %v8025_v20, %v8000_v12  ;;  %7588 = vmatpush1.bf16.msra.mxu1 %v11554_v32 }
 0x545   : > { %v13988_v50 = vpack.c.bf16 %v8024_v34, %v7999_v4  ;;  %v13990_v58 = vpack.c.bf16 %v8026_v26, %v8001_v1  ;;  %v6731_v37 = vpop.f32.mrb[160].mxu1  ;;  %v6844_v24 = vpop.f32.mrb[180].mxu0  ;;  %7797 = vmatprep.subr.bf16.mxu1 %v14983_v29 }
 0x546   : > { %14979 = vst [vmem:[#allocation38_spill] sm:$0xff] %v13984_v33  ;;  %14980 = vst [vmem:[#allocation39_spill] sm:$0xff] %v13986_v51  ;;  %v6732_v11 = vadd.f32 %v6731_v37, %v13679_v52  ;;  %v6845_v56 = vadd.f32 %v6844_v24, %v13679_v52  ;;  %v6733_v5 = vpop.f32.mrb[161].mxu1  ;;  %v6846_v44 = vpop.f32.mrb[181].mxu0 }
 0x547   : > { %14981 = vst [vmem:[#allocation40_spill] sm:$0xff] %v13988_v50  ;;  %14982 = vst [vmem:[#allocation41_spill] sm:$0xff] %v13990_v58  ;;  %v6734_v61 = vadd.f32 %v6733_v5, %v13679_v52  ;;  %v6847_v20 = vadd.f32 %v6846_v44, %v13679_v52  ;;  %v6735_v12 = vpop.f32.mrb[162].mxu1  ;;  %v6848_v32 = vpop.f32.mrb[182].mxu0 }
 0x548   : > { %v6736_v6 = vadd.f32 %v6735_v12, %v13681_v14  ;;  %v6849_v26 = vadd.f32 %v6848_v32, %v13681_v14  ;;  %v6737_v4 = vpop.f32.mrb[163].mxu1  ;;  %v6850_v1 = vpop.f32.mrb[183].mxu0  ;;  %v8048_v51 = vmax.f32 %v6732_v11, 0.0  ;;  %v8050_v24 = vmax.f32 %v6845_v56, 0.0 }
 0x549   : > { %v6738_v34 = vadd.f32 %v6737_v4, %v13681_v14  ;;  %v6851_v37 = vadd.f32 %v6850_v1, %v13681_v14  ;;  %v8049_v44 = vmax.f32 %v6734_v61, 0.0  ;;  %v8051_v5 = vmax.f32 %v6847_v20, 0.0 }
 0x54a   : > { %v8073_v58 = vmax.f32 %v6736_v6, 0.0  ;;  %v8075_v33 = vmax.f32 %v6849_v26, 0.0  ;;  %7438 = vmatmul.mubr.bf16.gmra.mrb[12].mxu1 %v13155_v49  ;;  %7551 = vmatmul.mubr.bf16.gmra.mrb[32].mxu0 %v13155_v49 }
 0x54b   : > { %v8074_v50 = vmax.f32 %v6738_v34, 0.0  ;;  %v8076_v12 = vmax.f32 %v6851_v37, 0.0  ;;  %9923 = vmatprep.mubr.msk.bf16.mxu1 %vm4818_vm0, %v12806_v36  ;;  %9931 = vmatprep.mubr.msk.bf16.mxu0 %vm4818_vm0, %v12806_v36 }
 0x54c   : > { %v14007_v32 = vpack.c.bf16 %v8073_v58, %v8048_v51  ;;  %v14009_v11 = vpack.c.bf16 %v8075_v33, %v8050_v24 }
 0x54d   : > { %v14011_v56 = vpack.c.bf16 %v8074_v50, %v8049_v44  ;;  %v14013_v6 = vpack.c.bf16 %v8076_v12, %v8051_v5  ;;  %v6741_v26 = vpop.f32.mrb[164].mxu1  ;;  %v6854_v4 = vpop.f32.mrb[184].mxu0 }
 0x54e   : > { %14984 = vst [vmem:[#allocation42_spill] sm:$0xff] %v14007_v32  ;;  %14985 = vst [vmem:[#allocation43_spill] sm:$0xff] %v14009_v11  ;;  %v6742_v61 = vadd.f32 %v6741_v26, %v13705_v46  ;;  %v6855_v20 = vadd.f32 %v6854_v4, %v13705_v46  ;;  %v6743_v1 = vpop.f32.mrb[165].mxu1  ;;  %v6856_v34 = vpop.f32.mrb[185].mxu0 }
 0x54f   : > { %14986 = vst [vmem:[#allocation44_spill] sm:$0xff] %v14011_v56  ;;  %14987 = vst [vmem:[#allocation45_spill] sm:$0xff] %v14013_v6  ;;  %v6744_v37 = vadd.f32 %v6743_v1, %v13705_v46  ;;  %v6857_v21 = vadd.f32 %v6856_v34, %v13705_v46  ;;  %v6745_v51 = vpop.f32.mrb[166].mxu1  ;;  %v6858_v58 = vpop.f32.mrb[186].mxu0 }
 0x550   : > { %v6746_v33 = vadd.f32 %v6745_v51, %v13707_v54  ;;  %v6859_v50 = vadd.f32 %v6858_v58, %v13707_v54  ;;  %v6747_v24 = vpop.f32.mrb[167].mxu1  ;;  %v6860_v44 = vpop.f32.mrb[187].mxu0  ;;  %v8098_v26 = vmax.f32 %v6742_v61, 0.0  ;;  %v8100_v4 = vmax.f32 %v6855_v20, 0.0 }
 0x551   : > { %v6748_v5 = vadd.f32 %v6747_v24, %v13707_v54  ;;  %v6861_v12 = vadd.f32 %v6860_v44, %v13707_v54  ;;  %v8099_v1 = vmax.f32 %v6744_v37, 0.0  ;;  %v8101_v34 = vmax.f32 %v6857_v21, 0.0 }
 0x552   : > { %v8123_v11 = vmax.f32 %v6746_v33, 0.0  ;;  %v8125_v6 = vmax.f32 %v6859_v50, 0.0  ;;  %7448 = vmatmul.mubr.bf16.gmra.mrb[16].mxu1 %v13169_v15  ;;  %7561 = vmatmul.mubr.bf16.gmra.mrb[36].mxu0 %v13169_v15 }
 0x553   : > { %v8124_v32 = vmax.f32 %v6748_v5, 0.0  ;;  %v8126_v51 = vmax.f32 %v6861_v12, 0.0  ;;  %9932 = vmatprep.mubr.msk.bf16.mxu1 %vm4818_vm0, %v12756_v47  ;;  %9940 = vmatprep.mubr.msk.bf16.mxu0 %vm4818_vm0, %v12756_v47 }
 0x554   : > { %v14029_v58 = vpack.c.bf16 %v8123_v11, %v8098_v26  ;;  %v14031_v61 = vpack.c.bf16 %v8125_v6, %v8100_v4 }
 0x555   : > { %v14033_v20 = vpack.c.bf16 %v8124_v32, %v8099_v1  ;;  %v14035_v33 = vpack.c.bf16 %v8126_v51, %v8101_v34  ;;  %v6751_v50 = vpop.f32.mrb[168].mxu1  ;;  %v6864_v24 = vpop.f32.mrb[188].mxu0  ;;  %v11557_v32 = vld [vmem:[%s14891_s5 + $0x60] ss:$100 sps:$4 sm:$0xff]  }
 0x556   : > { %14988 = vst [vmem:[#allocation46_spill] sm:$0xff] %v14029_v58  ;;  %14989 = vst [vmem:[#allocation47_spill] sm:$0xff] %v14031_v61  ;;  %v6752_v21 = vadd.f32 %v6751_v50, %v13731_v42  ;;  %v6865_v37 = vadd.f32 %v6864_v24, %v13731_v42  ;;  %v6753_v44 = vpop.f32.mrb[169].mxu1  ;;  %v6866_v5 = vpop.f32.mrb[189].mxu0 }
 0x557   : > { %14990 = vst [vmem:[#allocation48_spill] sm:$0xff] %v14033_v20  ;;  %14991 = vst [vmem:[#allocation49_spill] sm:$0xff] %v14035_v33  ;;  %v6754_v12 = vadd.f32 %v6753_v44, %v13731_v42  ;;  %v6867_v56 = vadd.f32 %v6866_v5, %v13731_v42  ;;  %v6755_v11 = vpop.f32.mrb[170].mxu1  ;;  %v6868_v26 = vpop.f32.mrb[190].mxu0 }
 0x558   : > { %v6756_v6 = vadd.f32 %v6755_v11, %v13733_v55  ;;  %v6869_v4 = vadd.f32 %v6868_v26, %v13733_v55  ;;  %v6757_v1 = vpop.f32.mrb[171].mxu1  ;;  %v6870_v34 = vpop.f32.mrb[191].mxu0  ;;  %v8148_v24 = vmax.f32 %v6752_v21, 0.0  ;;  %v8150_v44 = vmax.f32 %v6865_v37, 0.0  ;;  %v11558_v26 = vld [vmem:[%s14891_s5 + $0x128] ss:$100 sps:$4 sm:$0xff]  }
 0x559   : > { %v6758_v51 = vadd.f32 %v6757_v1, %v13733_v55  ;;  %v6871_v50 = vadd.f32 %v6870_v34, %v13733_v55  ;;  %v8149_v33 = vmax.f32 %v6754_v12, 0.0  ;;  %v8151_v58 = vmax.f32 %v6867_v56, 0.0 }
 0x55a   : > { %v8173_v61 = vmax.f32 %v6756_v6, 0.0  ;;  %v8175_v5 = vmax.f32 %v6869_v4, 0.0  ;;  %7604 = vmatmul.mubr.bf16.vlgmr.msra.gmra.mrb[20].mxu1 %v12924_v60  ;;  %7717 = vmatmul.mubr.bf16.vlgmr.msra.gmra.mrb[40].mxu0 %v12924_v60 }
 0x55b   : > { %v8174_v20 = vmax.f32 %v6758_v51, 0.0  ;;  %v8176_v11 = vmax.f32 %v6871_v50, 0.0  ;;  %7798 = vmatpush1.bf16.msra.mxu1 %v11557_v32  ;;  %8502 = vmatpush1.bf16.msra.mxu0 %v13601_v16 }
 0x55c   : > { %v14054_v1 = vpack.c.bf16 %v8173_v61, %v8148_v24  ;;  %v14056_v21 = vpack.c.bf16 %v8175_v5, %v8150_v44  ;;  %9933 = vmatprep.mubr.msk.bf16.mxu1 %vm4818_vm0, %v12752_v13  ;;  %9941 = vmatprep.mubr.msk.bf16.mxu0 %vm4818_vm0, %v12752_v13 }
 0x55d   : > { %v14062_v56 = vpack.c.bf16 %v8174_v20, %v8149_v33  ;;  %v14064_v37 = vpack.c.bf16 %v8176_v11, %v8151_v58  ;;  %8503 = vmatprep.subr.bf16.mxu0 %v13661_v3  ;;  %v6761_v16 = vpop.f32.mrb[172].mxu1  ;;  %v6874_v12 = vpop.f32.mrb[192].mxu0  ;;  %7799 = vmatprep.subr.bf16.mxu1 %v14983_v29  ;;  %v11559_v3 = vld [vmem:[%s14891_s5 + $0x1f0] ss:$100 sps:$4 sm:$0xff]  }
 0x55e   : > { %v6762_v61 = vadd.f32 %v6761_v16, %v13763_v23  ;;  %v6875_v32 = vadd.f32 %v6874_v12, %v13763_v23  ;;  %v6763_v6 = vpop.f32.mrb[173].mxu1  ;;  %v6876_v4 = vpop.f32.mrb[193].mxu0 }
 0x55f   : > { %v6764_v34 = vadd.f32 %v6763_v6, %v13763_v23  ;;  %v6877_v51 = vadd.f32 %v6876_v4, %v13763_v23  ;;  %7800 = vmatpush1.bf16.msra.mxu1 %v11558_v26  ;;  %8504 = vmatpush1.bf16.msra.mxu0 %v13651_v41  ;;  %v6765_v58 = vpop.f32.mrb[174].mxu1  ;;  %v6878_v20 = vpop.f32.mrb[194].mxu0 }
 0x560   : > { %v6766_v33 = vadd.f32 %v6765_v58, %v13765_v7  ;;  %v6879_v50 = vadd.f32 %v6878_v20, %v13765_v7  ;;  %8505 = vmatprep.subr.bf16.mxu0 %v13687_v17  ;;  %v6767_v24 = vpop.f32.mrb[175].mxu1  ;;  %v6880_v44 = vpop.f32.mrb[195].mxu0  ;;  %7801 = vmatprep.subr.bf16.mxu1 %v14983_v29  ;;  %v8198_v11 = vmax.f32 %v6762_v61, 0.0  ;;  %v8200_v26 = vmax.f32 %v6875_v32, 0.0  ;;  %v11560_v20 = vld [vmem:[%s14891_s5 + $0x2b8] ss:$100 sps:$4 sm:$0xff]  }
 0x561   : > { %v6768_v5 = vadd.f32 %v6767_v24, %v13765_v7  ;;  %v6881_v41 = vadd.f32 %v6880_v44, %v13765_v7  ;;  %v8199_v6 = vmax.f32 %v6764_v34, 0.0  ;;  %v8201_v4 = vmax.f32 %v6877_v51, 0.0 }
 0x562   : > { %v8223_v16 = vmax.f32 %v6766_v33, 0.0  ;;  %v8225_v12 = vmax.f32 %v6879_v50, 0.0  ;;  %7614 = vmatmul.mubr.bf16.gmra.mrb[24].mxu1 %v12975_v43  ;;  %7727 = vmatmul.mubr.bf16.gmra.mrb[44].mxu0 %v12975_v43 }
 0x563   : > { %v8224_v58 = vmax.f32 %v6768_v5, 0.0  ;;  %v8226_v17 = vmax.f32 %v6881_v41, 0.0  ;;  %7802 = vmatpush1.bf16.msra.mxu1 %v11559_v3  ;;  %8506 = vmatpush1.bf16.msra.mxu0 %v13683_v40 }
 0x564   : > { %v14088_v24 = vpack.c.bf16 %v8223_v16, %v8198_v11  ;;  %v14090_v61 = vpack.c.bf16 %v8225_v12, %v8200_v26  ;;  %9934 = vmatprep.mubr.msk.bf16.mxu1 %vm4818_vm0, %v12774_v62  ;;  %9942 = vmatprep.mubr.msk.bf16.mxu0 %vm4818_vm0, %v12774_v62 }
 0x565   : > { %v14096_v32 = vpack.c.bf16 %v8224_v58, %v8199_v6  ;;  %v14098_v34 = vpack.c.bf16 %v8226_v17, %v8201_v4  ;;  %8507 = vmatprep.subr.bf16.mxu0 %v13713_v31  ;;  %v6771_v40 = vpop.f32.mrb[176].mxu1  ;;  %v6884_v51 = vpop.f32.mrb[196].mxu0  ;;  %7803 = vmatprep.subr.bf16.mxu1 %v14983_v29  ;;  %v11561_v31 = vld [vmem:[%s14891_s5 + $0x380] ss:$100 sps:$4 sm:$0xff]  }
 0x566   : > { %v6772_v3 = vadd.f32 %v6771_v40, %v13834_v45  ;;  %v6885_v33 = vadd.f32 %v6884_v51, %v13834_v45  ;;  %v6773_v50 = vpop.f32.mrb[177].mxu1  ;;  %v6886_v44 = vpop.f32.mrb[197].mxu0 }
 0x567   : > { %v6774_v5 = vadd.f32 %v6773_v50, %v13834_v45  ;;  %v6887_v41 = vadd.f32 %v6886_v44, %v13834_v45  ;;  %7804 = vmatpush1.bf16.msra.mxu1 %v11560_v20  ;;  %8508 = vmatpush1.bf16.msra.mxu0 %v13709_v59  ;;  %v6775_v11 = vpop.f32.mrb[178].mxu1  ;;  %v6888_v26 = vpop.f32.mrb[198].mxu0 }
 0x568   : > { %v6776_v16 = vadd.f32 %v6775_v11, %v13836_v22  ;;  %v6889_v12 = vadd.f32 %v6888_v26, %v13836_v22  ;;  %8509 = vmatprep.subr.bf16.mxu0 %v13739_v2  ;;  %v6777_v6 = vpop.f32.mrb[179].mxu1  ;;  %v6890_v4 = vpop.f32.mrb[199].mxu0  ;;  %7805 = vmatprep.subr.bf16.mxu1 %v14983_v29  ;;  %v8248_v17 = vmax.f32 %v6772_v3, 0.0  ;;  %v8250_v20 = vmax.f32 %v6885_v33, 0.0  ;;  %v11562_v26 = vld [vmem:[%s14891_s5 + $0x448] ss:$100 sps:$4 sm:$0xff]  }
 0x569   : > { %v6778_v58 = vadd.f32 %v6777_v6, %v13836_v22  ;;  %v6891_v59 = vadd.f32 %v6890_v4, %v13836_v22  ;;  %v8249_v50 = vmax.f32 %v6774_v5, 0.0  ;;  %v8251_v44 = vmax.f32 %v6887_v41, 0.0 }
 0x56a   : > { %v8273_v40 = vmax.f32 %v6776_v16, 0.0  ;;  %v8275_v51 = vmax.f32 %v6889_v12, 0.0  ;;  %7624 = vmatmul.mubr.bf16.gmra.mrb[28].mxu1 %v13023_v39  ;;  %7737 = vmatmul.mubr.bf16.gmra.mrb[48].mxu0 %v13023_v39 }
 0x56b   : > { %v8274_v11 = vmax.f32 %v6778_v58, 0.0  ;;  %v8276_v2 = vmax.f32 %v6891_v59, 0.0  ;;  %7806 = vmatpush1.bf16.msra.mxu1 %v11561_v31  ;;  %8510 = vmatpush1.bf16.msra.mxu0 %v13735_v48 }
 0x56c   : > { %v14122_v6 = vpack.c.bf16 %v8273_v40, %v8248_v17  ;;  %v14124_v3 = vpack.c.bf16 %v8275_v51, %v8250_v20  ;;  %9935 = vmatprep.mubr.msk.bf16.mxu1 %vm4818_vm0, %v12772_v53  ;;  %9943 = vmatprep.mubr.msk.bf16.mxu0 %vm4818_vm0, %v12772_v53  ;;  %v14994_v17 = vld [vmem:[#allocation19_spill] sm:$0xff] }
 0x56d   : > { %v14130_v33 = vpack.c.bf16 %v8274_v11, %v8249_v50  ;;  %v14132_v5 = vpack.c.bf16 %v8276_v2, %v8251_v44  ;;  %8511 = vmatprep.subr.bf16.mxu0 %v13777_v30  ;;  %v6927_v48 = vpop.f32.mrb[180].mxu1  ;;  %v7040_v41 = vpop.f32.mrb[200].mxu0  ;;  %7807 = vmatprep.subr.bf16.mxu1 %v14983_v29  ;;  %v11563_v30 = vld [vmem:[%s14891_s5 + $0x510] ss:$100 sps:$4 sm:$0xff]  }
 0x56e   : > { %14992 = vst [vmem:[#allocation50_spill] sm:$0xff] %v14124_v3  ;;  %v6928_v31 = vadd.f32 %v6927_v48, %v13555_v57  ;;  %v7041_v16 = vadd.f32 %v7040_v41, %v13555_v57  ;;  %v6929_v12 = vpop.f32.mrb[181].mxu1  ;;  %v7042_v4 = vpop.f32.mrb[201].mxu0  ;;  %v14995_v44 = vld [vmem:[#allocation24_spill] sm:$0xff] }
 0x56f   : > { %14993 = vst [vmem:[#allocation51_spill] sm:$0xff] %v14132_v5  ;;  %v6930_v58 = vadd.f32 %v6929_v12, %v13555_v57  ;;  %v7043_v59 = vadd.f32 %v7042_v4, %v13555_v57  ;;  %7808 = vmatpush1.bf16.msra.mxu1 %v11562_v26  ;;  %8512 = vmatpush1.bf16.msra.mxu0 %v14994_v17  ;;  %v6931_v20 = vpop.f32.mrb[182].mxu1  ;;  %v7044_v40 = vpop.f32.mrb[202].mxu0  ;;  %v14996_v5 = vld [vmem:[#allocation22_spill] sm:$0xff] }
 0x570   : > { %v6932_v51 = vadd.f32 %v6931_v20, %v13557_v35  ;;  %v7045_v50 = vadd.f32 %v7044_v40, %v13557_v35  ;;  %8513 = vmatprep.subr.bf16.mxu0 %v14995_v44  ;;  %v6933_v11 = vpop.f32.mrb[183].mxu1  ;;  %v7046_v2 = vpop.f32.mrb[203].mxu0  ;;  %7809 = vmatprep.subr.bf16.mxu1 %v14983_v29  ;;  %v7902_v41 = vmax.f32 %v6928_v31, 0.0  ;;  %v7904_v12 = vmax.f32 %v7041_v16, 0.0 }
 0x571   : > { %v6934_v26 = vadd.f32 %v6933_v11, %v13557_v35  ;;  %v7047_v48 = vadd.f32 %v7046_v2, %v13557_v35  ;;  %v7903_v20 = vmax.f32 %v6930_v58, 0.0  ;;  %v7905_v40 = vmax.f32 %v7043_v59, 0.0  ;;  %v11564_v11 = vld [vmem:[%s14891_s5 + $0x5d8] ss:$100 sps:$4 sm:$0xff]  }
 0x572   : > { %v7927_v4 = vmax.f32 %v6932_v51, 0.0  ;;  %v7929_v17 = vmax.f32 %v7045_v50, 0.0  ;;  %7634 = vmatmul.mubr.bf16.gmra.mrb[32].mxu1 %v13066_v0  ;;  %7747 = vmatmul.mubr.bf16.gmra.mrb[52].mxu0 %v13066_v0 }
 0x573   : > { %v7928_v3 = vmax.f32 %v6934_v26, 0.0  ;;  %v7930_v44 = vmax.f32 %v7047_v48, 0.0  ;;  %7810 = vmatpush1.bf16.msra.mxu1 %v11563_v30  ;;  %8514 = vmatpush1.bf16.msra.mxu0 %v14996_v5 }
 0x574   : > { %v14156_v2 = vpack.c.bf16 %v7927_v4, %v7902_v41  ;;  %v14158_v31 = vpack.c.bf16 %v7929_v17, %v7904_v12  ;;  %9936 = vmatprep.mubr.msk.bf16.mxu1 %vm4818_vm0, %v12794_v28  ;;  %9944 = vmatprep.mubr.msk.bf16.mxu0 %vm4818_vm0, %v12794_v28 }
 0x575   : > { %v14164_v16 = vpack.c.bf16 %v7928_v3, %v7903_v20  ;;  %v14166_v58 = vpack.c.bf16 %v7930_v44, %v7905_v40  ;;  %8515 = vmatprep.subr.bf16.mxu0 %v13885_v18  ;;  %v6937_v5 = vpop.f32.mrb[184].mxu1  ;;  %v7050_v59 = vpop.f32.mrb[204].mxu0  ;;  %7811 = vmatprep.subr.bf16.mxu1 %v14983_v29  ;;  %v15000_v3 = vld [vmem:[#allocation27_spill] sm:$0xff]  ;;  %v11565_v18 = vld [vmem:[%s14891_s5 + $0x6a0] ss:$100 sps:$4 sm:$0xff]   ;;  %v15001_v40 = vld [vmem:[#allocation4_spill] sm:$0xff] }
 0x576   : > { %14997 = vst [vmem:[#allocation19_spill] sm:$0xff] %v14156_v2  ;;  %14998 = vst [vmem:[#allocation24_spill] sm:$0xff] %v14158_v31  ;;  %v6938_v30 = vadd.f32 %v6937_v5, %v13597_v38  ;;  %v7051_v51 = vadd.f32 %v7050_v59, %v13597_v38  ;;  %v6939_v50 = vpop.f32.mrb[185].mxu1  ;;  %v7052_v26 = vpop.f32.mrb[205].mxu0 }
 0x577   : > { %14999 = vst [vmem:[#allocation22_spill] sm:$0xff] %v14166_v58  ;;  %v6940_v48 = vadd.f32 %v6939_v50, %v13597_v38  ;;  %v7053_v41 = vadd.f32 %v7052_v26, %v13597_v38  ;;  %7812 = vmatpush1.bf16.msra.mxu1 %v11564_v11  ;;  %8516 = vmatpush1.bf16.msra.mxu0 %v15000_v3  ;;  %v6941_v12 = vpop.f32.mrb[186].mxu1  ;;  %v7054_v4 = vpop.f32.mrb[206].mxu0 }
 0x578   : > { %v6942_v17 = vadd.f32 %v6941_v12, %v13599_v8  ;;  %v7055_v20 = vadd.f32 %v7054_v4, %v13599_v8  ;;  %8542 = vmatprep.subr.bf16.mxu0 %v15001_v40  ;;  %v6943_v44 = vpop.f32.mrb[187].mxu1  ;;  %v7056_v5 = vpop.f32.mrb[207].mxu0  ;;  %7813 = vmatprep.subr.bf16.mxu1 %v14983_v29  ;;  %v7952_v50 = vmax.f32 %v6938_v30, 0.0  ;;  %v7954_v26 = vmax.f32 %v7051_v51, 0.0  ;;  %v15004_v30 = vld [vmem:[#allocation32_spill] sm:$0xff] }
 0x579   : > { %v6944_v11 = vadd.f32 %v6943_v44, %v13599_v8  ;;  %v7057_v59 = vadd.f32 %v7056_v5, %v13599_v8  ;;  %v7953_v12 = vmax.f32 %v6940_v48, 0.0  ;;  %v7955_v4 = vmax.f32 %v7053_v41, 0.0 }
 0x57a   : > { %v7977_v3 = vmax.f32 %v6942_v17, 0.0  ;;  %v7979_v31 = vmax.f32 %v7055_v20, 0.0  ;;  %7644 = vmatmul.mubr.bf16.gmra.mrb[36].mxu1 %v13114_v63  ;;  %7757 = vmatmul.mubr.bf16.gmra.mrb[56].mxu0 %v13114_v63 }
 0x57b   : > { %v7978_v2 = vmax.f32 %v6944_v11, 0.0  ;;  %v7980_v40 = vmax.f32 %v7057_v59, 0.0  ;;  %7814 = vmatpush1.bf16.msra.mxu1 %v11565_v18  ;;  %9937 = vmatprep.mubr.msk.bf16.mxu1 %vm4818_vm0, %v12792_v9 }
 0x57c   : > { %v14188_v58 = vpack.c.bf16 %v7977_v3, %v7952_v50  ;;  %v14190_v44 = vpack.c.bf16 %v7979_v31, %v7954_v26  ;;  %9945 = vmatprep.mubr.msk.bf16.mxu0 %vm4818_vm0, %v12792_v9  ;;  %8583 = vmatprep.subr.bf16.mxu1 %v15004_v30 }
 0x57d   : > { %v14195_v51 = vpack.c.bf16 %v7978_v2, %v7953_v12  ;;  %v14197_v17 = vpack.c.bf16 %v7980_v40, %v7955_v4  ;;  %v6947_v48 = vpop.f32.mrb[188].mxu1  ;;  %v7060_v41 = vpop.f32.mrb[208].mxu0 }
 0x57e   : > { %15002 = vst [vmem:[#allocation27_spill] sm:$0xff] %v14188_v58  ;;  %15003 = vst [vmem:[#allocation4_spill] sm:$0xff] %v14190_v44  ;;  %v6948_v18 = vadd.f32 %v6947_v48, %v13647_v19  ;;  %v7061_v20 = vadd.f32 %v7060_v41, %v13647_v19  ;;  %v6949_v5 = vpop.f32.mrb[189].mxu1  ;;  %v7062_v11 = vpop.f32.mrb[209].mxu0 }
 0x57f   : > { %15005 = vst [vmem:[#allocation32_spill] sm:$0xff] %v14195_v51  ;;  %15006 = vst [vmem:[#allocation52_spill] sm:$0xff] %v14197_v17  ;;  %v6950_v31 = vadd.f32 %v6949_v5, %v13647_v19  ;;  %v7063_v59 = vadd.f32 %v7062_v11, %v13647_v19  ;;  %v6951_v50 = vpop.f32.mrb[190].mxu1  ;;  %v7064_v26 = vpop.f32.mrb[210].mxu0 }
 0x580   : > { %v6952_v3 = vadd.f32 %v6951_v50, %v13649_v27  ;;  %v7065_v2 = vadd.f32 %v7064_v26, %v13649_v27  ;;  %v6953_v12 = vpop.f32.mrb[191].mxu1  ;;  %v7066_v4 = vpop.f32.mrb[211].mxu0  ;;  %v8002_v48 = vmax.f32 %v6948_v18, 0.0  ;;  %v8004_v41 = vmax.f32 %v7061_v20, 0.0 }
 0x581   : > { %v6954_v40 = vadd.f32 %v6953_v12, %v13649_v27  ;;  %v7067_v30 = vadd.f32 %v7066_v4, %v13649_v27  ;;  %v8003_v5 = vmax.f32 %v6950_v31, 0.0  ;;  %v8005_v11 = vmax.f32 %v7063_v59, 0.0 }
 0x582   : > { %v8027_v44 = vmax.f32 %v6952_v3, 0.0  ;;  %v8029_v58 = vmax.f32 %v7065_v2, 0.0  ;;  %7654 = vmatmul.mubr.bf16.gmra.mrb[40].mxu1 %v13138_v25  ;;  %7767 = vmatmul.mubr.bf16.gmra.mrb[60].mxu0 %v13138_v25 }
 0x583   : > { %v8028_v17 = vmax.f32 %v6954_v40, 0.0  ;;  %v8030_v50 = vmax.f32 %v7067_v30, 0.0  ;;  %9938 = vmatprep.mubr.msk.bf16.mxu1 %vm4818_vm0, %v12818_v10  ;;  %9946 = vmatprep.mubr.msk.bf16.mxu0 %vm4818_vm0, %v12818_v10 }
 0x584   : > { %v14213_v26 = vpack.c.bf16 %v8027_v44, %v8002_v48  ;;  %v14215_v18 = vpack.c.bf16 %v8029_v58, %v8004_v41 }
 0x585   : > { %v14217_v20 = vpack.c.bf16 %v8028_v17, %v8003_v5  ;;  %v14219_v3 = vpack.c.bf16 %v8030_v50, %v8005_v11  ;;  %v6957_v2 = vpop.f32.mrb[192].mxu1  ;;  %v7070_v12 = vpop.f32.mrb[212].mxu0 }
 0x586   : > { %15007 = vst [vmem:[#allocation53_spill] sm:$0xff] %v14213_v26  ;;  %15008 = vst [vmem:[#allocation54_spill] sm:$0xff] %v14215_v18  ;;  %v6958_v31 = vadd.f32 %v6957_v2, %v13679_v52  ;;  %v7071_v59 = vadd.f32 %v7070_v12, %v13679_v52  ;;  %v6959_v4 = vpop.f32.mrb[193].mxu1  ;;  %v7072_v40 = vpop.f32.mrb[213].mxu0 }
 0x587   : > { %15009 = vst [vmem:[#allocation55_spill] sm:$0xff] %v14217_v20  ;;  %15010 = vst [vmem:[#allocation56_spill] sm:$0xff] %v14219_v3  ;;  %v6960_v30 = vadd.f32 %v6959_v4, %v13679_v52  ;;  %v7073_v51 = vadd.f32 %v7072_v40, %v13679_v52  ;;  %v6961_v44 = vpop.f32.mrb[194].mxu1  ;;  %v7074_v48 = vpop.f32.mrb[214].mxu0 }
 0x588   : > { %v6962_v58 = vadd.f32 %v6961_v44, %v13681_v14  ;;  %v7075_v17 = vadd.f32 %v7074_v48, %v13681_v14  ;;  %v6963_v41 = vpop.f32.mrb[195].mxu1  ;;  %v7076_v5 = vpop.f32.mrb[215].mxu0  ;;  %v8052_v2 = vmax.f32 %v6958_v31, 0.0  ;;  %v8054_v12 = vmax.f32 %v7071_v59, 0.0 }
 0x589   : > { %v6964_v11 = vadd.f32 %v6963_v41, %v13681_v14  ;;  %v7077_v50 = vadd.f32 %v7076_v5, %v13681_v14  ;;  %v8053_v4 = vmax.f32 %v6960_v30, 0.0  ;;  %v8055_v40 = vmax.f32 %v7073_v51, 0.0 }
 0x58a   : > { %v8077_v18 = vmax.f32 %v6962_v58, 0.0  ;;  %v8079_v26 = vmax.f32 %v7075_v17, 0.0  ;;  %7664 = vmatmul.mubr.bf16.gmra.mrb[44].mxu1 %v13155_v49  ;;  %7777 = vmatmul.mubr.bf16.gmra.mrb[64].mxu0 %v13155_v49 }
 0x58b   : > { %v8078_v3 = vmax.f32 %v6964_v11, 0.0  ;;  %v8080_v44 = vmax.f32 %v7077_v50, 0.0  ;;  %9939 = vmatprep.mubr.msk.bf16.mxu1 %vm4818_vm0, %v12806_v36  ;;  %9947 = vmatprep.mubr.msk.bf16.mxu0 %vm4818_vm0, %v12806_v36 }
 0x58c   : > { %v14235_v48 = vpack.c.bf16 %v8077_v18, %v8052_v2  ;;  %v14237_v31 = vpack.c.bf16 %v8079_v26, %v8054_v12 }
 0x58d   : > { %v14239_v59 = vpack.c.bf16 %v8078_v3, %v8053_v4  ;;  %v14241_v58 = vpack.c.bf16 %v8080_v44, %v8055_v40  ;;  %v6967_v17 = vpop.f32.mrb[196].mxu1  ;;  %v7080_v41 = vpop.f32.mrb[216].mxu0 }
 0x58e   : > { %15011 = vst [vmem:[#allocation57_spill] sm:$0xff] %v14235_v48  ;;  %15012 = vst [vmem:[#allocation58_spill] sm:$0xff] %v14237_v31  ;;  %v6968_v51 = vadd.f32 %v6967_v17, %v13705_v46  ;;  %v7081_v30 = vadd.f32 %v7080_v41, %v13705_v46  ;;  %v6969_v5 = vpop.f32.mrb[197].mxu1  ;;  %v7082_v11 = vpop.f32.mrb[217].mxu0 }
 0x58f   : > { %15013 = vst [vmem:[#allocation59_spill] sm:$0xff] %v14239_v59  ;;  %15014 = vst [vmem:[#allocation60_spill] sm:$0xff] %v14241_v58  ;;  %v6970_v50 = vadd.f32 %v6969_v5, %v13705_v46  ;;  %v7083_v20 = vadd.f32 %v7082_v11, %v13705_v46  ;;  %v6971_v18 = vpop.f32.mrb[198].mxu1  ;;  %v7084_v2 = vpop.f32.mrb[218].mxu0  ;;  %v15019_v59 = vld [vmem:[#allocation2_spill] sm:$0xff] }
 0x590   : > { %v6972_v26 = vadd.f32 %v6971_v18, %v13707_v54  ;;  %v7085_v3 = vadd.f32 %v7084_v2, %v13707_v54  ;;  %v6973_v12 = vpop.f32.mrb[199].mxu1  ;;  %v7086_v4 = vpop.f32.mrb[219].mxu0  ;;  %v8102_v17 = vmax.f32 %v6968_v51, 0.0  ;;  %v8104_v41 = vmax.f32 %v7081_v30, 0.0 }
 0x591   : > { %v6974_v40 = vadd.f32 %v6973_v12, %v13707_v54  ;;  %v7087_v44 = vadd.f32 %v7086_v4, %v13707_v54  ;;  %v8103_v5 = vmax.f32 %v6970_v50, 0.0  ;;  %v8105_v11 = vmax.f32 %v7083_v20, 0.0 }
 0x592   : > { %v8127_v31 = vmax.f32 %v6972_v26, 0.0  ;;  %v8129_v48 = vmax.f32 %v7085_v3, 0.0  ;;  %7674 = vmatmul.mubr.bf16.gmra.mrb[48].mxu1 %v13169_v15  ;;  %7787 = vmatmul.mubr.bf16.gmra.mrb[68].mxu0 %v13169_v15 }
 0x593   : > { %v8128_v58 = vmax.f32 %v6974_v40, 0.0  ;;  %v8130_v18 = vmax.f32 %v7087_v44, 0.0  ;;  %9948 = vmatprep.mubr.msk.bf16.mxu1 %vm4818_vm0, %v12756_v47  ;;  %8533 = vmatprep.mubr.bf16.mxu0 %v14983_v29 }
 0x594   : > { %v14256_v2 = vpack.c.bf16 %v8127_v31, %v8102_v17  ;;  %v14258_v12 = vpack.c.bf16 %v8129_v48, %v8104_v41  ;;  %v14271_v48 = vld [vmem:[%s14892_s6] sm:$0x3] }
 0x595   : > { %v14260_v51 = vpack.c.bf16 %v8128_v58, %v8103_v5  ;;  %v14262_v30 = vpack.c.bf16 %v8130_v18, %v8105_v11  ;;  %v6977_v26 = vpop.f32.mrb[200].mxu1  ;;  %v7090_v3 = vpop.f32.mrb[220].mxu0 }
 0x596   : > { %15015 = vst [vmem:[#allocation61_spill] sm:$0xff] %v14256_v2  ;;  %15016 = vst [vmem:[#allocation62_spill] sm:$0xff] %v14258_v12  ;;  %v6978_v50 = vadd.f32 %v6977_v26, %v13731_v42  ;;  %v7091_v20 = vadd.f32 %v7090_v3, %v13731_v42  ;;  %v6979_v4 = vpop.f32.mrb[201].mxu1  ;;  %v7092_v40 = vpop.f32.mrb[221].mxu0 }
 0x597   : > { %15017 = vst [vmem:[#allocation63_spill] sm:$0xff] %v14260_v51  ;;  %15018 = vst [vmem:[#allocation64_spill] sm:$0xff] %v14262_v30  ;;  %v6980_v47 = vadd.f32 %v6979_v4, %v13731_v42  ;;  %v7093_v44 = vadd.f32 %v7092_v40, %v13731_v42  ;;  %v6981_v31 = vpop.f32.mrb[202].mxu1  ;;  %v7094_v17 = vpop.f32.mrb[222].mxu0 }
 0x598   : > { %v6982_v58 = vadd.f32 %v6981_v31, %v13733_v55  ;;  %v7095_v41 = vadd.f32 %v7094_v17, %v13733_v55  ;;  %v6983_v5 = vpop.f32.mrb[203].mxu1  ;;  %v7096_v11 = vpop.f32.mrb[223].mxu0  ;;  %v8152_v3 = vmax.f32 %v6978_v50, 0.0  ;;  %v8154_v4 = vmax.f32 %v7091_v20, 0.0  ;;  %v15020_v17 = vld [vmem:[#allocation30_spill] sm:$0xff] }
 0x599   : > { %v6984_v18 = vadd.f32 %v6983_v5, %v13733_v55  ;;  %v7097_v26 = vadd.f32 %v7096_v11, %v13733_v55  ;;  %v8153_v2 = vmax.f32 %v6980_v47, 0.0  ;;  %v8155_v30 = vmax.f32 %v7093_v44, 0.0  ;;  %v15023_v50 = vld [vmem:[#allocation6_spill] sm:$0xff]  ;;  %v15025_v47 = vld [vmem:[#allocation36_spill] sm:$0xff] }
 0x59a   : > { %v8177_v40 = vmax.f32 %v6982_v58, 0.0  ;;  %v8179_v12 = vmax.f32 %v7095_v41, 0.0  ;;  %7830 = vmatmul.mubr.bf16.vlgmr.msra.gmra.mrb[52].mxu1 %v12924_v60  ;;  %8534 = vmatmul.mubr.bf16.vlgmr.msra.gmra.mrb[72].mxu0 %v14271_v48 }
 0x59b   : > { %v8178_v51 = vmax.f32 %v6984_v18, 0.0  ;;  %v8180_v31 = vmax.f32 %v7097_v26, 0.0  ;;  %8543 = vmatpush1.bf16.msra.mxu0 %v15019_v59  ;;  %8584 = vmatpush1.bf16.msra.mxu1 %v15020_v17 }
 0x59c   : > { %v14281_v42 = vpack.c.bf16 %v8177_v40, %v8152_v3  ;;  %v14283_v5 = vpack.c.bf16 %v8179_v12, %v8154_v4  ;;  %9949 = vmatprep.mubr.msk.bf16.mxu1 %vm4818_vm0, %v12752_v13  ;;  %8544 = vmatprep.subr.bf16.mxu0 %v15023_v50  ;;  %v15028_v40 = vld [vmem:[#allocation8_spill] sm:$0xff] }
 0x59d   : > { %v14288_v60 = vpack.c.bf16 %v8178_v51, %v8153_v2  ;;  %v14290_v20 = vpack.c.bf16 %v8180_v31, %v8155_v30  ;;  %8585 = vmatprep.subr.bf16.mxu1 %v15025_v47  ;;  %v6987_v44 = vpop.f32.mrb[204].mxu1  ;;  %v7100_v58 = vpop.f32.mrb[224].mxu0  ;;  %8574 = vmatprep.mubr.bf16.mxu0 %v14983_v29  ;;  %v15026_v2 = vld [vmem:[#allocation5_spill] sm:$0xff]  ;;  %v15027_v51 = vld [vmem:[#allocation34_spill] sm:$0xff]  ;;  %v15029_v31 = vld [vmem:[#allocation40_spill] sm:$0xff] }
 0x59e   : > { %15021 = vst [vmem:[#allocation2_spill] sm:$0xff] %v14281_v42  ;;  %15022 = vst [vmem:[#allocation30_spill] sm:$0xff] %v14283_v5  ;;  %v6988_v59 = vadd.f32 %v6987_v44, %v13763_v23  ;;  %v7101_v12 = vadd.f32 %v7100_v58, %v13763_v23  ;;  %v6989_v41 = vpop.f32.mrb[205].mxu1  ;;  %v7102_v11 = vpop.f32.mrb[225].mxu0  ;;  %v15030_v42 = vld [vmem:[#allocation7_spill] sm:$0xff] }
 0x59f   : > { %15024 = vst [vmem:[#allocation6_spill] sm:$0xff] %v14290_v20  ;;  %v6990_v13 = vadd.f32 %v6989_v41, %v13763_v23  ;;  %v7103_v18 = vadd.f32 %v7102_v11, %v13763_v23  ;;  %8545 = vmatpush1.bf16.msra.mxu0 %v15026_v2  ;;  %8586 = vmatpush1.bf16.msra.mxu1 %v15027_v51  ;;  %v6991_v30 = vpop.f32.mrb[206].mxu1  ;;  %v7104_v26 = vpop.f32.mrb[226].mxu0 }
 0x5a0   : > { %v6992_v3 = vadd.f32 %v6991_v30, %v13765_v7  ;;  %v7105_v4 = vadd.f32 %v7104_v26, %v13765_v7  ;;  %8546 = vmatprep.subr.bf16.mxu0 %v15028_v40  ;;  %8587 = vmatprep.subr.bf16.mxu1 %v15029_v31  ;;  %v6993_v17 = vpop.f32.mrb[207].mxu1  ;;  %v7106_v50 = vpop.f32.mrb[227].mxu0  ;;  %v8202_v58 = vmax.f32 %v6988_v59, 0.0  ;;  %v8204_v41 = vmax.f32 %v7101_v12, 0.0  ;;  %v15031_v40 = vld [vmem:[#allocation38_spill] sm:$0xff]  ;;  %v15034_v59 = vld [vmem:[#allocation12_spill] sm:$0xff] }
 0x5a1   : > { %v6994_v47 = vadd.f32 %v6993_v17, %v13765_v7  ;;  %v7107_v44 = vadd.f32 %v7106_v50, %v13765_v7  ;;  %v8203_v51 = vmax.f32 %v6990_v13, 0.0  ;;  %v8205_v30 = vmax.f32 %v7103_v18, 0.0  ;;  %v15035_v13 = vld [vmem:[#allocation44_spill] sm:$0xff] }
 0x5a2   : > { %v8227_v11 = vmax.f32 %v6992_v3, 0.0  ;;  %v8229_v2 = vmax.f32 %v7105_v4, 0.0  ;;  %7838 = vmatmul.mubr.bf16.gmra.mrb[56].mxu1 %v12975_v43 }
 0x5a3   : > { %v8228_v5 = vmax.f32 %v6994_v47, 0.0  ;;  %v8230_v26 = vmax.f32 %v7107_v44, 0.0  ;;  %8547 = vmatpush1.bf16.msra.mxu0 %v15030_v42  ;;  %8588 = vmatpush1.bf16.msra.mxu1 %v15031_v40  ;;  %v15036_v44 = vld [vmem:[#allocation11_spill] sm:$0xff] }
 0x5a4   : > { %v14309_v31 = vpack.c.bf16 %v8227_v11, %v8202_v58  ;;  %v14311_v20 = vpack.c.bf16 %v8229_v2, %v8204_v41  ;;  %9950 = vmatprep.mubr.msk.bf16.mxu1 %vm4818_vm0, %v12774_v62  ;;  %8548 = vmatprep.subr.bf16.mxu0 %v15034_v59 }
 0x5a5   : > { %v14316_v12 = vpack.c.bf16 %v8228_v5, %v8203_v51  ;;  %v14318_v43 = vpack.c.bf16 %v8230_v26, %v8205_v30  ;;  %8589 = vmatprep.subr.bf16.mxu1 %v15035_v13  ;;  %v6997_v18 = vpop.f32.mrb[208].mxu1  ;;  %v7110_v3 = vpop.f32.mrb[228].mxu0  ;;  %v15037_v5 = vld [vmem:[#allocation42_spill] sm:$0xff]  ;;  %v15038_v51 = vld [vmem:[#allocation16_spill] sm:$0xff] }
 0x5a6   : > { %15032 = vst [vmem:[#allocation36_spill] sm:$0xff] %v14309_v31  ;;  %15033 = vst [vmem:[#allocation5_spill] sm:$0xff] %v14311_v20  ;;  %v6998_v42 = vadd.f32 %v6997_v18, %v13834_v45  ;;  %v7111_v4 = vadd.f32 %v7110_v3, %v13834_v45  ;;  %v6999_v17 = vpop.f32.mrb[209].mxu1  ;;  %v7112_v50 = vpop.f32.mrb[229].mxu0  ;;  %v15039_v30 = vld [vmem:[#allocation48_spill] sm:$0xff]  ;;  %v15040_v20 = vld [vmem:[#allocation15_spill] sm:$0xff] }
 0x5a7   : > { %v7000_v47 = vadd.f32 %v6999_v17, %v13834_v45  ;;  %v7113_v62 = vadd.f32 %v7112_v50, %v13834_v45  ;;  %8549 = vmatpush1.bf16.msra.mxu0 %v15036_v44  ;;  %8590 = vmatpush1.bf16.msra.mxu1 %v15037_v5  ;;  %v7001_v58 = vpop.f32.mrb[210].mxu1  ;;  %v7114_v41 = vpop.f32.mrb[230].mxu0 }
 0x5a8   : > { %v7002_v11 = vadd.f32 %v7001_v58, %v13836_v22  ;;  %v7115_v2 = vadd.f32 %v7114_v41, %v13836_v22  ;;  %8550 = vmatprep.subr.bf16.mxu0 %v15038_v51  ;;  %8591 = vmatprep.subr.bf16.mxu1 %v15039_v30  ;;  %v7003_v26 = vpop.f32.mrb[211].mxu1  ;;  %v7116_v40 = vpop.f32.mrb[231].mxu0  ;;  %v8252_v18 = vmax.f32 %v6998_v42, 0.0  ;;  %v8254_v3 = vmax.f32 %v7111_v4, 0.0  ;;  %v15041_v51 = vld [vmem:[#allocation46_spill] sm:$0xff]  ;;  %v15042_v42 = vld [vmem:[#allocation21_spill] sm:$0xff] }
 0x5a9   : > { %v7004_v59 = vadd.f32 %v7003_v26, %v13836_v22  ;;  %v7117_v13 = vadd.f32 %v7116_v40, %v13836_v22  ;;  %v8253_v44 = vmax.f32 %v7000_v47, 0.0  ;;  %v8255_v5 = vmax.f32 %v7113_v62, 0.0 }
 0x5aa   : > { %v8277_v17 = vmax.f32 %v7002_v11, 0.0  ;;  %v8279_v50 = vmax.f32 %v7115_v2, 0.0  ;;  %7846 = vmatmul.mubr.bf16.gmra.mrb[60].mxu1 %v13023_v39 }
 0x5ab   : > { %v8278_v58 = vmax.f32 %v7004_v59, 0.0  ;;  %v8280_v41 = vmax.f32 %v7117_v13, 0.0  ;;  %8551 = vmatpush1.bf16.msra.mxu0 %v15040_v20  ;;  %8592 = vmatpush1.bf16.msra.mxu1 %v15041_v51  ;;  %v15043_v59 = vld [vmem:[#allocation20_spill] sm:$0xff] }
 0x5ac   : > { %v14336_v30 = vpack.c.bf16 %v8277_v17, %v8252_v18  ;;  %v14338_v31 = vpack.c.bf16 %v8279_v50, %v8254_v3  ;;  %9951 = vmatprep.mubr.msk.bf16.mxu1 %vm4818_vm0, %v12772_v53  ;;  %8552 = vmatprep.subr.bf16.mxu0 %v15042_v42  ;;  %v15044_v17 = vld [vmem:[#allocation25_spill] sm:$0xff] }
 0x5ad   : > { %v14343_v4 = vpack.c.bf16 %v8278_v58, %v8253_v44  ;;  %v14345_v39 = vpack.c.bf16 %v8280_v41, %v8255_v5  ;;  %8593 = vmatprep.subr.bf16.mxu1 %v14062_v56  ;;  %v7153_v47 = vpop.f32.mrb[212].mxu1  ;;  %v7266_v62 = vpop.f32.mrb[232].mxu0 }
 0x5ae   : > { %v7154_v20 = vadd.f32 %v7153_v47, %v13555_v57  ;;  %v7267_v11 = vadd.f32 %v7266_v62, %v13555_v57  ;;  %v7155_v2 = vpop.f32.mrb[213].mxu1  ;;  %v7268_v26 = vpop.f32.mrb[233].mxu0 }
 0x5af   : > { %v7156_v40 = vadd.f32 %v7155_v2, %v13555_v57  ;;  %v7269_v53 = vadd.f32 %v7268_v26, %v13555_v57  ;;  %8553 = vmatpush1.bf16.msra.mxu0 %v15043_v59  ;;  %8594 = vmatpush1.bf16.msra.mxu1 %v14054_v1  ;;  %v7157_v13 = vpop.f32.mrb[214].mxu1  ;;  %v7270_v18 = vpop.f32.mrb[234].mxu0  ;;  %v15045_v59 = vld [vmem:[#allocation23_spill] sm:$0xff] }
 0x5b0   : > { %v7158_v56 = vadd.f32 %v7157_v13, %v13557_v35  ;;  %v7271_v3 = vadd.f32 %v7270_v18, %v13557_v35  ;;  %8554 = vmatprep.subr.bf16.mxu0 %v15044_v17  ;;  %8595 = vmatprep.subr.bf16.mxu1 %v14096_v32  ;;  %v7159_v50 = vpop.f32.mrb[215].mxu1  ;;  %v7272_v44 = vpop.f32.mrb[235].mxu0  ;;  %v7906_v41 = vmax.f32 %v7154_v20, 0.0  ;;  %v7908_v51 = vmax.f32 %v7267_v11, 0.0  ;;  %v15046_v20 = vld [vmem:[#allocation29_spill] sm:$0xff] }
 0x5b1   : > { %v7160_v5 = vadd.f32 %v7159_v50, %v13557_v35  ;;  %v7273_v58 = vadd.f32 %v7272_v44, %v13557_v35  ;;  %v7907_v47 = vmax.f32 %v7156_v40, 0.0  ;;  %v7909_v62 = vmax.f32 %v7269_v53, 0.0  ;;  %v15047_v50 = vld [vmem:[#allocation28_spill] sm:$0xff] }
 0x5b2   : > { %v7931_v42 = vmax.f32 %v7158_v56, 0.0  ;;  %v7933_v1 = vmax.f32 %v7271_v3, 0.0  ;;  %7854 = vmatmul.mubr.bf16.gmra.mrb[64].mxu1 %v13066_v0 }
 0x5b3   : > { %v7932_v2 = vmax.f32 %v7160_v5, 0.0  ;;  %v7934_v26 = vmax.f32 %v7273_v58, 0.0  ;;  %8555 = vmatpush1.bf16.msra.mxu0 %v15045_v59  ;;  %8596 = vmatpush1.bf16.msra.mxu1 %v14088_v24 }
 0x5b4   : > { %v14363_v32 = vpack.c.bf16 %v7931_v42, %v7906_v41  ;;  %v14365_v13 = vpack.c.bf16 %v7933_v1, %v7908_v51  ;;  %9952 = vmatprep.mubr.msk.bf16.mxu1 %vm4818_vm0, %v12794_v28  ;;  %8556 = vmatprep.subr.bf16.mxu0 %v15046_v20  ;;  %v15048_v41 = vld [vmem:[#allocation33_spill] sm:$0xff] }
 0x5b5   : > { %v14370_v11 = vpack.c.bf16 %v7932_v2, %v7907_v47  ;;  %v14372_v0 = vpack.c.bf16 %v7934_v26, %v7909_v62  ;;  %8597 = vmatprep.subr.bf16.mxu1 %v14130_v33  ;;  %v7163_v40 = vpop.f32.mrb[216].mxu1  ;;  %v7276_v53 = vpop.f32.mrb[236].mxu0 }
 0x5b6   : > { %v7164_v18 = vadd.f32 %v7163_v40, %v13597_v38  ;;  %v7277_v24 = vadd.f32 %v7276_v53, %v13597_v38  ;;  %v7165_v56 = vpop.f32.mrb[217].mxu1  ;;  %v7278_v3 = vpop.f32.mrb[237].mxu0 }
 0x5b7   : > { %v7166_v17 = vadd.f32 %v7165_v56, %v13597_v38  ;;  %v7279_v28 = vadd.f32 %v7278_v3, %v13597_v38  ;;  %8557 = vmatpush1.bf16.msra.mxu0 %v15047_v50  ;;  %8598 = vmatpush1.bf16.msra.mxu1 %v14122_v6  ;;  %v7167_v44 = vpop.f32.mrb[218].mxu1  ;;  %v7280_v5 = vpop.f32.mrb[238].mxu0  ;;  %v15049_v56 = vld [vmem:[#allocation31_spill] sm:$0xff] }
 0x5b8   : > { %v7168_v33 = vadd.f32 %v7167_v44, %v13599_v8  ;;  %v7281_v58 = vadd.f32 %v7280_v5, %v13599_v8  ;;  %8624 = vmatprep.subr.bf16.mxu0 %v15048_v41  ;;  %8665 = vmatprep.subr.bf16.mxu1 %v14164_v16  ;;  %v7169_v51 = vpop.f32.mrb[219].mxu1  ;;  %v7282_v42 = vpop.f32.mrb[239].mxu0  ;;  %v7956_v62 = vmax.f32 %v7164_v18, 0.0  ;;  %v7958_v2 = vmax.f32 %v7277_v24, 0.0  ;;  %v15050_v18 = vld [vmem:[#allocation37_spill] sm:$0xff]  ;;  %v15051_v41 = vld [vmem:[#allocation35_spill] sm:$0xff] }
 0x5b9   : > { %v7170_v1 = vadd.f32 %v7169_v51, %v13599_v8  ;;  %v7283_v47 = vadd.f32 %v7282_v42, %v13599_v8  ;;  %v7957_v59 = vmax.f32 %v7166_v17, 0.0  ;;  %v7959_v20 = vmax.f32 %v7279_v28, 0.0 }
 0x5ba   : > { %v7981_v26 = vmax.f32 %v7168_v33, 0.0  ;;  %v7983_v6 = vmax.f32 %v7281_v58, 0.0  ;;  %8575 = vmatmul.mubr.bf16.vlgmr.msra.gmra.mrb[76].mxu0 %v14271_v48  ;;  %7862 = vmatmul.mubr.bf16.gmra.mrb[68].mxu1 %v13114_v63 }
 0x5bb   : > { %v7982_v40 = vmax.f32 %v7170_v1, 0.0  ;;  %v7984_v53 = vmax.f32 %v7283_v47, 0.0  ;;  %8625 = vmatpush1.bf16.msra.mxu0 %v15049_v56  ;;  %9953 = vmatprep.mubr.msk.bf16.mxu1 %vm4818_vm0, %v12792_v9 }
 0x5bc   : > { %v14392_v16 = vpack.c.bf16 %v7981_v26, %v7956_v62  ;;  %v14394_v3 = vpack.c.bf16 %v7983_v6, %v7958_v2  ;;  %8626 = vmatprep.subr.bf16.mxu0 %v15050_v18  ;;  %8656 = vmatprep.mubr.bf16.mxu0 %v14983_v29  ;;  %v15052_v62 = vld [vmem:[#allocation41_spill] sm:$0xff] }
 0x5bd   : > { %v14398_v24 = vpack.c.bf16 %v7982_v40, %v7957_v59  ;;  %v14400_v63 = vpack.c.bf16 %v7984_v53, %v7959_v20  ;;  %v7173_v17 = vpop.f32.mrb[220].mxu1  ;;  %v7286_v28 = vpop.f32.mrb[240].mxu0 }
 0x5be   : > { %v7174_v50 = vadd.f32 %v7173_v17, %v13647_v19  ;;  %v7287_v44 = vadd.f32 %v7286_v28, %v13647_v19  ;;  %v7175_v5 = vpop.f32.mrb[221].mxu1  ;;  %v7288_v9 = vpop.f32.mrb[241].mxu0 }
 0x5bf   : > { %v7176_v33 = vadd.f32 %v7175_v5, %v13647_v19  ;;  %v7289_v58 = vadd.f32 %v7288_v9, %v13647_v19  ;;  %8627 = vmatpush1.bf16.msra.mxu0 %v15051_v41  ;;  %v7177_v51 = vpop.f32.mrb[222].mxu1  ;;  %v7290_v42 = vpop.f32.mrb[242].mxu0  ;;  %v15053_v9 = vld [vmem:[#allocation39_spill] sm:$0xff] }
 0x5c0   : > { %v7178_v1 = vadd.f32 %v7177_v51, %v13649_v27  ;;  %v7291_v47 = vadd.f32 %v7290_v42, %v13649_v27  ;;  %8628 = vmatprep.subr.bf16.mxu0 %v15052_v62  ;;  %v7179_v2 = vpop.f32.mrb[223].mxu1  ;;  %v7292_v26 = vpop.f32.mrb[243].mxu0  ;;  %v8006_v20 = vmax.f32 %v7174_v50, 0.0  ;;  %v8008_v40 = vmax.f32 %v7287_v44, 0.0  ;;  %v15054_v42 = vld [vmem:[#allocation45_spill] sm:$0xff] }
 0x5c1   : > { %v7180_v6 = vadd.f32 %v7179_v2, %v13649_v27  ;;  %v7293_v59 = vadd.f32 %v7292_v26, %v13649_v27  ;;  %v8007_v18 = vmax.f32 %v7176_v33, 0.0  ;;  %v8009_v17 = vmax.f32 %v7289_v58, 0.0  ;;  %v15055_v26 = vld [vmem:[#allocation43_spill] sm:$0xff] }
 0x5c2   : > { %v8031_v53 = vmax.f32 %v7178_v1, 0.0  ;;  %v8033_v56 = vmax.f32 %v7291_v47, 0.0  ;;  %7870 = vmatmul.mubr.bf16.gmra.mrb[72].mxu1 %v13138_v25 }
 0x5c3   : > { %v8032_v28 = vmax.f32 %v7180_v6, 0.0  ;;  %v8034_v5 = vmax.f32 %v7293_v59, 0.0  ;;  %8629 = vmatpush1.bf16.msra.mxu0 %v15053_v9  ;;  %9954 = vmatprep.mubr.msk.bf16.mxu1 %vm4818_vm0, %v12818_v10 }
 0x5c4   : > { %v14416_v41 = vpack.c.bf16 %v8031_v53, %v8006_v20  ;;  %v14418_v51 = vpack.c.bf16 %v8033_v56, %v8008_v40  ;;  %8630 = vmatprep.subr.bf16.mxu0 %v15054_v42  ;;  %v15056_v53 = vld [vmem:[#allocation49_spill] sm:$0xff] }
 0x5c5   : > { %v14421_v50 = vpack.c.bf16 %v8032_v28, %v8007_v18  ;;  %v14423_v44 = vpack.c.bf16 %v8034_v5, %v8009_v17  ;;  %v7183_v25 = vpop.f32.mrb[224].mxu1  ;;  %v7296_v33 = vpop.f32.mrb[244].mxu0 }
 0x5c6   : > { %v7184_v58 = vadd.f32 %v7183_v25, %v13679_v52  ;;  %v7297_v1 = vadd.f32 %v7296_v33, %v13679_v52  ;;  %v7185_v47 = vpop.f32.mrb[225].mxu1  ;;  %v7298_v62 = vpop.f32.mrb[245].mxu0 }
 0x5c7   : > { %v7186_v10 = vadd.f32 %v7185_v47, %v13679_v52  ;;  %v7299_v2 = vadd.f32 %v7298_v62, %v13679_v52  ;;  %8631 = vmatpush1.bf16.msra.mxu0 %v15055_v26  ;;  %v7187_v6 = vpop.f32.mrb[226].mxu1  ;;  %v7300_v59 = vpop.f32.mrb[246].mxu0 }
 0x5c8   : > { %v7188_v20 = vadd.f32 %v7187_v6, %v13681_v14  ;;  %v7301_v40 = vadd.f32 %v7300_v59, %v13681_v14  ;;  %8632 = vmatprep.subr.bf16.mxu0 %v15056_v53  ;;  %v7189_v56 = vpop.f32.mrb[227].mxu1  ;;  %v7302_v18 = vpop.f32.mrb[247].mxu0  ;;  %v8056_v5 = vmax.f32 %v7184_v58, 0.0  ;;  %v8058_v9 = vmax.f32 %v7297_v1, 0.0  ;;  %v15057_v6 = vld [vmem:[#allocation47_spill] sm:$0xff] }
 0x5c9   : > { %v7190_v17 = vadd.f32 %v7189_v56, %v13681_v14  ;;  %v7303_v28 = vadd.f32 %v7302_v18, %v13681_v14  ;;  %v8057_v33 = vmax.f32 %v7186_v10, 0.0  ;;  %v8059_v47 = vmax.f32 %v7299_v2, 0.0 }
 0x5ca   : > { %v8081_v42 = vmax.f32 %v7188_v20, 0.0  ;;  %v8083_v25 = vmax.f32 %v7301_v40, 0.0  ;;  %7878 = vmatmul.mubr.bf16.gmra.mrb[76].mxu1 %v13155_v49 }
 0x5cb   : > { %v8082_v62 = vmax.f32 %v7190_v17, 0.0  ;;  %v8084_v26 = vmax.f32 %v7303_v28, 0.0  ;;  %8633 = vmatpush1.bf16.msra.mxu0 %v15057_v6  ;;  %9955 = vmatprep.mubr.msk.bf16.mxu1 %vm4818_vm0, %v12806_v36 }
 0x5cc   : > { %v14439_v59 = vpack.c.bf16 %v8081_v42, %v8056_v5  ;;  %v14441_v53 = vpack.c.bf16 %v8083_v25, %v8058_v9  ;;  %8634 = vmatprep.subr.bf16.mxu0 %v14064_v37 }
 0x5cd   : > { %v14444_v58 = vpack.c.bf16 %v8082_v62, %v8057_v33  ;;  %v14446_v1 = vpack.c.bf16 %v8084_v26, %v8059_v47  ;;  %v7193_v49 = vpop.f32.mrb[228].mxu1  ;;  %v7306_v10 = vpop.f32.mrb[248].mxu0 }
 0x5ce   : > { %v7194_v2 = vadd.f32 %v7193_v49, %v13705_v46  ;;  %v7307_v20 = vadd.f32 %v7306_v10, %v13705_v46  ;;  %v7195_v40 = vpop.f32.mrb[229].mxu1  ;;  %v7308_v56 = vpop.f32.mrb[249].mxu0 }
 0x5cf   : > { %v7196_v36 = vadd.f32 %v7195_v40, %v13705_v46  ;;  %v7309_v18 = vadd.f32 %v7308_v56, %v13705_v46  ;;  %8635 = vmatpush1.bf16.msra.mxu0 %v14056_v21  ;;  %v7197_v17 = vpop.f32.mrb[230].mxu1  ;;  %v7310_v37 = vpop.f32.mrb[250].mxu0  ;;  %v15073_v46 = vld [vmem:[#allocation53_spill] sm:$0xff] }
 0x5d0   : > { %v7198_v28 = vadd.f32 %v7197_v17, %v13707_v54  ;;  %v7311_v5 = vadd.f32 %v7310_v37, %v13707_v54  ;;  %8636 = vmatprep.subr.bf16.mxu0 %v14098_v34  ;;  %v7199_v9 = vpop.f32.mrb[231].mxu1  ;;  %v7312_v42 = vpop.f32.mrb[251].mxu0  ;;  %v8106_v47 = vmax.f32 %v7194_v2, 0.0  ;;  %v8108_v62 = vmax.f32 %v7307_v20, 0.0  ;;  %v15058_v17 = vld [vmem:[#allocation51_spill] sm:$0xff] }
 0x5d1   : > { %v7200_v25 = vadd.f32 %v7199_v9, %v13707_v54  ;;  %v7313_v33 = vadd.f32 %v7312_v42, %v13707_v54  ;;  %v8107_v21 = vmax.f32 %v7196_v36, 0.0  ;;  %v8109_v49 = vmax.f32 %v7309_v18, 0.0  ;;  %v15059_v36 = vld [vmem:[#allocation13_spill] sm:$0xff] }
 0x5d2   : > { %v8131_v26 = vmax.f32 %v7198_v28, 0.0  ;;  %v8133_v6 = vmax.f32 %v7311_v5, 0.0  ;;  %7886 = vmatmul.mubr.bf16.gmra.mrb[80].mxu1 %v13169_v15 }
 0x5d3   : > { %v8132_v10 = vmax.f32 %v7200_v25, 0.0  ;;  %v8134_v40 = vmax.f32 %v7313_v33, 0.0  ;;  %8637 = vmatpush1.bf16.msra.mxu0 %v14090_v61  ;;  %8615 = vmatprep.mubr.bf16.mxu1 %v14983_v29  ;;  %v15060_v25 = vld [vmem:[#allocation50_spill] sm:$0xff] }
 0x5d4   : > { %v14461_v34 = vpack.c.bf16 %v8131_v26, %v8106_v47  ;;  %v14463_v56 = vpack.c.bf16 %v8133_v6, %v8108_v62  ;;  %8638 = vmatprep.subr.bf16.mxu0 %v15058_v17  ;;  %v15061_v6 = vld [vmem:[#allocation22_spill] sm:$0xff] }
 0x5d5   : > { %v14466_v2 = vpack.c.bf16 %v8132_v10, %v8107_v21  ;;  %v14468_v20 = vpack.c.bf16 %v8134_v40, %v8109_v49  ;;  %v7203_v37 = vpop.f32.mrb[232].mxu1  ;;  %v7316_v15 = vpop.f32.mrb[252].mxu0 }
 0x5d6   : > { %v7204_v18 = vadd.f32 %v7203_v37, %v15059_v36  ;;  %v7317_v28 = vadd.f32 %v7316_v15, %v15059_v36  ;;  %v7205_v5 = vpop.f32.mrb[233].mxu1  ;;  %v7318_v61 = vpop.f32.mrb[253].mxu0 }
 0x5d7   : > { %v7206_v9 = vadd.f32 %v7205_v5, %v15059_v36  ;;  %v7319_v42 = vadd.f32 %v7318_v61, %v15059_v36  ;;  %8639 = vmatpush1.bf16.msra.mxu0 %v15060_v25  ;;  %v7207_v33 = vpop.f32.mrb[234].mxu1  ;;  %v7320_v47 = vpop.f32.mrb[254].mxu0  ;;  %v15062_v36 = vld [vmem:[#allocation19_spill] sm:$0xff] }
 0x5d8   : > { %v7208_v62 = vadd.f32 %v7207_v33, %v13733_v55  ;;  %v7321_v26 = vadd.f32 %v7320_v47, %v13733_v55  ;;  %8706 = vmatprep.subr.bf16.mxu0 %v15061_v6  ;;  %v7209_v21 = vpop.f32.mrb[235].mxu1  ;;  %v7322_v49 = vpop.f32.mrb[255].mxu0  ;;  %v8156_v17 = vmax.f32 %v7204_v18, 0.0  ;;  %v8158_v37 = vmax.f32 %v7317_v28, 0.0  ;;  %v15063_v6 = vld [vmem:[#allocation24_spill] sm:$0xff] }
 0x5d9   : > { %v7210_v10 = vadd.f32 %v7209_v21, %v13733_v55  ;;  %v7323_v40 = vadd.f32 %v7322_v49, %v13733_v55  ;;  %v8157_v61 = vmax.f32 %v7206_v9, 0.0  ;;  %v8159_v25 = vmax.f32 %v7319_v42, 0.0  ;;  %v15066_v18 = vld [vmem:[#allocation32_spill] sm:$0xff] }
 0x5da   : > { %v8181_v15 = vmax.f32 %v7208_v62, 0.0  ;;  %v8183_v5 = vmax.f32 %v7321_v26, 0.0  ;;  %8657 = vmatmul.mubr.bf16.vlgmr.msra.gmra.mrb[80].mxu0 %v14271_v48  ;;  %8616 = vmatmul.mubr.bf16.vlgmr.msra.gmra.mrb[84].mxu1 %v14271_v48  ;;  %v15067_v28 = vld [vmem:[#allocation52_spill] sm:$0xff] }
 0x5db   : > { %v8182_v33 = vmax.f32 %v7210_v10, 0.0  ;;  %v8184_v47 = vmax.f32 %v7323_v40, 0.0  ;;  %8666 = vmatpush1.bf16.msra.mxu1 %v15062_v36  ;;  %8707 = vmatpush1.bf16.msra.mxu0 %v15063_v6  ;;  %v15071_v6 = vld [vmem:[#allocation55_spill] sm:$0xff] }
 0x5dc   : > { %v14484_v54 = vpack.c.bf16 %v8181_v15, %v8156_v17  ;;  %v14486_v21 = vpack.c.bf16 %v8183_v5, %v8158_v37  ;;  %8667 = vmatprep.subr.bf16.mxu1 %v15066_v18  ;;  %8708 = vmatprep.subr.bf16.mxu0 %v15067_v28  ;;  %v15069_v15 = vld [vmem:[#allocation27_spill] sm:$0xff]  ;;  %v15070_v5 = vld [vmem:[#allocation4_spill] sm:$0xff] }
 0x5dd   : > { %v14490_v62 = vpack.c.bf16 %v8182_v33, %v8157_v61  ;;  %v14492_v26 = vpack.c.bf16 %v8184_v47, %v8159_v25  ;;  %v7213_v9 = vpop.f32.mrb[236].mxu1  ;;  %v7326_v42 = vpop.f32.mrb[0].mxu0  ;;  %8697 = vmatprep.mubr.bf16.mxu1 %v14983_v29  ;;  %8738 = vmatprep.mubr.bf16.mxu0 %v14983_v29  ;;  %v15072_v18 = vld [vmem:[#allocation56_spill] sm:$0xff] }
 0x5de   : > { %15064 = vst [vmem:[#allocation34_spill] sm:$0xff] %v14484_v54  ;;  %15065 = vst [vmem:[#allocation8_spill] sm:$0xff] %v14486_v21  ;;  %v7214_v36 = vadd.f32 %v7213_v9, %v13763_v23  ;;  %v7327_v49 = vadd.f32 %v7326_v42, %v13763_v23  ;;  %v7215_v10 = vpop.f32.mrb[237].mxu1  ;;  %v7328_v40 = vpop.f32.mrb[1].mxu0 }
 0x5df   : > { %15068 = vst [vmem:[#allocation40_spill] sm:$0xff] %v14492_v26  ;;  %v7216_v17 = vadd.f32 %v7215_v10, %v13763_v23  ;;  %v7329_v37 = vadd.f32 %v7328_v40, %v13763_v23  ;;  %8668 = vmatpush1.bf16.msra.mxu1 %v15069_v15  ;;  %8709 = vmatpush1.bf16.msra.mxu0 %v15070_v5  ;;  %v7217_v61 = vpop.f32.mrb[238].mxu1  ;;  %v7330_v25 = vpop.f32.mrb[2].mxu0  ;;  %v15076_v26 = vld [vmem:[#allocation59_spill] sm:$0xff] }
 0x5e0   : > { %v7218_v33 = vadd.f32 %v7217_v61, %v13765_v7  ;;  %v7331_v47 = vadd.f32 %v7330_v25, %v13765_v7  ;;  %8669 = vmatprep.subr.bf16.mxu1 %v15071_v6  ;;  %8710 = vmatprep.subr.bf16.mxu0 %v15072_v18  ;;  %v7219_v28 = vpop.f32.mrb[239].mxu1  ;;  %v7332_v9 = vpop.f32.mrb[3].mxu0  ;;  %v8206_v40 = vmax.f32 %v7214_v36, 0.0  ;;  %v8208_v15 = vmax.f32 %v7327_v49, 0.0  ;;  %v15074_v25 = vld [vmem:[#allocation54_spill] sm:$0xff] }
 0x5e1   : > { %v7220_v42 = vadd.f32 %v7219_v28, %v13765_v7  ;;  %v7333_v10 = vadd.f32 %v7332_v9, %v13765_v7  ;;  %v8207_v55 = vmax.f32 %v7216_v17, 0.0  ;;  %v8209_v21 = vmax.f32 %v7329_v37, 0.0  ;;  %v15077_v28 = vld [vmem:[#allocation60_spill] sm:$0xff] }
 0x5e2   : > { %v8231_v23 = vmax.f32 %v7218_v33, 0.0  ;;  %v8233_v5 = vmax.f32 %v7331_v47, 0.0 }
 0x5e3   : > { %v8232_v54 = vmax.f32 %v7220_v42, 0.0  ;;  %v8234_v61 = vmax.f32 %v7333_v10, 0.0  ;;  %8670 = vmatpush1.bf16.msra.mxu1 %v15073_v46  ;;  %8711 = vmatpush1.bf16.msra.mxu0 %v15074_v25  ;;  %v15078_v10 = vld [vmem:[#allocation57_spill] sm:$0xff] }
 0x5e4   : > { %v14510_v6 = vpack.c.bf16 %v8231_v23, %v8206_v40  ;;  %v14512_v18 = vpack.c.bf16 %v8233_v5, %v8208_v15  ;;  %8671 = vmatprep.subr.bf16.mxu1 %v15076_v26  ;;  %8712 = vmatprep.subr.bf16.mxu0 %v15077_v28  ;;  %v15079_v26 = vld [vmem:[#allocation58_spill] sm:$0xff]  ;;  %v15080_v15 = vld [vmem:[#allocation63_spill] sm:$0xff]  ;;  %v15081_v5 = vld [vmem:[#allocation64_spill] sm:$0xff] }
 0x5e5   : > { %v14516_v36 = vpack.c.bf16 %v8232_v54, %v8207_v55  ;;  %v14518_v49 = vpack.c.bf16 %v8234_v61, %v8209_v21  ;;  %v7223_v17 = vpop.f32.mrb[240].mxu1  ;;  %v7336_v37 = vpop.f32.mrb[4].mxu0 }
 0x5e6   : > { %15075 = vst [vmem:[#allocation7_spill] sm:$0xff] %v14512_v18  ;;  %v7224_v33 = vadd.f32 %v7223_v17, %v13834_v45  ;;  %v7337_v46 = vadd.f32 %v7336_v37, %v13834_v45  ;;  %v7225_v47 = vpop.f32.mrb[241].mxu1  ;;  %v7338_v9 = vpop.f32.mrb[5].mxu0  ;;  %v15082_v18 = vld [vmem:[#allocation61_spill] sm:$0xff] }
 0x5e7   : > { %v7226_v23 = vadd.f32 %v7225_v47, %v13834_v45  ;;  %v7339_v42 = vadd.f32 %v7338_v9, %v13834_v45  ;;  %8672 = vmatpush1.bf16.msra.mxu1 %v15078_v10  ;;  %8713 = vmatpush1.bf16.msra.mxu0 %v15079_v26  ;;  %v7227_v54 = vpop.f32.mrb[242].mxu1  ;;  %v7340_v55 = vpop.f32.mrb[6].mxu0 }
 0x5e8   : > { %v7228_v21 = vadd.f32 %v7227_v54, %v13836_v22  ;;  %v7341_v40 = vadd.f32 %v7340_v55, %v13836_v22  ;;  %8673 = vmatprep.subr.bf16.mxu1 %v15080_v15  ;;  %8714 = vmatprep.subr.bf16.mxu0 %v15081_v5  ;;  %v7229_v61 = vpop.f32.mrb[243].mxu1  ;;  %v7342_v25 = vpop.f32.mrb[7].mxu0  ;;  %v8256_v37 = vmax.f32 %v7224_v33, 0.0  ;;  %v8258_v47 = vmax.f32 %v7337_v46, 0.0  ;;  %v15083_v55 = vld [vmem:[#allocation62_spill] sm:$0xff] }
 0x5e9   : > { %v7230_v28 = vadd.f32 %v7229_v61, %v13836_v22  ;;  %v7343_v17 = vadd.f32 %v7342_v25, %v13836_v22  ;;  %v8257_v26 = vmax.f32 %v7226_v23, 0.0  ;;  %v8259_v45 = vmax.f32 %v7339_v42, 0.0  ;;  %v15084_v61 = vld [vmem:[#allocation6_spill] sm:$0xff] }
 0x5ea   : > { %v8281_v9 = vmax.f32 %v7228_v21, 0.0  ;;  %v8283_v10 = vmax.f32 %v7341_v40, 0.0 }
 0x5eb   : > { %v8282_v7 = vmax.f32 %v7230_v28, 0.0  ;;  %v8284_v54 = vmax.f32 %v7343_v17, 0.0  ;;  %8674 = vmatpush1.bf16.msra.mxu1 %v15082_v18  ;;  %8715 = vmatpush1.bf16.msra.mxu0 %v15083_v55 }
 0x5ec   : > { %v14534_v15 = vpack.c.bf16 %v8281_v9, %v8256_v37  ;;  %v14536_v5 = vpack.c.bf16 %v8283_v10, %v8258_v47  ;;  %8675 = vmatprep.subr.bf16.mxu1 %v14288_v60  ;;  %8716 = vmatprep.subr.bf16.mxu0 %v15084_v61  ;;  %v15085_v37 = vld [vmem:[#allocation2_spill] sm:$0xff] }
 0x5ed   : > { %v14540_v33 = vpack.c.bf16 %v8282_v7, %v8257_v26  ;;  %v14542_v46 = vpack.c.bf16 %v8284_v54, %v8259_v45  ;;  %v7379_v23 = vpop.f32.mrb[244].mxu1  ;;  %v7492_v42 = vpop.f32.mrb[8].mxu0  ;;  %v15086_v60 = vld [vmem:[#allocation30_spill] sm:$0xff] }
 0x5ee   : > { %v7380_v21 = vadd.f32 %v7379_v23, %v13555_v57  ;;  %v7493_v18 = vadd.f32 %v7492_v42, %v13555_v57  ;;  %v7381_v40 = vpop.f32.mrb[245].mxu1  ;;  %v7494_v25 = vpop.f32.mrb[9].mxu0 }
 0x5ef   : > { %v7382_v28 = vadd.f32 %v7381_v40, %v13555_v57  ;;  %v7495_v17 = vadd.f32 %v7494_v25, %v13555_v57  ;;  %8676 = vmatpush1.bf16.msra.mxu1 %v15085_v37  ;;  %8717 = vmatpush1.bf16.msra.mxu0 %v15086_v60  ;;  %v7383_v7 = vpop.f32.mrb[246].mxu1  ;;  %v7496_v47 = vpop.f32.mrb[10].mxu0  ;;  %v15087_v57 = vld [vmem:[#allocation36_spill] sm:$0xff] }
 0x5f0   : > { %v7384_v45 = vadd.f32 %v7383_v7, %v13557_v35  ;;  %v7497_v9 = vadd.f32 %v7496_v47, %v13557_v35  ;;  %8677 = vmatprep.subr.bf16.mxu1 %v14316_v12  ;;  %8718 = vmatprep.subr.bf16.mxu0 %v14318_v43  ;;  %v7385_v10 = vpop.f32.mrb[247].mxu1  ;;  %v7498_v26 = vpop.f32.mrb[11].mxu0  ;;  %v7910_v61 = vmax.f32 %v7380_v21, 0.0  ;;  %v7912_v23 = vmax.f32 %v7493_v18, 0.0  ;;  %v15088_v47 = vld [vmem:[#allocation5_spill] sm:$0xff] }
 0x5f1   : > { %v7386_v54 = vadd.f32 %v7385_v10, %v13557_v35  ;;  %v7499_v55 = vadd.f32 %v7498_v26, %v13557_v35  ;;  %v7911_v25 = vmax.f32 %v7382_v28, 0.0  ;;  %v7913_v37 = vmax.f32 %v7495_v17, 0.0 }
 0x5f2   : > { %v7935_v42 = vmax.f32 %v7384_v45, 0.0  ;;  %v7937_v40 = vmax.f32 %v7497_v9, 0.0 }
 0x5f3   : > { %v7936_v60 = vmax.f32 %v7386_v54, 0.0  ;;  %v7938_v7 = vmax.f32 %v7499_v55, 0.0  ;;  %8678 = vmatpush1.bf16.msra.mxu1 %v15087_v57  ;;  %8719 = vmatpush1.bf16.msra.mxu0 %v15088_v47 }
 0x5f4   : > { %v14558_v12 = vpack.c.bf16 %v7935_v42, %v7910_v61  ;;  %v14560_v43 = vpack.c.bf16 %v7937_v40, %v7912_v23  ;;  %8679 = vmatprep.subr.bf16.mxu1 %v14343_v4  ;;  %8720 = vmatprep.subr.bf16.mxu0 %v14345_v39 }
 0x5f5   : > { %v14564_v21 = vpack.c.bf16 %v7936_v60, %v7911_v25  ;;  %v14566_v18 = vpack.c.bf16 %v7938_v7, %v7913_v37  ;;  %v7389_v28 = vpop.f32.mrb[248].mxu1  ;;  %v7502_v17 = vpop.f32.mrb[12].mxu0 }
 0x5f6   : > { %v7390_v45 = vadd.f32 %v7389_v28, %v13597_v38  ;;  %v7503_v57 = vadd.f32 %v7502_v17, %v13597_v38  ;;  %v7391_v9 = vpop.f32.mrb[249].mxu1  ;;  %v7504_v10 = vpop.f32.mrb[13].mxu0 }
 0x5f7   : > { %v7392_v26 = vadd.f32 %v7391_v9, %v13597_v38  ;;  %v7505_v54 = vadd.f32 %v7504_v10, %v13597_v38  ;;  %8680 = vmatpush1.bf16.msra.mxu1 %v14336_v30  ;;  %8721 = vmatpush1.bf16.msra.mxu0 %v14338_v31  ;;  %v7393_v4 = vpop.f32.mrb[250].mxu1  ;;  %v7506_v39 = vpop.f32.mrb[14].mxu0 }
 0x5f8   : > { %v7394_v55 = vadd.f32 %v7393_v4, %v13599_v8  ;;  %v7507_v61 = vadd.f32 %v7506_v39, %v13599_v8  ;;  %8747 = vmatprep.subr.bf16.mxu1 %v14370_v11  ;;  %8788 = vmatprep.subr.bf16.mxu0 %v14372_v0  ;;  %v7395_v23 = vpop.f32.mrb[251].mxu1  ;;  %v7508_v42 = vpop.f32.mrb[15].mxu0  ;;  %v7960_v37 = vmax.f32 %v7390_v45, 0.0  ;;  %v7962_v30 = vmax.f32 %v7503_v57, 0.0 }
 0x5f9   : > { %v7396_v40 = vadd.f32 %v7395_v23, %v13599_v8  ;;  %v7509_v25 = vadd.f32 %v7508_v42, %v13599_v8  ;;  %v7961_v7 = vmax.f32 %v7392_v26, 0.0  ;;  %v7963_v47 = vmax.f32 %v7505_v54, 0.0 }
 0x5fa   : > { %v7985_v60 = vmax.f32 %v7394_v55, 0.0  ;;  %v7987_v31 = vmax.f32 %v7507_v61, 0.0  ;;  %8698 = vmatmul.mubr.bf16.vlgmr.msra.gmra.mrb[88].mxu1 %v14271_v48  ;;  %8739 = vmatmul.mubr.bf16.vlgmr.msra.gmra.mrb[84].mxu0 %v14271_v48 }
 0x5fb   : > { %v7986_v28 = vmax.f32 %v7396_v40, 0.0  ;;  %v7988_v11 = vmax.f32 %v7509_v25, 0.0  ;;  %8748 = vmatpush1.bf16.msra.mxu1 %v14363_v32  ;;  %8789 = vmatpush1.bf16.msra.mxu0 %v14365_v13 }
 0x5fc   : > { %v14584_v0 = vpack.c.bf16 %v7985_v60, %v7960_v37  ;;  %v14586_v17 = vpack.c.bf16 %v7987_v31, %v7962_v30  ;;  %8749 = vmatprep.subr.bf16.mxu1 %v14398_v24  ;;  %8790 = vmatprep.subr.bf16.mxu0 %v14400_v63 }
 0x5fd   : > { %v14590_v45 = vpack.c.bf16 %v7986_v28, %v7961_v7  ;;  %v14592_v57 = vpack.c.bf16 %v7988_v11, %v7963_v47  ;;  %v7399_v48 = vpop.f32.mrb[252].mxu1  ;;  %v7512_v9 = vpop.f32.mrb[16].mxu0  ;;  %8779 = vmatprep.mubr.bf16.mxu1 %v14983_v29  ;;  %8820 = vmatprep.mubr.bf16.mxu0 %v14983_v29 }
 0x5fe   : > { %v7400_v32 = vadd.f32 %v7399_v48, %v13647_v19  ;;  %v7513_v13 = vadd.f32 %v7512_v9, %v13647_v19  ;;  %v7401_v10 = vpop.f32.mrb[253].mxu1  ;;  %v7514_v26 = vpop.f32.mrb[17].mxu0 }
 0x5ff   : > { %v7402_v24 = vadd.f32 %v7401_v10, %v13647_v19  ;;  %v7515_v63 = vadd.f32 %v7514_v26, %v13647_v19  ;;  %8750 = vmatpush1.bf16.msra.mxu1 %v14392_v16  ;;  %8791 = vmatpush1.bf16.msra.mxu0 %v14394_v3  ;;  %v7403_v54 = vpop.f32.mrb[254].mxu1  ;;  %v7516_v4 = vpop.f32.mrb[18].mxu0 }
 0x600   : > { %v7404_v39 = vadd.f32 %v7403_v54, %v13649_v27  ;;  %v7517_v55 = vadd.f32 %v7516_v4, %v13649_v27  ;;  %8751 = vmatprep.subr.bf16.mxu1 %v14421_v50  ;;  %8792 = vmatprep.subr.bf16.mxu0 %v14423_v44  ;;  %v7405_v61 = vpop.f32.mrb[255].mxu1  ;;  %v7518_v23 = vpop.f32.mrb[19].mxu0  ;;  %v8010_v25 = vmax.f32 %v7400_v32, 0.0  ;;  %v8012_v16 = vmax.f32 %v7513_v13, 0.0 }
 0x601   : > { %v7406_v42 = vadd.f32 %v7405_v61, %v13649_v27  ;;  %v7519_v40 = vadd.f32 %v7518_v23, %v13649_v27  ;;  %v8011_v30 = vmax.f32 %v7402_v24, 0.0  ;;  %v8013_v60 = vmax.f32 %v7515_v63, 0.0 }
 0x602   : > { %v8035_v37 = vmax.f32 %v7404_v39, 0.0  ;;  %v8037_v3 = vmax.f32 %v7517_v55, 0.0 }
 0x603   : > { %v8036_v31 = vmax.f32 %v7406_v42, 0.0  ;;  %v8038_v7 = vmax.f32 %v7519_v40, 0.0  ;;  %8752 = vmatpush1.bf16.msra.mxu1 %v14416_v41  ;;  %8793 = vmatpush1.bf16.msra.mxu0 %v14418_v51 }
 0x604   : > { %v14610_v50 = vpack.c.bf16 %v8035_v37, %v8010_v25  ;;  %v14612_v44 = vpack.c.bf16 %v8037_v3, %v8012_v16  ;;  %8753 = vmatprep.subr.bf16.mxu1 %v14444_v58  ;;  %8794 = vmatprep.subr.bf16.mxu0 %v14446_v1  ;;  %v15089_v16 = vld [vmem:[#allocation40_spill] sm:$0xff] }
 0x605   : > { %v14616_v47 = vpack.c.bf16 %v8036_v31, %v8011_v30  ;;  %v14618_v28 = vpack.c.bf16 %v8038_v7, %v8013_v60  ;;  %v7409_v11 = vpop.f32.mrb[0].mxu1  ;;  %v7522_v48 = vpop.f32.mrb[20].mxu0  ;;  %v15090_v31 = vld [vmem:[#allocation9_spill] sm:$0xff] }
 0x606   : > { %v7410_v9 = vadd.f32 %v7409_v11, %v13679_v52  ;;  %v7523_v41 = vadd.f32 %v7522_v48, %v13679_v52  ;;  %v7411_v32 = vpop.f32.mrb[1].mxu1  ;;  %v7524_v51 = vpop.f32.mrb[21].mxu0 }
 0x607   : > { %v7412_v13 = vadd.f32 %v7411_v32, %v13679_v52  ;;  %v7525_v10 = vadd.f32 %v7524_v51, %v13679_v52  ;;  %8754 = vmatpush1.bf16.msra.mxu1 %v14439_v59  ;;  %8795 = vmatpush1.bf16.msra.mxu0 %v14441_v53  ;;  %v7413_v58 = vpop.f32.mrb[2].mxu1  ;;  %v7526_v1 = vpop.f32.mrb[22].mxu0 }
 0x608   : > { %v7414_v26 = vadd.f32 %v7413_v58, %v13681_v14  ;;  %v7527_v24 = vadd.f32 %v7526_v1, %v13681_v14  ;;  %8755 = vmatprep.subr.bf16.mxu1 %v14466_v2  ;;  %8796 = vmatprep.subr.bf16.mxu0 %v14468_v20  ;;  %v7415_v63 = vpop.f32.mrb[3].mxu1  ;;  %v7528_v54 = vpop.f32.mrb[23].mxu0  ;;  %v8060_v55 = vmax.f32 %v7410_v9, 0.0  ;;  %v8062_v59 = vmax.f32 %v7523_v41, 0.0  ;;  %v15091_v41 = vld [vmem:[#allocation34_spill] sm:$0xff] }
 0x609   : > { %v7416_v4 = vadd.f32 %v7415_v63, %v13681_v14  ;;  %v7529_v39 = vadd.f32 %v7528_v54, %v13681_v14  ;;  %v8061_v23 = vmax.f32 %v7412_v13, 0.0  ;;  %v8063_v42 = vmax.f32 %v7525_v10, 0.0  ;;  %v15093_v13 = vld [vmem:[#allocation10_spill] sm:$0xff] }
 0x60a   : > { %v8085_v61 = vmax.f32 %v7414_v26, 0.0  ;;  %v8087_v53 = vmax.f32 %v7527_v24, 0.0 }
 0x60b   : > { %v8086_v40 = vmax.f32 %v7416_v4, 0.0  ;;  %v8088_v25 = vmax.f32 %v7529_v39, 0.0  ;;  %8756 = vmatpush1.bf16.msra.mxu1 %v14461_v34  ;;  %8797 = vmatpush1.bf16.msra.mxu0 %v14463_v56 }
 0x60c   : > { %v14634_v2 = vpack.c.bf16 %v8085_v61, %v8060_v55  ;;  %v14636_v20 = vpack.c.bf16 %v8087_v53, %v8062_v59  ;;  %8757 = vmatprep.subr.bf16.mxu1 %v14490_v62  ;;  %8798 = vmatprep.subr.bf16.mxu0 %v15089_v16  ;;  %v15092_v62 = vld [vmem:[#allocation8_spill] sm:$0xff] }
 0x60d   : > { %v14640_v37 = vpack.c.bf16 %v8086_v40, %v8061_v23  ;;  %v14642_v3 = vpack.c.bf16 %v8088_v25, %v8063_v42  ;;  %v7419_v30 = vpop.f32.mrb[4].mxu1  ;;  %v7532_v60 = vpop.f32.mrb[24].mxu0  ;;  %v15094_v42 = vld [vmem:[#allocation7_spill] sm:$0xff] }
 0x60e   : > { %v7420_v7 = vadd.f32 %v7419_v30, %v15090_v31  ;;  %v7533_v34 = vadd.f32 %v7532_v60, %v15090_v31  ;;  %v7421_v11 = vpop.f32.mrb[5].mxu1  ;;  %v7534_v56 = vpop.f32.mrb[25].mxu0  ;;  %v15095_v60 = vld [vmem:[#allocation13_spill] sm:$0xff] }
 0x60f   : > { %v7422_v48 = vadd.f32 %v7421_v11, %v15090_v31  ;;  %v7535_v9 = vadd.f32 %v7534_v56, %v15090_v31  ;;  %8758 = vmatpush1.bf16.msra.mxu1 %v15091_v41  ;;  %8799 = vmatpush1.bf16.msra.mxu0 %v15092_v62  ;;  %v7423_v32 = vpop.f32.mrb[6].mxu1  ;;  %v7536_v51 = vpop.f32.mrb[26].mxu0 }
 0x610   : > { %v7424_v10 = vadd.f32 %v7423_v32, %v15093_v13  ;;  %v7537_v58 = vadd.f32 %v7536_v51, %v15093_v13  ;;  %8759 = vmatprep.subr.bf16.mxu1 %v14516_v36  ;;  %8800 = vmatprep.subr.bf16.mxu0 %v14518_v49  ;;  %v7425_v1 = vpop.f32.mrb[7].mxu1  ;;  %v7538_v26 = vpop.f32.mrb[27].mxu0  ;;  %v8110_v54 = vmax.f32 %v7420_v7, 0.0  ;;  %v8112_v4 = vmax.f32 %v7533_v34, 0.0 }
 0x611   : > { %v7426_v24 = vadd.f32 %v7425_v1, %v15093_v13  ;;  %v7539_v63 = vadd.f32 %v7538_v26, %v15093_v13  ;;  %v8111_v59 = vmax.f32 %v7422_v48, 0.0  ;;  %v8113_v61 = vmax.f32 %v7535_v9, 0.0  ;;  %v15096_v9 = vld [vmem:[#allocation14_spill] sm:$0xff] }
 0x612   : > { %v8135_v39 = vmax.f32 %v7424_v10, 0.0  ;;  %v8137_v55 = vmax.f32 %v7537_v58, 0.0 }
 0x613   : > { %v8136_v53 = vmax.f32 %v7426_v24, 0.0  ;;  %v8138_v23 = vmax.f32 %v7539_v63, 0.0  ;;  %8760 = vmatpush1.bf16.msra.mxu1 %v14510_v6  ;;  %8801 = vmatpush1.bf16.msra.mxu0 %v15094_v42  ;;  %v14683_v24 = vld [vmem:[%s14892_s6] sm:$0x3] }
 0x614   : > { %v14658_v36 = vpack.c.bf16 %v8135_v39, %v8110_v54  ;;  %v14660_v49 = vpack.c.bf16 %v8137_v55, %v8112_v4  ;;  %8761 = vmatprep.subr.bf16.mxu1 %v14540_v33  ;;  %8802 = vmatprep.subr.bf16.mxu0 %v14542_v46 }
 0x615   : > { %v14664_v40 = vpack.c.bf16 %v8136_v53, %v8111_v59  ;;  %v14666_v25 = vpack.c.bf16 %v8138_v23, %v8113_v61  ;;  %v7429_v16 = vpop.f32.mrb[8].mxu1  ;;  %v7542_v30 = vpop.f32.mrb[28].mxu0 }
 0x616   : > { %v7430_v7 = vadd.f32 %v7429_v16, %v15095_v60  ;;  %v7543_v6 = vadd.f32 %v7542_v30, %v15095_v60  ;;  %v7431_v34 = vpop.f32.mrb[9].mxu1  ;;  %v7544_v11 = vpop.f32.mrb[29].mxu0 }
 0x617   : > { %v7432_v56 = vadd.f32 %v7431_v34, %v15095_v60  ;;  %v7545_v48 = vadd.f32 %v7544_v11, %v15095_v60  ;;  %8762 = vmatpush1.bf16.msra.mxu1 %v14534_v15  ;;  %8803 = vmatpush1.bf16.msra.mxu0 %v14536_v5  ;;  %v7433_v33 = vpop.f32.mrb[10].mxu1  ;;  %v7546_v46 = vpop.f32.mrb[30].mxu0 }
 0x618   : > { %v7434_v41 = vadd.f32 %v7433_v33, %v15096_v9  ;;  %v7547_v62 = vadd.f32 %v7546_v46, %v15096_v9  ;;  %8829 = vmatprep.subr.bf16.mxu1 %v14564_v21  ;;  %8870 = vmatprep.subr.bf16.mxu0 %v14566_v18  ;;  %v7435_v32 = vpop.f32.mrb[11].mxu1  ;;  %v7548_v51 = vpop.f32.mrb[31].mxu0  ;;  %v8160_v1 = vmax.f32 %v7430_v7, 0.0  ;;  %v8162_v15 = vmax.f32 %v7543_v6, 0.0  ;;  %v15098_v6 = vld [vmem:[#allocation18_spill] sm:$0xff] }
 0x619   : > { %v7436_v10 = vadd.f32 %v7435_v32, %v15096_v9  ;;  %v7549_v58 = vadd.f32 %v7548_v51, %v15096_v9  ;;  %v8161_v21 = vmax.f32 %v7432_v56, 0.0  ;;  %v8163_v18 = vmax.f32 %v7545_v48, 0.0 }
 0x61a   : > { %v8185_v26 = vmax.f32 %v7434_v41, 0.0  ;;  %v8187_v5 = vmax.f32 %v7547_v62, 0.0  ;;  %8780 = vmatmul.mubr.bf16.vlgmr.msra.gmra.mrb[92].mxu1 %v14683_v24  ;;  %8821 = vmatmul.mubr.bf16.vlgmr.msra.gmra.mrb[88].mxu0 %v14683_v24 }
 0x61b   : > { %v8186_v63 = vmax.f32 %v7436_v10, 0.0  ;;  %v8188_v54 = vmax.f32 %v7549_v58, 0.0  ;;  %8830 = vmatpush1.bf16.msra.mxu1 %v14558_v12  ;;  %8871 = vmatpush1.bf16.msra.mxu0 %v14560_v43  ;;  %v15097_v12 = vld [vmem:[#allocation17_spill] sm:$0xff] }
 0x61c   : > { %v14689_v4 = vpack.c.bf16 %v8185_v26, %v8160_v1  ;;  %v14691_v39 = vpack.c.bf16 %v8187_v5, %v8162_v15  ;;  %8831 = vmatprep.subr.bf16.mxu1 %v14590_v45  ;;  %8872 = vmatprep.subr.bf16.mxu0 %v14592_v57 }
 0x61d   : > { %v14695_v55 = vpack.c.bf16 %v8186_v63, %v8161_v21  ;;  %v14697_v59 = vpack.c.bf16 %v8188_v54, %v8163_v18  ;;  %v7439_v61 = vpop.f32.mrb[12].mxu1  ;;  %v7552_v53 = vpop.f32.mrb[32].mxu0  ;;  %8861 = vmatprep.mubr.bf16.mxu1 %v14983_v29  ;;  %8902 = vmatprep.mubr.bf16.mxu0 %v14983_v29  ;;  %v15099_v21 = vld [vmem:[#allocation26_spill] sm:$0xff] }
 0x61e   : > { %v7440_v43 = vadd.f32 %v7439_v61, %v15097_v12  ;;  %v7553_v23 = vadd.f32 %v7552_v53, %v15097_v12  ;;  %v7441_v42 = vpop.f32.mrb[13].mxu1  ;;  %v7554_v16 = vpop.f32.mrb[33].mxu0 }
 0x61f   : > { %v7442_v45 = vadd.f32 %v7441_v42, %v15097_v12  ;;  %v7555_v57 = vadd.f32 %v7554_v16, %v15097_v12  ;;  %8832 = vmatpush1.bf16.msra.mxu1 %v14584_v0  ;;  %8873 = vmatpush1.bf16.msra.mxu0 %v14586_v17  ;;  %v7443_v30 = vpop.f32.mrb[14].mxu1  ;;  %v7556_v7 = vpop.f32.mrb[34].mxu0 }
 0x620   : > { %v7444_v34 = vadd.f32 %v7443_v30, %v15098_v6  ;;  %v7557_v11 = vadd.f32 %v7556_v7, %v15098_v6  ;;  %8833 = vmatprep.subr.bf16.mxu1 %v14616_v47  ;;  %8874 = vmatprep.subr.bf16.mxu0 %v14618_v28  ;;  %v7445_v56 = vpop.f32.mrb[15].mxu1  ;;  %v7558_v48 = vpop.f32.mrb[35].mxu0  ;;  %v8210_v41 = vmax.f32 %v7440_v43, 0.0  ;;  %v8212_v0 = vmax.f32 %v7553_v23, 0.0 }
 0x621   : > { %v7446_v33 = vadd.f32 %v7445_v56, %v15098_v6  ;;  %v7559_v46 = vadd.f32 %v7558_v48, %v15098_v6  ;;  %v8211_v32 = vmax.f32 %v7442_v45, 0.0  ;;  %v8213_v51 = vmax.f32 %v7555_v57, 0.0 }
 0x622   : > { %v8235_v62 = vmax.f32 %v7444_v34, 0.0  ;;  %v8237_v17 = vmax.f32 %v7557_v11, 0.0 }
 0x623   : > { %v8236_v10 = vmax.f32 %v7446_v33, 0.0  ;;  %v8238_v58 = vmax.f32 %v7559_v46, 0.0  ;;  %8834 = vmatpush1.bf16.msra.mxu1 %v14610_v50  ;;  %8875 = vmatpush1.bf16.msra.mxu0 %v14612_v44 }
 0x624   : > { %v14715_v47 = vpack.c.bf16 %v8235_v62, %v8210_v41  ;;  %v14717_v28 = vpack.c.bf16 %v8237_v17, %v8212_v0  ;;  %8835 = vmatprep.subr.bf16.mxu1 %v14640_v37  ;;  %8876 = vmatprep.subr.bf16.mxu0 %v14642_v3  ;;  %v15100_v0 = vld [vmem:[#allocation3_spill] sm:$0xff] }
 0x625   : > { %v8461_v1 = vpack.c.bf16 %v8236_v10, %v8211_v32  ;;  %v8463_v15 = vpack.c.bf16 %v8238_v58, %v8213_v51  ;;  %v7449_v26 = vpop.f32.mrb[16].mxu1  ;;  %v7562_v5 = vpop.f32.mrb[36].mxu0 }
 0x626   : > { %v7450_v18 = vadd.f32 %v7449_v26, %v15099_v21  ;;  %v7563_v63 = vadd.f32 %v7562_v5, %v15099_v21  ;;  %v7451_v54 = vpop.f32.mrb[17].mxu1  ;;  %v7564_v50 = vpop.f32.mrb[37].mxu0 }
 0x627   : > { %v7452_v44 = vadd.f32 %v7451_v54, %v15099_v21  ;;  %v7565_v61 = vadd.f32 %v7564_v50, %v15099_v21  ;;  %8836 = vmatpush1.bf16.msra.mxu1 %v14634_v2  ;;  %8877 = vmatpush1.bf16.msra.mxu0 %v14636_v20  ;;  %v7453_v37 = vpop.f32.mrb[18].mxu1  ;;  %v7566_v3 = vpop.f32.mrb[38].mxu0 }
 0x628   : > { %v7454_v53 = vadd.f32 %v7453_v37, %v13836_v22  ;;  %v7567_v43 = vadd.f32 %v7566_v3, %v13836_v22  ;;  %8837 = vmatprep.subr.bf16.mxu1 %v14664_v40  ;;  %8878 = vmatprep.subr.bf16.mxu0 %v14666_v25  ;;  %v7455_v23 = vpop.f32.mrb[19].mxu1  ;;  %v7568_v42 = vpop.f32.mrb[39].mxu0  ;;  %v8260_v57 = vmax.f32 %v7450_v18, 0.0  ;;  %v8262_v2 = vmax.f32 %v7563_v63, 0.0 }
 0x629   : > { %v7456_v16 = vadd.f32 %v7455_v23, %v13836_v22  ;;  %v7569_v45 = vadd.f32 %v7568_v42, %v13836_v22  ;;  %v8261_v7 = vmax.f32 %v7452_v44, 0.0  ;;  %v8263_v34 = vmax.f32 %v7565_v61, 0.0 }
 0x62a   : > { %v8285_v30 = vmax.f32 %v7454_v53, 0.0  ;;  %v8287_v20 = vmax.f32 %v7567_v43, 0.0 }
 0x62b   : > { %v8286_v11 = vmax.f32 %v7456_v16, 0.0  ;;  %v8288_v56 = vmax.f32 %v7569_v45, 0.0  ;;  %8838 = vmatpush1.bf16.msra.mxu1 %v14658_v36  ;;  %8879 = vmatpush1.bf16.msra.mxu0 %v14660_v49 }
 0x62c   : > { %v8485_v40 = vpack.c.bf16 %v8285_v30, %v8260_v57  ;;  %v8487_v25 = vpack.c.bf16 %v8287_v20, %v8262_v2  ;;  %8839 = vmatprep.subr.bf16.mxu1 %v14695_v55  ;;  %8880 = vmatprep.subr.bf16.mxu0 %v14697_v59 }
 0x62d   : > { %v8486_v48 = vpack.c.bf16 %v8286_v11, %v8261_v7  ;;  %v8488_v33 = vpack.c.bf16 %v8288_v56, %v8263_v34  ;;  %v7605_v46 = vpop.f32.mrb[20].mxu1  ;;  %v7718_v41 = vpop.f32.mrb[40].mxu0 }
 0x62e   : > { %v7606_v62 = vadd.f32 %v7605_v46, %v15100_v0  ;;  %v7719_v17 = vadd.f32 %v7718_v41, %v15100_v0  ;;  %v7607_v32 = vpop.f32.mrb[21].mxu1  ;;  %v7720_v51 = vpop.f32.mrb[41].mxu0 }
 0x62f   : > { %v7608_v36 = vadd.f32 %v7607_v32, %v15100_v0  ;;  %v7721_v49 = vadd.f32 %v7720_v51, %v15100_v0  ;;  %8840 = vmatpush1.bf16.msra.mxu1 %v14689_v4  ;;  %8881 = vmatpush1.bf16.msra.mxu0 %v14691_v39  ;;  %v7609_v55 = vpop.f32.mrb[22].mxu1  ;;  %v7722_v59 = vpop.f32.mrb[42].mxu0 }
 0x630   : > { %v7610_v10 = vadd.f32 %v7609_v55, %v13557_v35  ;;  %v7723_v58 = vadd.f32 %v7722_v59, %v13557_v35  ;;  %8841 = vmatprep.subr.bf16.mxu1 %v8461_v1  ;;  %8882 = vmatprep.subr.bf16.mxu0 %v8463_v15  ;;  %v7611_v26 = vpop.f32.mrb[23].mxu1  ;;  %v7724_v5 = vpop.f32.mrb[43].mxu0  ;;  %v7914_v54 = vmax.f32 %v7606_v62, 0.0  ;;  %v7916_v50 = vmax.f32 %v7719_v17, 0.0 }
 0x631   : > { %v7612_v18 = vadd.f32 %v7611_v26, %v13557_v35  ;;  %v7725_v63 = vadd.f32 %v7724_v5, %v13557_v35  ;;  %v7915_v61 = vmax.f32 %v7608_v36, 0.0  ;;  %v7917_v39 = vmax.f32 %v7721_v49, 0.0 }
 0x632   : > { %v7939_v44 = vmax.f32 %v7610_v10, 0.0  ;;  %v7941_v4 = vmax.f32 %v7723_v58, 0.0 }
 0x633   : > { %v7940_v37 = vmax.f32 %v7612_v18, 0.0  ;;  %v7942_v3 = vmax.f32 %v7725_v63, 0.0  ;;  %8842 = vmatpush1.bf16.msra.mxu1 %v14715_v47  ;;  %8883 = vmatpush1.bf16.msra.mxu0 %v14717_v28 }
 0x634   : > { %v8314_v1 = vpack.c.bf16 %v7939_v44, %v7914_v54  ;;  %v8316_v15 = vpack.c.bf16 %v7941_v4, %v7916_v50  ;;  %8843 = vmatprep.subr.bf16.mxu1 %v8486_v48  ;;  %8884 = vmatprep.subr.bf16.mxu0 %v8488_v33 }
 0x635   : > { %v8315_v53 = vpack.c.bf16 %v7940_v37, %v7915_v61  ;;  %v8317_v43 = vpack.c.bf16 %v7942_v3, %v7917_v39  ;;  %v7615_v23 = vpop.f32.mrb[24].mxu1  ;;  %v7728_v42 = vpop.f32.mrb[44].mxu0 }
 0x636   : > { %v7616_v16 = vadd.f32 %v7615_v23, %v13597_v38  ;;  %v7729_v45 = vadd.f32 %v7728_v42, %v13597_v38  ;;  %v7617_v57 = vpop.f32.mrb[25].mxu1  ;;  %v7730_v2 = vpop.f32.mrb[45].mxu0 }
 0x637   : > { %v7618_v30 = vadd.f32 %v7617_v57, %v13597_v38  ;;  %v7731_v47 = vadd.f32 %v7730_v2, %v13597_v38  ;;  %8844 = vmatpush1.bf16.msra.mxu1 %v8485_v40  ;;  %8885 = vmatpush1.bf16.msra.mxu0 %v8487_v25  ;;  %v7619_v28 = vpop.f32.mrb[26].mxu1  ;;  %v7732_v20 = vpop.f32.mrb[46].mxu0 }
 0x638   : > { %v7620_v7 = vadd.f32 %v7619_v28, %v13599_v8  ;;  %v7733_v34 = vadd.f32 %v7732_v20, %v13599_v8  ;;  %8911 = vmatprep.subr.bf16.mxu1 %v8315_v53  ;;  %8952 = vmatprep.subr.bf16.mxu0 %v8317_v43  ;;  %v7621_v11 = vpop.f32.mrb[27].mxu1  ;;  %v7734_v56 = vpop.f32.mrb[47].mxu0  ;;  %v7964_v46 = vmax.f32 %v7616_v16, 0.0  ;;  %v7966_v41 = vmax.f32 %v7729_v45, 0.0 }
 0x639   : > { %v7622_v48 = vadd.f32 %v7621_v11, %v13599_v8  ;;  %v7735_v33 = vadd.f32 %v7734_v56, %v13599_v8  ;;  %v7965_v40 = vmax.f32 %v7618_v30, 0.0  ;;  %v7967_v25 = vmax.f32 %v7731_v47, 0.0 }
 0x63a   : > { %v7989_v62 = vmax.f32 %v7620_v7, 0.0  ;;  %v7991_v17 = vmax.f32 %v7733_v34, 0.0  ;;  %8862 = vmatmul.mubr.bf16.vlgmr.msra.gmra.mrb[96].mxu1 %v14683_v24  ;;  %8903 = vmatmul.mubr.bf16.vlgmr.msra.gmra.mrb[92].mxu0 %v14683_v24 }
 0x63b   : > { %v7990_v32 = vmax.f32 %v7622_v48, 0.0  ;;  %v7992_v51 = vmax.f32 %v7735_v33, 0.0  ;;  %8912 = vmatpush1.bf16.msra.mxu1 %v8314_v1  ;;  %8953 = vmatpush1.bf16.msra.mxu0 %v8316_v15 }
 0x63c   : > { %v8339_v36 = vpack.c.bf16 %v7989_v62, %v7964_v46  ;;  %v8341_v49 = vpack.c.bf16 %v7991_v17, %v7966_v41  ;;  %8943 = vmatprep.mubr.bf16.mxu1 %v14983_v29  ;;  %8984 = vmatprep.mubr.bf16.mxu0 %v14983_v29 }
 0x63d   : > { %v8340_v55 = vpack.c.bf16 %v7990_v32, %v7965_v40  ;;  %v8342_v59 = vpack.c.bf16 %v7992_v51, %v7967_v25  ;;  %v7625_v10 = vpop.f32.mrb[28].mxu1  ;;  %v7738_v58 = vpop.f32.mrb[48].mxu0 }
 0x63e   : > { %v7626_v26 = vadd.f32 %v7625_v10, %v13647_v19  ;;  %v7739_v5 = vadd.f32 %v7738_v58, %v13647_v19  ;;  %v7627_v18 = vpop.f32.mrb[29].mxu1  ;;  %v7740_v63 = vpop.f32.mrb[49].mxu0 }
 0x63f   : > { %v7628_v54 = vadd.f32 %v7627_v18, %v13647_v19  ;;  %v7741_v50 = vadd.f32 %v7740_v63, %v13647_v19  ;;  %v7629_v44 = vpop.f32.mrb[30].mxu1  ;;  %v7742_v4 = vpop.f32.mrb[50].mxu0  ;;  %8913 = vmatprep.subr.bf16.mxu1 %v8340_v55  ;;  %8954 = vmatprep.subr.bf16.mxu0 %v8342_v59 }
 0x640   : > { %v7630_v29 = vadd.f32 %v7629_v44, %v13649_v27  ;;  %v7743_v61 = vadd.f32 %v7742_v4, %v13649_v27  ;;  %v7631_v39 = vpop.f32.mrb[31].mxu1  ;;  %v7744_v37 = vpop.f32.mrb[51].mxu0  ;;  %8914 = vmatpush1.bf16.msra.mxu1 %v8339_v36  ;;  %8955 = vmatpush1.bf16.msra.mxu0 %v8341_v49  ;;  %v8014_v15 = vmax.f32 %v7626_v26, 0.0  ;;  %v8016_v53 = vmax.f32 %v7739_v5, 0.0 }
 0x641   : > { %v7632_v3 = vadd.f32 %v7631_v39, %v13649_v27  ;;  %v7745_v1 = vadd.f32 %v7744_v37, %v13649_v27  ;;  %v8015_v42 = vmax.f32 %v7628_v54, 0.0  ;;  %v8017_v16 = vmax.f32 %v7741_v50, 0.0 }
 0x642   : > { %v8039_v43 = vmax.f32 %v7630_v29, 0.0  ;;  %v8041_v23 = vmax.f32 %v7743_v61, 0.0 }
 0x643   : > { %v8040_v45 = vmax.f32 %v7632_v3, 0.0  ;;  %v8042_v57 = vmax.f32 %v7745_v1, 0.0 }
 0x644   : > { %v8364_v2 = vpack.c.bf16 %v8039_v43, %v8014_v15  ;;  %v8366_v30 = vpack.c.bf16 %v8041_v23, %v8016_v53 }
 0x645   : > { %v8365_v47 = vpack.c.bf16 %v8040_v45, %v8015_v42  ;;  %v8367_v28 = vpack.c.bf16 %v8042_v57, %v8017_v16  ;;  %v7635_v20 = vpop.f32.mrb[32].mxu1  ;;  %v7748_v7 = vpop.f32.mrb[52].mxu0 }
 0x646   : > { %v7636_v34 = vadd.f32 %v7635_v20, %v13679_v52  ;;  %v7749_v11 = vadd.f32 %v7748_v7, %v13679_v52  ;;  %v7637_v56 = vpop.f32.mrb[33].mxu1  ;;  %v7750_v48 = vpop.f32.mrb[53].mxu0 }
 0x647   : > { %v7638_v33 = vadd.f32 %v7637_v56, %v13679_v52  ;;  %v7751_v46 = vadd.f32 %v7750_v48, %v13679_v52  ;;  %v7639_v41 = vpop.f32.mrb[34].mxu1  ;;  %v7752_v62 = vpop.f32.mrb[54].mxu0  ;;  %8915 = vmatprep.subr.bf16.mxu1 %v8365_v47  ;;  %8956 = vmatprep.subr.bf16.mxu0 %v8367_v28 }
 0x648   : > { %v7640_v17 = vadd.f32 %v7639_v41, %v13681_v14  ;;  %v7753_v40 = vadd.f32 %v7752_v62, %v13681_v14  ;;  %v7641_v25 = vpop.f32.mrb[35].mxu1  ;;  %v7754_v32 = vpop.f32.mrb[55].mxu0  ;;  %8916 = vmatpush1.bf16.msra.mxu1 %v8364_v2  ;;  %8957 = vmatpush1.bf16.msra.mxu0 %v8366_v30  ;;  %v8064_v49 = vmax.f32 %v7636_v34, 0.0  ;;  %v8066_v55 = vmax.f32 %v7749_v11, 0.0 }
 0x649   : > { %v7642_v51 = vadd.f32 %v7641_v25, %v13681_v14  ;;  %v7755_v36 = vadd.f32 %v7754_v32, %v13681_v14  ;;  %v8065_v58 = vmax.f32 %v7638_v33, 0.0  ;;  %v8067_v26 = vmax.f32 %v7751_v46, 0.0 }
 0x64a   : > { %v8089_v59 = vmax.f32 %v7640_v17, 0.0  ;;  %v8091_v10 = vmax.f32 %v7753_v40, 0.0 }
 0x64b   : > { %v8090_v5 = vmax.f32 %v7642_v51, 0.0  ;;  %v8092_v18 = vmax.f32 %v7755_v36, 0.0 }
 0x64c   : > { %v8389_v63 = vpack.c.bf16 %v8089_v59, %v8064_v49  ;;  %v8391_v54 = vpack.c.bf16 %v8091_v10, %v8066_v55 }
 0x64d   : > { %v8390_v50 = vpack.c.bf16 %v8090_v5, %v8065_v58  ;;  %v8392_v44 = vpack.c.bf16 %v8092_v18, %v8067_v26  ;;  %v7645_v4 = vpop.f32.mrb[36].mxu1  ;;  %v7758_v29 = vpop.f32.mrb[56].mxu0 }
 0x64e   : > { %v7646_v61 = vadd.f32 %v7645_v4, %v15090_v31  ;;  %v7759_v39 = vadd.f32 %v7758_v29, %v15090_v31  ;;  %v7647_v37 = vpop.f32.mrb[37].mxu1  ;;  %v7760_v3 = vpop.f32.mrb[57].mxu0 }
 0x64f   : > { %v7648_v1 = vadd.f32 %v7647_v37, %v15090_v31  ;;  %v7761_v15 = vadd.f32 %v7760_v3, %v15090_v31  ;;  %v7649_v53 = vpop.f32.mrb[38].mxu1  ;;  %v7762_v43 = vpop.f32.mrb[58].mxu0  ;;  %8917 = vmatprep.subr.bf16.mxu1 %v8390_v50  ;;  %8958 = vmatprep.subr.bf16.mxu0 %v8392_v44 }
 0x650   : > { %v7650_v23 = vadd.f32 %v7649_v53, %v15093_v13  ;;  %v7763_v42 = vadd.f32 %v7762_v43, %v15093_v13  ;;  %v7651_v16 = vpop.f32.mrb[39].mxu1  ;;  %v7764_v45 = vpop.f32.mrb[59].mxu0  ;;  %8918 = vmatpush1.bf16.msra.mxu1 %v8389_v63  ;;  %8959 = vmatpush1.bf16.msra.mxu0 %v8391_v54  ;;  %v8114_v30 = vmax.f32 %v7646_v61, 0.0  ;;  %v8116_v47 = vmax.f32 %v7759_v39, 0.0 }
 0x651   : > { %v7652_v57 = vadd.f32 %v7651_v16, %v15093_v13  ;;  %v7765_v2 = vadd.f32 %v7764_v45, %v15093_v13  ;;  %v8115_v7 = vmax.f32 %v7648_v1, 0.0  ;;  %v8117_v34 = vmax.f32 %v7761_v15, 0.0 }
 0x652   : > { %v8139_v28 = vmax.f32 %v7650_v23, 0.0  ;;  %v8141_v20 = vmax.f32 %v7763_v42, 0.0 }
 0x653   : > { %v8140_v11 = vmax.f32 %v7652_v57, 0.0  ;;  %v8142_v56 = vmax.f32 %v7765_v2, 0.0 }
 0x654   : > { %v8414_v48 = vpack.c.bf16 %v8139_v28, %v8114_v30  ;;  %v8416_v33 = vpack.c.bf16 %v8141_v20, %v8116_v47 }
 0x655   : > { %v8415_v46 = vpack.c.bf16 %v8140_v11, %v8115_v7  ;;  %v8417_v41 = vpack.c.bf16 %v8142_v56, %v8117_v34  ;;  %v7655_v62 = vpop.f32.mrb[40].mxu1  ;;  %v7768_v17 = vpop.f32.mrb[60].mxu0 }
 0x656   : > { %v7656_v40 = vadd.f32 %v7655_v62, %v15095_v60  ;;  %v7769_v25 = vadd.f32 %v7768_v17, %v15095_v60  ;;  %v7657_v32 = vpop.f32.mrb[41].mxu1  ;;  %v7770_v51 = vpop.f32.mrb[61].mxu0 }
 0x657   : > { %v7658_v36 = vadd.f32 %v7657_v32, %v15095_v60  ;;  %v7771_v49 = vadd.f32 %v7770_v51, %v15095_v60  ;;  %v7659_v55 = vpop.f32.mrb[42].mxu1  ;;  %v7772_v59 = vpop.f32.mrb[62].mxu0  ;;  %8919 = vmatprep.subr.bf16.mxu1 %v8415_v46  ;;  %8960 = vmatprep.subr.bf16.mxu0 %v8417_v41 }
 0x658   : > { %v7660_v10 = vadd.f32 %v7659_v55, %v15096_v9  ;;  %v7773_v58 = vadd.f32 %v7772_v59, %v15096_v9  ;;  %v7661_v26 = vpop.f32.mrb[43].mxu1  ;;  %v7774_v5 = vpop.f32.mrb[63].mxu0  ;;  %8920 = vmatpush1.bf16.msra.mxu1 %v8414_v48  ;;  %8961 = vmatpush1.bf16.msra.mxu0 %v8416_v33  ;;  %v8164_v54 = vmax.f32 %v7656_v40, 0.0  ;;  %v8166_v50 = vmax.f32 %v7769_v25, 0.0 }
 0x659   : > { %v7662_v18 = vadd.f32 %v7661_v26, %v15096_v9  ;;  %v7775_v63 = vadd.f32 %v7774_v5, %v15096_v9  ;;  %v8165_v29 = vmax.f32 %v7658_v36, 0.0  ;;  %v8167_v61 = vmax.f32 %v7771_v49, 0.0 }
 0x65a   : > { %v8189_v44 = vmax.f32 %v7660_v10, 0.0  ;;  %v8191_v4 = vmax.f32 %v7773_v58, 0.0 }
 0x65b   : > { %v8190_v39 = vmax.f32 %v7662_v18, 0.0  ;;  %v8192_v37 = vmax.f32 %v7775_v63, 0.0 }
 0x65c   : > { %v8439_v3 = vpack.c.bf16 %v8189_v44, %v8164_v54  ;;  %v8441_v1 = vpack.c.bf16 %v8191_v4, %v8166_v50 }
 0x65d   : > { %v8440_v15 = vpack.c.bf16 %v8190_v39, %v8165_v29  ;;  %v8442_v53 = vpack.c.bf16 %v8192_v37, %v8167_v61  ;;  %v7665_v43 = vpop.f32.mrb[44].mxu1  ;;  %v7778_v23 = vpop.f32.mrb[64].mxu0 }
 0x65e   : > { %v7666_v42 = vadd.f32 %v7665_v43, %v15097_v12  ;;  %v7779_v16 = vadd.f32 %v7778_v23, %v15097_v12  ;;  %v7667_v45 = vpop.f32.mrb[45].mxu1  ;;  %v7780_v57 = vpop.f32.mrb[65].mxu0 }
 0x65f   : > { %v7668_v2 = vadd.f32 %v7667_v45, %v15097_v12  ;;  %v7781_v30 = vadd.f32 %v7780_v57, %v15097_v12  ;;  %v7669_v47 = vpop.f32.mrb[46].mxu1  ;;  %v7782_v28 = vpop.f32.mrb[66].mxu0  ;;  %8921 = vmatprep.subr.bf16.mxu1 %v8440_v15  ;;  %8962 = vmatprep.subr.bf16.mxu0 %v8442_v53 }
 0x660   : > { %v7670_v20 = vadd.f32 %v7669_v47, %v15098_v6  ;;  %v7783_v7 = vadd.f32 %v7782_v28, %v15098_v6  ;;  %v7671_v34 = vpop.f32.mrb[47].mxu1  ;;  %v7784_v11 = vpop.f32.mrb[67].mxu0  ;;  %8922 = vmatpush1.bf16.msra.mxu1 %v8439_v3  ;;  %8963 = vmatpush1.bf16.msra.mxu0 %v8441_v1  ;;  %v8214_v33 = vmax.f32 %v7666_v42, 0.0  ;;  %v8216_v46 = vmax.f32 %v7779_v16, 0.0 }
 0x661   : > { %v7672_v56 = vadd.f32 %v7671_v34, %v15098_v6  ;;  %v7785_v48 = vadd.f32 %v7784_v11, %v15098_v6  ;;  %v8215_v17 = vmax.f32 %v7668_v2, 0.0  ;;  %v8217_v40 = vmax.f32 %v7781_v30, 0.0  ;;  %v14809_v57 = vpop.permute.xlu0 %8498 }
 0x662   : > { %v8239_v41 = vmax.f32 %v7670_v20, 0.0  ;;  %v8241_v62 = vmax.f32 %v7783_v7, 0.0 }
 0x663   : > { %v8240_v25 = vmax.f32 %v7672_v56, 0.0  ;;  %v8242_v32 = vmax.f32 %v7785_v48, 0.0 }
 0x664   : > { %v8464_v51 = vpack.c.bf16 %v8239_v41, %v8214_v33  ;;  %v8466_v36 = vpack.c.bf16 %v8241_v62, %v8216_v46 }
 0x665   : > { %v8465_v49 = vpack.c.bf16 %v8240_v25, %v8215_v17  ;;  %v8467_v55 = vpack.c.bf16 %v8242_v32, %v8217_v40  ;;  %v7675_v59 = vpop.f32.mrb[48].mxu1  ;;  %v7788_v10 = vpop.f32.mrb[68].mxu0  ;;  %v11583_v25 = vmov 0.0  }
 0x666   : > { %v7676_v58 = vadd.f32 %v7675_v59, %v15099_v21  ;;  %v7789_v26 = vadd.f32 %v7788_v10, %v15099_v21  ;;  %v7677_v5 = vpop.f32.mrb[49].mxu1  ;;  %v7790_v18 = vpop.f32.mrb[69].mxu0 }
 0x667   : > { %v7678_v63 = vadd.f32 %v7677_v5, %v15099_v21  ;;  %v7791_v54 = vadd.f32 %v7790_v18, %v15099_v21  ;;  %v7679_v50 = vpop.f32.mrb[50].mxu1  ;;  %v7792_v44 = vpop.f32.mrb[70].mxu0  ;;  %8923 = vmatprep.subr.bf16.mxu1 %v8465_v49  ;;  %8964 = vmatprep.subr.bf16.mxu0 %v8467_v55 }
 0x668   : > { %v7680_v4 = vadd.f32 %v7679_v50, %v13836_v22  ;;  %v7793_v29 = vadd.f32 %v7792_v44, %v13836_v22  ;;  %v7681_v61 = vpop.f32.mrb[51].mxu1  ;;  %v7794_v39 = vpop.f32.mrb[71].mxu0  ;;  %8924 = vmatpush1.bf16.msra.mxu1 %v8464_v51  ;;  %8965 = vmatpush1.bf16.msra.mxu0 %v8466_v36  ;;  %v8264_v1 = vmax.f32 %v7676_v58, 0.0  ;;  %v8266_v15 = vmax.f32 %v7789_v26, 0.0 }
 0x669   : > { %v7682_v37 = vadd.f32 %v7681_v61, %v13836_v22  ;;  %v7795_v3 = vadd.f32 %v7794_v39, %v13836_v22  ;;  %v8265_v23 = vmax.f32 %v7678_v63, 0.0  ;;  %v8267_v42 = vmax.f32 %v7791_v54, 0.0 }
 0x66a   : > { %v8289_v53 = vmax.f32 %v7680_v4, 0.0  ;;  %v8291_v43 = vmax.f32 %v7793_v29, 0.0 }
 0x66b   : > { %v8290_v16 = vmax.f32 %v7682_v37, 0.0  ;;  %v8292_v45 = vmax.f32 %v7795_v3, 0.0 }
 0x66c   : > { %v8489_v2 = vpack.c.bf16 %v8289_v53, %v8264_v1  ;;  %v8491_v30 = vpack.c.bf16 %v8291_v43, %v8266_v15 }
 0x66d   : > { %v8490_v47 = vpack.c.bf16 %v8290_v16, %v8265_v23  ;;  %v8492_v28 = vpack.c.bf16 %v8292_v45, %v8267_v42  ;;  %v7831_v20 = vpop.f32.mrb[52].mxu1  ;;  %v8535_v7 = vpop.f32.mrb[72].mxu0 }
 0x66e   : > { %v7832_v34 = vadd.f32 %v7831_v20, %v15100_v0  ;;  %v8536_v11 = vadd.f32 %v8535_v7, %v14809_v57  ;;  %v7833_v56 = vpop.f32.mrb[53].mxu1  ;;  %v8537_v48 = vpop.f32.mrb[73].mxu0 }
 0x66f   : > { %v8538_v33 = vadd.f32 %v8537_v48, %v14809_v57  ;;  %v7834_v46 = vpop.f32.mrb[54].mxu1  ;;  %8925 = vmatprep.subr.bf16.mxu1 %v8490_v47  ;;  %8966 = vmatprep.subr.bf16.mxu0 %v8492_v28  ;;  %v8539_v41 = vpop.f32.mrb[74].mxu0 }
 0x670   : > { %v7835_v62 = vadd.f32 %v7834_v46, %v13557_v35  ;;  %v7836_v17 = vpop.f32.mrb[55].mxu1  ;;  %8926 = vmatpush1.bf16.msra.mxu1 %v8489_v2  ;;  %8967 = vmatpush1.bf16.msra.mxu0 %v8491_v30  ;;  %v8540_v0 = vpop.f32.mrb[75].mxu0  ;;  %v7918_v32 = vmax.f32 %v7832_v34, 0.0 }
 0x671   : > { %v9057_v40 = vcombine.low %v8536_v11, %v8538_v33  ;;  %10793 = vmatprep.subr.bf16.mxu1 %v11583_v25 }
 0x672   : > { %v7943_v51 = vmax.f32 %v7835_v62, 0.0 }
 0x673   : > { %9081 = vst [vmem:[%s14818_s28] sm:$0xff] %v9057_v40  ;;  %8944 = vmatmul.mubr.bf16.vlgmr.msra.gmra.mrb[100].mxu1 %v14683_v24  ;;  %8985 = vmatmul.mubr.bf16.vlgmr.msra.gmra.mrb[96].mxu0 %v14683_v24 }
 0x674   : > { %v8318_v36 = vpack.c.bf16 %v7943_v51, %v7918_v32  ;;  %10809 = vmatprep.mubr.msk.bf16.mxu1 %vm11584_vm7, %v11583_v25 }
 0x675   : > { %v7839_v35 = vpop.f32.mrb[56].mxu1 }
 0x676   : > { %v7840_v49 = vadd.f32 %v7839_v35, %v13597_v38  ;;  %v7841_v55 = vpop.f32.mrb[57].mxu1  ;;  %10794 = vmatpush3.bf16.msra.mxu1 %v8318_v36 }
 0x677   : > { %v7842_v59 = vpop.f32.mrb[58].mxu1  ;;  %10795 = vmatprep.subr.bf16.mxu1 %v11583_v25 }
 0x678   : > { %v7843_v10 = vadd.f32 %v7842_v59, %v13599_v8  ;;  %v7844_v58 = vpop.f32.mrb[59].mxu1  ;;  %v7968_v26 = vmax.f32 %v7840_v49, 0.0 }
 0x67a   : > { %v7993_v5 = vmax.f32 %v7843_v10, 0.0 }
 0x67c   : > { %v8343_v18 = vpack.c.bf16 %v7993_v5, %v7968_v26 }
 0x67d   : > { %v7847_v63 = vpop.f32.mrb[60].mxu1 }
 0x67e   : > { %v7848_v54 = vadd.f32 %v7847_v63, %v13647_v19  ;;  %v7849_v50 = vpop.f32.mrb[61].mxu1  ;;  %10796 = vmatpush3.bf16.msra.mxu1 %v8343_v18 }
 0x67f   : > { %v7850_v44 = vpop.f32.mrb[62].mxu1  ;;  %10797 = vmatprep.subr.bf16.mxu1 %v11583_v25 }
 0x680   : > { %v7851_v38 = vadd.f32 %v7850_v44, %v13649_v27  ;;  %v7852_v4 = vpop.f32.mrb[63].mxu1  ;;  %v8018_v29 = vmax.f32 %v7848_v54, 0.0 }
 0x682   : > { %v8043_v61 = vmax.f32 %v7851_v38, 0.0 }
 0x684   : > { %v8368_v39 = vpack.c.bf16 %v8043_v61, %v8018_v29 }
 0x685   : > { %v7855_v37 = vpop.f32.mrb[64].mxu1 }
 0x686   : > { %v7856_v8 = vadd.f32 %v7855_v37, %v13679_v52  ;;  %v7857_v3 = vpop.f32.mrb[65].mxu1  ;;  %10798 = vmatpush3.bf16.msra.mxu1 %v8368_v39 }
 0x687   : > { %v7858_v1 = vpop.f32.mrb[66].mxu1  ;;  %10799 = vmatprep.subr.bf16.mxu1 %v11583_v25 }
 0x688   : > { %v7859_v19 = vadd.f32 %v7858_v1, %v13681_v14  ;;  %v7860_v15 = vpop.f32.mrb[67].mxu1  ;;  %v8068_v53 = vmax.f32 %v7856_v8, 0.0 }
 0x68a   : > { %v8093_v43 = vmax.f32 %v7859_v19, 0.0 }
 0x68c   : > { %v8393_v23 = vpack.c.bf16 %v8093_v43, %v8068_v53 }
 0x68d   : > { %v8576_v42 = vpop.f32.mrb[76].mxu0  ;;  %v7863_v27 = vpop.f32.mrb[68].mxu1 }
 0x68e   : > { %v8577_v16 = vadd.f32 %v8576_v42, %v14809_v57  ;;  %v7864_v45 = vadd.f32 %v7863_v27, %v15090_v31  ;;  %v8578_v2 = vpop.f32.mrb[77].mxu0  ;;  %v7865_v52 = vpop.f32.mrb[69].mxu1  ;;  %10800 = vmatpush3.bf16.msra.mxu1 %v8393_v23 }
 0x68f   : > { %v8579_v30 = vadd.f32 %v8578_v2, %v14809_v57  ;;  %v7866_v47 = vpop.f32.mrb[70].mxu1  ;;  %10801 = vmatprep.subr.bf16.mxu1 %v11583_v25  ;;  %v8580_v14 = vpop.f32.mrb[78].mxu0 }
 0x690   : > { %v7867_v28 = vadd.f32 %v7866_v47, %v15093_v13  ;;  %v7868_v20 = vpop.f32.mrb[71].mxu1  ;;  %v8581_v7 = vpop.f32.mrb[79].mxu0  ;;  %v8118_v11 = vmax.f32 %v7864_v45, 0.0 }
 0x691   : > { %v9058_v34 = vcombine.low %v8577_v16, %v8579_v30 }
 0x692   : > { %v8143_v56 = vmax.f32 %v7867_v28, 0.0 }
 0x693   : > { %9082 = vst [vmem:[%s14818_s28 + $0x8] sm:$0xff] %v9058_v34 }
 0x694   : > { %v8418_v48 = vpack.c.bf16 %v8143_v56, %v8118_v11 }
 0x695   : > { %v7871_v33 = vpop.f32.mrb[72].mxu1 }
 0x696   : > { %v7872_v31 = vadd.f32 %v7871_v33, %v15095_v60  ;;  %v7873_v46 = vpop.f32.mrb[73].mxu1  ;;  %10802 = vmatpush3.bf16.msra.mxu1 %v8418_v48 }
 0x697   : > { %v7874_v41 = vpop.f32.mrb[74].mxu1  ;;  %10803 = vmatprep.subr.bf16.mxu1 %v11583_v25 }
 0x698   : > { %v7875_v62 = vadd.f32 %v7874_v41, %v15096_v9  ;;  %v7876_v17 = vpop.f32.mrb[75].mxu1  ;;  %v8168_v0 = vmax.f32 %v7872_v31, 0.0 }
 0x69a   : > { %v8193_v13 = vmax.f32 %v7875_v62, 0.0 }
 0x69c   : > { %v8443_v40 = vpack.c.bf16 %v8193_v13, %v8168_v0 }
 0x69d   : > { %v7879_v32 = vpop.f32.mrb[76].mxu1 }
 0x69e   : > { %v7880_v51 = vadd.f32 %v7879_v32, %v15097_v12  ;;  %v7881_v36 = vpop.f32.mrb[77].mxu1  ;;  %10804 = vmatpush3.bf16.msra.mxu1 %v8443_v40 }
 0x69f   : > { %v7882_v35 = vpop.f32.mrb[78].mxu1  ;;  %10805 = vmatprep.subr.bf16.mxu1 %v11583_v25 }
 0x6a0   : > { %v7883_v60 = vadd.f32 %v7882_v35, %v15098_v6  ;;  %v7884_v49 = vpop.f32.mrb[79].mxu1  ;;  %v8218_v55 = vmax.f32 %v7880_v51, 0.0 }
 0x6a2   : > { %v8243_v59 = vmax.f32 %v7883_v60, 0.0 }
 0x6a4   : > { %v8468_v10 = vpack.c.bf16 %v8243_v59, %v8218_v55 }
 0x6a5   : > { %v7887_v58 = vpop.f32.mrb[80].mxu1 }
 0x6a6   : > { %v7888_v9 = vadd.f32 %v7887_v58, %v15099_v21  ;;  %v7889_v26 = vpop.f32.mrb[81].mxu1  ;;  %10806 = vmatpush3.bf16.msra.mxu1 %v8468_v10 }
 0x6a7   : > { %v7890_v5 = vpop.f32.mrb[82].mxu1  ;;  %10807 = vmatprep.subr.bf16.mxu1 %v11583_v25 }
 0x6a8   : > { %v7891_v12 = vadd.f32 %v7890_v5, %v13836_v22  ;;  %v7892_v18 = vpop.f32.mrb[83].mxu1  ;;  %v8268_v63 = vmax.f32 %v7888_v9, 0.0 }
 0x6aa   : > { %v8293_v54 = vmax.f32 %v7891_v12, 0.0 }
 0x6ac   : > { %v8493_v50 = vpack.c.bf16 %v8293_v54, %v8268_v63 }
 0x6ad   : > { %v8658_v44 = vpop.f32.mrb[80].mxu0  ;;  %v8617_v6 = vpop.f32.mrb[84].mxu1 }
 0x6ae   : > { %v8659_v38 = vadd.f32 %v8658_v44, %v14809_v57  ;;  %v8618_v4 = vadd.f32 %v8617_v6, %v14809_v57  ;;  %v8660_v21 = vpop.f32.mrb[81].mxu0  ;;  %v8619_v29 = vpop.f32.mrb[85].mxu1  ;;  %10808 = vmatpush3.bf16.msra.mxu1 %v8493_v50 }
 0x6af   : > { %v8661_v61 = vadd.f32 %v8660_v21, %v14809_v57  ;;  %v8620_v25 = vadd.f32 %v8619_v29, %v14809_v57  ;;  %v8621_v22 = vpop.f32.mrb[86].mxu1  ;;  %v8662_v39 = vpop.f32.mrb[82].mxu0 }
 0x6b0   : > { %v8622_v37 = vpop.f32.mrb[87].mxu1  ;;  %v8663_v8 = vpop.f32.mrb[83].mxu0 }
 0x6b1   : > { %v9060_v3 = vcombine.low %v8659_v38, %v8661_v61  ;;  %v9059_v1 = vcombine.low %v8618_v4, %v8620_v25  ;;  %10810 = vmatmul.mubr.bf16.vlgmr.msra.gmra.mrb[104].mxu1 %v14683_v24 }
 0x6b3   : > { %9084 = vst [vmem:[%s14818_s28 + $0x18] sm:$0xff] %v9060_v3  ;;  %9083 = vst [vmem:[%s14818_s28 + $0x10] sm:$0xff] %v9059_v1 }
 0x6cd   : > { %v8699_v19 = vpop.f32.mrb[88].mxu1  ;;  %v8740_v15 = vpop.f32.mrb[84].mxu0 }
 0x6ce   : > { %v8700_v53 = vadd.f32 %v8699_v19, %v14809_v57  ;;  %v8741_v43 = vadd.f32 %v8740_v15, %v14809_v57  ;;  %v8701_v23 = vpop.f32.mrb[89].mxu1  ;;  %v8742_v42 = vpop.f32.mrb[85].mxu0 }
 0x6cf   : > { %v8702_v27 = vadd.f32 %v8701_v23, %v14809_v57  ;;  %v8743_v16 = vadd.f32 %v8742_v42, %v14809_v57  ;;  %v8703_v45 = vpop.f32.mrb[90].mxu1  ;;  %v8744_v2 = vpop.f32.mrb[86].mxu0 }
 0x6d0   : > { %v8704_v52 = vpop.f32.mrb[91].mxu1  ;;  %v8745_v24 = vpop.f32.mrb[87].mxu0 }
 0x6d1   : > { %v9061_v30 = vcombine.low %v8700_v53, %v8702_v27  ;;  %v9062_v47 = vcombine.low %v8741_v43, %v8743_v16 }
 0x6d3   : > { %9085 = vst [vmem:[%s14818_s28 + $0x20] sm:$0xff] %v9061_v30  ;;  %9086 = vst [vmem:[%s14818_s28 + $0x28] sm:$0xff] %v9062_v47 }
 0x6ed   : > { %v8781_v14 = vpop.f32.mrb[92].mxu1  ;;  %v8822_v28 = vpop.f32.mrb[88].mxu0 }
 0x6ee   : > { %v8782_v20 = vadd.f32 %v8781_v14, %v14809_v57  ;;  %v8823_v7 = vadd.f32 %v8822_v28, %v14809_v57  ;;  %v8783_v34 = vpop.f32.mrb[93].mxu1  ;;  %v8824_v11 = vpop.f32.mrb[89].mxu0 }
 0x6ef   : > { %v8784_v56 = vadd.f32 %v8783_v34, %v14809_v57  ;;  %v8825_v48 = vadd.f32 %v8824_v11, %v14809_v57  ;;  %v8785_v33 = vpop.f32.mrb[94].mxu1  ;;  %v8826_v31 = vpop.f32.mrb[90].mxu0 }
 0x6f0   : > { %v8786_v46 = vpop.f32.mrb[95].mxu1  ;;  %v8827_v41 = vpop.f32.mrb[91].mxu0 }
 0x6f1   : > { %v9063_v62 = vcombine.low %v8782_v20, %v8784_v56  ;;  %v9064_v17 = vcombine.low %v8823_v7, %v8825_v48 }
 0x6f3   : > { %9087 = vst [vmem:[%s14818_s28 + $0x30] sm:$0xff] %v9063_v62  ;;  %9088 = vst [vmem:[%s14818_s28 + $0x38] sm:$0xff] %v9064_v17 }
 0x70d   : > { %v8863_v0 = vpop.f32.mrb[96].mxu1  ;;  %v8904_v13 = vpop.f32.mrb[92].mxu0 }
 0x70e   : > { %v8864_v40 = vadd.f32 %v8863_v0, %v14809_v57  ;;  %v8905_v32 = vadd.f32 %v8904_v13, %v14809_v57  ;;  %v8865_v51 = vpop.f32.mrb[97].mxu1  ;;  %v8906_v36 = vpop.f32.mrb[93].mxu0 }
 0x70f   : > { %v8866_v35 = vadd.f32 %v8865_v51, %v14809_v57  ;;  %v8907_v60 = vadd.f32 %v8906_v36, %v14809_v57  ;;  %v8867_v49 = vpop.f32.mrb[98].mxu1  ;;  %v8908_v55 = vpop.f32.mrb[94].mxu0 }
 0x710   : > { %v8868_v59 = vpop.f32.mrb[99].mxu1  ;;  %v8909_v10 = vpop.f32.mrb[95].mxu0 }
 0x711   : > { %v9065_v58 = vcombine.low %v8864_v40, %v8866_v35  ;;  %v9066_v9 = vcombine.low %v8905_v32, %v8907_v60 }
 0x713   : > { %9089 = vst [vmem:[%s14818_s28 + $0x40] sm:$0xff] %v9065_v58  ;;  %9090 = vst [vmem:[%s14818_s28 + $0x48] sm:$0xff] %v9066_v9 }
 0x746   : > { %v8945_v26 = vpop.f32.mrb[100].mxu1  ;;  %v8986_v5 = vpop.f32.mrb[96].mxu0 }
 0x747   : > { %v8946_v12 = vadd.f32 %v8945_v26, %v14809_v57  ;;  %v8987_v18 = vadd.f32 %v8986_v5, %v14809_v57  ;;  %v8947_v63 = vpop.f32.mrb[101].mxu1  ;;  %v8988_v54 = vpop.f32.mrb[97].mxu0 }
 0x748   : > { %v8948_v50 = vadd.f32 %v8947_v63, %v14809_v57  ;;  %v8989_v44 = vadd.f32 %v8988_v54, %v14809_v57  ;;  %v8949_v6 = vpop.f32.mrb[102].mxu1  ;;  %v8990_v38 = vpop.f32.mrb[98].mxu0 }
 0x749   : > { %v8950_v4 = vpop.f32.mrb[103].mxu1  ;;  %v8991_v21 = vpop.f32.mrb[99].mxu0 }
 0x74a   : > { %v9067_v29 = vcombine.low %v8946_v12, %v8948_v50  ;;  %v9068_v61 = vcombine.low %v8987_v18, %v8989_v44 }
 0x74c   : > { %9091 = vst [vmem:[%s14818_s28 + $0x50] sm:$0xff] %v9067_v29  ;;  %9092 = vst [vmem:[%s14818_s28 + $0x58] sm:$0xff] %v9068_v61 }
 0x784   : > { %v9027_v25 = vpop.f32.mrb[104].mxu1 }
 0x785   : > { %v9028_v22 = vadd.f32 %v9027_v25, %v14809_v57  ;;  %v10811_v39 = vpop.f32.mrb[105].mxu1 }
 0x786   : > { %v9030_v37 = vpop.f32.mrb[106].mxu1 }
 0x787   : > { %9094 = vst.msk [vmem:[%s14818_s28 + $0x60] sm:$0xf] %vm9093_vm8, %v9028_v22  ;;  %v10812_v8 = vpop.f32.mrb[107].mxu1 }
 0x788 PF: > { %s18_s27 = sadd.s32 1, %s11573_s27  }
 0x789   : > { %p15_p4 = scmp.ge.s32.totalorder %s18_s27, 4  }
 0x78b   :  { %17 = sbr.rel (!%p15_p4) target bundleno = 1 (0x1), region = 90 }

</bundles_post_ra>
